<compile_context>
chip_gen: v6e
topology: v6e:2x2x1
jax: 0.10.0
libtpu: 0.0.40
codegen_flags: <defaults>
</compile_context>

<pallas_src>
import functools

import jax
import jax.numpy as jnp
from jax.experimental import pallas as pl
from jax.experimental.pallas import tpu as pltpu

EPS = 1e-5
LANE = 128


def _round_up(v, m):
    return (v + m - 1) // m * m


def _fold_bn(gamma, beta, mean, var):
    """Inference-mode BN folded to per-channel scale/shift:  y*scale + shift."""
    scale = gamma * jax.lax.rsqrt(var + EPS)
    shift = beta - mean * scale
    return scale.astype(jnp.float32), shift.astype(jnp.float32)


def _bottleneck_kernel(x_ref, w1_ref, w2_ref, w3_ref,
                       s1_ref, t1_ref, s2_ref, t2_ref, s3_ref, t3_ref,
                       out_ref, pad_ref, *, wp):
    nb, H, W, Ci = x_ref.shape
    Pp = w1_ref.shape[1]           # padded bottleneck width (multiple of 128)
    Co = w3_ref.shape[1]           # padded output channels (== Ci here)
    M = nb * H * W
    Sz = (H + 2) * wp              # flat rows per padded image
    L = nb * Sz                    # flat rows covered by one conv2 tap window
    TOT = pad_ref.shape[0]

    # ---- activations (bf16 DMA); residual uses the f32 upcast --------------
    x_bf = x_ref[...].reshape(M, Ci)                          # bf16

    # ---- conv1: 1x1 matmul + folded BN1 + ReLU ------------------------------
    y1 = jnp.dot(x_bf, w1_ref[...], preferred_element_type=jnp.float32)
    y1 = jnp.maximum(y1 * s1_ref[...] + t1_ref[...], 0.0)     # (M, Pp) f32

    # ---- build padded conv2 input in the flat VMEM scratch ------------------
    # Per-image layout (wp = round_up(W+2, 8) columns per padded row):
    #   rows [0, wp)              : top zero-halo row
    #   rows [wp, (H+1)*wp)       : H rows of [0 | y1 row | 0 ... 0]
    #   rows [(H+1)*wp, Sz)       : bottom zero-halo row
    # Column halos are folded into one contiguous interior store per image.
    slab = jnp.concatenate(
        [jnp.zeros((nb, H, 1, Pp), jnp.float32),
         y1.reshape(nb, H, W, Pp),
         jnp.zeros((nb, H, wp - 1 - W, Pp), jnp.float32)],
        axis=2).astype(jnp.bfloat16)                          # (nb, H, wp, Pp)

    zero_row = jnp.zeros((wp, Pp), jnp.bfloat16)
    for b in range(nb):
        base = b * Sz
        pad_ref[base:base + wp, :] = zero_row                          # top halo
        pad_ref[base + (H + 1) * wp:base + Sz, :] = zero_row           # bottom halo
        pad_ref[base + wp:base + (H + 1) * wp, :] = slab[b].reshape(H * wp, Pp)
    # Trailing alignment rows only feed junk output rows; zero them anyway.
    pad_ref[nb * Sz:TOT, :] = jnp.zeros((TOT - nb * Sz, Pp), jnp.bfloat16)

    # ---- conv2: 3x3 / stride 1 as 9 contiguous-window matmuls ---------------
    # Tap (dy, dx) is the contiguous (L, Pp) window at flat offset dy*wp + dx.
    # Output pixel (b, i, j) lives at row b*Sz + i*wp + j of the accumulator;
    # rows whose column index falls in the halo/alignment region are junk and
    # never feed valid outputs (row-independent matmuls), dropped once below.
    acc = jnp.dot(pad_ref[0:L, :], w2_ref[0],
                  preferred_element_type=jnp.float32)
    for t in range(1, 9):
        off = (t // 3) * wp + (t % 3)
        acc = acc + jnp.dot(pad_ref[off:off + L, :], w2_ref[t],
                            preferred_element_type=jnp.float32)

    # Drop junk rows/columns once, then folded BN2 + ReLU.
    y2 = acc.reshape(nb, H + 2, wp, Pp)[:, :H, :W, :].reshape(M, Pp)
    y2 = jnp.maximum(y2 * s2_ref[...] + t2_ref[...], 0.0)

    # ---- conv3: 1x1 expand + folded BN3, residual add, final ReLU -----------
    y3 = jnp.dot(y2.astype(jnp.bfloat16), w3_ref[...],
                 preferred_element_type=jnp.float32)
    y3 = y3 * s3_ref[...] + t3_ref[...]
    out = jnp.maximum(y3 + x_bf.astype(jnp.float32), 0.0)
    out_ref[...] = out.reshape(nb, H, W, Co).astype(out_ref.dtype)


def _full_spec(shape):
    """Untiled (whole-array) BlockSpec, constant across the batch grid."""
    zeros = (0,) * len(shape)
    return pl.BlockSpec(shape, lambda n, _z=zeros: _z)


def _pick_nb(N, H, W, Ci, Pp, Co, Wp, vmem_limit):
    """Pick images-per-step from a coarse per-step VMEM budget."""
    Sz = (H + 2) * Wp
    weights = (Ci * Pp + 9 * Pp * Pp + Pp * Co) * 2 * 2       # bf16, 2 buffers

    def est(nb):
        m = nb * H * W
        rows = nb * Sz
        tile_in = m * Ci * 2 * 2                              # bf16 in, 2 buffers
        tile_out = m * Co * 4 * 2                             # f32 out, 2 buffers
        scratch = (rows + 3 * Wp) * Pp * 2                    # bf16 padded buffer
        temps = (rows * Pp + m * (2 * Pp + 2 * Co)) * 4       # f32 value temps
        return weights + tile_in + tile_out + scratch + temps

    nb = 1
    for cand in (2, 4, 8):
        if cand <= N and est(cand) <= (vmem_limit * 3) // 5:
            nb = cand
    return min(nb, N)


def bottleneck_forward(x_nchw, params, *, out_dtype=jnp.float32):
    """Bottleneck forward.  x_nchw: (N, Cin, H, W) with Cin == planes*4, stride=1."""
    x = jnp.transpose(x_nchw, (0, 2, 3, 1))                    # -> NHWC
    N, H, W, Cin = x.shape
    P = params["w1"].shape[1]
    Cout = params["w3"].shape[1]
    assert Cout == Cin, "identity residual requires in_planes == planes * 4"

    Ci = _round_up(Cin, LANE)
    Pp = _round_up(P, LANE)
    Co = _round_up(Cout, LANE)
    Wp = _round_up(W + 2, 8)            # padded-row width (sublane aligned)
    Sz = (H + 2) * Wp

    # VMEM budget: ~48 MiB-class on v7x (64 MiB physical), up to 96 MiB on
    # v5e/v6e (128 MiB physical).
    try:
        vmem_cap = int(pltpu.get_tpu_info().vmem_capacity_bytes)
    except Exception:
        vmem_cap = 64 * 1024 * 1024
    vmem_limit = max(32 * 1024 * 1024,
                     min((vmem_cap * 3) // 4, 96 * 1024 * 1024))

    Nb = _pick_nb(N, H, W, Ci, Pp, Co, Wp, vmem_limit)
    Npad = _round_up(N, Nb)

    # bf16 activation DMA; channel dims zero-padded to lane-dense multiples of
    # 128 (padded lanes stay zero: padded weights and BN scale/shift are zero).
    xp = jnp.pad(x, ((0, Npad - N), (0, 0), (0, 0), (0, Ci - Cin))
                 ).astype(jnp.bfloat16)
    w1 = jnp.pad(params["w1"], ((0, Ci - Cin), (0, Pp - P))).astype(jnp.bfloat16)
    w2 = jnp.pad(params["w2"], ((0, 0), (0, Pp - P), (0, Pp - P))).astype(jnp.bfloat16)
    w3 = jnp.pad(params["w3"], ((0, Pp - P), (0, Co - Cout))).astype(jnp.bfloat16)

    s1, t1 = _fold_bn(params["g1"], params["b1"], params["m1"], params["v1"])
    s2, t2 = _fold_bn(params["g2"], params["b2"], params["m2"], params["v2"])
    s3, t3 = _fold_bn(params["g3"], params["b3"], params["m3"], params["v3"])
    s1 = jnp.pad(s1, (0, Pp - P)).reshape(1, Pp)
    t1 = jnp.pad(t1, (0, Pp - P)).reshape(1, Pp)
    s2 = jnp.pad(s2, (0, Pp - P)).reshape(1, Pp)
    t2 = jnp.pad(t2, (0, Pp - P)).reshape(1, Pp)
    s3 = jnp.pad(s3, (0, Co - Cout)).reshape(1, Co)
    t3 = jnp.pad(t3, (0, Co - Cout)).reshape(1, Co)

    args = (xp, w1, w2, w3, s1, t1, s2, t2, s3, t3)

    in_specs = [pl.BlockSpec((Nb, H, W, Ci), lambda n: (n, 0, 0, 0))]
    in_specs += [_full_spec(a.shape) for a in args[1:]]
    out_spec = pl.BlockSpec((Nb, H, W, Co), lambda n: (n, 0, 0, 0))

    TOT = Nb * Sz + 3 * Wp              # flat scratch rows (tap-overrun slack)
    grid = (Npad // Nb,)

    # Advisory cost estimate (counts padded 128-wide channels — overestimate).
    Mtot = Npad * H * W
    rows2 = Npad * Sz
    flops = (2 * Mtot * (Ci * Pp + Pp * Co) + 2 * rows2 * 9 * Pp * Pp
             + 12 * Mtot * max(Pp, Co))
    bytes_accessed = (xp.size * 2 + Mtot * Co * jnp.dtype(out_dtype).itemsize
                      + (w1.size + w2.size + w3.size) * 2
                      + (s1.size + t1.size + s2.size + t2.size
                         + s3.size + t3.size) * 4)

    out_p = pl.pallas_call(
        functools.partial(_bottleneck_kernel, wp=Wp),
        out_shape=jax.ShapeDtypeStruct((Npad, H, W, Co), out_dtype),
        grid=grid,
        in_specs=in_specs,
        out_specs=out_spec,
        scratch_shapes=[pltpu.VMEM((TOT, Pp), jnp.bfloat16)],
        compiler_params=pltpu.CompilerParams(
            dimension_semantics=("parallel",),
            vmem_limit_bytes=int(vmem_limit)),
        cost_estimate=pl.CostEstimate(
            flops=int(flops), transcendentals=0,
            bytes_accessed=int(bytes_accessed)),
    )(*args)

    out = out_p[:N, :, :, :Cout]
    return jnp.transpose(out, (0, 3, 1, 2))                    # -> NCHW


def bottleneck_reference(x_nchw, params):
    """Pure-JAX reference: same math (eval-mode BN, bf16 activations/weights in
    matmuls and the residual path, f32 accumulation)."""
    x_bf = jnp.transpose(x_nchw, (0, 2, 3, 1)).astype(jnp.bfloat16)
    xr = x_bf.astype(jnp.float32)
    N, H, W, _ = x_bf.shape

    def pconv(a, w):
        return jnp.einsum("nhwc,cd->nhwd", a.astype(jnp.bfloat16),
                          w.astype(jnp.bfloat16),
                          preferred_element_type=jnp.float32)

    s1, t1 = _fold_bn(params["g1"], params["b1"], params["m1"], params["v1"])
    s2, t2 = _fold_bn(params["g2"], params["b2"], params["m2"], params["v2"])
    s3, t3 = _fold_bn(params["g3"], params["b3"], params["m3"], params["v3"])

    y = jax.nn.relu(pconv(xr, params["w1"]) * s1 + t1)
    yp = jnp.pad(y.astype(jnp.bfloat16), ((0, 0), (1, 1), (1, 1), (0, 0)))
    acc = jnp.zeros_like(y)
    for dy in range(3):
        for dx in range(3):
            acc = acc + jnp.einsum(
                "nhwc,cd->nhwd", yp[:, dy:dy + H, dx:dx + W, :],
                params["w2"][dy * 3 + dx].astype(jnp.bfloat16),
                preferred_element_type=jnp.float32)
    y = jax.nn.relu(acc * s2 + t2)
    y = pconv(y, params["w3"]) * s3 + t3
    out = jax.nn.relu(y + xr)
    return jnp.transpose(out, (0, 3, 1, 2))


def init_params(key, in_planes, planes):
    expansion = 4
    cout = planes * expansion
    ks = jax.random.split(key, 15)
    w1 = jax.random.normal(ks[0], (in_planes, planes), jnp.float32) / jnp.sqrt(1.0 * in_planes)
    w2 = jax.random.normal(ks[1], (9, planes, planes), jnp.float32) / jnp.sqrt(9.0 * planes)
    w3 = jax.random.normal(ks[2], (planes, cout), jnp.float32) / jnp.sqrt(1.0 * planes)

    def bn(i, c):
        g = 1.0 + 0.1 * jax.random.normal(ks[i], (c,), jnp.float32)
        b = 0.1 * jax.random.normal(ks[i + 1], (c,), jnp.float32)
        m = 0.1 * jax.random.normal(ks[i + 2], (c,), jnp.float32)
        v = 0.5 + jax.random.uniform(ks[i + 3], (c,), jnp.float32)   # > 0
        return g, b, m, v

    g1, b1, m1, v1 = bn(3, planes)
    g2, b2, m2, v2 = bn(7, planes)
    g3, b3, m3, v3 = bn(11, cout)
    return dict(w1=w1, w2=w2, w3=w3,
                g1=g1, b1=b1, m1=m1, v1=v1,
                g2=g2, b2=b2, m2=m2, v2=v2,
                g3=g3, b3=b3, m3=m3, v3=v3)


if __name__ == "__main__":
    # Bottleneck(in_planes=32, planes=8, stride=1, downsample=None)
    N, H, W = 2, 16, 16
    planes = 8
    in_planes = planes * 4   # expansion = 4 -> identity residual is shape-valid

    key = jax.random.PRNGKey(0)
    kx, kp = jax.random.split(key)
    x = jax.random.normal(kx, (N, in_planes, H, W), jnp.float32)   # NCHW input
    params = init_params(kp, in_planes, planes)

    out = jax.block_until_ready(bottleneck_forward(x, params))
    ref = jax.block_until_ready(bottleneck_reference(x, params))

    assert out.shape == (N, in_planes, H, W)
    max_diff = float(jnp.max(jnp.abs(out - ref)))
    assert jnp.allclose(out, ref, rtol=1e-2, atol=1e-2), (
        "mismatch vs reference, max abs diff = %g" % max_diff)

    print("KERNEL_OK")
</pallas_src>

<mosaic_0001>
module attributes {stable_mosaic.version = 11 : i64} {
  func.func @_bottleneck_kernel(%arg0: i32, %arg1: memref<2x16x16x128xbf16, #tpu.memory_space<vmem>>, %arg2: memref<128x128xbf16, #tpu.memory_space<vmem>>, %arg3: memref<9x128x128xbf16, #tpu.memory_space<vmem>>, %arg4: memref<128x128xbf16, #tpu.memory_space<vmem>>, %arg5: memref<1x128xf32, #tpu.memory_space<vmem>>, %arg6: memref<1x128xf32, #tpu.memory_space<vmem>>, %arg7: memref<1x128xf32, #tpu.memory_space<vmem>>, %arg8: memref<1x128xf32, #tpu.memory_space<vmem>>, %arg9: memref<1x128xf32, #tpu.memory_space<vmem>>, %arg10: memref<1x128xf32, #tpu.memory_space<vmem>>, %arg11: memref<2x16x16x128xf32, #tpu.memory_space<vmem>>, %arg12: memref<936x128xbf16, #tpu.memory_space<vmem>>) attributes {dimension_semantics = [#tpu.dimension_semantics<parallel>], iteration_bounds = array<i64: 1>, scalar_prefetch = 0 : i64, scratch_operands = 1 : i64, tpu.core_type = #tpu.core_type<tc>, window_params = [{transform_indices = @transform_0, window_bounds = array<i64: 2, 16, 16, 128>}, {pipeline_mode = #tpu.pipeline_mode<synchronous>, transform_indices = @transform_1, window_bounds = array<i64: 128, 128>}, {pipeline_mode = #tpu.pipeline_mode<synchronous>, transform_indices = @transform_2, window_bounds = array<i64: 9, 128, 128>}, {pipeline_mode = #tpu.pipeline_mode<synchronous>, transform_indices = @transform_3, window_bounds = array<i64: 128, 128>}, {pipeline_mode = #tpu.pipeline_mode<synchronous>, transform_indices = @transform_4, window_bounds = array<i64: 1, 128>}, {pipeline_mode = #tpu.pipeline_mode<synchronous>, transform_indices = @transform_5, window_bounds = array<i64: 1, 128>}, {pipeline_mode = #tpu.pipeline_mode<synchronous>, transform_indices = @transform_6, window_bounds = array<i64: 1, 128>}, {pipeline_mode = #tpu.pipeline_mode<synchronous>, transform_indices = @transform_7, window_bounds = array<i64: 1, 128>}, {pipeline_mode = #tpu.pipeline_mode<synchronous>, transform_indices = @transform_8, window_bounds = array<i64: 1, 128>}, {pipeline_mode = #tpu.pipeline_mode<synchronous>, transform_indices = @transform_9, window_bounds = array<i64: 1, 128>}, {transform_indices = @transform_10, window_bounds = array<i64: 2, 16, 16, 128>}]} {
    %c0 = arith.constant 0 : index
    %c0_0 = arith.constant 0 : index
    %c0_1 = arith.constant 0 : index
    %c0_2 = arith.constant 0 : index
    %0 = vector.load %arg1[%c0, %c0_0, %c0_1, %c0_2] : memref<2x16x16x128xbf16, #tpu.memory_space<vmem>>, vector<2x16x16x128xbf16>
    %1 = vector.shape_cast %0 : vector<2x16x16x128xbf16> to vector<512x128xbf16>
    %c0_3 = arith.constant 0 : index
    %c0_4 = arith.constant 0 : index
    %2 = vector.load %arg2[%c0_3, %c0_4] : memref<128x128xbf16, #tpu.memory_space<vmem>>, vector<128x128xbf16>
    %cst = arith.constant dense<0.000000e+00> : vector<512x128xf32>
    %3 = tpu.matmul %1, %2, %cst {dimension_numbers = #tpu.dot_dimension_numbers<[1], [0], [0], [1], [0, 0, 1, 1], [], []>} : vector<512x128xbf16>, vector<128x128xbf16>, vector<512x128xf32> -> vector<512x128xf32>
    %c0_5 = arith.constant 0 : index
    %c0_6 = arith.constant 0 : index
    %4 = vector.load %arg5[%c0_5, %c0_6] : memref<1x128xf32, #tpu.memory_space<vmem>>, vector<1x128xf32>
    %5 = vector.broadcast %4 : vector<1x128xf32> to vector<512x128xf32>
    %6 = arith.mulf %3, %5 : vector<512x128xf32>
    %c0_7 = arith.constant 0 : index
    %c0_8 = arith.constant 0 : index
    %7 = vector.load %arg6[%c0_7, %c0_8] : memref<1x128xf32, #tpu.memory_space<vmem>>, vector<1x128xf32>
    %8 = vector.broadcast %7 : vector<1x128xf32> to vector<512x128xf32>
    %9 = arith.addf %6, %8 : vector<512x128xf32>
    %cst_9 = arith.constant 0.000000e+00 : f32
    %10 = vector.broadcast %cst_9 : f32 to vector<512x128xf32>
    %11 = arith.maximumf %9, %10 : vector<512x128xf32>
    %cst_10 = arith.constant 0.000000e+00 : f32
    %12 = vector.broadcast %cst_10 : f32 to vector<2x16x1x128xf32>
    %13 = vector.shape_cast %11 : vector<512x128xf32> to vector<2x16x16x128xf32>
    %cst_11 = arith.constant 0.000000e+00 : f32
    %14 = vector.broadcast %cst_11 : f32 to vector<2x16x7x128xf32>
    %15 = tpu.concatenate %12, %13, %14 in 2 : vector<2x16x1x128xf32>, vector<2x16x16x128xf32>, vector<2x16x7x128xf32> -> vector<2x16x24x128xf32>
    %16 = arith.truncf %15 : vector<2x16x24x128xf32> to vector<2x16x24x128xbf16>
    %cst_12 = arith.constant 0.000000e+00 : bf16
    %17 = vector.broadcast %cst_12 : bf16 to vector<24x128xbf16>
    %c0_13 = arith.constant 0 : index
    %c0_14 = arith.constant 0 : index
    %18 = vector.load %arg12[%c0_13, %c0_14] : memref<936x128xbf16, #tpu.memory_space<vmem>>, vector<24x128xbf16>
    tpu.vector_store %arg12[%c0_13, %c0_14], %17 {strides = array<i32>} : memref<936x128xbf16, #tpu.memory_space<vmem>>, vector<24x128xbf16>,
    %c408 = arith.constant 408 : index
    %c0_15 = arith.constant 0 : index
    %19 = vector.load %arg12[%c408, %c0_15] : memref<936x128xbf16, #tpu.memory_space<vmem>>, vector<24x128xbf16>
    tpu.vector_store %arg12[%c408, %c0_15], %17 {strides = array<i32>} : memref<936x128xbf16, #tpu.memory_space<vmem>>, vector<24x128xbf16>,
    %20 = vector.extract_strided_slice %16 {offsets = [0, 0, 0, 0], sizes = [1, 16, 24, 128], strides = [1, 1, 1, 1]} : vector<2x16x24x128xbf16> to vector<1x16x24x128xbf16>
    %21 = vector.shape_cast %20 : vector<1x16x24x128xbf16> to vector<16x24x128xbf16>
    %22 = vector.shape_cast %21 : vector<16x24x128xbf16> to vector<384x128xbf16>
    %c24 = arith.constant 24 : index
    %c0_16 = arith.constant 0 : index
    %23 = vector.load %arg12[%c24, %c0_16] : memref<936x128xbf16, #tpu.memory_space<vmem>>, vector<384x128xbf16>
    tpu.vector_store %arg12[%c24, %c0_16], %22 {strides = array<i32>} : memref<936x128xbf16, #tpu.memory_space<vmem>>, vector<384x128xbf16>,
    %c432 = arith.constant 432 : index
    %c0_17 = arith.constant 0 : index
    %24 = vector.load %arg12[%c432, %c0_17] : memref<936x128xbf16, #tpu.memory_space<vmem>>, vector<24x128xbf16>
    tpu.vector_store %arg12[%c432, %c0_17], %17 {strides = array<i32>} : memref<936x128xbf16, #tpu.memory_space<vmem>>, vector<24x128xbf16>,
    %c840 = arith.constant 840 : index
    %c0_18 = arith.constant 0 : index
    %25 = vector.load %arg12[%c840, %c0_18] : memref<936x128xbf16, #tpu.memory_space<vmem>>, vector<24x128xbf16>
    tpu.vector_store %arg12[%c840, %c0_18], %17 {strides = array<i32>} : memref<936x128xbf16, #tpu.memory_space<vmem>>, vector<24x128xbf16>,
    %26 = vector.extract_strided_slice %16 {offsets = [1, 0, 0, 0], sizes = [1, 16, 24, 128], strides = [1, 1, 1, 1]} : vector<2x16x24x128xbf16> to vector<1x16x24x128xbf16>
    %27 = vector.shape_cast %26 : vector<1x16x24x128xbf16> to vector<16x24x128xbf16>
    %28 = vector.shape_cast %27 : vector<16x24x128xbf16> to vector<384x128xbf16>
    %c456 = arith.constant 456 : index
    %c0_19 = arith.constant 0 : index
    %29 = vector.load %arg12[%c456, %c0_19] : memref<936x128xbf16, #tpu.memory_space<vmem>>, vector<384x128xbf16>
    tpu.vector_store %arg12[%c456, %c0_19], %28 {strides = array<i32>} : memref<936x128xbf16, #tpu.memory_space<vmem>>, vector<384x128xbf16>,
    %cst_20 = arith.constant 0.000000e+00 : bf16
    %30 = vector.broadcast %cst_20 : bf16 to vector<72x128xbf16>
    %c864 = arith.constant 864 : index
    %c0_21 = arith.constant 0 : index
    %31 = vector.load %arg12[%c864, %c0_21] : memref<936x128xbf16, #tpu.memory_space<vmem>>, vector<72x128xbf16>
    tpu.vector_store %arg12[%c864, %c0_21], %30 {strides = array<i32>} : memref<936x128xbf16, #tpu.memory_space<vmem>>, vector<72x128xbf16>,
    %c0_22 = arith.constant 0 : index
    %c0_23 = arith.constant 0 : index
    %32 = vector.load %arg12[%c0_22, %c0_23] : memref<936x128xbf16, #tpu.memory_space<vmem>>, vector<864x128xbf16>
    %c0_24 = arith.constant 0 : index
    %c0_25 = arith.constant 0 : index
    %c0_26 = arith.constant 0 : index
    %33 = vector.load %arg3[%c0_24, %c0_25, %c0_26] : memref<9x128x128xbf16, #tpu.memory_space<vmem>>, vector<1x128x128xbf16>
    %34 = vector.shape_cast %33 : vector<1x128x128xbf16> to vector<128x128xbf16>
    %cst_27 = arith.constant dense<0.000000e+00> : vector<864x128xf32>
    %35 = tpu.matmul %32, %34, %cst_27 {dimension_numbers = #tpu.dot_dimension_numbers<[1], [0], [0], [1], [0, 0, 1, 1], [], []>} : vector<864x128xbf16>, vector<128x128xbf16>, vector<864x128xf32> -> vector<864x128xf32>
    %c1 = arith.constant 1 : index
    %c0_28 = arith.constant 0 : index
    %36 = vector.load %arg12[%c1, %c0_28] : memref<936x128xbf16, #tpu.memory_space<vmem>>, vector<864x128xbf16>
    %c1_29 = arith.constant 1 : index
    %c0_30 = arith.constant 0 : index
    %c0_31 = arith.constant 0 : index
    %37 = vector.load %arg3[%c1_29, %c0_30, %c0_31] : memref<9x128x128xbf16, #tpu.memory_space<vmem>>, vector<1x128x128xbf16>
    %38 = vector.shape_cast %37 : vector<1x128x128xbf16> to vector<128x128xbf16>
    %cst_32 = arith.constant dense<0.000000e+00> : vector<864x128xf32>
    %39 = tpu.matmul %36, %38, %cst_32 {dimension_numbers = #tpu.dot_dimension_numbers<[1], [0], [0], [1], [0, 0, 1, 1], [], []>} : vector<864x128xbf16>, vector<128x128xbf16>, vector<864x128xf32> -> vector<864x128xf32>
    %40 = arith.addf %35, %39 : vector<864x128xf32>
    %c2 = arith.constant 2 : index
    %c0_33 = arith.constant 0 : index
    %41 = vector.load %arg12[%c2, %c0_33] : memref<936x128xbf16, #tpu.memory_space<vmem>>, vector<864x128xbf16>
    %c2_34 = arith.constant 2 : index
    %c0_35 = arith.constant 0 : index
    %c0_36 = arith.constant 0 : index
    %42 = vector.load %arg3[%c2_34, %c0_35, %c0_36] : memref<9x128x128xbf16, #tpu.memory_space<vmem>>, vector<1x128x128xbf16>
    %43 = vector.shape_cast %42 : vector<1x128x128xbf16> to vector<128x128xbf16>
    %cst_37 = arith.constant dense<0.000000e+00> : vector<864x128xf32>
    %44 = tpu.matmul %41, %43, %cst_37 {dimension_numbers = #tpu.dot_dimension_numbers<[1], [0], [0], [1], [0, 0, 1, 1], [], []>} : vector<864x128xbf16>, vector<128x128xbf16>, vector<864x128xf32> -> vector<864x128xf32>
    %45 = arith.addf %40, %44 : vector<864x128xf32>
    %c24_38 = arith.constant 24 : index
    %c0_39 = arith.constant 0 : index
    %46 = vector.load %arg12[%c24_38, %c0_39] : memref<936x128xbf16, #tpu.memory_space<vmem>>, vector<864x128xbf16>
    %c3 = arith.constant 3 : index
    %c0_40 = arith.constant 0 : index
    %c0_41 = arith.constant 0 : index
    %47 = vector.load %arg3[%c3, %c0_40, %c0_41] : memref<9x128x128xbf16, #tpu.memory_space<vmem>>, vector<1x128x128xbf16>
    %48 = vector.shape_cast %47 : vector<1x128x128xbf16> to vector<128x128xbf16>
    %cst_42 = arith.constant dense<0.000000e+00> : vector<864x128xf32>
    %49 = tpu.matmul %46, %48, %cst_42 {dimension_numbers = #tpu.dot_dimension_numbers<[1], [0], [0], [1], [0, 0, 1, 1], [], []>} : vector<864x128xbf16>, vector<128x128xbf16>, vector<864x128xf32> -> vector<864x128xf32>
    %50 = arith.addf %45, %49 : vector<864x128xf32>
    %c25 = arith.constant 25 : index
    %c0_43 = arith.constant 0 : index
    %51 = vector.load %arg12[%c25, %c0_43] : memref<936x128xbf16, #tpu.memory_space<vmem>>, vector<864x128xbf16>
    %c4 = arith.constant 4 : index
    %c0_44 = arith.constant 0 : index
    %c0_45 = arith.constant 0 : index
    %52 = vector.load %arg3[%c4, %c0_44, %c0_45] : memref<9x128x128xbf16, #tpu.memory_space<vmem>>, vector<1x128x128xbf16>
    %53 = vector.shape_cast %52 : vector<1x128x128xbf16> to vector<128x128xbf16>
    %cst_46 = arith.constant dense<0.000000e+00> : vector<864x128xf32>
    %54 = tpu.matmul %51, %53, %cst_46 {dimension_numbers = #tpu.dot_dimension_numbers<[1], [0], [0], [1], [0, 0, 1, 1], [], []>} : vector<864x128xbf16>, vector<128x128xbf16>, vector<864x128xf32> -> vector<864x128xf32>
    %55 = arith.addf %50, %54 : vector<864x128xf32>
    %c26 = arith.constant 26 : index
    %c0_47 = arith.constant 0 : index
    %56 = vector.load %arg12[%c26, %c0_47] : memref<936x128xbf16, #tpu.memory_space<vmem>>, vector<864x128xbf16>
    %c5 = arith.constant 5 : index
    %c0_48 = arith.constant 0 : index
    %c0_49 = arith.constant 0 : index
    %57 = vector.load %arg3[%c5, %c0_48, %c0_49] : memref<9x128x128xbf16, #tpu.memory_space<vmem>>, vector<1x128x128xbf16>
    %58 = vector.shape_cast %57 : vector<1x128x128xbf16> to vector<128x128xbf16>
    %cst_50 = arith.constant dense<0.000000e+00> : vector<864x128xf32>
    %59 = tpu.matmul %56, %58, %cst_50 {dimension_numbers = #tpu.dot_dimension_numbers<[1], [0], [0], [1], [0, 0, 1, 1], [], []>} : vector<864x128xbf16>, vector<128x128xbf16>, vector<864x128xf32> -> vector<864x128xf32>
    %60 = arith.addf %55, %59 : vector<864x128xf32>
    %c48 = arith.constant 48 : index
    %c0_51 = arith.constant 0 : index
    %61 = vector.load %arg12[%c48, %c0_51] : memref<936x128xbf16, #tpu.memory_space<vmem>>, vector<864x128xbf16>
    %c6 = arith.constant 6 : index
    %c0_52 = arith.constant 0 : index
    %c0_53 = arith.constant 0 : index
    %62 = vector.load %arg3[%c6, %c0_52, %c0_53] : memref<9x128x128xbf16, #tpu.memory_space<vmem>>, vector<1x128x128xbf16>
    %63 = vector.shape_cast %62 : vector<1x128x128xbf16> to vector<128x128xbf16>
    %cst_54 = arith.constant dense<0.000000e+00> : vector<864x128xf32>
    %64 = tpu.matmul %61, %63, %cst_54 {dimension_numbers = #tpu.dot_dimension_numbers<[1], [0], [0], [1], [0, 0, 1, 1], [], []>} : vector<864x128xbf16>, vector<128x128xbf16>, vector<864x128xf32> -> vector<864x128xf32>
    %65 = arith.addf %60, %64 : vector<864x128xf32>
    %c49 = arith.constant 49 : index
    %c0_55 = arith.constant 0 : index
    %66 = vector.load %arg12[%c49, %c0_55] : memref<936x128xbf16, #tpu.memory_space<vmem>>, vector<864x128xbf16>
    %c7 = arith.constant 7 : index
    %c0_56 = arith.constant 0 : index
    %c0_57 = arith.constant 0 : index
    %67 = vector.load %arg3[%c7, %c0_56, %c0_57] : memref<9x128x128xbf16, #tpu.memory_space<vmem>>, vector<1x128x128xbf16>
    %68 = vector.shape_cast %67 : vector<1x128x128xbf16> to vector<128x128xbf16>
    %cst_58 = arith.constant dense<0.000000e+00> : vector<864x128xf32>
    %69 = tpu.matmul %66, %68, %cst_58 {dimension_numbers = #tpu.dot_dimension_numbers<[1], [0], [0], [1], [0, 0, 1, 1], [], []>} : vector<864x128xbf16>, vector<128x128xbf16>, vector<864x128xf32> -> vector<864x128xf32>
    %70 = arith.addf %65, %69 : vector<864x128xf32>
    %c50 = arith.constant 50 : index
    %c0_59 = arith.constant 0 : index
    %71 = vector.load %arg12[%c50, %c0_59] : memref<936x128xbf16, #tpu.memory_space<vmem>>, vector<864x128xbf16>
    %c8 = arith.constant 8 : index
    %c0_60 = arith.constant 0 : index
    %c0_61 = arith.constant 0 : index
    %72 = vector.load %arg3[%c8, %c0_60, %c0_61] : memref<9x128x128xbf16, #tpu.memory_space<vmem>>, vector<1x128x128xbf16>
    %73 = vector.shape_cast %72 : vector<1x128x128xbf16> to vector<128x128xbf16>
    %cst_62 = arith.constant dense<0.000000e+00> : vector<864x128xf32>
    %74 = tpu.matmul %71, %73, %cst_62 {dimension_numbers = #tpu.dot_dimension_numbers<[1], [0], [0], [1], [0, 0, 1, 1], [], []>} : vector<864x128xbf16>, vector<128x128xbf16>, vector<864x128xf32> -> vector<864x128xf32>
    %75 = arith.addf %70, %74 : vector<864x128xf32>
    %76 = vector.shape_cast %75 : vector<864x128xf32> to vector<2x18x24x128xf32>
    %77 = vector.extract_strided_slice %76 {offsets = [0, 0, 0, 0], sizes = [2, 16, 16, 128], strides = [1, 1, 1, 1]} : vector<2x18x24x128xf32> to vector<2x16x16x128xf32>
    %78 = vector.shape_cast %77 : vector<2x16x16x128xf32> to vector<512x128xf32>
    %c0_63 = arith.constant 0 : index
    %c0_64 = arith.constant 0 : index
    %79 = vector.load %arg7[%c0_63, %c0_64] : memref<1x128xf32, #tpu.memory_space<vmem>>, vector<1x128xf32>
    %80 = vector.broadcast %79 : vector<1x128xf32> to vector<512x128xf32>
    %81 = arith.mulf %78, %80 : vector<512x128xf32>
    %c0_65 = arith.constant 0 : index
    %c0_66 = arith.constant 0 : index
    %82 = vector.load %arg8[%c0_65, %c0_66] : memref<1x128xf32, #tpu.memory_space<vmem>>, vector<1x128xf32>
    %83 = vector.broadcast %82 : vector<1x128xf32> to vector<512x128xf32>
    %84 = arith.addf %81, %83 : vector<512x128xf32>
    %cst_67 = arith.constant 0.000000e+00 : f32
    %85 = vector.broadcast %cst_67 : f32 to vector<512x128xf32>
    %86 = arith.maximumf %84, %85 : vector<512x128xf32>
    %87 = arith.truncf %86 : vector<512x128xf32> to vector<512x128xbf16>
    %c0_68 = arith.constant 0 : index
    %c0_69 = arith.constant 0 : index
    %88 = vector.load %arg4[%c0_68, %c0_69] : memref<128x128xbf16, #tpu.memory_space<vmem>>, vector<128x128xbf16>
    %cst_70 = arith.constant dense<0.000000e+00> : vector<512x128xf32>
    %89 = tpu.matmul %87, %88, %cst_70 {dimension_numbers = #tpu.dot_dimension_numbers<[1], [0], [0], [1], [0, 0, 1, 1], [], []>} : vector<512x128xbf16>, vector<128x128xbf16>, vector<512x128xf32> -> vector<512x128xf32>
    %c0_71 = arith.constant 0 : index
    %c0_72 = arith.constant 0 : index
    %90 = vector.load %arg9[%c0_71, %c0_72] : memref<1x128xf32, #tpu.memory_space<vmem>>, vector<1x128xf32>
    %91 = vector.broadcast %90 : vector<1x128xf32> to vector<512x128xf32>
    %92 = arith.mulf %89, %91 : vector<512x128xf32>
    %c0_73 = arith.constant 0 : index
    %c0_74 = arith.constant 0 : index
    %93 = vector.load %arg10[%c0_73, %c0_74] : memref<1x128xf32, #tpu.memory_space<vmem>>, vector<1x128xf32>
    %94 = vector.broadcast %93 : vector<1x128xf32> to vector<512x128xf32>
    %95 = arith.addf %92, %94 : vector<512x128xf32>
    %96 = arith.extf %1 : vector<512x128xbf16> to vector<512x128xf32>
    %97 = arith.addf %95, %96 : vector<512x128xf32>
    %cst_75 = arith.constant 0.000000e+00 : f32
    %98 = vector.broadcast %cst_75 : f32 to vector<512x128xf32>
    %99 = arith.maximumf %97, %98 : vector<512x128xf32>
    %100 = vector.shape_cast %99 : vector<512x128xf32> to vector<2x16x16x128xf32>
    %c0_76 = arith.constant 0 : index
    %c0_77 = arith.constant 0 : index
    %c0_78 = arith.constant 0 : index
    %c0_79 = arith.constant 0 : index
    %101 = vector.load %arg11[%c0_76, %c0_77, %c0_78, %c0_79] : memref<2x16x16x128xf32, #tpu.memory_space<vmem>>, vector<2x16x16x128xf32>
    tpu.vector_store %arg11[%c0_76, %c0_77, %c0_78, %c0_79], %100 {strides = array<i32>} : memref<2x16x16x128xf32, #tpu.memory_space<vmem>>, vector<2x16x16x128xf32>,
    return
  }
  func.func @transform_0(%arg0: i32) -> (i32, i32, i32, i32) {
    %c0_i32 = arith.constant 0 : i32
    %c0_i32_0 = arith.constant 0 : i32
    %c0_i32_1 = arith.constant 0 : i32
    %c0_i32_2 = arith.constant 0 : i32
    return %arg0, %c0_i32, %c0_i32_0, %c0_i32_1 : i32, i32, i32, i32
  }
  func.func @transform_1(%arg0: i32) -> (i32, i32) {
    %c0_i32 = arith.constant 0 : i32
    %c0_i32_0 = arith.constant 0 : i32
    %c0_i32_1 = arith.constant 0 : i32
    return %c0_i32, %c0_i32_0 : i32, i32
  }
  func.func @transform_2(%arg0: i32) -> (i32, i32, i32) {
    %c0_i32 = arith.constant 0 : i32
    %c0_i32_0 = arith.constant 0 : i32
    %c0_i32_1 = arith.constant 0 : i32
    %c0_i32_2 = arith.constant 0 : i32
    return %c0_i32, %c0_i32_0, %c0_i32_1 : i32, i32, i32
  }
  func.func @transform_3(%arg0: i32) -> (i32, i32) {
    %c0_i32 = arith.constant 0 : i32
    %c0_i32_0 = arith.constant 0 : i32
    %c0_i32_1 = arith.constant 0 : i32
    return %c0_i32, %c0_i32_0 : i32, i32
  }
  func.func @transform_4(%arg0: i32) -> (i32, i32) {
    %c0_i32 = arith.constant 0 : i32
    %c0_i32_0 = arith.constant 0 : i32
    %c0_i32_1 = arith.constant 0 : i32
    return %c0_i32, %c0_i32_0 : i32, i32
  }
  func.func @transform_5(%arg0: i32) -> (i32, i32) {
    %c0_i32 = arith.constant 0 : i32
    %c0_i32_0 = arith.constant 0 : i32
    %c0_i32_1 = arith.constant 0 : i32
    return %c0_i32, %c0_i32_0 : i32, i32
  }
  func.func @transform_6(%arg0: i32) -> (i32, i32) {
    %c0_i32 = arith.constant 0 : i32
    %c0_i32_0 = arith.constant 0 : i32
    %c0_i32_1 = arith.constant 0 : i32
    return %c0_i32, %c0_i32_0 : i32, i32
  }
  func.func @transform_7(%arg0: i32) -> (i32, i32) {
    %c0_i32 = arith.constant 0 : i32
    %c0_i32_0 = arith.constant 0 : i32
    %c0_i32_1 = arith.constant 0 : i32
    return %c0_i32, %c0_i32_0 : i32, i32
  }
  func.func @transform_8(%arg0: i32) -> (i32, i32) {
    %c0_i32 = arith.constant 0 : i32
    %c0_i32_0 = arith.constant 0 : i32
    %c0_i32_1 = arith.constant 0 : i32
    return %c0_i32, %c0_i32_0 : i32, i32
  }
  func.func @transform_9(%arg0: i32) -> (i32, i32) {
    %c0_i32 = arith.constant 0 : i32
    %c0_i32_0 = arith.constant 0 : i32
    %c0_i32_1 = arith.constant 0 : i32
    return %c0_i32, %c0_i32_0 : i32, i32
  }
  func.func @transform_10(%arg0: i32) -> (i32, i32, i32, i32) {
    %c0_i32 = arith.constant 0 : i32
    %c0_i32_0 = arith.constant 0 : i32
    %c0_i32_1 = arith.constant 0 : i32
    %c0_i32_2 = arith.constant 0 : i32
    return %arg0, %c0_i32, %c0_i32_0, %c0_i32_1 : i32, i32, i32, i32
  }
}

</mosaic_0001>

<bundles_post_ra>
// kernel: tpu_custom_call.1
= control target key start
LH: loop header
LB: loop body
LE: loop exit
PB: predicated region body
PF: predicated region fallthrough
CT: control target
= control target key end

     0   :  { %15 = vsyncpa [#allocation4], 0  ;;  %s18266_s0 = inlined_call_operand.hbm [shape: bf16[2,16,16,128], index: 0, kind: input, shape index: {}]   ;;  %s18267_s1 = inlined_call_operand.hbm [shape: bf16[128,128], index: 1, kind: input, shape index: {}]   ;;  %s18268_s2 = inlined_call_operand.hbm [shape: bf16[9,128,128], index: 2, kind: input, shape index: {}]   ;;  %s18269_s3 = inlined_call_operand.hbm [shape: bf16[128,128], index: 3, kind: input, shape index: {}]   ;;  %s18270_s4 = inlined_call_operand.vmem [shape: f32[1,128], index: 4, kind: input, shape index: {}]   ;;  %s18271_s5 = inlined_call_operand.vmem [shape: f32[1,128], index: 5, kind: input, shape index: {}]   ;;  %s18272_s6 = inlined_call_operand.vmem [shape: f32[1,128], index: 6, kind: input, shape index: {}]   ;;  %s18273_s7 = inlined_call_operand.vmem [shape: f32[1,128], index: 7, kind: input, shape index: {}]   ;;  %s18274_s8 = inlined_call_operand.vmem [shape: f32[1,128], index: 8, kind: input, shape index: {}]   ;;  %s18275_s9 = inlined_call_operand.vmem [shape: f32[1,128], index: 9, kind: input, shape index: {}]   ;;  %s18276_s10 = inlined_call_operand.hbm [shape: f32[2,16,16,128], index: 10, kind: output, shape index: {}]  }
   0x1   :  { %16 = vsyncpa [#allocation7], 0 }
   0x2   :  { %17 = vsyncpa [#allocation10], 0 }
   0x3   :  { %18 = vsyncpa [#allocation5], 0  ;;  %s15097_s13 = smov [#allocation6]   ;;  %s15098_s15 = smov [#allocation3]  }
   0x4   :  { %s36_s14 = sshll.u32 %s15097_s13, 4  ;;  %s24_s16 = sshll.u32 %s15098_s15, 4  ;;  %s37_s14 = int_to_ptr.vmem [resolvable:$true] %s36_s14  ;;  %s25_s16 = int_to_ptr.vmem [resolvable:$true] %s24_s16 }
   0x5   :  { %s14997_s17 = scalar_lea.vmem %s37_s14, 1024  ;;  %p15002_p1 = scmp.lt.s32.totalorder %s37_s14, %s37_s14 }
   0x6   :  { %p14998_p0 = scmp.ne.s32.totalorder %s37_s14, %s14997_s17  ;;  %p15003_p2 = scmp.lt.s32.totalorder %s14997_s17, %s14997_s17 }
   0x8   :  { %p15004_p3 = por %p15003_p2, %p15002_p1 }
   0xa   :  { %p15005_p4 = pnand %p15004_p3, %p14998_p0 }
   0xc   :  { %15008 = shalt.err (!%p15005_p4)
}
   0xd   :  { %s15099_s18 = smov 64   ;;  %s15100_s19 = smov 4  }
   0xe   :  { %42 = dma.hbm_to_vmem [thread:$0]  %s18267_s1, 1024, %s37_s14, [#allocation7], %s15099_s18, %s15099_s18, %s15100_s19  }
   0xf   :  { %s15017_s22 = scalar_lea.vmem %s25_s16, 4096  ;;  %p15022_p6 = scmp.lt.s32.totalorder %s25_s16, %s25_s16 }
  0x10   :  { %p15018_p5 = scmp.ne.s32.totalorder %s25_s16, %s15017_s22  ;;  %p15023_p7 = scmp.lt.s32.totalorder %s15017_s22, %s15017_s22 }
  0x12   :  { %p15024_p8 = por %p15023_p7, %p15022_p6 }
  0x14   :  { %p15025_p9 = pnand %p15024_p8, %p15018_p5 }
  0x16   :  { %15028 = shalt.err (!%p15025_p9)
}
  0x17   :  { %30 = dma.hbm_to_vmem [thread:$0]  %s18266_s0, 4096, %s25_s16, [#allocation4], %s15099_s18, %s15099_s18, %s15100_s19  }
  0x18   :  { %s15101_s25 = smov [#allocation8]   ;;  %s15102_s27 = smov [#allocation9]  }
  0x19   :  { %s48_s26 = sshll.u32 %s15101_s25, 4  ;;  %s60_s28 = sshll.u32 %s15102_s27, 4  ;;  %s49_s26 = int_to_ptr.vmem [resolvable:$true] %s48_s26  ;;  %s61_s28 = int_to_ptr.vmem [resolvable:$true] %s60_s28 }
  0x1a   :  { %s15037_s1 = scalar_lea.vmem %s49_s26, 9216  ;;  %p15042_p11 = scmp.lt.s32.totalorder %s49_s26, %s49_s26 }
  0x1b   :  { %p15038_p10 = scmp.ne.s32.totalorder %s49_s26, %s15037_s1  ;;  %p15043_p12 = scmp.lt.s32.totalorder %s15037_s1, %s15037_s1 }
  0x1d   :  { %p15044_p13 = por %p15043_p12, %p15042_p11 }
  0x1f   :  { %p15045_p0 = pnand %p15044_p13, %p15038_p10 }
  0x21   :  { %15048 = shalt.err (!%p15045_p0)
}
  0x22   :  { %54 = dma.hbm_to_vmem [thread:$0]  %s18268_s2, 9216, %s49_s26, [#allocation7], %s15099_s18, %s15099_s18, %s15100_s19  }
  0x23   :  { %s15057_s0 = scalar_lea.vmem %s61_s28, 1024  ;;  %p15062_p2 = scmp.lt.s32.totalorder %s61_s28, %s61_s28 }
  0x24   :  { %p15058_p1 = scmp.ne.s32.totalorder %s61_s28, %s15057_s0  ;;  %p15063_p3 = scmp.lt.s32.totalorder %s15057_s0, %s15057_s0 }
  0x26   :  { %p15064_p4 = por %p15063_p3, %p15062_p2 }
  0x28   :  { %p15065_p5 = pnand %p15064_p4, %p15058_p1 }
  0x2a   :  { %15068 = shalt.err (!%p15065_p5)
}
  0x2b   :  { %66 = dma.hbm_to_vmem [thread:$0]  %s18269_s3, 1024, %s61_s28, [#allocation10], %s15099_s18, %s15099_s18, %s15100_s19  }
  0x2c   :  { %15089 = dma.done.wait [#allocation4], 4096  }
  0x2d   :  { %15090 = vsyncadd [#allocation4], 4294963200 }
  0x2e   :  { %15091 = dma.done.wait [#allocation7], 10240  }
  0x2f   :  { %15092 = vsyncadd [#allocation7], 4294957056 }
  0x30   :  { %15093 = dma.done.wait [#allocation10], 1024  }
  0x31   :  { %15094 = vsyncadd [#allocation10], 4294966272  ;;  %v14437_v0 = vld [vmem:[#allocation6 + $0x38] sm:$0xff]   ;;  %v14438_v1 = vld [vmem:[#allocation6 + $0x30] sm:$0xff]   ;;  %v15103_v41 = vmov 0   ;;  %vm971_vm0 = vcmask 1040384  }
  0x32   :  { %13135 = vmatprep.subr.bf16.mxu0 %v14437_v0  ;;  %v14439_v2 = vld [vmem:[#allocation6 + $0x28] sm:$0xff]   ;;  %v14440_v3 = vld [vmem:[#allocation6 + $0x20] sm:$0xff]   ;;  %v14441_v5 = vld [vmem:[#allocation6 + $0x18] sm:$0xff]   ;;  %1292 = vst [vmem:[#allocation2] sm:$0xf] %v15103_v41  ;;  %vm3680_vm2 = vcmask 1046528  }
  0x33   :  { %13136 = vmatpush3.bf16.msra.mxu0 %v14437_v0  ;;  %v92_v4 = vld [vmem:[#allocation3] sm:$0xff]   ;;  %v14442_v6 = vld [vmem:[#allocation6 + $0x10] sm:$0xff]   ;;  %v14443_v7 = vld [vmem:[#allocation6 + $0x8] sm:$0xff]   ;;  %1293 = vst [vmem:[#allocation2 + $0x4] sm:$0xf] %v15103_v41 }
  0x34   :  { %13137 = vmatprep.subr.bf16.mxu0 %v14438_v1  ;;  %13151 = vmatprep.mubr.bf16.mxu0 %v92_v4  ;;  %v14444_v8 = vld [vmem:[#allocation6] sm:$0xff]   ;;  %v94_v9 = vld [vmem:[#allocation3 + $0x8] sm:$0xff]   ;;  %v96_v10 = vld [vmem:[#allocation3 + $0x10] sm:$0xff]   ;;  %1294 = vst [vmem:[#allocation2 + $0x8] sm:$0xf] %v15103_v41 }
  0x35   :  { %v14477_v11 = vld [vmem:[#allocation8 + $0x38] sm:$0xff]   ;;  %v14478_v12 = vld [vmem:[#allocation8 + $0x30] sm:$0xff]   ;;  %v100_v14 = vld [vmem:[#allocation3 + $0x20] sm:$0xff]   ;;  %1295 = vst [vmem:[#allocation2 + $0xcc] sm:$0xf] %v15103_v41 }
  0x36   :  { %v98_v13 = vld [vmem:[#allocation3 + $0x18] sm:$0xff]   ;;  %v102_v15 = vld [vmem:[#allocation3 + $0x28] sm:$0xff]   ;;  %v104_v16 = vld [vmem:[#allocation3 + $0x30] sm:$0xff]   ;;  %1296 = vst [vmem:[#allocation2 + $0xd0] sm:$0xf] %v15103_v41 }
  0x37   :  { %13138 = vmatpush3.bf16.msra.mxu0 %v14438_v1  ;;  %v106_v17 = vld [vmem:[#allocation3 + $0x38] sm:$0xff]   ;;  %v108_v18 = vld [vmem:[#allocation3 + $0x40] sm:$0xff]   ;;  %v110_v19 = vld [vmem:[#allocation3 + $0x48] sm:$0xff]   ;;  %1297 = vst [vmem:[#allocation2 + $0xd4] sm:$0xf] %v15103_v41 }
  0x38   :  { %13139 = vmatprep.subr.bf16.mxu0 %v14439_v2  ;;  %v112_v20 = vld [vmem:[#allocation3 + $0x50] sm:$0xff]   ;;  %v114_v21 = vld [vmem:[#allocation3 + $0x58] sm:$0xff]   ;;  %v116_v22 = vld [vmem:[#allocation3 + $0x60] sm:$0xff]   ;;  %1522 = vst [vmem:[#allocation2 + $0xd8] sm:$0xf] %v15103_v41 }
  0x39   :  { %v118_v23 = vld [vmem:[#allocation3 + $0x68] sm:$0xff]   ;;  %v120_v24 = vld [vmem:[#allocation3 + $0x70] sm:$0xff]   ;;  %v122_v25 = vld [vmem:[#allocation3 + $0x78] sm:$0xff]   ;;  %1523 = vst [vmem:[#allocation2 + $0xdc] sm:$0xf] %v15103_v41 }
  0x3a   :  { %v124_v26 = vld [vmem:[#allocation3 + $0x80] sm:$0xff]   ;;  %v126_v27 = vld [vmem:[#allocation3 + $0x88] sm:$0xff]   ;;  %v128_v28 = vld [vmem:[#allocation3 + $0x90] sm:$0xff]   ;;  %1524 = vst [vmem:[#allocation2 + $0xe0] sm:$0xf] %v15103_v41 }
  0x3b   :  { %13140 = vmatpush3.bf16.msra.mxu0 %v14439_v2  ;;  %v14480_v29 = vld [vmem:[#allocation8 + $0x28] sm:$0xff]   ;;  %v14479_v30 = vld [vmem:[#allocation8 + $0x78] sm:$0xff]   ;;  %v14482_v32 = vld [vmem:[#allocation8 + $0x20] sm:$0xff]   ;;  %1525 = vst [vmem:[#allocation2 + $0x1a4] sm:$0xf] %v15103_v41 }
  0x3c   :  { %13141 = vmatprep.subr.bf16.mxu0 %v14440_v3  ;;  %13215 = vmatprep.subr.bf16.mxu1 %v14479_v30  ;;  %v130_v31 = vld [vmem:[#allocation3 + $0x98] sm:$0xff]   ;;  %v132_v33 = vld [vmem:[#allocation3 + $0xa0] sm:$0xff]   ;;  %v14481_v34 = vld [vmem:[#allocation8 + $0x70] sm:$0xff]   ;;  %1526 = vst [vmem:[#allocation2 + $0x1a8] sm:$0xf] %v15103_v41 }
  0x3d   :  { %13216 = vmatpush3.bf16.msra.mxu1 %v14479_v30  ;;  %v14484_v35 = vld [vmem:[#allocation8 + $0x18] sm:$0xff]   ;;  %v14483_v36 = vld [vmem:[#allocation8 + $0x68] sm:$0xff]   ;;  %v136_v38 = vld [vmem:[#allocation3 + $0xb0] sm:$0xff]   ;;  %1527 = vst [vmem:[#allocation2 + $0x1ac] sm:$0xf] %v15103_v41 }
  0x3e   :  { %13217 = vmatprep.subr.bf16.mxu1 %v14481_v34  ;;  %v134_v37 = vld [vmem:[#allocation3 + $0xa8] sm:$0xff]   ;;  %v14486_v39 = vld [vmem:[#allocation8 + $0x10] sm:$0xff]   ;;  %v14485_v40 = vld [vmem:[#allocation8 + $0x60] sm:$0xff]   ;;  %1752 = vst [vmem:[#allocation2 + $0x1b0] sm:$0xf] %v15103_v41 }
  0x3f   :  { %13142 = vmatpush3.bf16.msra.mxu0 %v14440_v3  ;;  %1753 = vst [vmem:[#allocation2 + $0x1b4] sm:$0xf] %v15103_v41  ;;  %1754 = vst [vmem:[#allocation2 + $0x1b8] sm:$0xf] %v15103_v41  ;;  %v14488_v42 = vld [vmem:[#allocation8 + $0x8] sm:$0xff]   ;;  %v14487_v43 = vld [vmem:[#allocation8 + $0x58] sm:$0xff]  }
  0x40   :  { %13143 = vmatprep.subr.bf16.mxu0 %v14441_v5  ;;  %1755 = vst [vmem:[#allocation2 + $0x1bc] sm:$0xf] %v15103_v41  ;;  %1756 = vst [vmem:[#allocation2 + $0x1c0] sm:$0xf] %v15103_v41  ;;  %v138_v44 = vld [vmem:[#allocation3 + $0xb8] sm:$0xff]   ;;  %v140_v45 = vld [vmem:[#allocation3 + $0xc0] sm:$0xff]  }
  0x41   :  { %13218 = vmatpush3.bf16.msra.mxu1 %v14481_v34  ;;  %1757 = vst [vmem:[#allocation2 + $0x1c4] sm:$0xf] %v15103_v41  ;;  %1758 = vst [vmem:[#allocation2 + $0x1c8] sm:$0xf] %v15103_v41  ;;  %v14490_v46 = vld [vmem:[#allocation8] sm:$0xff]   ;;  %v14489_v47 = vld [vmem:[#allocation8 + $0x50] sm:$0xff]  }
  0x42   :  { %13219 = vmatprep.subr.bf16.mxu1 %v14483_v36  ;;  %v142_v48 = vld [vmem:[#allocation3 + $0xc8] sm:$0xff]   ;;  %v144_v50 = vld [vmem:[#allocation3 + $0xd0] sm:$0xff]   ;;  %v14495_v51 = vld [vmem:[#allocation8 + $0x40] sm:$0xff]   ;;  %vm2176_vm1 = vsmask.f32 7424 }
  0x43   :  { %13144 = vmatpush3.bf16.msra.mxu0 %v14441_v5  ;;  %v14493_v49 = vld [vmem:[#allocation8 + $0x48] sm:$0xff]   ;;  %v146_v52 = vld [vmem:[#allocation3 + $0xd8] sm:$0xff]   ;;  %v148_v53 = vld [vmem:[#allocation3 + $0xe0] sm:$0xff]  }
  0x44   :  { %13145 = vmatprep.subr.bf16.mxu0 %v14442_v6  ;;  %v150_v54 = vld [vmem:[#allocation3 + $0xe8] sm:$0xff]   ;;  %v152_v55 = vld [vmem:[#allocation3 + $0xf0] sm:$0xff]   ;;  %v15186_v56 = vld [vmem:[#allocation8 + $0xb8] sm:$0xff]  }
  0x45   :  { %13220 = vmatpush3.bf16.msra.mxu1 %v14483_v36  ;;  %v154_v57 = vld [vmem:[#allocation3 + $0xf8] sm:$0xff]   ;;  %v1761_v58 = vld [vmem:[#allocation2] sm:$0xf]  ;;  %v1762_v59 = vld [vmem:[#allocation2 + $0x4] sm:$0xf] }
  0x46   :  { %13221 = vmatprep.subr.bf16.mxu1 %v14485_v40  ;;  %v15189_v60 = vcombine.low %v1761_v58, %v1762_v59  ;;  %v15195_v61 = vld [vmem:[%s18270_s4] ss:$0 sm:$0xff] }
  0x47   :  { %13146 = vmatpush3.bf16.msra.mxu0 %v14442_v6  ;;  %v15200_v63 = vld [vmem:[%s18271_s5] ss:$0 sm:$0xff] }
  0x48   :  { %13147 = vmatprep.subr.bf16.mxu0 %v14443_v7 }
  0x49   :  { %13222 = vmatpush3.bf16.msra.mxu1 %v14485_v40 }
  0x4a   :  { %13223 = vmatprep.subr.bf16.mxu1 %v14487_v43 }
  0x4b   :  { %13148 = vmatpush3.bf16.msra.mxu0 %v14443_v7 }
  0x4c   :  { %13149 = vmatprep.subr.bf16.mxu0 %v14444_v8 }
  0x4d   :  { %13224 = vmatpush3.bf16.msra.mxu1 %v14487_v43 }
  0x4e   :  { %13225 = vmatprep.subr.bf16.mxu1 %v14489_v47 }
  0x4f   :  { %13150 = vmatpush3.bf16.msra.mxu0 %v14444_v8 }
  0x50   :  { %13339 = vmatprep.subr.bf16.mxu0 %v14477_v11 }
  0x51   :  { %13226 = vmatpush3.bf16.msra.mxu1 %v14489_v47 }
  0x52   :  { %13152 = vmatmul.mubr.bf16.vlgmr.msra.gmra.mxu0 %v94_v9  ;;  %13227 = vmatprep.subr.bf16.mxu1 %v14493_v49 }
  0x53   :  { %13155 = vmatprep.mubr.bf16.mxu0 %v96_v10  ;;  %13340 = vmatpush3.bf16.msra.mxu0 %v14477_v11 }
  0x54   :  { %13341 = vmatprep.subr.bf16.mxu0 %v14478_v12 }
  0x55   :  { %13228 = vmatpush3.bf16.msra.mxu1 %v14493_v49  ;;  %v2178_v49 = vshrl.u32 %v15189_v60, 16 }
  0x56   :  { %13229 = vmatprep.subr.bf16.mxu1 %v14495_v51 }
  0x57   :  { %13342 = vmatpush3.bf16.msra.mxu0 %v14478_v12 }
  0x58   :  { %13343 = vmatprep.subr.bf16.mxu0 %v14480_v29 }
  0x59   :  { %13230 = vmatpush3.bf16.msra.mxu1 %v14495_v51 }
  0x5a   :  { %13156 = vmatmul.mubr.bf16.gmra.mxu0 %v98_v13  ;;  %13463 = vmatprep.subr.bf16.mxu1 %v15186_v56 }
  0x5b   :  { %13159 = vmatprep.mubr.bf16.mxu0 %v100_v14  ;;  %13344 = vmatpush3.bf16.msra.mxu0 %v14480_v29 }
  0x5c   :  { %13345 = vmatprep.subr.bf16.mxu0 %v14482_v32 }
  0x5f   :  { %13346 = vmatpush3.bf16.msra.mxu0 %v14482_v32 }
  0x60   :  { %13347 = vmatprep.subr.bf16.mxu0 %v14484_v35 }
  0x62   :  { %13160 = vmatmul.mubr.bf16.gmra.mxu0 %v102_v15 }
  0x63   :  { %13163 = vmatprep.mubr.bf16.mxu0 %v104_v16  ;;  %13348 = vmatpush3.bf16.msra.mxu0 %v14484_v35 }
  0x64   :  { %13349 = vmatprep.subr.bf16.mxu0 %v14486_v39 }
  0x67   :  { %13350 = vmatpush3.bf16.msra.mxu0 %v14486_v39 }
  0x68   :  { %13351 = vmatprep.subr.bf16.mxu0 %v14488_v42 }
  0x6a   :  { %13164 = vmatmul.mubr.bf16.gmra.mxu0 %v106_v17 }
  0x6b   :  { %13167 = vmatprep.mubr.bf16.mxu0 %v108_v18  ;;  %13352 = vmatpush3.bf16.msra.mxu0 %v14488_v42  ;;  %v2180_v42 = vshll.u32 %v15189_v60, 16 }
  0x6c   :  { %13353 = vmatprep.subr.bf16.mxu0 %v14490_v46 }
  0x6d   :  { %v2182_v59 = vrot.slane %v2180_v42, 1 }
  0x6f   :  { %13354 = vmatpush3.bf16.msra.mxu0 %v14490_v46 }
  0x72   :  { %13168 = vmatmul.mubr.bf16.gmra.mxu0 %v110_v19 }
  0x73   :  { %13171 = vmatprep.mubr.bf16.mxu0 %v112_v20 }
  0x7a   :  { %13172 = vmatmul.mubr.bf16.gmra.mxu0 %v114_v21 }
  0x7b   :  { %13175 = vmatprep.mubr.bf16.mxu0 %v116_v22 }
  0x82   :  { %13176 = vmatmul.mubr.bf16.gmra.mxu0 %v118_v23 }
  0x83   :  { %13179 = vmatprep.mubr.bf16.mxu0 %v120_v24 }
  0x8a   :  { %13180 = vmatmul.mubr.bf16.gmra.mxu0 %v122_v25 }
  0x8b   :  { %13183 = vmatprep.mubr.bf16.mxu0 %v124_v26 }
  0x92   :  { %13184 = vmatmul.mubr.bf16.gmra.mxu0 %v126_v27 }
  0x93   :  { %13187 = vmatprep.mubr.bf16.mxu0 %v128_v28 }
  0x9a   :  { %13188 = vmatmul.mubr.bf16.gmra.mxu0 %v130_v31 }
  0x9b   :  { %13191 = vmatprep.mubr.bf16.mxu0 %v132_v33 }
  0xa2   :  { %13192 = vmatmul.mubr.bf16.gmra.mxu0 %v134_v37 }
  0xa3   :  { %13195 = vmatprep.mubr.bf16.mxu0 %v136_v38 }
  0xaa   :  { %13196 = vmatmul.mubr.bf16.gmra.mxu0 %v138_v44 }
  0xab   :  { %13199 = vmatprep.mubr.bf16.mxu0 %v140_v45 }
  0xb2   :  { %13200 = vmatmul.mubr.bf16.gmra.mxu0 %v142_v48 }
  0xb3   :  { %13203 = vmatprep.mubr.bf16.mxu0 %v144_v50 }
  0xba   :  { %13204 = vmatmul.mubr.bf16.gmra.mxu0 %v146_v52 }
  0xbb   :  { %13207 = vmatprep.mubr.bf16.mxu0 %v148_v53 }
  0xc2   :  { %13208 = vmatmul.mubr.bf16.gmra.mxu0 %v150_v54 }
  0xc3   :  { %13211 = vmatprep.mubr.bf16.mxu0 %v152_v55 }
  0xca   :  { %13212 = vmatmul.mubr.bf16.gmra.mxu0 %v154_v57 }
  0xcb   :  { %13355 = vmatprep.mubr.bf16.mxu0 %v15189_v60 }
 0x112   :  { %v13153_v62 = vpop.f32.mrf.mxu0 }
 0x113   :  { %v710_v0 = vmul.f32 %v13153_v62, %v15195_v61 }
 0x114   :  { %v446_v1 = vpop.f32.mrf.mxu0 }
 0x115   :  { %v781_v2 = vadd.f32 %v15200_v63, %v710_v0  ;;  %v708_v3 = vmul.f32 %v15195_v61, %v446_v1 }
 0x116   :  { %v13154_v4 = vpop.f32.mrf.mxu0 }
 0x117   :  { %v845_v5 = vmax.f32 %v781_v2, 0.0  ;;  %v779_v6 = vadd.f32 %v15200_v63, %v708_v3  ;;  %v711_v7 = vmul.f32 %v13154_v4, %v15195_v61 }
 0x118   :  { %v449_v8 = vpop.f32.mrf.mxu0 }
 0x119   :  { %v843_v9 = vmax.f32 %v779_v6, 0.0  ;;  %v782_v10 = vadd.f32 %v15200_v63, %v711_v7  ;;  %v709_v11 = vmul.f32 %v15195_v61, %v449_v8  ;;  %v975_v13 = vrot.slane %v845_v5, 7 }
 0x11a   :  { %v13157_v12 = vpop.f32.mrf.mxu0 }
 0x11b   :  { %v972_v14 = vrot.slane %v843_v9, 7  ;;  %v846_v15 = vmax.f32 %v782_v10, 0.0  ;;  %v780_v16 = vadd.f32 %v15200_v63, %v709_v11  ;;  %v714_v17 = vmul.f32 %v13157_v12, %v15195_v61 }
 0x11c   :  { %v462_v18 = vpop.f32.mrf.mxu0  ;;  %v1165_v26 = vsel %vm971_vm0, 0.0, %v975_v13 }
 0x11d   :  { %v1164_v19 = vsel %vm971_vm0, 0.0, %v972_v14  ;;  %v976_v20 = vrot.slane %v846_v15, 7  ;;  %v844_v21 = vmax.f32 %v780_v16, 0.0  ;;  %v712_v22 = vmul.f32 %v15195_v61, %v462_v18 }
 0x11e   :  { %v12125_v23 = vpack.c.bf16 %v1164_v19, %v1164_v19  ;;  %v785_v24 = vadd.f32 %v15200_v63, %v714_v17  ;;  %v13158_v25 = vpop.f32.mrf.mxu0  ;;  %v2183_v18 = vor.u32 %v2182_v59, %v2178_v49 }
 0x11f   :  { %v977_v27 = vsel %vm971_vm0, %v975_v13, %v976_v20  ;;  %v973_v28 = vrot.slane %v844_v21, 7  ;;  %v783_v29 = vadd.f32 %v15200_v63, %v712_v22  ;;  %v715_v32 = vmul.f32 %v13158_v25, %v15195_v61 }
 0x120   :  { %1474 = vst [vmem:[#allocation2 + $0xc] sm:$0xf] %v12125_v23  ;;  %v12229_v30 = vpack.c.bf16 %v977_v27, %v1165_v26  ;;  %v849_v31 = vmax.f32 %v785_v24, 0.0  ;;  %v465_v33 = vpop.f32.mrf.mxu0  ;;  %v1197_v46 = vsel %vm971_vm0, %v976_v20, 0.0 }
 0x121   :  { %v974_v34 = vsel %vm971_vm0, %v972_v14, %v973_v28  ;;  %v1196_v35 = vsel %vm971_vm0, %v973_v28, 0.0  ;;  %v847_v36 = vmax.f32 %v783_v29, 0.0  ;;  %v713_v37 = vmul.f32 %v15195_v61, %v465_v33 }
 0x122   :  { %12452 = vst [vmem:[#allocation2 + $0x18] sm:$0xff] %v12229_v30   ;;  %v12224_v38 = vpack.c.bf16 %v1196_v35, %v974_v34  ;;  %v981_v39 = vrot.slane %v849_v31, 7  ;;  %v786_v40 = vadd.f32 %v15200_v63, %v715_v32  ;;  %v13161_v41 = vpop.f32.mrf.mxu0 }
 0x123   :  { %v978_v43 = vrot.slane %v847_v36, 7  ;;  %v784_v44 = vadd.f32 %v15200_v63, %v713_v37  ;;  %v718_v45 = vmul.f32 %v13161_v41, %v15195_v61 }
 0x124   :  { %12451 = vst [vmem:[#allocation2 + $0x10] sm:$0xff] %v12224_v38   ;;  %v850_v47 = vmax.f32 %v786_v40, 0.0  ;;  %v478_v48 = vpop.f32.mrf.mxu0  ;;  %v1167_v54 = vsel %vm971_vm0, 0.0, %v981_v39 }
 0x125   :  { %v1166_v50 = vsel %vm971_vm0, 0.0, %v978_v43  ;;  %v848_v51 = vmax.f32 %v784_v44, 0.0  ;;  %v789_v52 = vadd.f32 %v15200_v63, %v718_v45  ;;  %v716_v53 = vmul.f32 %v15195_v61, %v478_v48 }
 0x126   :  { %v12234_v55 = vpack.c.bf16 %v1166_v50, %v1197_v46  ;;  %v982_v57 = vrot.slane %v850_v47, 7  ;;  %v13162_v58 = vpop.f32.mrf.mxu0 }
 0x127   :  { %v979_v62 = vrot.slane %v848_v51, 7  ;;  %v853_v0 = vmax.f32 %v789_v52, 0.0  ;;  %v787_v1 = vadd.f32 %v15200_v63, %v716_v53  ;;  %v719_v2 = vmul.f32 %v13162_v58, %v15195_v61  ;;  %v14494_v60 = vld [vmem:[#allocation2 + $0x8] sm:$0xff]  }
 0x128   :  { %12453 = vst [vmem:[#allocation2 + $0x20] sm:$0xff] %v12234_v55   ;;  %v983_v3 = vsel %vm971_vm0, %v981_v39, %v982_v57  ;;  %v1199_v4 = vsel %vm971_vm0, %v982_v57, 0.0  ;;  %v481_v5 = vpop.f32.mrf.mxu0  ;;  %13356 = vmatmul.mubr.bf16.vlgmr.msra.gmra.mxu0 %v14494_v60  ;;  %v2185_v23 = vshll.u32 %v14494_v60, 16  ;;  %v2189_v27 = vshrl.u32 %v14494_v60, 16 }
 0x129   :  { %v12244_v6 = vpack.c.bf16 %v983_v3, %v1167_v54  ;;  %v980_v7 = vsel %vm971_vm0, %v978_v43, %v979_v62  ;;  %v1198_v8 = vsel %vm971_vm0, %v979_v62, 0.0  ;;  %v987_v9 = vrot.slane %v853_v0, 7  ;;  %v15247_v26 = vld [vmem:[#allocation2 + $0x18] sm:$0xff]  }
 0x12a   :  { %v12239_v10 = vpack.c.bf16 %v1198_v8, %v980_v7  ;;  %v851_v11 = vmax.f32 %v787_v1, 0.0  ;;  %v790_v12 = vadd.f32 %v15200_v63, %v719_v2  ;;  %v717_v13 = vmul.f32 %v15195_v61, %v481_v5  ;;  %v13165_v14 = vpop.f32.mrf.mxu0  ;;  %v14506_v5 = vld [vmem:[#allocation8 + $0xb0] sm:$0xff]  }
 0x12b   :  { %12455 = vst [vmem:[#allocation2 + $0x30] sm:$0xff] %v12244_v6   ;;  %v1169_v15 = vsel %vm971_vm0, 0.0, %v987_v9  ;;  %v722_v16 = vmul.f32 %v13165_v14, %v15195_v61  ;;  %v15241_v17 = vld [vmem:[#allocation2 + $0x10] sm:$0xff]   ;;  %v2187_v33 = vrot.slane %v2185_v23, 1 }
 0x12c   :  { %12454 = vst [vmem:[#allocation2 + $0x28] sm:$0xff] %v12239_v10   ;;  %v984_v19 = vrot.slane %v851_v11, 7  ;;  %v854_v20 = vmax.f32 %v790_v12, 0.0  ;;  %v788_v21 = vadd.f32 %v15200_v63, %v717_v13  ;;  %v494_v22 = vpop.f32.mrf.mxu0  ;;  %13359 = vmatprep.mubr.bf16.mxu0 %v15241_v17  ;;  %v2193_v28 = vshll.u32 %v15241_v17, 16 }
 0x12d   :  { %v793_v24 = vadd.f32 %v15200_v63, %v722_v16  ;;  %v720_v25 = vmul.f32 %v15195_v61, %v494_v22  ;;  %v2188_v42 = vsel %vm2176_vm1, %v2183_v18, %v2187_v33  ;;  %v2191_v52 = vor.u32 %v2189_v27, %v2187_v33  ;;  %v14513_v16 = vld [vmem:[#allocation8 + $0xa8] sm:$0xff]  }
 0x12e   :  { %v1168_v29 = vsel %vm971_vm0, 0.0, %v984_v19  ;;  %v988_v30 = vrot.slane %v854_v20, 7  ;;  %v852_v31 = vmax.f32 %v788_v21, 0.0  ;;  %v13166_v32 = vpop.f32.mrf.mxu0  ;;  %13231 = vmatprep.mubr.bf16.mxu1 %v2188_v42  ;;  %v2195_v62 = vrot.slane %v2193_v28, 1 }
 0x12f   :  { %v12249_v34 = vpack.c.bf16 %v1168_v29, %v1199_v4  ;;  %v857_v35 = vmax.f32 %v793_v24, 0.0  ;;  %v791_v36 = vadd.f32 %v15200_v63, %v720_v25  ;;  %v723_v37 = vmul.f32 %v13166_v32, %v15195_v61  ;;  %v15253_v38 = vld [vmem:[#allocation2 + $0x20] sm:$0xff]  }
 0x130   :  { %v989_v39 = vsel %vm971_vm0, %v987_v9, %v988_v30  ;;  %v1201_v40 = vsel %vm971_vm0, %v988_v30, 0.0  ;;  %v985_v41 = vrot.slane %v852_v31, 7  ;;  %v497_v43 = vpop.f32.mrf.mxu0  ;;  %13360 = vmatmul.mubr.bf16.gmra.mxu0 %v15247_v26  ;;  %v2197_v1 = vshrl.u32 %v15241_v17, 16 }
 0x131   :  { %12456 = vst [vmem:[#allocation2 + $0x38] sm:$0xff] %v12249_v34   ;;  %v12259_v44 = vpack.c.bf16 %v989_v39, %v1169_v15  ;;  %v993_v45 = vrot.slane %v857_v35, 7  ;;  %v855_v46 = vmax.f32 %v791_v36, 0.0  ;;  %v794_v47 = vadd.f32 %v15200_v63, %v723_v37  ;;  %13363 = vmatprep.mubr.bf16.mxu0 %v15253_v38 }
 0x132   :  { %v986_v48 = vsel %vm971_vm0, %v984_v19, %v985_v41  ;;  %v1200_v49 = vsel %vm971_vm0, %v985_v41, 0.0  ;;  %v721_v50 = vmul.f32 %v15195_v61, %v497_v43  ;;  %v13169_v51 = vpop.f32.mrf.mxu0  ;;  %v2201_v4 = vshll.u32 %v15247_v26, 16  ;;  %v15279_v22 = vld [vmem:[#allocation2 + $0x30] sm:$0xff]  }
 0x133   :  { %12458 = vst [vmem:[#allocation2 + $0x48] sm:$0xff] %v12259_v44   ;;  %v12254_v53 = vpack.c.bf16 %v1200_v49, %v986_v48  ;;  %v1171_v54 = vsel %vm971_vm0, 0.0, %v993_v45  ;;  %v990_v55 = vrot.slane %v855_v46, 7  ;;  %v858_v57 = vmax.f32 %v794_v47, 0.0  ;;  %v15276_v15 = vld [vmem:[#allocation2 + $0x28] sm:$0xff]  }
 0x134   :  { %v792_v58 = vadd.f32 %v15200_v63, %v721_v50  ;;  %v726_v59 = vmul.f32 %v13169_v51, %v15195_v61  ;;  %v510_v0 = vpop.f32.mrf.mxu0  ;;  %v2196_v9 = vsel %vm2176_vm1, %v2191_v52, %v2195_v62  ;;  %v2199_v14 = vor.u32 %v2197_v1, %v2195_v62 }
 0x135   :  { %12457 = vst [vmem:[#allocation2 + $0x40] sm:$0xff] %v12254_v53   ;;  %v1170_v2 = vsel %vm971_vm0, 0.0, %v990_v55  ;;  %v994_v60 = vrot.slane %v858_v57, 7  ;;  %v724_v3 = vmul.f32 %v15195_v61, %v510_v0  ;;  %13232 = vmatmul.mubr.bf16.vlgmr.msra.gmra.mxu1 %v2196_v9  ;;  %v2203_v20 = vrot.slane %v2201_v4, 1  ;;  %v14529_v57 = vld [vmem:[#allocation8 + $0x98] sm:$0xff]  }
 0x136   :  { %v12264_v6 = vpack.c.bf16 %v1170_v2, %v1201_v40  ;;  %v856_v7 = vmax.f32 %v792_v58, 0.0  ;;  %v797_v8 = vadd.f32 %v15200_v63, %v726_v59  ;;  %v13170_v10 = vpop.f32.mrf.mxu0  ;;  %13464 = vmatpush3.bf16.msra.mxu1 %v15186_v56  ;;  %v2205_v27 = vshrl.u32 %v15247_v26, 16 }
 0x137   :  { %v995_v11 = vsel %vm971_vm0, %v993_v45, %v994_v60  ;;  %v1203_v12 = vsel %vm971_vm0, %v994_v60, 0.0  ;;  %v795_v13 = vadd.f32 %v15200_v63, %v724_v3  ;;  %v727_v24 = vmul.f32 %v13170_v10, %v15195_v61  ;;  %13465 = vmatprep.subr.bf16.mxu1 %v14506_v5  ;;  %v14522_v45 = vld [vmem:[#allocation8 + $0xa0] sm:$0xff]  }
 0x138   :  { %12459 = vst [vmem:[#allocation2 + $0x50] sm:$0xff] %v12264_v6   ;;  %v12274_v17 = vpack.c.bf16 %v995_v11, %v1171_v54  ;;  %v991_v18 = vrot.slane %v856_v7, 7  ;;  %v861_v19 = vmax.f32 %v797_v8, 0.0  ;;  %v513_v21 = vpop.f32.mrf.mxu0  ;;  %13364 = vmatmul.mubr.bf16.gmra.mxu0 %v15276_v15  ;;  %v2204_v30 = vsel %vm2176_vm1, %v2199_v14, %v2203_v20 }
 0x139   :  { %v859_v23 = vmax.f32 %v795_v13, 0.0  ;;  %v725_v25 = vmul.f32 %v15195_v61, %v513_v21  ;;  %13367 = vmatprep.mubr.bf16.mxu0 %v15279_v22  ;;  %13235 = vmatprep.mubr.bf16.mxu1 %v2204_v30  ;;  %v798_v34 = vadd.f32 %v15200_v63, %v727_v24  ;;  %v2207_v37 = vor.u32 %v2205_v27, %v2203_v20 }
 0x13a   :  { %12461 = vst [vmem:[#allocation2 + $0x60] sm:$0xff] %v12274_v17   ;;  %v992_v28 = vsel %vm971_vm0, %v990_v55, %v991_v18  ;;  %v1202_v29 = vsel %vm971_vm0, %v991_v18, 0.0  ;;  %v999_v56 = vrot.slane %v861_v19, 7  ;;  %v13173_v31 = vpop.f32.mrf.mxu0  ;;  %v2209_v39 = vshll.u32 %v15253_v38, 16  ;;  %13466 = vmatpush3.bf16.msra.mxu1 %v14506_v5  ;;  %v15300_v55 = vld [vmem:[#allocation2 + $0x38] sm:$0xff]  }
 0x13b   :  { %v12269_v32 = vpack.c.bf16 %v1202_v29, %v992_v28  ;;  %v996_v33 = vrot.slane %v859_v23, 7  ;;  %v796_v35 = vadd.f32 %v15200_v63, %v725_v25  ;;  %v730_v36 = vmul.f32 %v13173_v31, %v15195_v61  ;;  %13467 = vmatprep.subr.bf16.mxu1 %v14513_v16  ;;  %v15320_v25 = vld [vmem:[#allocation2 + $0x48] sm:$0xff]  }
 0x13c   :  { %v1173_v26 = vsel %vm971_vm0, 0.0, %v999_v56  ;;  %v526_v40 = vpop.f32.mrf.mxu0  ;;  %v862_v42 = vmax.f32 %v798_v34, 0.0  ;;  %v2211_v48 = vrot.slane %v2209_v39, 1  ;;  %v2213_v49 = vshrl.u32 %v15253_v38, 16  ;;  %v15304_v2 = vld [vmem:[#allocation2 + $0x40] sm:$0xff]  }
 0x13d   :  { %12460 = vst [vmem:[#allocation2 + $0x58] sm:$0xff] %v12269_v32   ;;  %v1172_v41 = vsel %vm971_vm0, 0.0, %v996_v33  ;;  %v860_v43 = vmax.f32 %v796_v35, 0.0  ;;  %v728_v44 = vmul.f32 %v15195_v61, %v526_v40  ;;  %v801_v47 = vadd.f32 %v15200_v63, %v730_v36 }
 0x13e   :  { %v12279_v46 = vpack.c.bf16 %v1172_v41, %v1203_v12  ;;  %v13174_v50 = vpop.f32.mrf.mxu0  ;;  %v1000_v51 = vrot.slane %v862_v42, 7  ;;  %v2217_v54 = vshll.u32 %v15276_v15, 16  ;;  %v2212_v59 = vsel %vm2176_vm1, %v2207_v37, %v2211_v48  ;;  %13468 = vmatpush3.bf16.msra.mxu1 %v14513_v16 }
 0x13f   :  { %v997_v52 = vrot.slane %v860_v43, 7  ;;  %v799_v53 = vadd.f32 %v15200_v63, %v728_v44  ;;  %v865_v58 = vmax.f32 %v801_v47, 0.0  ;;  %v2215_v62 = vor.u32 %v2213_v49, %v2211_v48  ;;  %13236 = vmatmul.mubr.bf16.gmra.mxu1 %v2212_v59  ;;  %13469 = vmatprep.subr.bf16.mxu1 %v14522_v45  ;;  %v15328_v37 = vld [vmem:[#allocation2 + $0x50] sm:$0xff]  }
 0x140   :  { %12462 = vst [vmem:[#allocation2 + $0x68] sm:$0xff] %v12279_v46   ;;  %v731_v0 = vmul.f32 %v13174_v50, %v15195_v61  ;;  %v529_v1 = vpop.f32.mrf.mxu0  ;;  %v1001_v38 = vsel %vm971_vm0, %v999_v56, %v1000_v51  ;;  %v1205_v60 = vsel %vm971_vm0, %v1000_v51, 0.0  ;;  %13368 = vmatmul.mubr.bf16.gmra.mxu0 %v15300_v55  ;;  %v2219_v10 = vrot.slane %v2217_v54, 1  ;;  %v14536_v56 = vld [vmem:[#allocation8 + $0x90] sm:$0xff]  }
 0x141   :  { %v998_v3 = vsel %vm971_vm0, %v996_v33, %v997_v52  ;;  %v1204_v4 = vsel %vm971_vm0, %v997_v52, 0.0  ;;  %v12289_v5 = vpack.c.bf16 %v1001_v38, %v1173_v26  ;;  %v1005_v7 = vrot.slane %v865_v58, 7  ;;  %13371 = vmatprep.mubr.bf16.mxu0 %v15304_v2 }
 0x142   :  { %v12284_v6 = vpack.c.bf16 %v1204_v4, %v998_v3  ;;  %v863_v8 = vmax.f32 %v799_v53, 0.0  ;;  %v13177_v9 = vpop.f32.mrf.mxu0  ;;  %v802_v11 = vadd.f32 %v15200_v63, %v731_v0  ;;  %v729_v12 = vmul.f32 %v15195_v61, %v529_v1  ;;  %13470 = vmatpush3.bf16.msra.mxu1 %v14522_v45 }
 0x143   :  { %v2221_v13 = vshrl.u32 %v15276_v15, 16  ;;  %12464 = vst [vmem:[#allocation2 + $0x78] sm:$0xff] %v12289_v5   ;;  %v1175_v14 = vsel %vm971_vm0, 0.0, %v1005_v7  ;;  %v2225_v17 = vshll.u32 %v15279_v22, 16  ;;  %v2229_v18 = vshrl.u32 %v15279_v22, 16  ;;  %13471 = vmatprep.subr.bf16.mxu1 %v14529_v57 }
 0x144   :  { %12463 = vst [vmem:[#allocation2 + $0x70] sm:$0xff] %v12284_v6   ;;  %v1002_v16 = vrot.slane %v863_v8, 7  ;;  %v542_v19 = vpop.f32.mrf.mxu0  ;;  %v2220_v20 = vsel %vm2176_vm1, %v2215_v62, %v2219_v10  ;;  %v866_v21 = vmax.f32 %v802_v11, 0.0  ;;  %v800_v23 = vadd.f32 %v15200_v63, %v729_v12  ;;  %v15346_v5 = vld [vmem:[#allocation2 + $0x58] sm:$0xff]  }
 0x145   :  { %v2223_v24 = vor.u32 %v2221_v13, %v2219_v10  ;;  %13239 = vmatprep.mubr.bf16.mxu1 %v2220_v20  ;;  %v2227_v27 = vrot.slane %v2225_v17, 1  ;;  %v2233_v28 = vshll.u32 %v15300_v55, 16  ;;  %v734_v29 = vmul.f32 %v13177_v9, %v15195_v61 }
 0x146   :  { %v1174_v15 = vsel %vm971_vm0, 0.0, %v1002_v16  ;;  %v13178_v22 = vpop.f32.mrf.mxu0  ;;  %v1006_v31 = vrot.slane %v866_v21, 7  ;;  %v864_v32 = vmax.f32 %v800_v23, 0.0  ;;  %v732_v33 = vmul.f32 %v15195_v61, %v542_v19  ;;  %13472 = vmatpush3.bf16.msra.mxu1 %v14529_v57 }
 0x147   :  { %v12294_v30 = vpack.c.bf16 %v1174_v15, %v1205_v60  ;;  %v2228_v34 = vsel %vm2176_vm1, %v2223_v24, %v2227_v27  ;;  %v2231_v35 = vor.u32 %v2229_v18, %v2227_v27  ;;  %v2235_v26 = vrot.slane %v2233_v28, 1  ;;  %13473 = vmatprep.subr.bf16.mxu1 %v14536_v56 }
 0x148   :  { %v805_v36 = vadd.f32 %v15200_v63, %v734_v29  ;;  %v545_v39 = vpop.f32.mrf.mxu0  ;;  %v1007_v40 = vsel %vm971_vm0, %v1005_v7, %v1006_v31  ;;  %v1207_v41 = vsel %vm971_vm0, %v1006_v31, 0.0  ;;  %v1003_v42 = vrot.slane %v864_v32, 7  ;;  %13240 = vmatmul.mubr.bf16.gmra.mxu1 %v2228_v34  ;;  %13372 = vmatmul.mubr.bf16.gmra.mxu0 %v15320_v25 }
 0x149   :  { %12465 = vst [vmem:[#allocation2 + $0x80] sm:$0xff] %v12294_v30   ;;  %v803_v43 = vadd.f32 %v15200_v63, %v732_v33  ;;  %v12304_v44 = vpack.c.bf16 %v1007_v40, %v1175_v14  ;;  %v2236_v45 = vsel %vm2176_vm1, %v2231_v35, %v2235_v26  ;;  %v735_v47 = vmul.f32 %v13178_v22, %v15195_v61  ;;  %v15353_v14 = vld [vmem:[#allocation2 + $0x60] sm:$0xff]  }
 0x14a   :  { %v869_v46 = vmax.f32 %v805_v36, 0.0  ;;  %13375 = vmatprep.mubr.bf16.mxu0 %v15328_v37  ;;  %v13181_v48 = vpop.f32.mrf.mxu0  ;;  %v1004_v49 = vsel %vm971_vm0, %v1002_v16, %v1003_v42  ;;  %v1206_v50 = vsel %vm971_vm0, %v1003_v42, 0.0  ;;  %13243 = vmatprep.mubr.bf16.mxu1 %v2236_v45  ;;  %v2237_v52 = vshrl.u32 %v15300_v55, 16  ;;  %v15374_v42 = vld [vmem:[#allocation2 + $0x68] sm:$0xff]  }
 0x14b   :  { %v867_v51 = vmax.f32 %v803_v43, 0.0  ;;  %12467 = vst [vmem:[#allocation2 + $0x90] sm:$0xff] %v12304_v44   ;;  %v12299_v53 = vpack.c.bf16 %v1206_v50, %v1004_v49  ;;  %v806_v57 = vadd.f32 %v15200_v63, %v735_v47  ;;  %v2241_v58 = vshll.u32 %v15304_v2, 16  ;;  %13474 = vmatpush3.bf16.msra.mxu1 %v14536_v56 }
 0x14c   :  { %v1011_v54 = vrot.slane %v869_v46, 7  ;;  %v558_v59 = vpop.f32.mrf.mxu0  ;;  %v2239_v0 = vor.u32 %v2237_v52, %v2235_v26  ;;  %v733_v1 = vmul.f32 %v15195_v61, %v545_v39  ;;  %v2245_v38 = vshrl.u32 %v15304_v2, 16 }
 0x14d   :  { %v1008_v62 = vrot.slane %v867_v51, 7  ;;  %12466 = vst [vmem:[#allocation2 + $0x88] sm:$0xff] %v12299_v53   ;;  %v870_v3 = vmax.f32 %v806_v57, 0.0  ;;  %v2243_v55 = vrot.slane %v2241_v58, 1  ;;  %v2249_v4 = vshll.u32 %v15320_v25, 16 }
 0x14e   :  { %v1177_v60 = vsel %vm971_vm0, 0.0, %v1011_v54  ;;  %v13182_v6 = vpop.f32.mrf.mxu0  ;;  %v804_v8 = vadd.f32 %v15200_v63, %v733_v1  ;;  %v738_v9 = vmul.f32 %v13181_v48, %v15195_v61  ;;  %v2253_v10 = vshrl.u32 %v15320_v25, 16  ;;  %v15380_v48 = vld [vmem:[#allocation2 + $0x70] sm:$0xff]   ;;  %v14545_v1 = vld [vmem:[#allocation8 + $0x88] sm:$0xff]  }
 0x14f   :  { %v1176_v7 = vsel %vm971_vm0, 0.0, %v1008_v62  ;;  %v1012_v2 = vrot.slane %v870_v3, 7  ;;  %v2244_v12 = vsel %vm2176_vm1, %v2239_v0, %v2243_v55  ;;  %v2247_v13 = vor.u32 %v2245_v38, %v2243_v55  ;;  %13475 = vmatprep.subr.bf16.mxu1 %v14545_v1 }
 0x150   :  { %v12309_v11 = vpack.c.bf16 %v1176_v7, %v1207_v41  ;;  %v561_v16 = vpop.f32.mrf.mxu0  ;;  %13244 = vmatmul.mubr.bf16.gmra.mxu1 %v2244_v12  ;;  %v868_v17 = vmax.f32 %v804_v8, 0.0  ;;  %v2251_v18 = vrot.slane %v2249_v4, 1  ;;  %v809_v19 = vadd.f32 %v15200_v63, %v738_v9  ;;  %13376 = vmatmul.mubr.bf16.gmra.mxu0 %v15346_v5 }
 0x151   :  { %v2257_v20 = vshll.u32 %v15328_v37, 16  ;;  %v1013_v21 = vsel %vm971_vm0, %v1011_v54, %v1012_v2  ;;  %v1209_v23 = vsel %vm971_vm0, %v1012_v2, 0.0  ;;  %13379 = vmatprep.mubr.bf16.mxu0 %v15353_v14  ;;  %v736_v24 = vmul.f32 %v15195_v61, %v558_v59  ;;  %13476 = vmatpush3.bf16.msra.mxu1 %v14545_v1 }
 0x152   :  { %12468 = vst [vmem:[#allocation2 + $0x98] sm:$0xff] %v12309_v11   ;;  %v15362_v25 = vpop.f32.mrf.mxu0  ;;  %v12319_v15 = vpack.c.bf16 %v1013_v21, %v1177_v60  ;;  %v1009_v27 = vrot.slane %v868_v17, 7  ;;  %v2252_v28 = vsel %vm2176_vm1, %v2247_v13, %v2251_v18  ;;  %v873_v29 = vmax.f32 %v809_v19, 0.0  ;;  %v15408_v19 = vld [vmem:[#allocation2 + $0x80] sm:$0xff]  }
 0x153   :  { %13247 = vmatprep.mubr.bf16.mxu1 %v2252_v28  ;;  %v2255_v22 = vor.u32 %v2253_v10, %v2251_v18  ;;  %v2259_v56 = vrot.slane %v2257_v20, 1  ;;  %v807_v30 = vadd.f32 %v15200_v63, %v736_v24  ;;  %v2265_v31 = vshll.u32 %v15346_v5, 16 }
 0x154   :  { %v15367_v32 = vpop.f32.mrf.mxu0  ;;  %12470 = vst [vmem:[#allocation2 + $0xa8] sm:$0xff] %v12319_v15   ;;  %v1010_v33 = vsel %vm971_vm0, %v1008_v62, %v1009_v27  ;;  %v1208_v34 = vsel %vm971_vm0, %v1009_v27, 0.0  ;;  %v2261_v35 = vshrl.u32 %v15328_v37, 16  ;;  %v739_v26 = vmul.f32 %v13182_v6, %v15195_v61  ;;  %v15396_v6 = vld [vmem:[#allocation2 + $0x78] sm:$0xff]  }
 0x155   :  { %v12314_v36 = vpack.c.bf16 %v1208_v34, %v1010_v33  ;;  %v1017_v39 = vrot.slane %v873_v29, 7  ;;  %v2260_v40 = vsel %vm2176_vm1, %v2255_v22, %v2259_v56  ;;  %v871_v41 = vmax.f32 %v807_v30, 0.0  ;;  %v15417_v29 = vld [vmem:[#allocation2 + $0x88] sm:$0xff]  }
 0x156   :  { %v15376_v43 = vpop.f32.mrf.mxu0  ;;  %v2263_v44 = vor.u32 %v2261_v35, %v2259_v56  ;;  %v2267_v45 = vrot.slane %v2265_v31, 1  ;;  %v810_v46 = vadd.f32 %v15200_v63, %v739_v26  ;;  %v737_v47 = vmul.f32 %v15195_v61, %v561_v16  ;;  %v15422_v56 = vld [vmem:[#allocation2 + $0x90] sm:$0xff]  }
 0x157   :  { %12469 = vst [vmem:[#allocation2 + $0xa0] sm:$0xff] %v12314_v36   ;;  %v1014_v37 = vrot.slane %v871_v41, 7  ;;  %v2269_v49 = vshrl.u32 %v15346_v5, 16  ;;  %v2273_v50 = vshll.u32 %v15353_v14, 16  ;;  %v2277_v51 = vshrl.u32 %v15353_v14, 16  ;;  %v14549_v34 = vld [vmem:[#allocation8 + $0xf8] sm:$0xff]  }
 0x158   :  { %v15385_v52 = vpop.f32.mrf.mxu0  ;;  %13248 = vmatmul.mubr.bf16.gmra.mxu1 %v2260_v40  ;;  %v2268_v53 = vsel %vm2176_vm1, %v2263_v44, %v2267_v45  ;;  %v874_v54 = vmax.f32 %v810_v46, 0.0  ;;  %v808_v57 = vadd.f32 %v15200_v63, %v737_v47  ;;  %13380 = vmatmul.mubr.bf16.gmra.mxu0 %v15374_v42  ;;  %v1179_v58 = vsel %vm971_vm0, 0.0, %v1017_v39 }
 0x159   :  { %v1178_v59 = vsel %vm971_vm0, 0.0, %v1014_v37  ;;  %13251 = vmatprep.mubr.bf16.mxu1 %v2268_v53  ;;  %v2275_v62 = vrot.slane %v2273_v50, 1  ;;  %13383 = vmatprep.mubr.bf16.mxu0 %v15380_v48  ;;  %v2281_v55 = vshll.u32 %v15374_v42, 16  ;;  %v2271_v4 = vor.u32 %v2269_v49, %v2267_v45  ;;  %v15442_v45 = vld [vmem:[%s18270_s4] ss:$0 sm:$0xff] }
 0x15a   :  { %v15393_v0 = vpop.f32.mrf.mxu0  ;;  %v12324_v38 = vpack.c.bf16 %v1178_v59, %v1209_v23  ;;  %v1018_v60 = vrot.slane %v874_v54, 7  ;;  %v872_v3 = vmax.f32 %v808_v57, 0.0  ;;  %v2289_v11 = vshll.u32 %v15380_v48, 16  ;;  %13587 = vmatprep.subr.bf16.mxu0 %v14549_v34  ;;  %v15454_v54 = vld [vmem:[%s18271_s5] ss:$0 sm:$0xff] }
 0x15b   :  { %v2279_v5 = vor.u32 %v2277_v51, %v2275_v62  ;;  %v2283_v17 = vrot.slane %v2281_v55, 1  ;;  %v2285_v18 = vshrl.u32 %v15374_v42, 16  ;;  %v2276_v21 = vsel %vm2176_vm1, %v2271_v4, %v2275_v62  ;;  %13588 = vmatpush3.bf16.msra.mxu0 %v14549_v34  ;;  %v15464_v55 = vld [vmem:[#allocation2 + $0x98] sm:$0xff]   ;;  %v15493_v34 = vld [vmem:[#allocation2 + $0xa8] sm:$0xff]  }
 0x15c   :  { %v15398_v7 = vpop.f32.mrf.mxu0  ;;  %12471 = vst [vmem:[#allocation2 + $0xb0] sm:$0xff] %v12324_v38   ;;  %v1019_v8 = vsel %vm971_vm0, %v1017_v39, %v1018_v60  ;;  %v1211_v9 = vsel %vm971_vm0, %v1018_v60, 0.0  ;;  %v1015_v10 = vrot.slane %v872_v3, 7  ;;  %v2293_v23 = vshrl.u32 %v15380_v48, 16 }
 0x15d   :  { %v12172_v2 = vpack.c.bf16 %v1211_v9, %v1211_v9  ;;  %v12334_v12 = vpack.c.bf16 %v1019_v8, %v1179_v58  ;;  %v2297_v24 = vshll.u32 %v15396_v6, 16  ;;  %v2284_v27 = vsel %vm2176_vm1, %v2279_v5, %v2283_v17 }
 0x15e   :  { %v15403_v13 = vpop.f32.mrf.mxu0  ;;  %v1016_v14 = vsel %vm971_vm0, %v1014_v37, %v1015_v10  ;;  %v1210_v16 = vsel %vm971_vm0, %v1015_v10, 0.0  ;;  %v2291_v28 = vrot.slane %v2289_v11, 1  ;;  %v742_v22 = vmul.f32 %v15362_v25, %v15195_v61  ;;  %v15474_v10 = vld [vmem:[#allocation2 + $0xd0] sm:$0xff]   ;;  %v14551_v11 = vld [vmem:[#allocation8 + $0xf0] sm:$0xff]  }
 0x15f   :  { %12473 = vst [vmem:[#allocation2 + $0xc0] sm:$0xff] %v12334_v12   ;;  %1521 = vst [vmem:[#allocation2 + $0xc8] sm:$0xf] %v12172_v2  ;;  %v12329_v20 = vpack.c.bf16 %v1210_v16, %v1016_v14  ;;  %v740_v30 = vmul.f32 %v15195_v61, %v15367_v32  ;;  %v743_v31 = vmul.f32 %v15376_v43, %v15195_v61  ;;  %v2301_v26 = vshrl.u32 %v15396_v6, 16 }
 0x160   :  { %v15413_v15 = vpop.f32.mrf.mxu0  ;;  %13252 = vmatmul.mubr.bf16.gmra.mxu1 %v2276_v21  ;;  %13384 = vmatmul.mubr.bf16.gmra.mxu0 %v15396_v6  ;;  %v2287_v35 = vor.u32 %v2285_v18, %v2283_v17  ;;  %v2305_v25 = vshll.u32 %v15408_v19, 16  ;;  %v813_v36 = vadd.f32 %v15200_v63, %v742_v22  ;;  %v2295_v39 = vor.u32 %v2293_v23, %v2291_v28  ;;  %v14553_v17 = vld [vmem:[#allocation8 + $0xe8] sm:$0xff]  }
 0x161   :  { %12472 = vst [vmem:[#allocation2 + $0xb8] sm:$0xff] %v12329_v20   ;;  %13255 = vmatprep.mubr.bf16.mxu1 %v2284_v27  ;;  %13387 = vmatprep.mubr.bf16.mxu0 %v15408_v19  ;;  %v2299_v40 = vrot.slane %v2297_v24, 1  ;;  %v811_v41 = vadd.f32 %v15200_v63, %v740_v30  ;;  %v814_v42 = vadd.f32 %v15200_v63, %v743_v31  ;;  %v2313_v43 = vshll.u32 %v15417_v29, 16 }
 0x162   :  { %v15428_v33 = vpop.f32.mrf.mxu0  ;;  %v2292_v61 = vsel %vm2176_vm1, %v2287_v35, %v2291_v28  ;;  %v877_v44 = vmax.f32 %v813_v36, 0.0  ;;  %v741_v46 = vmul.f32 %v15442_v45, %v15385_v52  ;;  %v2309_v47 = vshrl.u32 %v15408_v19, 16  ;;  %13589 = vmatprep.subr.bf16.mxu0 %v14551_v11  ;;  %v15498_v36 = vld [vmem:[#allocation2 + $0xa0] sm:$0xff]  }
 0x163   :  { %v875_v63 = vmax.f32 %v811_v41, 0.0  ;;  %v878_v48 = vmax.f32 %v814_v42, 0.0  ;;  %v2321_v37 = vshll.u32 %v15422_v56, 16  ;;  %v2307_v50 = vrot.slane %v2305_v25, 1  ;;  %13590 = vmatpush3.bf16.msra.mxu0 %v14551_v11  ;;  %v15500_v41 = vld [vmem:[#allocation2 + $0xb0] sm:$0xff]  }
 0x164   :  { %v15435_v32 = vpop.f32.mrf.mxu0  ;;  %v1023_v51 = vrot.slane %v877_v44, 7  ;;  %v2317_v53 = vshrl.u32 %v15417_v29, 16  ;;  %v812_v52 = vadd.f32 %v15454_v54, %v741_v46  ;;  %v2300_v57 = vsel %vm2176_vm1, %v2295_v39, %v2299_v40  ;;  %13591 = vmatprep.subr.bf16.mxu0 %v14553_v17 }
 0x165   :  { %v1020_v58 = vrot.slane %v875_v63, 7  ;;  %v1024_v59 = vrot.slane %v878_v48, 7  ;;  %v746_v62 = vmul.f32 %v15442_v45, %v15393_v0  ;;  %v2303_v38 = vor.u32 %v2301_v26, %v2299_v40 }
 0x166   :  { %v15448_v49 = vpop.f32.mrf.mxu0  ;;  %v2315_v60 = vrot.slane %v2313_v43, 1  ;;  %v1181_v3 = vsel %vm971_vm0, 0.0, %v1023_v51  ;;  %v876_v4 = vmax.f32 %v812_v52, 0.0  ;;  %v15469_v0 = vrot.slane %v2321_v37, 1 }
 0x167   :  { %v1180_v5 = vsel %vm971_vm0, 0.0, %v1020_v58  ;;  %v1025_v6 = vsel %vm971_vm0, %v1023_v51, %v1024_v59  ;;  %v817_v8 = vadd.f32 %v15454_v54, %v746_v62  ;;  %v2311_v2 = vor.u32 %v2309_v47, %v2307_v50  ;;  %v14555_v51 = vld [vmem:[#allocation8 + $0xe0] sm:$0xff]   ;;  %13592 = vmatpush3.bf16.msra.mxu0 %v14553_v17 }
 0x168   :  { %v15460_v1 = vpop.f32.mrf.mxu0  ;;  %13256 = vmatmul.mubr.bf16.gmra.mxu1 %v2292_v61  ;;  %13388 = vmatmul.mubr.bf16.gmra.mxu0 %v15417_v29  ;;  %v12173_v12 = vpack.c.bf16 %v1180_v5, %v1180_v5  ;;  %v12344_v14 = vpack.c.bf16 %v1025_v6, %v1181_v3  ;;  %v1021_v16 = vrot.slane %v876_v4, 7  ;;  %v2325_v18 = vshrl.u32 %v15422_v56, 16 }
 0x169   :  { %13259 = vmatprep.mubr.bf16.mxu1 %v2300_v57  ;;  %13391 = vmatprep.mubr.bf16.mxu0 %v15422_v56  ;;  %v881_v19 = vmax.f32 %v817_v8, 0.0  ;;  %v744_v20 = vmul.f32 %v15442_v45, %v15398_v7  ;;  %v747_v21 = vmul.f32 %v15442_v45, %v15403_v13  ;;  %v2329_v28 = vshll.u32 %v15464_v55, 16 }
 0x16a   :  { %v15472_v9 = vpop.f32.mrf.mxu0  ;;  %1704 = vst [vmem:[#allocation2 + $0xe4] sm:$0xf] %v12173_v12  ;;  %12475 = vst [vmem:[#allocation2 + $0xf0] sm:$0xff] %v12344_v14   ;;  %v1022_v24 = vsel %vm971_vm0, %v1020_v58, %v1021_v16  ;;  %v1212_v27 = vsel %vm971_vm0, %v1021_v16, 0.0  ;;  %v745_v29 = vmul.f32 %v15442_v45, %v15413_v15  ;;  %v2308_v31 = vsel %vm2176_vm1, %v2303_v38, %v2307_v50 }
 0x16b   :  { %v12339_v22 = vpack.c.bf16 %v1212_v27, %v1022_v24  ;;  %v1029_v7 = vrot.slane %v881_v19, 7  ;;  %v815_v56 = vadd.f32 %v15454_v54, %v744_v20  ;;  %v818_v13 = vadd.f32 %v15454_v54, %v747_v21  ;;  %13593 = vmatprep.subr.bf16.mxu0 %v14555_v51 }
 0x16c   :  { %v15481_v23 = vpop.f32.mrf.mxu0  ;;  %v816_v35 = vadd.f32 %v15454_v54, %v745_v29  ;;  %v2385_v26 = vshll.u32 %v15474_v10, 16  ;;  %v2316_v15 = vsel %vm2176_vm1, %v2311_v2, %v2315_v60  ;;  %v2319_v25 = vor.u32 %v2317_v53, %v2315_v60  ;;  %v14556_v53 = vld [vmem:[#allocation8 + $0x80] sm:$0xff]   ;;  %13594 = vmatpush3.bf16.msra.mxu0 %v14555_v51 }
 0x16d   :  { %12474 = vst [vmem:[#allocation2 + $0xe8] sm:$0xff] %v12339_v22   ;;  %v879_v39 = vmax.f32 %v815_v56, 0.0  ;;  %v882_v40 = vmax.f32 %v818_v13, 0.0  ;;  %v2327_v61 = vor.u32 %v2325_v18, %v15469_v0  ;;  %v2331_v43 = vrot.slane %v2329_v28, 1  ;;  %13477 = vmatprep.subr.bf16.mxu1 %v14556_v53  ;;  %v15538_v28 = vld [vmem:[#allocation2 + $0xb8] sm:$0xff]   ;;  %v14560_v13 = vld [vmem:[#allocation8 + $0xd0] sm:$0xff]  }
 0x16e   :  { %v15490_v30 = vpop.f32.mrf.mxu0  ;;  %v880_v44 = vmax.f32 %v816_v35, 0.0  ;;  %v750_v46 = vmul.f32 %v15442_v45, %v15428_v33  ;;  %v1213_v47 = vsel %vm971_vm0, %v1024_v59, 0.0  ;;  %v1183_v63 = vsel %vm971_vm0, 0.0, %v1029_v7  ;;  %13478 = vmatpush3.bf16.msra.mxu1 %v14556_v53  ;;  %v15561_v53 = vld [vmem:[#allocation2 + $0xc0] sm:$0xff]  }
 0x16f   :  { %v1026_v48 = vrot.slane %v879_v39, 7  ;;  %v1030_v37 = vrot.slane %v882_v40, 7  ;;  %v2333_v52 = vshrl.u32 %v15464_v55, 16  ;;  %v748_v33 = vmul.f32 %v15442_v45, %v15435_v32 }
 0x170   :  { %v15502_v42 = vpop.f32.mrf.mxu0  ;;  %13260 = vmatmul.mubr.bf16.gmra.mxu1 %v2308_v31  ;;  %13392 = vmatmul.mubr.bf16.gmra.mxu0 %v15464_v55  ;;  %v1027_v57 = vrot.slane %v880_v44, 7  ;;  %v821_v58 = vadd.f32 %v15454_v54, %v750_v46  ;;  %v2337_v38 = vshll.u32 %v15498_v36, 16  ;;  %v2345_v60 = vshll.u32 %v15493_v34, 16  ;;  %v14558_v55 = vld [vmem:[#allocation8 + $0xd8] sm:$0xff]  }
 0x171   :  { %13263 = vmatprep.mubr.bf16.mxu1 %v2316_v15  ;;  %13395 = vmatprep.mubr.bf16.mxu0 %v15498_v36  ;;  %v1182_v59 = vsel %vm971_vm0, 0.0, %v1026_v48  ;;  %v1031_v62 = vsel %vm971_vm0, %v1029_v7, %v1030_v37  ;;  %v2353_v2 = vshll.u32 %v15500_v41, 16  ;;  %v2324_v12 = vsel %vm2176_vm1, %v2319_v25, %v15469_v0 }
 0x172   :  { %v15511_v50 = vpop.f32.mrf.mxu0  ;;  %v12349_v4 = vpack.c.bf16 %v1182_v59, %v1213_v47  ;;  %v12359_v5 = vpack.c.bf16 %v1031_v62, %v1183_v63  ;;  %v1028_v6 = vsel %vm971_vm0, %v1026_v48, %v1027_v57  ;;  %v1214_v32 = vsel %vm971_vm0, %v1027_v57, 0.0  ;;  %13595 = vmatprep.subr.bf16.mxu0 %v14558_v55 }
 0x173   :  { %v12354_v8 = vpack.c.bf16 %v1214_v32, %v1028_v6  ;;  %v885_v11 = vmax.f32 %v821_v58, 0.0  ;;  %v2341_v14 = vshrl.u32 %v15498_v36, 16  ;;  %v819_v16 = vadd.f32 %v15454_v54, %v748_v33  ;;  %13596 = vmatpush3.bf16.msra.mxu0 %v14558_v55 }
 0x174   :  { %v15521_v3 = vpop.f32.mrf.mxu0  ;;  %12476 = vst [vmem:[#allocation2 + $0xf8] sm:$0xff] %v12349_v4   ;;  %12478 = vst [vmem:[#allocation2 + $0x108] sm:$0xff] %v12359_v5   ;;  %v751_v17 = vmul.f32 %v15442_v45, %v15448_v49  ;;  %v2332_v19 = vsel %vm2176_vm1, %v2327_v61, %v2331_v43  ;;  %v2335_v20 = vor.u32 %v2333_v52, %v2331_v43  ;;  %v2339_v24 = vrot.slane %v2337_v38, 1  ;;  %v14562_v4 = vld [vmem:[#allocation8 + $0xc8] sm:$0xff]  }
 0x175   :  { %12477 = vst [vmem:[#allocation2 + $0x100] sm:$0xff] %v12354_v8   ;;  %v1035_v21 = vrot.slane %v885_v11, 7  ;;  %v749_v0 = vmul.f32 %v15442_v45, %v15460_v1  ;;  %v2347_v27 = vrot.slane %v2345_v60, 1  ;;  %v883_v49 = vmax.f32 %v819_v16, 0.0  ;;  %13597 = vmatprep.subr.bf16.mxu0 %v14560_v13 }
 0x176   :  { %v15532_v18 = vpop.f32.mrf.mxu0  ;;  %v822_v29 = vadd.f32 %v15454_v54, %v751_v17  ;;  %v1215_v22 = vsel %vm971_vm0, %v1030_v37, 0.0  ;;  %v2349_v7 = vshrl.u32 %v15493_v34, 16  ;;  %v2355_v56 = vrot.slane %v2353_v2, 1 }
 0x177   :  { %v820_v1 = vadd.f32 %v15454_v54, %v749_v0  ;;  %v2343_v31 = vor.u32 %v2341_v14, %v2339_v24  ;;  %v1032_v35 = vrot.slane %v883_v49, 7  ;;  %v1185_v36 = vsel %vm971_vm0, 0.0, %v1035_v21  ;;  %13598 = vmatpush3.bf16.msra.mxu0 %v14560_v13 }
 0x178   :  { %13264 = vmatmul.mubr.bf16.gmra.mxu1 %v2324_v12  ;;  %13396 = vmatmul.mubr.bf16.gmra.mxu0 %v15493_v34  ;;  %v886_v15 = vmax.f32 %v822_v29, 0.0  ;;  %v15545_v25 = vpop.f32.mrf.mxu0  ;;  %v2357_v39 = vshrl.u32 %v15500_v41, 16  ;;  %v754_v61 = vmul.f32 %v15442_v45, %v15472_v9  ;;  %v752_v44 = vmul.f32 %v15442_v45, %v15481_v23 }
 0x179   :  { %13267 = vmatprep.mubr.bf16.mxu1 %v2332_v19  ;;  %13399 = vmatprep.mubr.bf16.mxu0 %v15500_v41  ;;  %v884_v40 = vmax.f32 %v820_v1, 0.0  ;;  %v1184_v34 = vsel %vm971_vm0, 0.0, %v1032_v35  ;;  %v755_v46 = vmul.f32 %v15442_v45, %v15490_v30  ;;  %v2340_v63 = vsel %vm2176_vm1, %v2335_v20, %v2339_v24 }
 0x17a   :  { %v1036_v43 = vrot.slane %v886_v15, 7  ;;  %v15556_v47 = vpop.f32.mrf.mxu0  ;;  %v12364_v48 = vpack.c.bf16 %v1184_v34, %v1215_v22  ;;  %v2361_v41 = vshll.u32 %v15538_v28, 16  ;;  %v2348_v9 = vsel %vm2176_vm1, %v2343_v31, %v2347_v27  ;;  %13599 = vmatprep.subr.bf16.mxu0 %v14562_v4 }
 0x17b   :  { %v1033_v37 = vrot.slane %v884_v40, 7  ;;  %v2351_v51 = vor.u32 %v2349_v7, %v2347_v27  ;;  %v825_v23 = vadd.f32 %v15454_v54, %v754_v61  ;;  %v823_v33 = vadd.f32 %v15454_v54, %v752_v44  ;;  %13600 = vmatpush3.bf16.msra.mxu0 %v14562_v4  ;;  %v15601_v44 = vld [vmem:[#allocation2 + $0xd8] sm:$0xff]  }
 0x17c   :  { %v1037_v52 = vsel %vm971_vm0, %v1035_v21, %v1036_v43  ;;  %12479 = vst [vmem:[#allocation2 + $0x110] sm:$0xff] %v12364_v48   ;;  %v2359_v59 = vor.u32 %v2357_v39, %v2355_v56  ;;  %v826_v60 = vadd.f32 %v15454_v54, %v755_v46  ;;  %v15570_v55 = vpop.f32.mrf.mxu0  ;;  %v2363_v5 = vrot.slane %v2361_v41, 1  ;;  %v15584_v21 = vld [vmem:[#allocation2 + $0xc8] sm:$0xff]  }
 0x17d   :  { %v12374_v30 = vpack.c.bf16 %v1037_v52, %v1185_v36  ;;  %v1034_v57 = vsel %vm971_vm0, %v1032_v35, %v1033_v37  ;;  %v1216_v58 = vsel %vm971_vm0, %v1033_v37, 0.0  ;;  %v889_v38 = vmax.f32 %v825_v23, 0.0 }
 0x17e   :  { %v12369_v62 = vpack.c.bf16 %v1216_v58, %v1034_v57  ;;  %v887_v6 = vmax.f32 %v823_v33, 0.0  ;;  %v753_v32 = vmul.f32 %v15442_v45, %v15502_v42  ;;  %v758_v8 = vmul.f32 %v15442_v45, %v15511_v50  ;;  %v14564_v42 = vld [vmem:[#allocation8 + $0xc0] sm:$0xff]  }
 0x17f   :  { %12481 = vst [vmem:[#allocation2 + $0x120] sm:$0xff] %v12374_v30   ;;  %v2369_v11 = vshll.u32 %v15561_v53, 16  ;;  %v1041_v2 = vrot.slane %v889_v38, 7  ;;  %v890_v12 = vmax.f32 %v826_v60, 0.0  ;;  %v756_v14 = vmul.f32 %v15442_v45, %v15521_v3  ;;  %v13206_v3 = vpop.f32.mrf.mxu0  ;;  %13601 = vmatprep.subr.bf16.mxu0 %v14564_v42  ;;  %v15615_v38 = vld [vmem:[#allocation2 + $0xe0] sm:$0xff]  }
 0x180   :  { %13268 = vmatmul.mubr.bf16.gmra.mxu1 %v2340_v63  ;;  %13400 = vmatmul.mubr.bf16.gmra.mxu0 %v15538_v28  ;;  %12480 = vst [vmem:[#allocation2 + $0x118] sm:$0xff] %v12369_v62   ;;  %v1217_v16 = vsel %vm971_vm0, %v1036_v43, 0.0  ;;  %v1038_v17 = vrot.slane %v887_v6, 7  ;;  %v824_v19 = vadd.f32 %v15454_v54, %v753_v32  ;;  %v829_v20 = vadd.f32 %v15454_v54, %v758_v8 }
 0x181   :  { %13271 = vmatprep.mubr.bf16.mxu1 %v2348_v9  ;;  %13403 = vmatprep.mubr.bf16.mxu0 %v15561_v53  ;;  %v2356_v50 = vsel %vm2176_vm1, %v2351_v51, %v2355_v56  ;;  %v1187_v0 = vsel %vm971_vm0, 0.0, %v1041_v2  ;;  %v1042_v24 = vrot.slane %v890_v12, 7  ;;  %v827_v27 = vadd.f32 %v15454_v54, %v756_v14  ;;  %v657_v43 = vpop.f32.mrf.mxu0 }
 0x182   :  { %v2365_v49 = vshrl.u32 %v15538_v28, 16  ;;  %v1186_v29 = vsel %vm971_vm0, 0.0, %v1038_v17  ;;  %v888_v22 = vmax.f32 %v824_v19, 0.0  ;;  %v893_v7 = vmax.f32 %v829_v20, 0.0  ;;  %13602 = vmatpush3.bf16.msra.mxu0 %v14564_v42  ;;  %v14569_v20 = vld [vmem:[#allocation8 + $0x138] sm:$0xff]  }
 0x183   :  { %v2364_v1 = vsel %vm2176_vm1, %v2359_v59, %v2363_v5  ;;  %v2373_v13 = vshrl.u32 %v15561_v53, 16  ;;  %v12379_v56 = vpack.c.bf16 %v1186_v29, %v1217_v16  ;;  %v1043_v31 = vsel %vm971_vm0, %v1041_v2, %v1042_v24  ;;  %v13209_v9 = vpop.f32.mrf.mxu0  ;;  %13711 = vmatprep.subr.bf16.mxu1 %v14569_v20 }
 0x184   :  { %v2371_v35 = vrot.slane %v2369_v11, 1  ;;  %v12389_v15 = vpack.c.bf16 %v1043_v31, %v1187_v0  ;;  %v1039_v36 = vrot.slane %v888_v22, 7  ;;  %v891_v39 = vmax.f32 %v827_v27, 0.0 }
 0x185   :  { %v2377_v28 = vshll.u32 %v15584_v21, 16  ;;  %12482 = vst [vmem:[#allocation2 + $0x128] sm:$0xff] %v12379_v56   ;;  %v1219_v40 = vsel %vm971_vm0, %v1042_v24, 0.0  ;;  %v759_v61 = vmul.f32 %v15442_v45, %v15532_v18  ;;  %v757_v34 = vmul.f32 %v15442_v45, %v15545_v25  ;;  %v670_v6 = vpop.f32.mrf.mxu0  ;;  %v14527_v56 = vld [vmem:[#allocation2 + $0xe8] sm:$0xff]  }
 0x186   :  { %12484 = vst [vmem:[#allocation2 + $0x138] sm:$0xff] %v12389_v15   ;;  %v1040_v46 = vsel %vm971_vm0, %v1038_v17, %v1039_v36  ;;  %v1218_v63 = vsel %vm971_vm0, %v1039_v36, 0.0  ;;  %v1047_v48 = vrot.slane %v893_v7, 7  ;;  %v1044_v41 = vrot.slane %v891_v39, 7 }
 0x187   :  { %v15607_v37 = vrot.slane %v2385_v26, 1  ;;  %v12384_v18 = vpack.c.bf16 %v1218_v63, %v1040_v46  ;;  %v830_v25 = vadd.f32 %v15454_v54, %v759_v61  ;;  %v2367_v51 = vor.u32 %v2365_v49, %v2363_v5  ;;  %v13210_v24 = vpop.f32.mrf.mxu0 }
 0x188   :  { %13272 = vmatmul.mubr.bf16.gmra.mxu1 %v2356_v50  ;;  %13404 = vmatmul.mubr.bf16.gmra.mxu0 %v15584_v21  ;;  %v2375_v53 = vor.u32 %v2373_v13, %v2371_v35  ;;  %v1188_v52 = vsel %vm971_vm0, 0.0, %v1044_v41  ;;  %v828_v23 = vadd.f32 %v15454_v54, %v757_v34  ;;  %v2389_v30 = vshrl.u32 %v15474_v10, 16 }
 0x189   :  { %13275 = vmatprep.mubr.bf16.mxu1 %v2364_v1  ;;  %13407 = vmatprep.mubr.bf16.mxu0 %v15474_v10  ;;  %12483 = vst [vmem:[#allocation2 + $0x130] sm:$0xff] %v12384_v18   ;;  %v12394_v57 = vpack.c.bf16 %v1188_v52, %v1219_v40  ;;  %v894_v58 = vmax.f32 %v830_v25, 0.0  ;;  %v2379_v33 = vrot.slane %v2377_v28, 1  ;;  %v1189_v59 = vsel %vm971_vm0, 0.0, %v1047_v48  ;;  %v673_v61 = vpop.f32.mrf.mxu0 }
 0x18a   :  { %v2393_v26 = vshll.u32 %v15601_v44, 16  ;;  %v892_v62 = vmax.f32 %v828_v23, 0.0  ;;  %v762_v4 = vmul.f32 %v15442_v45, %v15556_v47  ;;  %v760_v5 = vmul.f32 %v15442_v45, %v15570_v55 }
 0x18b   :  { %12485 = vst [vmem:[#allocation2 + $0x140] sm:$0xff] %v12394_v57   ;;  %v1048_v60 = vrot.slane %v894_v58, 7  ;;  %v763_v10 = vmul.f32 %v15442_v45, %v13206_v3  ;;  %v2372_v32 = vsel %vm2176_vm1, %v2367_v51, %v2371_v35  ;;  %v2380_v8 = vsel %vm2176_vm1, %v2375_v53, %v2379_v33  ;;  %v13213_v25 = vpop.f32.mrf.mxu0 }
 0x18c   :  { %v2381_v11 = vshrl.u32 %v15584_v21, 16  ;;  %v1045_v2 = vrot.slane %v892_v62, 7  ;;  %v833_v47 = vadd.f32 %v15454_v54, %v762_v4  ;;  %v831_v14 = vadd.f32 %v15454_v54, %v760_v5 }
 0x18d   :  { %v1049_v12 = vsel %vm971_vm0, %v1047_v48, %v1048_v60  ;;  %v2391_v55 = vor.u32 %v2389_v30, %v15607_v37  ;;  %v834_v0 = vadd.f32 %v15454_v54, %v763_v10  ;;  %v2395_v3 = vrot.slane %v2393_v26, 1  ;;  %v15649_v30 = vld [vmem:[#allocation2 + $0xf8] sm:$0xff]  }
 0x18e   :  { %v12404_v16 = vpack.c.bf16 %v1049_v12, %v1189_v59  ;;  %v1046_v17 = vsel %vm971_vm0, %v1044_v41, %v1045_v2  ;;  %v1220_v19 = vsel %vm971_vm0, %v1045_v2, 0.0  ;;  %v897_v50 = vmax.f32 %v833_v47, 0.0 }
 0x18f   :  { %v12399_v42 = vpack.c.bf16 %v1220_v19, %v1046_v17  ;;  %v895_v21 = vmax.f32 %v831_v14, 0.0  ;;  %v2383_v27 = vor.u32 %v2381_v11, %v2379_v33  ;;  %v2401_v49 = vshll.u32 %v15615_v38, 16 }
 0x190   :  { %13276 = vmatmul.mubr.bf16.gmra.mxu1 %v2372_v32  ;;  %13408 = vmatmul.mubr.bf16.gmra.mxu0 %v15601_v44  ;;  %12487 = vst [vmem:[#allocation2 + $0x150] sm:$0xff] %v12404_v16   ;;  %v761_v29 = vmul.f32 %v15442_v45, %v657_v43  ;;  %v1221_v22 = vsel %vm971_vm0, %v1048_v60, 0.0  ;;  %v1053_v7 = vrot.slane %v897_v50, 7  ;;  %v898_v13 = vmax.f32 %v834_v0, 0.0  ;;  %v14528_v43 = vld [vmem:[#allocation2 + $0xf0] sm:$0xff]   ;;  %v686_v60 = vpop.f32.mrf.mxu0 }
 0x191   :  { %13279 = vmatprep.mubr.bf16.mxu1 %v2380_v8  ;;  %13411 = vmatprep.mubr.bf16.mxu0 %v15615_v38  ;;  %12486 = vst [vmem:[#allocation2 + $0x148] sm:$0xff] %v12399_v42   ;;  %v1050_v1 = vrot.slane %v895_v21, 7  ;;  %v2397_v31 = vshrl.u32 %v15601_v44, 16  ;;  %v766_v15 = vmul.f32 %v15442_v45, %v13209_v9  ;;  %v2396_v36 = vsel %vm2176_vm1, %v2391_v55, %v2395_v3 }
 0x192   :  { %v832_v35 = vadd.f32 %v15454_v54, %v761_v29  ;;  %v1191_v39 = vsel %vm971_vm0, 0.0, %v1053_v7  ;;  %v1054_v40 = vrot.slane %v898_v13, 7  ;;  %v2388_v34 = vsel %vm2176_vm1, %v2383_v27, %v15607_v37  ;;  %v13214_v42 = vpop.f32.mrf.mxu0 }
 0x193   :  { %v1190_v28 = vsel %vm971_vm0, 0.0, %v1050_v1  ;;  %v2403_v44 = vrot.slane %v2401_v49, 1  ;;  %v2405_v48 = vshrl.u32 %v15615_v38, 16  ;;  %v837_v18 = vadd.f32 %v15454_v54, %v766_v15 }
 0x194   :  { %v12409_v46 = vpack.c.bf16 %v1190_v28, %v1221_v22  ;;  %v896_v63 = vmax.f32 %v832_v35, 0.0  ;;  %v1055_v41 = vsel %vm971_vm0, %v1053_v7, %v1054_v40  ;;  %v2409_v9 = vshll.u32 %v14527_v56, 16 }
 0x195   :  { %v12419_v51 = vpack.c.bf16 %v1055_v41, %v1191_v39  ;;  %v901_v37 = vmax.f32 %v837_v18, 0.0  ;;  %v764_v52 = vmul.f32 %v15442_v45, %v670_v6  ;;  %v2399_v23 = vor.u32 %v2397_v31, %v2395_v3  ;;  %v15656_v6 = vld [vmem:[#allocation2 + $0x100] sm:$0xff]   ;;  %v689_v39 = vpop.f32.mrf.mxu0  ;;  %v15683_v18 = vld [vmem:[#allocation2 + $0x110] sm:$0xff]  }
 0x196   :  { %12488 = vst [vmem:[#allocation2 + $0x158] sm:$0xff] %v12409_v46   ;;  %v1051_v53 = vrot.slane %v896_v63, 7  ;;  %v2417_v57 = vshll.u32 %v14528_v43, 16  ;;  %v2407_v59 = vor.u32 %v2405_v48, %v2403_v44  ;;  %v767_v38 = vmul.f32 %v15442_v45, %v13210_v24 }
 0x197   :  { %12490 = vst [vmem:[#allocation2 + $0x168] sm:$0xff] %v12419_v51   ;;  %v835_v62 = vadd.f32 %v15454_v54, %v764_v52  ;;  %v2411_v4 = vrot.slane %v2409_v9, 1  ;;  %v2413_v5 = vshrl.u32 %v14527_v56, 16  ;;  %v765_v10 = vmul.f32 %v15442_v45, %v673_v61 }
 0x198   :  { %13280 = vmatmul.mubr.bf16.gmra.mxu1 %v2388_v34  ;;  %13412 = vmatmul.mubr.bf16.gmra.mxu0 %v14527_v56  ;;  %v1052_v58 = vsel %vm971_vm0, %v1050_v1, %v1051_v53  ;;  %v1222_v33 = vsel %vm971_vm0, %v1051_v53, 0.0  ;;  %v2421_v32 = vshrl.u32 %v14528_v43, 16  ;;  %v1059_v8 = vrot.slane %v901_v37, 7  ;;  %v15671_v56 = vld [vmem:[#allocation2 + $0x108] sm:$0xff]  }
 0x199   :  { %13283 = vmatprep.mubr.bf16.mxu1 %v2396_v36  ;;  %13415 = vmatprep.mubr.bf16.mxu0 %v14528_v43  ;;  %v12414_v26 = vpack.c.bf16 %v1222_v33, %v1052_v58  ;;  %v899_v11 = vmax.f32 %v835_v62, 0.0  ;;  %v838_v2 = vadd.f32 %v15454_v54, %v767_v38  ;;  %v2404_v12 = vsel %vm2176_vm1, %v2399_v23, %v2403_v44 }
 0x19a   :  { %v2419_v47 = vrot.slane %v2417_v57, 1  ;;  %v2425_v14 = vshll.u32 %v15649_v30, 16  ;;  %v836_v55 = vadd.f32 %v15454_v54, %v765_v10  ;;  %v2412_v16 = vsel %vm2176_vm1, %v2407_v59, %v2411_v4 }
 0x19b   :  { %12489 = vst [vmem:[#allocation2 + $0x160] sm:$0xff] %v12414_v26   ;;  %v1223_v17 = vsel %vm971_vm0, %v1054_v40, 0.0  ;;  %v1056_v19 = vrot.slane %v899_v11, 7  ;;  %v902_v20 = vmax.f32 %v838_v2, 0.0  ;;  %v2415_v50 = vor.u32 %v2413_v5, %v2411_v4  ;;  %v15694_v26 = vld [vmem:[#allocation2 + $0x118] sm:$0xff]  }
 0x19c   :  { %v900_v21 = vmax.f32 %v836_v55, 0.0  ;;  %v770_v0 = vmul.f32 %v15442_v45, %v13213_v25  ;;  %v768_v24 = vmul.f32 %v15442_v45, %v686_v60  ;;  %v1193_v27 = vsel %vm971_vm0, 0.0, %v1059_v8 }
 0x19d   :  { %v1192_v3 = vsel %vm971_vm0, 0.0, %v1056_v19  ;;  %v1060_v49 = vrot.slane %v902_v20, 7  ;;  %v771_v29 = vmul.f32 %v15442_v45, %v13214_v42  ;;  %v2423_v22 = vor.u32 %v2421_v32, %v2419_v47 }
 0x19e   :  { %v2427_v7 = vrot.slane %v2425_v14, 1  ;;  %v12424_v1 = vpack.c.bf16 %v1192_v3, %v1223_v17  ;;  %v1057_v13 = vrot.slane %v900_v21, 7  ;;  %v2429_v31 = vshrl.u32 %v15649_v30, 16 }
 0x19f   :  { %v1061_v35 = vsel %vm971_vm0, %v1059_v8, %v1060_v49  ;;  %v841_v15 = vadd.f32 %v15454_v54, %v770_v0  ;;  %v839_v36 = vadd.f32 %v15454_v54, %v768_v24  ;;  %v2433_v28 = vshll.u32 %v15656_v6, 16 }
 0x1a0   :  { %13284 = vmatmul.mubr.bf16.gmra.mxu1 %v2404_v12  ;;  %13416 = vmatmul.mubr.bf16.gmra.mxu0 %v15649_v30  ;;  %12491 = vst [vmem:[#allocation2 + $0x170] sm:$0xff] %v12424_v1   ;;  %v12434_v40 = vpack.c.bf16 %v1061_v35, %v1193_v27  ;;  %v1058_v61 = vsel %vm971_vm0, %v1056_v19, %v1057_v13  ;;  %v1224_v34 = vsel %vm971_vm0, %v1057_v13, 0.0  ;;  %v2437_v25 = vshrl.u32 %v15656_v6, 16  ;;  %v15711_v27 = vld [vmem:[#allocation2 + $0x128] sm:$0xff]  }
 0x1a1   :  { %13287 = vmatprep.mubr.bf16.mxu1 %v2412_v16  ;;  %13419 = vmatprep.mubr.bf16.mxu0 %v15656_v6  ;;  %v12429_v43 = vpack.c.bf16 %v1224_v34, %v1058_v61  ;;  %v905_v46 = vmax.f32 %v841_v15, 0.0  ;;  %v903_v63 = vmax.f32 %v839_v36, 0.0  ;;  %v842_v44 = vadd.f32 %v15454_v54, %v771_v29  ;;  %v15715_v29 = vld [vmem:[#allocation2 + $0x130] sm:$0xff]   ;;  %v15722_v36 = vld [vmem:[#allocation2 + $0x138] sm:$0xff]   ;;  %v15727_v61 = vld [vmem:[#allocation2 + $0x140] sm:$0xff]  }
 0x1a2   :  { %v2420_v48 = vsel %vm2176_vm1, %v2415_v50, %v2419_v47  ;;  %v2428_v41 = vsel %vm2176_vm1, %v2423_v22, %v2427_v7  ;;  %12493 = vst [vmem:[#allocation2 + $0x180] sm:$0xff] %v12434_v40   ;;  %v769_v9 = vmul.f32 %v15442_v45, %v689_v39  ;;  %v1225_v51 = vsel %vm971_vm0, %v1060_v49, 0.0  ;;  %v15701_v47 = vld [vmem:[#allocation2 + $0x120] sm:$0xff]  }
 0x1a3   :  { %12492 = vst [vmem:[#allocation2 + $0x178] sm:$0xff] %v12429_v43   ;;  %v1065_v53 = vrot.slane %v905_v46, 7  ;;  %v1062_v37 = vrot.slane %v903_v63, 7  ;;  %v906_v52 = vmax.f32 %v842_v44, 0.0  ;;  %v2431_v23 = vor.u32 %v2429_v31, %v2427_v7 }
 0x1a4   :  { %v2441_v30 = vshll.u32 %v15671_v56, 16  ;;  %v840_v57 = vadd.f32 %v15454_v54, %v769_v9  ;;  %v2435_v58 = vrot.slane %v2433_v28, 1  ;;  %v2449_v4 = vshll.u32 %v15683_v18, 16 }
 0x1a5   :  { %v1195_v45 = vsel %vm971_vm0, 0.0, %v1065_v53  ;;  %v1194_v33 = vsel %vm971_vm0, 0.0, %v1062_v37  ;;  %v1066_v59 = vrot.slane %v906_v52, 7  ;;  %v2445_v12 = vshrl.u32 %v15671_v56, 16 }
 0x1a6   :  { %v12439_v62 = vpack.c.bf16 %v1194_v33, %v1225_v51  ;;  %v904_v38 = vmax.f32 %v840_v57, 0.0  ;;  %v2439_v60 = vor.u32 %v2437_v25, %v2435_v58  ;;  %v2436_v11 = vsel %vm2176_vm1, %v2431_v23, %v2435_v58  ;;  %v15735_v25 = vld [vmem:[#allocation2 + $0x148] sm:$0xff]   ;;  %v15737_v51 = vld [vmem:[#allocation2 + $0x150] sm:$0xff]  }
 0x1a7   :  { %v1067_v5 = vsel %vm971_vm0, %v1065_v53, %v1066_v59  ;;  %v1227_v10 = vsel %vm971_vm0, %v1066_v59, 0.0  ;;  %v2443_v2 = vrot.slane %v2441_v30, 1  ;;  %v2453_v14 = vshrl.u32 %v15683_v18, 16 }
 0x1a8   :  { %13288 = vmatmul.mubr.bf16.gmra.mxu1 %v2420_v48  ;;  %13420 = vmatmul.mubr.bf16.gmra.mxu0 %v15671_v56  ;;  %12494 = vst [vmem:[#allocation2 + $0x188] sm:$0xff] %v12439_v62   ;;  %v12220_v32 = vpack.c.bf16 %v1227_v10, %v1227_v10  ;;  %v12449_v54 = vpack.c.bf16 %v1067_v5, %v1195_v45  ;;  %v1063_v8 = vrot.slane %v904_v38, 7  ;;  %v2451_v19 = vrot.slane %v2449_v4, 1  ;;  %v14543_v62 = vld [vmem:[#allocation2 + $0x158] sm:$0xff]   ;;  %v15749_v4 = vld [vmem:[#allocation2 + $0x160] sm:$0xff]  }
 0x1a9   :  { %13291 = vmatprep.mubr.bf16.mxu1 %v2428_v41  ;;  %13423 = vmatprep.mubr.bf16.mxu0 %v15683_v18  ;;  %v2444_v17 = vsel %vm2176_vm1, %v2439_v60, %v2443_v2  ;;  %v2457_v20 = vshll.u32 %v15694_v26, 16  ;;  %v2447_v50 = vor.u32 %v2445_v12, %v2443_v2  ;;  %v2465_v24 = vshll.u32 %v15701_v47, 16 }
 0x1aa   :  { %12496 = vst [vmem:[#allocation2 + $0x198] sm:$0xff] %v12449_v54   ;;  %1751 = vst [vmem:[#allocation2 + $0x1a0] sm:$0xf] %v12220_v32  ;;  %v1064_v55 = vsel %vm971_vm0, %v1062_v37, %v1063_v8  ;;  %v1226_v16 = vsel %vm971_vm0, %v1063_v8, 0.0  ;;  %v2455_v21 = vor.u32 %v2453_v14, %v2451_v19  ;;  %v2461_v49 = vshrl.u32 %v15694_v26, 16 }
 0x1ab   :  { %v12444_v42 = vpack.c.bf16 %v1226_v16, %v1064_v55  ;;  %v2459_v0 = vrot.slane %v2457_v20, 1  ;;  %v2452_v3 = vsel %vm2176_vm1, %v2447_v50, %v2451_v19  ;;  %v2467_v7 = vrot.slane %v2465_v24, 1 }
 0x1ac   :  { %v2469_v1 = vshrl.u32 %v15701_v47, 16  ;;  %v2473_v13 = vshll.u32 %v15711_v27, 16  ;;  %v2481_v39 = vshll.u32 %v15715_v29, 16  ;;  %v2477_v40 = vshrl.u32 %v15711_v27, 16 }
 0x1ad   :  { %12495 = vst [vmem:[#allocation2 + $0x190] sm:$0xff] %v12444_v42   ;;  %v2460_v22 = vsel %vm2176_vm1, %v2455_v21, %v2459_v0  ;;  %v2463_v31 = vor.u32 %v2461_v49, %v2459_v0  ;;  %v2485_v43 = vshrl.u32 %v15715_v29, 16  ;;  %v2489_v63 = vshll.u32 %v15722_v36, 16 }
 0x1ae   :  { %v2471_v35 = vor.u32 %v2469_v1, %v2467_v7  ;;  %v2475_v15 = vrot.slane %v2473_v13, 1  ;;  %v2483_v46 = vrot.slane %v2481_v39, 1  ;;  %v2497_v48 = vshll.u32 %v15727_v61, 16  ;;  %v14547_v13 = vld [vmem:[#allocation2 + $0x170] sm:$0xff]  }
 0x1af   :  { %v2468_v28 = vsel %vm2176_vm1, %v2463_v31, %v2467_v7  ;;  %v2491_v9 = vrot.slane %v2489_v63, 1  ;;  %v2493_v37 = vshrl.u32 %v15722_v36, 16  ;;  %v2501_v30 = vshrl.u32 %v15727_v61, 16 }
 0x1b0   :  { %13292 = vmatmul.mubr.bf16.gmra.mxu1 %v2436_v11  ;;  %13424 = vmatmul.mubr.bf16.gmra.mxu0 %v15694_v26  ;;  %v2476_v34 = vsel %vm2176_vm1, %v2471_v35, %v2475_v15  ;;  %v2479_v44 = vor.u32 %v2477_v40, %v2475_v15  ;;  %v2487_v41 = vor.u32 %v2485_v43, %v2483_v46  ;;  %v2499_v52 = vrot.slane %v2497_v48, 1 }
 0x1b1   :  { %13295 = vmatprep.mubr.bf16.mxu1 %v2444_v17  ;;  %13427 = vmatprep.mubr.bf16.mxu0 %v15701_v47  ;;  %v2505_v57 = vshll.u32 %v15735_v25, 16  ;;  %v2495_v58 = vor.u32 %v2493_v37, %v2491_v9  ;;  %v2513_v59 = vshll.u32 %v15737_v51, 16  ;;  %v2509_v38 = vshrl.u32 %v15735_v25, 16 }
 0x1b2   :  { %v2484_v53 = vsel %vm2176_vm1, %v2479_v44, %v2483_v46  ;;  %v2492_v23 = vsel %vm2176_vm1, %v2487_v41, %v2491_v9  ;;  %v2503_v45 = vor.u32 %v2501_v30, %v2499_v52  ;;  %v2517_v5 = vshrl.u32 %v15737_v51, 16  ;;  %v15808_v44 = vld [vmem:[#allocation2 + $0x178] sm:$0xff]  }
 0x1b3   :  { %v2507_v33 = vrot.slane %v2505_v57, 1  ;;  %v2500_v60 = vsel %vm2176_vm1, %v2495_v58, %v2499_v52  ;;  %v18278_v10 = vrot.slane %v15656_v6, 1  ;;  %v3746_v32 = vrot.slane %v15671_v56, 1 }
 0x1b4   :  { %v2515_v8 = vrot.slane %v2513_v59, 1  ;;  %v3748_v11 = vrot.slane %v15683_v18, 1  ;;  %v2521_v12 = vshll.u32 %v14543_v62, 16  ;;  %v3750_v55 = vrot.slane %v15694_v26, 1 }
 0x1b5   :  { %v2508_v54 = vsel %vm2176_vm1, %v2503_v45, %v2507_v33  ;;  %v2511_v2 = vor.u32 %v2509_v38, %v2507_v33  ;;  %v15760_v14 = vsel %vm3680_vm2, %v18278_v10, %v3746_v32  ;;  %v3752_v16 = vrot.slane %v15701_v47, 1  ;;  %v14552_v38 = vld [vmem:[#allocation2 + $0x188] sm:$0xff]  }
 0x1b6   :  { %v15764_v56 = vsel %vm3680_vm2, %v3746_v32, %v3748_v11  ;;  %v3754_v17 = vrot.slane %v15711_v27, 1  ;;  %v3756_v18 = vrot.slane %v15715_v29, 1  ;;  %v15770_v19 = vsel %vm3680_vm2, %v3748_v11, %v3750_v55 }
 0x1b7   :  { %v3758_v20 = vrot.slane %v15722_v36, 1  ;;  %v3760_v42 = vrot.slane %v15727_v61, 1  ;;  %v3762_v50 = vrot.slane %v15735_v25, 1  ;;  %v2519_v21 = vor.u32 %v2517_v5, %v2515_v8  ;;  %v15817_v5 = vld [vmem:[#allocation2 + $0x190] sm:$0xff]  }
 0x1b8   :  { %13296 = vmatmul.mubr.bf16.gmra.mxu1 %v2452_v3  ;;  %13428 = vmatmul.mubr.bf16.gmra.mxu0 %v15711_v27  ;;  %v15776_v26 = vsel %vm3680_vm2, %v3750_v55, %v3752_v16  ;;  %v15779_v0 = vsel %vm3680_vm2, %v3752_v16, %v3754_v17  ;;  %v15782_v47 = vsel %vm3680_vm2, %v3754_v17, %v3756_v18  ;;  %v2523_v49 = vrot.slane %v2521_v12, 1 }
 0x1b9   :  { %13299 = vmatprep.mubr.bf16.mxu1 %v2460_v22  ;;  %13431 = vmatprep.mubr.bf16.mxu0 %v15715_v29  ;;  %v15785_v24 = vsel %vm3680_vm2, %v3756_v18, %v3758_v20  ;;  %v15788_v27 = vsel %vm3680_vm2, %v3758_v20, %v3760_v42  ;;  %v15791_v3 = vsel %vm3680_vm2, %v3760_v42, %v3762_v50  ;;  %v14546_v29 = vld [vmem:[#allocation2 + $0x168] sm:$0xff]   ;;  %v2529_v22 = vshll.u32 %v15749_v4, 16 }
 0x1ba   :  { %v2516_v7 = vsel %vm2176_vm1, %v2511_v2, %v2515_v8  ;;  %v2525_v1 = vshrl.u32 %v14543_v62, 16  ;;  %v2524_v31 = vsel %vm2176_vm1, %v2519_v21, %v2523_v49  ;;  %v2533_v35 = vshrl.u32 %v15749_v4, 16 }
 0x1bb   :  { %v3764_v15 = vrot.slane %v15737_v51, 1  ;;  %v3768_v39 = vrot.slane %v15749_v4, 1  ;;  %v2537_v40 = vshll.u32 %v14546_v29, 16  ;;  %v2545_v48 = vshll.u32 %v14547_v13, 16 }
 0x1bc   :  { %v2541_v9 = vshrl.u32 %v14546_v29, 16  ;;  %v3770_v33 = vrot.slane %v14546_v29, 1  ;;  %v3772_v59 = vrot.slane %v14547_v13, 1  ;;  %v2569_v16 = vshll.u32 %v14552_v38, 16 }
 0x1bd   :  { %v2539_v41 = vrot.slane %v2537_v40, 1  ;;  %v2547_v52 = vrot.slane %v2545_v48, 1 }
 0x1be   :  { %v15820_v32 = vsel %vm3680_vm2, %v3768_v39, %v3770_v33 }
 0x1bf   :  { %v2543_v30 = vor.u32 %v2541_v9, %v2539_v41 }
 0x1c0   :  { %13300 = vmatmul.mubr.bf16.gmra.mxu1 %v2468_v28  ;;  %13432 = vmatmul.mubr.bf16.gmra.mxu0 %v15722_v36  ;;  %v3766_v36 = vrot.slane %v14543_v62, 1  ;;  %v2531_v28 = vrot.slane %v2529_v22, 1 }
 0x1c1   :  { %13303 = vmatprep.mubr.bf16.mxu1 %v2476_v34  ;;  %13435 = vmatprep.mubr.bf16.mxu0 %v15727_v61  ;;  %v2527_v61 = vor.u32 %v2525_v1, %v2523_v49  ;;  %v15800_v34 = vsel %vm3680_vm2, %v3762_v50, %v3764_v15  ;;  %v2571_v50 = vrot.slane %v2569_v16, 1  ;;  %v14557_v49 = vld [vmem:[#allocation2 + $0x198] sm:$0xff]   ;;  %v14559_v1 = vld [vmem:[#allocation2 + $0x1a0] sm:$0xff]  }
 0x1c2   :  { %v15803_v43 = vsel %vm3680_vm2, %v3764_v15, %v3766_v36  ;;  %v15806_v46 = vsel %vm3680_vm2, %v3766_v36, %v3768_v39  ;;  %v2535_v63 = vor.u32 %v2533_v35, %v2531_v28  ;;  %v2581_v35 = vshrl.u32 %v15817_v5, 16 }
 0x1c3   :  { %v3778_v36 = vrot.slane %v14552_v38, 1  ;;  %v18277_v39 = vrot.slane %v15817_v5, 1  ;;  %v2585_v40 = vshll.u32 %v14557_v49, 16 }
 0x1c4   :  { %v2540_v37 = vsel %vm2176_vm1, %v2535_v63, %v2539_v41 }
 0x1c5   :  { %v15844_v41 = vsel %vm3680_vm2, %v3778_v36, %v18277_v39  ;;  %v14883_v39 = vld [vmem:[#allocation2 + $0x78] sm:$0xff]  }
 0x1c6   :  { %v3710_v10 = vrot.slane %v14883_v39, 1 }
 0x1c8   :  { %13304 = vmatmul.mubr.bf16.gmra.mxu1 %v2484_v53  ;;  %13436 = vmatmul.mubr.bf16.gmra.mxu0 %v15735_v25  ;;  %v2532_v25 = vsel %vm2176_vm1, %v2527_v61, %v2531_v28  ;;  %v2549_v53 = vshrl.u32 %v14547_v13, 16 }
 0x1c9   :  { %13307 = vmatprep.mubr.bf16.mxu1 %v2492_v23  ;;  %13439 = vmatprep.mubr.bf16.mxu0 %v15737_v51  ;;  %v14550_v51 = vld [vmem:[#allocation2 + $0x180] sm:$0xff]   ;;  %v2553_v23 = vshll.u32 %v15808_v44, 16 }
 0x1ca   :  { %v2551_v57 = vor.u32 %v2549_v53, %v2547_v52  ;;  %v2561_v45 = vshll.u32 %v14550_v51, 16  ;;  %v2565_v55 = vshrl.u32 %v14550_v51, 16  ;;  %v3776_v15 = vrot.slane %v14550_v51, 1 }
 0x1cb   :  { %v2555_v58 = vrot.slane %v2553_v23, 1  ;;  %v2593_v53 = vshll.u32 %v14559_v1, 16 }
 0x1cc   :  { %v2563_v12 = vrot.slane %v2561_v45, 1  ;;  %v15839_v48 = vsel %vm3680_vm2, %v3776_v15, %v3778_v36  ;;  %v2597_v45 = vshrl.u32 %v14559_v1, 16  ;;  %v14867_v36 = vld [vmem:[#allocation2 + $0x4] sm:$0xf] }
 0x1cd   :  { %v2556_v11 = vsel %vm2176_vm1, %v2551_v57, %v2555_v58 }
 0x1ce   :  { %v2567_v20 = vor.u32 %v2565_v55, %v2563_v12 }
 0x1d0   :  { %13308 = vmatmul.mubr.bf16.gmra.mxu1 %v2500_v60  ;;  %13440 = vmatmul.mubr.bf16.gmra.mxu0 %v14543_v62  ;;  %v3774_v62 = vrot.slane %v15808_v44, 1  ;;  %v2557_v60 = vshrl.u32 %v15808_v44, 16 }
 0x1d1   :  { %13311 = vmatprep.mubr.bf16.mxu1 %v2508_v54  ;;  %13443 = vmatprep.mubr.bf16.mxu0 %v15749_v4  ;;  %v2548_v4 = vsel %vm2176_vm1, %v2543_v30, %v2547_v52  ;;  %v15823_v54 = vsel %vm3680_vm2, %v3770_v33, %v3772_v59  ;;  %v2587_v52 = vrot.slane %v2585_v40, 1  ;;  %v14563_v30 = vld [vmem:[#allocation2 + $0xc] sm:$0xff]  }
 0x1d2   :  { %v15826_v8 = vsel %vm3680_vm2, %v3772_v59, %v3774_v62  ;;  %v2559_v18 = vor.u32 %v2557_v60, %v2555_v58  ;;  %v2589_v58 = vshrl.u32 %v14557_v49, 16  ;;  %v14566_v33 = vld [vmem:[#allocation2 + $0x1b0] ss:$0 sps:$4 sm:$0x11]   ;;  %v2595_v60 = vrot.slane %v2593_v53, 1 }
 0x1d4   :  { %v2564_v22 = vsel %vm2176_vm1, %v2559_v18, %v2563_v12  ;;  %v2591_v16 = vor.u32 %v2589_v58, %v2587_v52 }
 0x1d8   :  { %13312 = vmatmul.mubr.bf16.gmra.mxu1 %v2516_v7  ;;  %13444 = vmatmul.mubr.bf16.gmra.mxu0 %v14546_v29  ;;  %v2577_v29 = vshll.u32 %v15817_v5, 16  ;;  %v2573_v7 = vshrl.u32 %v14552_v38, 16 }
 0x1d9   :  { %13315 = vmatprep.mubr.bf16.mxu1 %v2524_v31  ;;  %13447 = vmatprep.mubr.bf16.mxu0 %v14547_v13  ;;  %v2572_v13 = vsel %vm2176_vm1, %v2567_v20, %v2571_v50  ;;  %v2599_v20 = vor.u32 %v2597_v45, %v2595_v60 }
 0x1da   :  { %v2579_v28 = vrot.slane %v2577_v29, 1  ;;  %v2575_v63 = vor.u32 %v2573_v7, %v2571_v50  ;;  %v3659_v29 = vld [vmem:[#allocation2] sm:$0xe] }
 0x1dc   :  { %v2580_v57 = vsel %vm2176_vm1, %v2575_v63, %v2579_v28 }
 0x1e0   :  { %13316 = vmatmul.mubr.bf16.gmra.mxu1 %v2532_v25  ;;  %13448 = vmatmul.mubr.bf16.gmra.mxu0 %v15808_v44  ;;  %v15836_v44 = vsel %vm3680_vm2, %v3774_v62, %v3776_v15  ;;  %v2583_v25 = vor.u32 %v2581_v35, %v2579_v28  ;;  %v14565_v35 = vld [vmem:[#allocation2 + $0x14] sm:$0xff]   ;;  %v14567_v15 = vld [vmem:[#allocation2 + $0x1c] sm:$0xff]   ;;  %v11836_v28 = vcombine.low %v3659_v29, %v14867_v36  ;;  %v14577_v36 = vld [vmem:[#allocation8 + $0x130] sm:$0xff]  }
 0x1e1   :  { %13319 = vmatprep.mubr.bf16.mxu1 %v2540_v37  ;;  %13451 = vmatprep.mubr.bf16.mxu0 %v14550_v51  ;;  %v14561_v51 = vld [vmem:[#allocation2 + $0x1a8] sm:$0xff]  }
 0x1e2   :  { %v2588_v59 = vsel %vm2176_vm1, %v2583_v25, %v2587_v52  ;;  %v2605_v7 = vshrl.u32 %v14561_v51, 16 }
 0x1e8   :  { %13320 = vmatmul.mubr.bf16.gmra.mxu1 %v2548_v4  ;;  %v13357_v2 = vpop.f32.mrf.mxu0  ;;  %13452 = vmatmul.mubr.bf16.gmra.mxu0 %v14552_v38  ;;  %v2601_v4 = vshll.u32 %v14561_v51, 16 }
 0x1e9   :  { %13323 = vmatprep.mubr.bf16.mxu1 %v2556_v11  ;;  %13455 = vmatprep.mubr.bf16.mxu0 %v15817_v5 }
 0x1ea   :  { %v3272_v17 = vpop.f32.mrf.mxu0  ;;  %v2603_v50 = vrot.slane %v2601_v4, 1  ;;  %v14570_v4 = vld [vmem:[#allocation2 + $0x2c] sm:$0xff]  }
 0x1ec   :  { %v13358_v42 = vpop.f32.mrf.mxu0 }
 0x1ee   :  { %v3275_v21 = vpop.f32.mrf.mxu0 }
 0x1f0   :  { %13324 = vmatmul.mubr.bf16.gmra.mxu1 %v2564_v22  ;;  %v13361_v31 = vpop.f32.mrf.mxu0  ;;  %13456 = vmatmul.mubr.bf16.gmra.mxu0 %v14557_v49 }
 0x1f1   :  { %13327 = vmatprep.mubr.bf16.mxu1 %v2572_v13  ;;  %13459 = vmatprep.mubr.bf16.mxu0 %v14559_v1  ;;  %v2609_v1 = vshll.u32 %v14566_v33, 16 }
 0x1f2   :  { %v3287_v61 = vpop.f32.mrf.mxu0 }
 0x1f3   :  { %v2611_v53 = vrot.slane %v2609_v1, 1 }
 0x1f4   :  { %v13362_v9 = vpop.f32.mrf.mxu0 }
 0x1f5   :  { %v13233_v37 = vpop.f32.mrf.mxu1 }
 0x1f6   :  { %v3290_v23 = vpop.f32.mrf.mxu0 }
 0x1f7   :  { %v2749_v62 = vpop.f32.mrf.mxu1 }
 0x1f8   :  { %13328 = vmatmul.mubr.bf16.gmra.mxu1 %v2580_v57  ;;  %v13365_v38 = vpop.f32.mrf.mxu0  ;;  %13460 = vmatmul.mubr.bf16.gmra.mxu0 %v14561_v51  ;;  %v15848_v11 = vadd.f32 %v3272_v17, %v2749_v62  ;;  %v2596_v17 = vsel %vm2176_vm1, %v2591_v16, %v2595_v60  ;;  %v14868_v57 = vld [vmem:[#allocation2 + $0x8] sm:$0xff]  }
 0x1f9   :  { %13331 = vmatprep.mubr.bf16.mxu1 %v2588_v59  ;;  %13603 = vmatprep.mubr.bf16.mxu0 %v14563_v30  ;;  %v13234_v2 = vpop.f32.mrf.mxu1  ;;  %v3681_v30 = vrot.slane %v11836_v28, 1  ;;  %v3682_v58 = vrot.slane %v14868_v57, 1  ;;  %v14568_v60 = vld [vmem:[#allocation2 + $0x24] sm:$0xff]  }
 0x1fa   :  { %v3302_v12 = vpop.f32.mrf.mxu0  ;;  %v15850_v55 = vadd.f32 %v13358_v42, %v13234_v2  ;;  %v2604_v42 = vsel %vm2176_vm1, %v2599_v20, %v2603_v50 }
 0x1fb   :  { %v2752_v18 = vpop.f32.mrf.mxu1  ;;  %v3683_v12 = vsel %vm3680_vm2, %v3681_v30, %v3682_v58  ;;  %v14584_v30 = vld [vmem:[#allocation8 + $0x128] sm:$0xff]  }
 0x1fc   :  { %v13366_v49 = vpop.f32.mrf.mxu0  ;;  %v15852_v22 = vadd.f32 %v3275_v21, %v2752_v18  ;;  %v2607_v21 = vor.u32 %v2605_v7, %v2603_v50  ;;  %v14571_v7 = vld [vmem:[#allocation2 + $0x34] sm:$0xff]  }
 0x1fe   :  { %v3304_v13 = vpop.f32.mrf.mxu0  ;;  %v2612_v59 = vsel %vm2176_vm1, %v2607_v21, %v2611_v53  ;;  %v14572_v21 = vld [vmem:[#allocation2 + $0x3c] sm:$0xff]   ;;  %v14871_v53 = vld [vmem:[#allocation8 + $0x138] sm:$0xff]  }
 0x1ff   :  { %v13237_v40 = vpop.f32.mrf.mxu1 }
 0x200   :  { %13332 = vmatmul.mubr.bf16.gmra.mxu1 %v2596_v17  ;;  %v13369_v63 = vpop.f32.mrf.mxu0  ;;  %13604 = vmatmul.mubr.bf16.vlgmr.msra.gmra.mxu0 %v14565_v35  ;;  %v15856_v25 = vadd.f32 %v13361_v31, %v13237_v40  ;;  %v14870_v35 = vld [vmem:[#allocation2 + $0x18] sm:$0xff]  }
 0x201   :  { %13335 = vmatprep.mubr.bf16.mxu1 %v2604_v42  ;;  %13607 = vmatprep.mubr.bf16.mxu0 %v14567_v15  ;;  %v2764_v51 = vpop.f32.mrf.mxu1  ;;  %v3686_v17 = vrot.slane %v14870_v35, 1 }
 0x202   :  { %v3316_v37 = vpop.f32.mrf.mxu0  ;;  %v15858_v52 = vadd.f32 %v3287_v61, %v2764_v51 }
 0x203   :  { %v13238_v23 = vpop.f32.mrf.mxu1 }
 0x204   :  { %v13370_v45 = vpop.f32.mrf.mxu0  ;;  %v15860_v33 = vadd.f32 %v13362_v9, %v13238_v23  ;;  %v14869_v9 = vld [vmem:[#allocation2 + $0x10] sm:$0xff]  }
 0x205   :  { %v2767_v62 = vpop.f32.mrf.mxu1  ;;  %v3684_v50 = vrot.slane %v14869_v9, 1  ;;  %v14573_v9 = vld [vmem:[#allocation2 + $0x44] sm:$0xff]  }
 0x206   :  { %v3319_v31 = vpop.f32.mrf.mxu0  ;;  %v14873_v62 = vld [vmem:[#allocation2 + $0x28] sm:$0xff]  }
 0x207   :  { %v3685_v40 = vsel %vm3680_vm2, %v3682_v58, %v3684_v50  ;;  %v3687_v42 = vsel %vm3680_vm2, %v3684_v50, %v3686_v17  ;;  %v14574_v50 = vld [vmem:[#allocation2 + $0x4c] sm:$0xff]  }
 0x208   :  { %v13241_v2 = vpop.f32.mrf.mxu1  ;;  %13336 = vmatmul.mubr.bf16.gmra.mxu1 %v2612_v59  ;;  %v13373_v16 = vpop.f32.mrf.mxu0  ;;  %13608 = vmatmul.mubr.bf16.gmra.mxu0 %v14568_v60  ;;  %v3690_v60 = vrot.slane %v14873_v62, 1 }
 0x209   :  { %v15864_v61 = vadd.f32 %v13365_v38, %v13241_v2  ;;  %13479 = vmatprep.mubr.bf16.mxu1 %v3683_v12  ;;  %13611 = vmatprep.mubr.bf16.mxu0 %v14570_v4 }
 0x20a   :  { %v2779_v18 = vpop.f32.mrf.mxu1  ;;  %v3331_v20 = vpop.f32.mrf.mxu0 }
 0x20c   :  { %v13242_v49 = vpop.f32.mrf.mxu1  ;;  %v13374_v29 = vpop.f32.mrf.mxu0 }
 0x20e   :  { %v2781_v1 = vpop.f32.mrf.mxu1  ;;  %v3334_v15 = vpop.f32.mrf.mxu0 }
 0x20f   :  { %v15866_v28 = vadd.f32 %v3304_v13, %v2781_v1  ;;  %v14872_v13 = vld [vmem:[#allocation2 + $0x20] sm:$0xff]  }
 0x210   :  { %v13245_v38 = vpop.f32.mrf.mxu1  ;;  %13480 = vmatmul.mubr.bf16.vlgmr.msra.gmra.mxu1 %v3685_v40  ;;  %v13377_v63 = vpop.f32.mrf.mxu0  ;;  %13612 = vmatmul.mubr.bf16.gmra.mxu0 %v14571_v7  ;;  %v3688_v59 = vrot.slane %v14872_v13, 1 }
 0x211   :  { %13712 = vmatpush3.bf16.msra.mxu1 %v14871_v53  ;;  %13483 = vmatprep.mubr.bf16.mxu1 %v3687_v42  ;;  %v14600_v38 = vld [vmem:[#allocation8 + $0x118] sm:$0xff]  }
 0x212   :  { %v2793_v51 = vpop.f32.mrf.mxu1  ;;  %13615 = vmatprep.mubr.bf16.mxu0 %v14572_v21  ;;  %v3346_v23 = vpop.f32.mrf.mxu0  ;;  %13713 = vmatprep.subr.bf16.mxu1 %v14577_v36  ;;  %v3689_v7 = vsel %vm3680_vm2, %v3686_v17, %v3688_v59  ;;  %v3691_v35 = vsel %vm3680_vm2, %v3688_v59, %v3690_v60  ;;  %v14874_v17 = vld [vmem:[#allocation2 + $0x38] sm:$0xff]  }
 0x213   :  { %v15870_v57 = vadd.f32 %v3316_v37, %v2793_v51  ;;  %v14592_v37 = vld [vmem:[#allocation8 + $0x120] sm:$0xff]   ;;  %v3694_v21 = vrot.slane %v14874_v17, 1 }
 0x214   :  { %v13246_v58 = vpop.f32.mrf.mxu1  ;;  %v13378_v4 = vpop.f32.mrf.mxu0  ;;  %v14875_v23 = vld [vmem:[#allocation2 + $0x30] sm:$0xff]  }
 0x215   :  { %v15872_v2 = vadd.f32 %v13370_v45, %v13246_v58  ;;  %13714 = vmatpush3.bf16.msra.mxu1 %v14577_v36  ;;  %v3692_v13 = vrot.slane %v14875_v23, 1  ;;  %v14575_v58 = vld [vmem:[#allocation2 + $0x54] sm:$0xff]   ;;  %v14576_v4 = vld [vmem:[#allocation2 + $0x5c] sm:$0xff]   ;;  %v14578_v23 = vld [vmem:[#allocation2 + $0x64] sm:$0xff]  }
 0x216   :  { %v2796_v12 = vpop.f32.mrf.mxu1  ;;  %v3348_v18 = vpop.f32.mrf.mxu0  ;;  %13715 = vmatprep.subr.bf16.mxu1 %v14584_v30 }
 0x217   :  { %v15874_v49 = vadd.f32 %v3319_v31, %v2796_v12  ;;  %v3693_v62 = vsel %vm3680_vm2, %v3690_v60, %v3692_v13  ;;  %v3695_v12 = vsel %vm3680_vm2, %v3692_v13, %v3694_v21 }
 0x218   :  { %v13249_v1 = vpop.f32.mrf.mxu1  ;;  %13484 = vmatmul.mubr.bf16.gmra.mxu1 %v3689_v7  ;;  %v13381_v15 = vpop.f32.mrf.mxu0  ;;  %13616 = vmatmul.mubr.bf16.gmra.mxu0 %v14573_v9 }
 0x219   :  { %v15878_v40 = vadd.f32 %v13373_v16, %v13249_v1  ;;  %13487 = vmatprep.mubr.bf16.mxu1 %v3691_v35  ;;  %13619 = vmatprep.mubr.bf16.mxu0 %v14574_v50  ;;  %v14876_v1 = vld [vmem:[#allocation2 + $0x40] sm:$0xff]   ;;  %v14877_v35 = vld [vmem:[#allocation2 + $0x48] sm:$0xff]  }
 0x21a   :  { %v2808_v45 = vpop.f32.mrf.mxu1  ;;  %v3360_v36 = vpop.f32.mrf.mxu0  ;;  %13716 = vmatpush3.bf16.msra.mxu1 %v14584_v30  ;;  %v14607_v30 = vld [vmem:[#allocation8 + $0x110] sm:$0xff]   ;;  %v3698_v15 = vrot.slane %v14877_v35, 1 }
 0x21b   :  { %18287 = vst [vmem:[#allocation16_spill] sm:$0xff] %v15878_v40  ;;  %v15880_v42 = vadd.f32 %v3331_v20, %v2808_v45  ;;  %13717 = vmatprep.subr.bf16.mxu1 %v14592_v37 }
 0x21c   :  { %v13250_v31 = vpop.f32.mrf.mxu1  ;;  %v13382_v53 = vpop.f32.mrf.mxu0 }
 0x21d   :  { %18288 = vst [vmem:[#allocation17_spill] sm:$0xff] %v15880_v42  ;;  %v15882_v51 = vadd.f32 %v13374_v29, %v13250_v31 }
 0x21e   :  { %v2811_v59 = vpop.f32.mrf.mxu1  ;;  %v3363_v16 = vpop.f32.mrf.mxu0  ;;  %13718 = vmatpush3.bf16.msra.mxu1 %v14592_v37  ;;  %v3696_v37 = vrot.slane %v14876_v1, 1 }
 0x21f   :  { %18289 = vst [vmem:[#allocation18_spill] sm:$0xff] %v15882_v51  ;;  %13719 = vmatprep.subr.bf16.mxu1 %v14600_v38  ;;  %v14579_v59 = vld [vmem:[#allocation2 + $0x6c] sm:$0xff]  }
 0x220   :  { %v13253_v20 = vpop.f32.mrf.mxu1  ;;  %13488 = vmatmul.mubr.bf16.gmra.mxu1 %v3693_v62  ;;  %v13385_v9 = vpop.f32.mrf.mxu0  ;;  %13620 = vmatmul.mubr.bf16.gmra.mxu0 %v14575_v58 }
 0x221   :  { %v15886_v50 = vadd.f32 %v13377_v63, %v13253_v20  ;;  %13491 = vmatprep.mubr.bf16.mxu1 %v3695_v12  ;;  %13623 = vmatprep.mubr.bf16.mxu0 %v14576_v4  ;;  %v3697_v63 = vsel %vm3680_vm2, %v3694_v21, %v3696_v37 }
 0x222   :  { %v2823_v29 = vpop.f32.mrf.mxu1  ;;  %v3375_v7 = vpop.f32.mrf.mxu0  ;;  %13720 = vmatpush3.bf16.msra.mxu1 %v14600_v38  ;;  %v3699_v38 = vsel %vm3680_vm2, %v3696_v37, %v3698_v15 }
 0x223   :  { %18290 = vst [vmem:[#allocation19_spill] sm:$0xff] %v15886_v50  ;;  %13721 = vmatprep.subr.bf16.mxu1 %v14607_v30  ;;  %v14878_v29 = vld [vmem:[#allocation2 + $0x50] sm:$0xff]  }
 0x224   :  { %v13254_v60 = vpop.f32.mrf.mxu1  ;;  %v13386_v45 = vpop.f32.mrf.mxu0  ;;  %v3700_v1 = vrot.slane %v14878_v29, 1 }
 0x226   :  { %v2825_v31 = vpop.f32.mrf.mxu1  ;;  %v3378_v17 = vpop.f32.mrf.mxu0  ;;  %13722 = vmatpush3.bf16.msra.mxu1 %v14607_v30 }
 0x227   :  { %v15888_v13 = vadd.f32 %v3348_v18, %v2825_v31  ;;  %v14879_v18 = vld [vmem:[#allocation2 + $0x58] sm:$0xff]  }
 0x228   :  { %v13257_v58 = vpop.f32.mrf.mxu1  ;;  %13492 = vmatmul.mubr.bf16.gmra.mxu1 %v3697_v63  ;;  %v13389_v62 = vpop.f32.mrf.mxu0  ;;  %13624 = vmatmul.mubr.bf16.gmra.mxu0 %v14578_v23  ;;  %v3702_v60 = vrot.slane %v14879_v18, 1  ;;  %v14580_v63 = vld [vmem:[#allocation2 + $0x74] sm:$0xff]   ;;  %v3701_v23 = vsel %vm3680_vm2, %v3698_v15, %v3700_v1 }
 0x229   :  { %18291 = vst [vmem:[#allocation20_spill] sm:$0xff] %v15888_v13  ;;  %13495 = vmatprep.mubr.bf16.mxu1 %v3699_v38  ;;  %13627 = vmatprep.mubr.bf16.mxu0 %v14579_v59  ;;  %v14581_v59 = vld [vmem:[#allocation2 + $0x7c] sm:$0xff]  }
 0x22a   :  { %v2837_v4 = vpop.f32.mrf.mxu1  ;;  %v3390_v20 = vpop.f32.mrf.mxu0  ;;  %v14740_v13 = vld [vmem:[#allocation2 + $0xa0] sm:$0xff]  }
 0x22b   :  { %v15892_v12 = vadd.f32 %v3360_v36, %v2837_v4  ;;  %v3703_v36 = vsel %vm3680_vm2, %v3700_v1, %v3702_v60 }
 0x22c   :  { %v13258_v30 = vpop.f32.mrf.mxu1  ;;  %v13390_v35 = vpop.f32.mrf.mxu0 }
 0x22d   :  { %18292 = vst [vmem:[#allocation21_spill] sm:$0xff] %v15892_v12  ;;  %v15894_v21 = vadd.f32 %v13382_v53, %v13258_v30  ;;  %v14616_v53 = vld [vmem:[#allocation8 + $0x108] sm:$0xff]   ;;  %v14881_v35 = vld [vmem:[#allocation2 + $0x68] sm:$0xff]  }
 0x22e   :  { %v2840_v31 = vpop.f32.mrf.mxu1  ;;  %v3392_v17 = vpop.f32.mrf.mxu0  ;;  %13723 = vmatprep.subr.bf16.mxu1 %v14616_v53  ;;  %v14732_v12 = vld [vmem:[#allocation2 + $0x80] sm:$0xff]  }
 0x22f   :  { %18293 = vst [vmem:[#allocation22_spill] sm:$0xff] %v15894_v21  ;;  %v15896_v37 = vadd.f32 %v3363_v16, %v2840_v31  ;;  %v14880_v16 = vld [vmem:[#allocation2 + $0x60] sm:$0xff]   ;;  %v3706_v31 = vrot.slane %v14881_v35, 1  ;;  %13724 = vmatpush3.bf16.msra.mxu1 %v14616_v53 }
 0x230   :  { %v13261_v58 = vpop.f32.mrf.mxu1  ;;  %13496 = vmatmul.mubr.bf16.gmra.mxu1 %v3701_v23  ;;  %v13393_v38 = vpop.f32.mrf.mxu0  ;;  %13628 = vmatmul.mubr.bf16.gmra.mxu0 %v14580_v63  ;;  %v3704_v18 = vrot.slane %v14880_v16, 1 }
 0x231   :  { %18294 = vst [vmem:[#allocation23_spill] sm:$0xff] %v15896_v37  ;;  %v15900_v4 = vadd.f32 %v13385_v9, %v13261_v58  ;;  %13499 = vmatprep.mubr.bf16.mxu1 %v3703_v36  ;;  %13631 = vmatprep.mubr.bf16.mxu0 %v14581_v59  ;;  %v14582_v58 = vld [vmem:[#allocation2 + $0x84] sm:$0xff]   ;;  %v14583_v36 = vld [vmem:[#allocation2 + $0x8c] sm:$0xff]  }
 0x232   :  { %v2852_v20 = vpop.f32.mrf.mxu1  ;;  %v3404_v29 = vpop.f32.mrf.mxu0  ;;  %v3705_v59 = vsel %vm3680_vm2, %v3702_v60, %v3704_v18  ;;  %v14897_v37 = vld [vmem:[#allocation2 + $0xe8] sm:$0xff]  }
 0x233   :  { %18295 = vst [vmem:[#allocation24_spill] sm:$0xff] %v15900_v4  ;;  %v15902_v30 = vadd.f32 %v3375_v7, %v2852_v20  ;;  %v3707_v7 = vsel %vm3680_vm2, %v3704_v18, %v3706_v31  ;;  %v14585_v4 = vld [vmem:[#allocation2 + $0x94] sm:$0xff]  }
 0x234   :  { %v13262_v15 = vpop.f32.mrf.mxu1  ;;  %v13394_v23 = vpop.f32.mrf.mxu0 }
 0x235   :  { %18296 = vst [vmem:[#allocation25_spill] sm:$0xff] %v15902_v30  ;;  %v15904_v1 = vadd.f32 %v13386_v45, %v13262_v15  ;;  %v14882_v45 = vld [vmem:[#allocation2 + $0x70] sm:$0xff]  }
 0x236   :  { %v2855_v63 = vpop.f32.mrf.mxu1  ;;  %v3407_v9 = vpop.f32.mrf.mxu0  ;;  %v3708_v15 = vrot.slane %v14882_v45, 1 }
 0x237   :  { %18297 = vst [vmem:[#allocation26_spill] sm:$0xff] %v15904_v1 }
 0x238   :  { %v13265_v38 = vpop.f32.mrf.mxu1  ;;  %13500 = vmatmul.mubr.bf16.gmra.mxu1 %v3705_v59  ;;  %v13397_v20 = vpop.f32.mrf.mxu0  ;;  %13632 = vmatmul.mubr.bf16.gmra.mxu0 %v14582_v58  ;;  %v3709_v18 = vsel %vm3680_vm2, %v3706_v31, %v3708_v15  ;;  %v14586_v58 = vld [vmem:[#allocation2 + $0x9c] sm:$0xff]   ;;  %v14622_v31 = vld [vmem:[#allocation8 + $0x170] sm:$0xff]  }
 0x239   :  { %v15908_v16 = vadd.f32 %v13389_v62, %v13265_v38  ;;  %13503 = vmatprep.mubr.bf16.mxu1 %v3707_v7  ;;  %13635 = vmatprep.mubr.bf16.mxu0 %v14583_v36  ;;  %v14620_v62 = vld [vmem:[#allocation8 + $0x178] sm:$0xff]   ;;  %v3711_v36 = vsel %vm3680_vm2, %v3708_v15, %v3710_v10 }
 0x23a   :  { %v2867_v35 = vpop.f32.mrf.mxu1  ;;  %v3419_v53 = vpop.f32.mrf.mxu0  ;;  %13835 = vmatprep.subr.bf16.mxu0 %v14620_v62 }
 0x23b   :  { %18298 = vst [vmem:[#allocation27_spill] sm:$0xff] %v15908_v16  ;;  %13836 = vmatpush3.bf16.msra.mxu0 %v14620_v62  ;;  %v14598_v16 = vld [vmem:[#allocation2 + $0xf4] sm:$0xff]  }
 0x23c   :  { %v13266_v63 = vpop.f32.mrf.mxu1  ;;  %v13398_v1 = vpop.f32.mrf.mxu0  ;;  %13837 = vmatprep.subr.bf16.mxu0 %v14622_v31 }
 0x23e   :  { %v2869_v60 = vpop.f32.mrf.mxu1  ;;  %v3422_v30 = vpop.f32.mrf.mxu0 }
 0x23f   :  { %v15910_v59 = vadd.f32 %v3392_v17, %v2869_v60  ;;  %v14884_v17 = vld [vmem:[#allocation2 + $0x80] sm:$0xff]   ;;  %v14885_v60 = vld [vmem:[#allocation2 + $0x88] sm:$0xff]   ;;  %13838 = vmatpush3.bf16.msra.mxu0 %v14622_v31 }
 0x240   :  { %v13269_v38 = vpop.f32.mrf.mxu1  ;;  %13504 = vmatmul.mubr.bf16.gmra.mxu1 %v3709_v18  ;;  %v15914_v7 = vpop.f32.mrf.mxu0  ;;  %13636 = vmatmul.mubr.bf16.gmra.mxu0 %v14585_v4  ;;  %v3712_v45 = vrot.slane %v14884_v17, 1 }
 0x241   :  { %18299 = vst [vmem:[#allocation28_spill] sm:$0xff] %v15910_v59  ;;  %13507 = vmatprep.mubr.bf16.mxu1 %v3711_v36  ;;  %13639 = vmatprep.mubr.bf16.mxu0 %v14586_v58  ;;  %v3714_v38 = vrot.slane %v14885_v60, 1  ;;  %v14587_v58 = vld [vmem:[#allocation2 + $0xa4] sm:$0xff]   ;;  %v14624_v36 = vld [vmem:[#allocation8 + $0x168] sm:$0xff]  }
 0x242   :  { %v2881_v39 = vpop.f32.mrf.mxu1  ;;  %v3434_v35 = vpop.f32.mrf.mxu0  ;;  %13839 = vmatprep.subr.bf16.mxu0 %v14624_v36 }
 0x243   :  { %v15916_v30 = vadd.f32 %v3404_v29, %v2881_v39  ;;  %v3713_v29 = vsel %vm3680_vm2, %v3710_v10, %v3712_v45  ;;  %v14588_v39 = vld [vmem:[#allocation2 + $0xac] sm:$0xff]   ;;  %v3715_v17 = vsel %vm3680_vm2, %v3712_v45, %v3714_v38  ;;  %13840 = vmatpush3.bf16.msra.mxu0 %v14624_v36  ;;  %v14627_v45 = vld [vmem:[#allocation8 + $0x100] sm:$0xff]  }
 0x244   :  { %v13270_v63 = vpop.f32.mrf.mxu1  ;;  %v13402_v18 = vpop.f32.mrf.mxu0  ;;  %13725 = vmatprep.subr.bf16.mxu1 %v14627_v45 }
 0x245   :  { %18300 = vst [vmem:[#allocation29_spill] sm:$0xff] %v15916_v30  ;;  %v15918_v59 = vadd.f32 %v13394_v23, %v13270_v63  ;;  %13726 = vmatpush3.bf16.msra.mxu1 %v14627_v45  ;;  %v14889_v45 = vld [vmem:[#allocation2 + $0xa8] sm:$0xff]  }
 0x246   :  { %v2884_v15 = vpop.f32.mrf.mxu1  ;;  %v15920_v4 = vpop.f32.mrf.mxu0 }
 0x247   :  { %18301 = vst [vmem:[#allocation30_spill] sm:$0xff] %v15918_v59  ;;  %v15922_v35 = vadd.f32 %v3407_v9, %v2884_v15  ;;  %v14626_v59 = vld [vmem:[#allocation8 + $0x160] sm:$0xff]  }
 0x248   :  { %v13273_v62 = vpop.f32.mrf.mxu1  ;;  %13508 = vmatmul.mubr.bf16.gmra.mxu1 %v3713_v29  ;;  %v13405_v60 = vpop.f32.mrf.mxu0  ;;  %13640 = vmatmul.mubr.bf16.gmra.mxu0 %v14587_v58  ;;  %v14886_v15 = vld [vmem:[#allocation2 + $0x90] sm:$0xff]  }
 0x249   :  { %18302 = vst [vmem:[#allocation31_spill] sm:$0xff] %v15922_v35  ;;  %v15926_v23 = vadd.f32 %v13397_v20, %v13273_v62  ;;  %13511 = vmatprep.mubr.bf16.mxu1 %v3715_v17  ;;  %13643 = vmatprep.mubr.bf16.mxu0 %v14588_v39  ;;  %v3716_v10 = vrot.slane %v14886_v15, 1  ;;  %v14887_v35 = vld [vmem:[#allocation2 + $0x98] sm:$0xff]   ;;  %v14629_v17 = vld [vmem:[#allocation8 + $0x158] sm:$0xff]   ;;  %v14888_v15 = vld [vmem:[#allocation2 + $0xa0] sm:$0xff]  }
 0x24a   :  { %v2896_v63 = vpop.f32.mrf.mxu1  ;;  %v3448_v18 = vpop.f32.mrf.mxu0  ;;  %v3718_v29 = vrot.slane %v14887_v35, 1  ;;  %13841 = vmatprep.subr.bf16.mxu0 %v14626_v59  ;;  %v14589_v39 = vld [vmem:[#allocation2 + $0xb4] sm:$0xff]  }
 0x24b   :  { %18303 = vst [vmem:[#allocation32_spill] sm:$0xff] %v15926_v23  ;;  %v15928_v9 = vadd.f32 %v3419_v53, %v2896_v63  ;;  %v3717_v60 = vsel %vm3680_vm2, %v3714_v38, %v3716_v10  ;;  %v14590_v53 = vld [vmem:[#allocation2 + $0xbc] sm:$0xff]   ;;  %13842 = vmatpush3.bf16.msra.mxu0 %v14626_v59  ;;  %v14630_v38 = vld [vmem:[#allocation8 + $0x150] sm:$0xff]  }
 0x24c   :  { %v13274_v31 = vpop.f32.mrf.mxu1  ;;  %v13406_v30 = vpop.f32.mrf.mxu0  ;;  %v3719_v36 = vsel %vm3680_vm2, %v3716_v10, %v3718_v29  ;;  %13843 = vmatprep.subr.bf16.mxu0 %v14629_v17  ;;  %v14596_v23 = vld [vmem:[#allocation2 + $0xe4] sm:$0xff]  }
 0x24d   :  { %18304 = vst [vmem:[#allocation33_spill] sm:$0xff] %v15928_v9  ;;  %v15930_v58 = vadd.f32 %v13398_v1, %v13274_v31  ;;  %v3720_v31 = vrot.slane %v14888_v15, 1 }
 0x24e   :  { %v2899_v20 = vpop.f32.mrf.mxu1  ;;  %v3450_v62 = vpop.f32.mrf.mxu0 }
 0x24f   :  { %18305 = vst [vmem:[#allocation34_spill] sm:$0xff] %v15930_v58  ;;  %13844 = vmatpush3.bf16.msra.mxu0 %v14629_v17  ;;  %v3722_v20 = vrot.slane %v14889_v45, 1  ;;  %v14591_v58 = vld [vmem:[#allocation2 + $0xc4] sm:$0xff]  }
 0x250   :  { %v13277_v63 = vpop.f32.mrf.mxu1  ;;  %13512 = vmatmul.mubr.bf16.gmra.mxu1 %v3717_v60  ;;  %v13409_v35 = vpop.f32.mrf.mxu0  ;;  %13644 = vmatmul.mubr.bf16.gmra.mxu0 %v14589_v39  ;;  %v14593_v60 = vld [vmem:[#allocation2 + $0xcc] sm:$0xff]  }
 0x251   :  { %v15935_v30 = vadd.f32 %v15914_v7, %v13277_v63  ;;  %13515 = vmatprep.mubr.bf16.mxu1 %v3719_v36  ;;  %13647 = vmatprep.mubr.bf16.mxu0 %v14590_v53  ;;  %v3721_v53 = vsel %vm3680_vm2, %v3718_v29, %v3720_v31  ;;  %v14633_v63 = vld [vmem:[#allocation8 + $0x148] sm:$0xff]   ;;  %v3723_v17 = vsel %vm3680_vm2, %v3720_v31, %v3722_v20 }
 0x252   :  { %v2911_v1 = vpop.f32.mrf.mxu1  ;;  %v3460_v18 = vpop.f32.mrf.mxu0  ;;  %13845 = vmatprep.subr.bf16.mxu0 %v14630_v38 }
 0x253   :  { %18306 = vst [vmem:[#allocation35_spill] sm:$0xff] %v15935_v30  ;;  %13846 = vmatpush3.bf16.msra.mxu0 %v14630_v38 }
 0x254   :  { %v13278_v59 = vpop.f32.mrf.mxu1  ;;  %v13410_v62 = vpop.f32.mrf.mxu0  ;;  %13847 = vmatprep.subr.bf16.mxu0 %v14633_v63 }
 0x255   :  { %v14890_v59 = vld [vmem:[#allocation2 + $0xb0] sm:$0xff]  }
 0x256   :  { %v2913_v10 = vpop.f32.mrf.mxu1  ;;  %v3462_v39 = vpop.f32.mrf.mxu0  ;;  %v3724_v45 = vrot.slane %v14890_v59, 1 }
 0x257   :  { %v15938_v7 = vadd.f32 %v15920_v4, %v2913_v10  ;;  %13848 = vmatpush3.bf16.msra.mxu0 %v14633_v63  ;;  %v14637_v4 = vld [vmem:[#allocation8 + $0x140] sm:$0xff]  }
 0x258   :  { %v13281_v36 = vpop.f32.mrf.mxu1  ;;  %13516 = vmatmul.mubr.bf16.gmra.mxu1 %v3721_v53  ;;  %v13413_v1 = vpop.f32.mrf.mxu0  ;;  %13648 = vmatmul.mubr.bf16.gmra.mxu0 %v14591_v58  ;;  %v14891_v39 = vld [vmem:[#allocation2 + $0xb8] sm:$0xff]   ;;  %v3725_v58 = vsel %vm3680_vm2, %v3722_v20, %v3724_v45 }
 0x259   :  { %18307 = vst [vmem:[#allocation36_spill] sm:$0xff] %v15938_v7  ;;  %13519 = vmatprep.mubr.bf16.mxu1 %v3723_v17  ;;  %13651 = vmatprep.mubr.bf16.mxu0 %v14593_v60  ;;  %v3726_v29 = vrot.slane %v14891_v39, 1  ;;  %v14594_v7 = vld [vmem:[#allocation2 + $0xd4] sm:$0xff]   ;;  %v14595_v36 = vld [vmem:[#allocation2 + $0xdc] sm:$0xff]  }
 0x25a   :  { %v2925_v18 = vpop.f32.mrf.mxu1  ;;  %v3474_v15 = vpop.f32.mrf.mxu0  ;;  %13849 = vmatprep.subr.bf16.mxu0 %v14637_v4 }
 0x25b   :  { %13850 = vmatpush3.bf16.msra.mxu0 %v14637_v4  ;;  %v3727_v17 = vsel %vm3680_vm2, %v3724_v45, %v3726_v29  ;;  %v14597_v45 = vld [vmem:[#allocation2 + $0xec] sm:$0xff]  }
 0x25c   :  { %v13282_v10 = vpop.f32.mrf.mxu1  ;;  %v13414_v38 = vpop.f32.mrf.mxu0 }
 0x25d   :  { %v14892_v10 = vld [vmem:[#allocation2 + $0xc0] sm:$0xff]  }
 0x25e   :  { %v2927_v53 = vpop.f32.mrf.mxu1  ;;  %v3476_v31 = vpop.f32.mrf.mxu0  ;;  %v3728_v39 = vrot.slane %v14892_v10, 1  ;;  %v14894_v10 = vld [vmem:[#allocation2 + $0xd0] sm:$0xff]  }
 0x25f   :  { %v14893_v53 = vld [vmem:[#allocation2 + $0xc8] sm:$0xff]  }
 0x260   :  { %v13285_v60 = vpop.f32.mrf.mxu1  ;;  %13520 = vmatmul.mubr.bf16.gmra.mxu1 %v3725_v58  ;;  %v13417_v18 = vpop.f32.mrf.mxu0  ;;  %13652 = vmatmul.mubr.bf16.gmra.mxu0 %v14594_v7  ;;  %v3730_v30 = vrot.slane %v14893_v53, 1  ;;  %v3729_v7 = vsel %vm3680_vm2, %v3726_v29, %v3728_v39  ;;  %v14895_v53 = vld [vmem:[#allocation2 + $0xd8] sm:$0xff]  }
 0x261   :  { %v15944_v63 = vadd.f32 %v13409_v35, %v13285_v60  ;;  %13523 = vmatprep.mubr.bf16.mxu1 %v3727_v17  ;;  %13655 = vmatprep.mubr.bf16.mxu0 %v14595_v36  ;;  %v15949_v35 = vld [vmem:[#allocation8 + $0x1b8] sm:$0xff]   ;;  %v3734_v29 = vrot.slane %v14895_v53, 1 }
 0x262   :  { %v2937_v15 = vpop.f32.mrf.mxu1  ;;  %v3488_v59 = vpop.f32.mrf.mxu0  ;;  %v3731_v36 = vsel %vm3680_vm2, %v3728_v39, %v3730_v30  ;;  %13959 = vmatprep.subr.bf16.mxu1 %v15949_v35 }
 0x263   :  { %18308 = vst [vmem:[#allocation37_spill] sm:$0xff] %v15944_v63 }
 0x264   :  { %v13286_v38 = vpop.f32.mrf.mxu1  ;;  %v13418_v9 = vpop.f32.mrf.mxu0 }
 0x265   :  { %v15946_v20 = vadd.f32 %v13410_v62, %v13286_v38  ;;  %v3732_v38 = vrot.slane %v14894_v10, 1 }
 0x266   :  { %v2939_v4 = vpop.f32.mrf.mxu1  ;;  %v3491_v58 = vpop.f32.mrf.mxu0 }
 0x267   :  { %18309 = vst [vmem:[#allocation38_spill] sm:$0xff] %v15946_v20  ;;  %v3735_v39 = vsel %vm3680_vm2, %v3732_v38, %v3734_v29 }
 0x268   :  { %v13289_v60 = vpop.f32.mrf.mxu1  ;;  %13524 = vmatmul.mubr.bf16.gmra.mxu1 %v3729_v7  ;;  %v13421_v17 = vpop.f32.mrf.mxu0  ;;  %13656 = vmatmul.mubr.bf16.gmra.mxu0 %v14596_v23 }
 0x269   :  { %v15952_v18 = vadd.f32 %v13413_v1, %v13289_v60  ;;  %13527 = vmatprep.mubr.bf16.mxu1 %v3731_v36  ;;  %13659 = vmatprep.mubr.bf16.mxu0 %v14597_v45  ;;  %v3733_v1 = vsel %vm3680_vm2, %v3730_v30, %v3732_v38  ;;  %v14599_v45 = vld [vmem:[#allocation2 + $0xfc] sm:$0xff]  }
 0x26a   :  { %v2951_v62 = vpop.f32.mrf.mxu1  ;;  %v3503_v15 = vpop.f32.mrf.mxu0 }
 0x26b   :  { %18310 = vst [vmem:[#allocation39_spill] sm:$0xff] %v15952_v18 }
 0x26c   :  { %v13290_v4 = vpop.f32.mrf.mxu1  ;;  %v13422_v20 = vpop.f32.mrf.mxu0 }
 0x26d   :  { %v14896_v4 = vld [vmem:[#allocation2 + $0xe0] sm:$0xff]  }
 0x26e   :  { %v2953_v63 = vpop.f32.mrf.mxu1  ;;  %v3506_v7 = vpop.f32.mrf.mxu0 }
 0x26f   :  { %v15956_v23 = vadd.f32 %v3476_v31, %v2953_v63  ;;  %v3736_v7 = vrot.slane %v14896_v4, 1  ;;  %v3738_v31 = vrot.slane %v14897_v37, 1 }
 0x270   :  { %v13293_v60 = vpop.f32.mrf.mxu1  ;;  %13528 = vmatmul.mubr.bf16.gmra.mxu1 %v3733_v1  ;;  %v15959_v36 = vpop.f32.mrf.mxu0  ;;  %13660 = vmatmul.mubr.bf16.gmra.mxu0 %v14598_v16  ;;  %v14601_v1 = vld [vmem:[#allocation2 + $0x104] sm:$0xff]  }
 0x271   :  { %18311 = vst [vmem:[#allocation40_spill] sm:$0xff] %v15956_v23  ;;  %13531 = vmatprep.mubr.bf16.mxu1 %v3735_v39  ;;  %13663 = vmatprep.mubr.bf16.mxu0 %v14599_v45  ;;  %v3737_v16 = vsel %vm3680_vm2, %v3734_v29, %v3736_v7  ;;  %v14602_v39 = vld [vmem:[#allocation2 + $0x10c] sm:$0xff]   ;;  %v14721_v29 = vld [vmem:[#allocation2 + $0x58] sm:$0xff]  }
 0x272   :  { %v2965_v62 = vpop.f32.mrf.mxu1  ;;  %v3518_v10 = vpop.f32.mrf.mxu0 }
 0x273   :  { %v15961_v53 = vadd.f32 %v3488_v59, %v2965_v62  ;;  %v3739_v59 = vsel %vm3680_vm2, %v3736_v7, %v3738_v31 }
 0x274   :  { %v13294_v18 = vpop.f32.mrf.mxu1  ;;  %v13426_v63 = vpop.f32.mrf.mxu0 }
 0x275   :  { %18312 = vst [vmem:[#allocation41_spill] sm:$0xff] %v15961_v53  ;;  %v15963_v23 = vadd.f32 %v13418_v9, %v13294_v18  ;;  %v14719_v63 = vld [vmem:[#allocation2 + $0x50] sm:$0xff]   ;;  %v9938_v53 = vrot.slane %v14721_v29, 1  ;;  %v14738_v29 = vld [vmem:[#allocation2 + $0x98] sm:$0xff]  }
 0x276   :  { %v2968_v30 = vpop.f32.mrf.mxu1  ;;  %v15965_v38 = vpop.f32.mrf.mxu0  ;;  %v9936_v7 = vrot.slane %v14719_v63, 1  ;;  %v14736_v63 = vld [vmem:[#allocation2 + $0x90] sm:$0xff]  }
 0x277   :  { %18313 = vst [vmem:[#allocation42_spill] sm:$0xff] %v15963_v23  ;;  %v15967_v60 = vadd.f32 %v3491_v58, %v2968_v30  ;;  %v14898_v58 = vld [vmem:[#allocation2 + $0xf0] sm:$0xff]  }
 0x278   :  { %v13297_v45 = vpop.f32.mrf.mxu1  ;;  %13532 = vmatmul.mubr.bf16.gmra.mxu1 %v3737_v16  ;;  %v13429_v62 = vpop.f32.mrf.mxu0  ;;  %13664 = vmatmul.mubr.bf16.gmra.mxu0 %v14601_v1  ;;  %v3740_v4 = vrot.slane %v14898_v58, 1  ;;  %v15984_v1 = vld [vmem:[#allocation2 + $0x48] sm:$0xff]  }
 0x279   :  { %18314 = vst [vmem:[#allocation43_spill] sm:$0xff] %v15967_v60  ;;  %v15971_v10 = vadd.f32 %v13421_v17, %v13297_v45  ;;  %13535 = vmatprep.mubr.bf16.mxu1 %v3739_v59  ;;  %13667 = vmatprep.mubr.bf16.mxu0 %v14602_v39  ;;  %v15977_v60 = vld [vmem:[#allocation2 + $0xf8] sm:$0xff]   ;;  %18318 = vst [vmem:[#allocation47_spill] sm:$0xff] %v15984_v1  ;;  %v14727_v39 = vld [vmem:[#allocation2 + $0x70] sm:$0xff]   ;;  %v18280_v23 = vrot.slane %v15984_v1, 1 }
 0x27a   :  { %v2980_v37 = vpop.f32.mrf.mxu1  ;;  %v15973_v9 = vpop.f32.mrf.mxu0  ;;  %v14723_v62 = vld [vmem:[#allocation2 + $0x60] sm:$0xff]   ;;  %v3741_v58 = vsel %vm3680_vm2, %v3738_v31, %v3740_v4  ;;  %v14745_v1 = vld [vmem:[#allocation2 + $0xb0] sm:$0xff]  }
 0x27b   :  { %18315 = vst [vmem:[#allocation44_spill] sm:$0xff] %v15971_v10  ;;  %v15975_v18 = vadd.f32 %v3503_v15, %v2980_v37  ;;  %v14603_v15 = vld [vmem:[#allocation2 + $0x114] sm:$0xff]   ;;  %v14725_v37 = vld [vmem:[#allocation2 + $0x68] sm:$0xff]   ;;  %v9940_v50 = vrot.slane %v14723_v62, 1 }
 0x27c   :  { %v13298_v30 = vpop.f32.mrf.mxu1  ;;  %v15980_v16 = vpop.f32.mrf.mxu0  ;;  %v14734_v10 = vld [vmem:[#allocation2 + $0x88] sm:$0xff]   ;;  %v9942_v31 = vrot.slane %v14725_v37, 1  ;;  %v14747_v37 = vld [vmem:[#allocation2 + $0xb8] sm:$0xff]  }
 0x27d   :  { %18316 = vst [vmem:[#allocation45_spill] sm:$0xff] %v15975_v18  ;;  %v15982_v17 = vadd.f32 %v13422_v20, %v13298_v30  ;;  %v14604_v18 = vld [vmem:[#allocation2 + $0x11c] sm:$0xff]   ;;  %v18319_v20 = vrot.slane %v15977_v60, 1  ;;  %v14743_v62 = vld [vmem:[#allocation2 + $0xa8] sm:$0xff]  }
 0x27e   :  { %v2983_v45 = vpop.f32.mrf.mxu1  ;;  %v15986_v59 = vpop.f32.mrf.mxu0 }
 0x27f   :  { %18317 = vst [vmem:[#allocation46_spill] sm:$0xff] %v15982_v17  ;;  %v3743_v30 = vsel %vm3680_vm2, %v3740_v4, %v18319_v20  ;;  %v14730_v17 = vld [vmem:[#allocation2 + $0x78] sm:$0xff]   ;;  %v16004_v4 = vsel %vm3680_vm2, %v9936_v7, %v9938_v53 }
 0x280   :  { %v13301_v21 = vpop.f32.mrf.mxu1  ;;  %13536 = vmatmul.mubr.bf16.gmra.mxu1 %v3741_v58  ;;  %v15993_v45 = vpop.f32.mrf.mxu0  ;;  %13668 = vmatmul.mubr.bf16.gmra.mxu0 %v14603_v15  ;;  %v16001_v58 = vsel %vm3680_vm2, %v18280_v23, %v9936_v7  ;;  %18322 = vst [vmem:[#allocation50_spill] sm:$0xff] %v16004_v4  ;;  %v9944_v15 = vrot.slane %v14727_v39, 1  ;;  %v9950_v7 = vrot.slane %v14734_v10, 1  ;;  %v9952_v4 = vrot.slane %v14736_v63, 1 }
 0x281   :  { %v15996_v51 = vadd.f32 %v15959_v36, %v13301_v21  ;;  %13539 = vmatprep.mubr.bf16.mxu1 %v3743_v30  ;;  %13671 = vmatprep.mubr.bf16.mxu0 %v14604_v18  ;;  %18321 = vst [vmem:[#allocation49_spill] sm:$0xff] %v16001_v58  ;;  %v16009_v21 = vsel %vm3680_vm2, %v9938_v53, %v9940_v50  ;;  %v9946_v18 = vrot.slane %v14730_v17, 1  ;;  %v9948_v30 = vrot.slane %v14732_v12, 1  ;;  %v14605_v12 = vld [vmem:[#allocation2 + $0x124] sm:$0xff]  }
 0x282   :  { %v2995_v20 = vpop.f32.mrf.mxu1  ;;  %v16006_v42 = vpop.f32.mrf.mxu0  ;;  %18323 = vst [vmem:[#allocation51_spill] sm:$0xff] %v16009_v21  ;;  %v16012_v36 = vsel %vm3680_vm2, %v9940_v50, %v9942_v31  ;;  %v16015_v23 = vsel %vm3680_vm2, %v9942_v31, %v9944_v15  ;;  %v9954_v39 = vrot.slane %v14738_v29, 1  ;;  %v9956_v50 = vrot.slane %v14740_v13, 1  ;;  %v14766_v13 = vld [vmem:[#allocation2 + $0x100] sm:$0xff]  }
 0x283   :  { %18320 = vst [vmem:[#allocation48_spill] sm:$0xff] %v15996_v51  ;;  %18324 = vst [vmem:[#allocation52_spill] sm:$0xff] %v16012_v36  ;;  %v14749_v51 = vld [vmem:[#allocation2 + $0xc0] sm:$0xff]   ;;  %v16020_v40 = vsel %vm3680_vm2, %v9944_v15, %v9946_v18  ;;  %v16023_v53 = vsel %vm3680_vm2, %v9946_v18, %v9948_v30  ;;  %v9958_v17 = vrot.slane %v14743_v62, 1  ;;  %v16025_v36 = vld [vmem:[#allocation2 + $0xc8] sm:$0xff]   ;;  %v16028_v31 = vsel %vm3680_vm2, %v9948_v30, %v9950_v7 }
 0x284   :  { %18325 = vst [vmem:[#allocation53_spill] sm:$0xff] %v16015_v23  ;;  %v13302_v20 = vpop.f32.mrf.mxu1  ;;  %v16017_v58 = vpop.f32.mrf.mxu0  ;;  %18326 = vst [vmem:[#allocation54_spill] sm:$0xff] %v16020_v40  ;;  %v16031_v10 = vsel %vm3680_vm2, %v9950_v7, %v9952_v4  ;;  %v16034_v63 = vsel %vm3680_vm2, %v9952_v4, %v9954_v39  ;;  %v9960_v29 = vrot.slane %v14745_v1, 1  ;;  %v16036_v40 = vld [vmem:[#allocation2 + $0xd8] sm:$0xff]   ;;  %v14757_v18 = vld [vmem:[#allocation2 + $0xe0] sm:$0xff]   ;;  %v16039_v62 = vsel %vm3680_vm2, %v9954_v39, %v9956_v50 }
 0x285   :  { %18327 = vst [vmem:[#allocation55_spill] sm:$0xff] %v16023_v53  ;;  %18328 = vst [vmem:[#allocation56_spill] sm:$0xff] %v16025_v36  ;;  %v16042_v53 = vsel %vm3680_vm2, %v9956_v50, %v9958_v17  ;;  %v9962_v30 = vrot.slane %v14747_v37, 1  ;;  %v18335_v4 = vrot.slane %v15656_v6, 1  ;;  %v18336_v1 = vrot.slane %v15977_v60, 1  ;;  %v14762_v23 = vld [vmem:[#allocation2 + $0xf0] sm:$0xff]  }
 0x286   :  { %18329 = vst [vmem:[#allocation57_spill] sm:$0xff] %v16028_v31  ;;  %18330 = vst [vmem:[#allocation58_spill] sm:$0xff] %v16031_v10  ;;  %v2997_v15 = vpop.f32.mrf.mxu1  ;;  %v3550_v20 = vpop.f32.mrf.mxu0  ;;  %v9964_v31 = vrot.slane %v14749_v51, 1  ;;  %v14760_v10 = vld [vmem:[#allocation2 + $0xe8] sm:$0xff]   ;;  %v16053_v39 = vsel %vm3680_vm2, %v9958_v17, %v9960_v29  ;;  %v18282_v50 = vrot.slane %v16025_v36, 1  ;;  %v14773_v6 = vld [vmem:[#allocation2 + $0x118] sm:$0xff]  }
 0x287   :  { %18331 = vst [vmem:[#allocation59_spill] sm:$0xff] %v16034_v63  ;;  %18332 = vst [vmem:[#allocation60_spill] sm:$0xff] %v16036_v40  ;;  %v16045_v7 = vadd.f32 %v15965_v38, %v2997_v15  ;;  %v3745_v20 = vsel %vm3680_vm2, %v18336_v1, %v18335_v4  ;;  %v14606_v63 = vld [vmem:[#allocation2 + $0x12c] sm:$0xff]   ;;  %v14764_v38 = vld [vmem:[#allocation2 + $0xf8] sm:$0xff]   ;;  %v16059_v60 = vsel %vm3680_vm2, %v9960_v29, %v9962_v30  ;;  %v18284_v4 = vrot.slane %v16036_v40, 1 }
 0x288   :  { %18333 = vst [vmem:[#allocation61_spill] sm:$0xff] %v16039_v62  ;;  %18334 = vst [vmem:[#allocation62_spill] sm:$0xff] %v16042_v53  ;;  %v13305_v53 = vpop.f32.mrf.mxu1  ;;  %13540 = vmatmul.mubr.bf16.gmra.mxu1 %v3745_v20  ;;  %v16056_v51 = vpop.f32.mrf.mxu0  ;;  %13672 = vmatmul.mubr.bf16.gmra.mxu0 %v14605_v12  ;;  %v14768_v37 = vld [vmem:[#allocation2 + $0x108] sm:$0xff]   ;;  %v16062_v15 = vsel %vm3680_vm2, %v9962_v30, %v9964_v31  ;;  %v9972_v17 = vrot.slane %v14757_v18, 1  ;;  %v16069_v12 = vsel %vm3680_vm2, %v9964_v31, %v18282_v50  ;;  %v14775_v36 = vld [vmem:[#allocation2 + $0x120] sm:$0xff]  }
 0x289   :  { %18337 = vst [vmem:[#allocation63_spill] sm:$0xff] %v16053_v39  ;;  %18338 = vst [vmem:[#allocation64_spill] sm:$0xff] %v16059_v60  ;;  %13543 = vmatprep.mubr.bf16.mxu1 %v15760_v14  ;;  %13675 = vmatprep.mubr.bf16.mxu0 %v14606_v63  ;;  %v14770_v53 = vld [vmem:[#allocation2 + $0x110] sm:$0xff]   ;;  %v9974_v1 = vrot.slane %v14760_v10, 1  ;;  %v9976_v20 = vrot.slane %v14762_v23, 1  ;;  %v9978_v18 = vrot.slane %v14764_v38, 1 }
 0x28a   :  { %18339 = vst [vmem:[#allocation65_spill] sm:$0xff] %v16062_v15  ;;  %18340 = vst [vmem:[#allocation66_spill] sm:$0xff] %v16069_v12  ;;  %v3009_v39 = vpop.f32.mrf.mxu1  ;;  %v3562_v29 = vpop.f32.mrf.mxu0  ;;  %v14779_v60 = vld [vmem:[#allocation2 + $0x130] sm:$0xff]   ;;  %v16074_v30 = vsel %vm3680_vm2, %v18284_v4, %v9972_v17  ;;  %v9980_v15 = vrot.slane %v14766_v13, 1  ;;  %v9982_v14 = vrot.slane %v14768_v37, 1  ;;  %v14777_v62 = vld [vmem:[#allocation2 + $0x128] sm:$0xff]  }
 0x28b   :  { %18341 = vst [vmem:[#allocation67_spill] sm:$0xff] %v16074_v30  ;;  %v16077_v63 = vadd.f32 %v15973_v9, %v3009_v39  ;;  %v14786_v31 = vld [vmem:[#allocation2 + $0x148] sm:$0xff]   ;;  %v16080_v10 = vsel %vm3680_vm2, %v9972_v17, %v9974_v1  ;;  %v16083_v23 = vsel %vm3680_vm2, %v9974_v1, %v9976_v20  ;;  %v9984_v29 = vrot.slane %v14770_v53, 1  ;;  %v14781_v4 = vld [vmem:[#allocation2 + $0x138] sm:$0xff]   ;;  %v14783_v30 = vld [vmem:[#allocation2 + $0x140] sm:$0xff]  }
 0x28c   :  { %18342 = vst [vmem:[#allocation68_spill] sm:$0xff] %v16080_v10  ;;  %18343 = vst [vmem:[#allocation69_spill] sm:$0xff] %v16083_v23  ;;  %v13306_v50 = vpop.f32.mrf.mxu1  ;;  %v13438_v40 = vpop.f32.mrf.mxu0  ;;  %v16086_v13 = vsel %vm3680_vm2, %v9976_v20, %v9978_v18  ;;  %v16089_v9 = vsel %vm3680_vm2, %v9978_v18, %v9980_v15  ;;  %v16092_v39 = vsel %vm3680_vm2, %v9980_v15, %v9982_v14  ;;  %v9986_v38 = vrot.slane %v14773_v6, 1  ;;  %v14608_v10 = vld [vmem:[#allocation2 + $0x134] sm:$0xff]   ;;  %v14609_v6 = vld [vmem:[#allocation2 + $0x13c] sm:$0xff]  }
 0x28d   :  { %18344 = vst [vmem:[#allocation70_spill] sm:$0xff] %v16086_v13  ;;  %18345 = vst [vmem:[#allocation71_spill] sm:$0xff] %v16089_v9  ;;  %v16095_v37 = vadd.f32 %v15980_v16, %v13306_v50  ;;  %v16098_v17 = vsel %vm3680_vm2, %v9982_v14, %v9984_v29  ;;  %v9988_v53 = vrot.slane %v14775_v36, 1  ;;  %v9990_v40 = vrot.slane %v14777_v62, 1  ;;  %v16106_v16 = vld [vmem:[#allocation2 + $0x160] sm:$0xff]   ;;  %v16258_v12 = vld [vmem:[#allocation2 + $0x34] sm:$0xff]  }
 0x28e   :  { %18346 = vst [vmem:[#allocation72_spill] sm:$0xff] %v16092_v39  ;;  %18347 = vst [vmem:[#allocation73_spill] sm:$0xff] %v16098_v17  ;;  %v3012_v1 = vpop.f32.mrf.mxu1  ;;  %v3564_v23 = vpop.f32.mrf.mxu0  ;;  %v16101_v20 = vsel %vm3680_vm2, %v9984_v29, %v9986_v38  ;;  %v9992_v18 = vrot.slane %v14779_v60, 1  ;;  %v9994_v9 = vrot.slane %v14781_v4, 1  ;;  %v9996_v13 = vrot.slane %v14783_v30, 1 }
 0x28f   :  { %18348 = vst [vmem:[#allocation74_spill] sm:$0xff] %v16101_v20  ;;  %v16104_v15 = vadd.f32 %v15986_v59, %v3012_v1  ;;  %v16109_v50 = vsel %vm3680_vm2, %v9986_v38, %v9988_v53  ;;  %v16112_v36 = vsel %vm3680_vm2, %v9988_v53, %v9990_v40  ;;  %v9998_v62 = vrot.slane %v14786_v31, 1  ;;  %v14788_v31 = vld [vmem:[#allocation2 + $0x150] sm:$0xff]   ;;  %v14790_v38 = vld [vmem:[#allocation2 + $0x158] sm:$0xff]   ;;  %v14902_v20 = vld [vmem:[#allocation2 + $0x1a8] sm:$0xff]  }
 0x290   :  { %18349 = vst [vmem:[#allocation75_spill] sm:$0xff] %v16109_v50  ;;  %18350 = vst [vmem:[#allocation76_spill] sm:$0xff] %v16112_v36  ;;  %v13309_v14 = vpop.f32.mrf.mxu1  ;;  %13544 = vmatmul.mubr.bf16.gmra.mxu1 %v15764_v56  ;;  %v13441_v29 = vpop.f32.mrf.mxu0  ;;  %13676 = vmatmul.mubr.bf16.gmra.mxu0 %v14608_v10  ;;  %v16116_v60 = vsel %vm3680_vm2, %v9990_v40, %v9992_v18  ;;  %v16119_v59 = vsel %vm3680_vm2, %v9992_v18, %v9994_v9  ;;  %v10000_v1 = vrot.slane %v14788_v31, 1  ;;  %v14610_v31 = vld [vmem:[#allocation2 + $0x144] sm:$0xff]  }
 0x291   :  { %18351 = vst [vmem:[#allocation77_spill] sm:$0xff] %v16116_v60  ;;  %18352 = vst [vmem:[#allocation78_spill] sm:$0xff] %v16119_v59  ;;  %v16122_v4 = vsel %vm3680_vm2, %v9994_v9, %v9996_v13  ;;  %v16125_v30 = vadd.f32 %v15993_v45, %v13309_v14  ;;  %13547 = vmatprep.mubr.bf16.mxu1 %v15770_v19  ;;  %13679 = vmatprep.mubr.bf16.mxu0 %v14609_v6  ;;  %v10002_v18 = vrot.slane %v14790_v38, 1  ;;  %v14611_v38 = vld [vmem:[#allocation2 + $0x14c] sm:$0xff]   ;;  %v14612_v59 = vld [vmem:[#allocation2 + $0x154] sm:$0xff]  }
 0x292   :  { %18353 = vst [vmem:[#allocation79_spill] sm:$0xff] %v16122_v4  ;;  %v16129_v56 = vsel %vm3680_vm2, %v9996_v13, %v9998_v62  ;;  %v3024_v10 = vpop.f32.mrf.mxu1  ;;  %v3576_v53 = vpop.f32.mrf.mxu0  ;;  %v10004_v9 = vrot.slane %v16106_v16, 1  ;;  %v16139_v19 = vsel %vm3680_vm2, %v9998_v62, %v10000_v1  ;;  %v3786_v17 = vrot.slane %v14902_v20, 1 }
 0x293   :  { %18354 = vst [vmem:[#allocation80_spill] sm:$0xff] %v16129_v56  ;;  %v16132_v40 = vadd.f32 %v16006_v42, %v3024_v10  ;;  %18355 = vst [vmem:[#allocation81_spill] sm:$0xff] %v16139_v19  ;;  %v16142_v13 = vsel %vm3680_vm2, %v10000_v1, %v10002_v18 }
 0x294   :  { %v13310_v29 = vpop.f32.mrf.mxu1  ;;  %v13442_v45 = vpop.f32.mrf.mxu0  ;;  %18356 = vst [vmem:[#allocation82_spill] sm:$0xff] %v16142_v13  ;;  %v16145_v6 = vsel %vm3680_vm2, %v10002_v18, %v10004_v9  ;;  %v14796_v13 = vld [vmem:[#allocation2 + $0x170] sm:$0xff]  }
 0x295   :  { %v16136_v14 = vadd.f32 %v16017_v58, %v13310_v29  ;;  %18357 = vst [vmem:[#allocation83_spill] sm:$0xff] %v16145_v6  ;;  %v14798_v29 = vld [vmem:[#allocation2 + $0x178] sm:$0xff]   ;;  %v10008_v36 = vrot.slane %v14796_v13, 1 }
 0x296   :  { %v3027_v42 = vpop.f32.mrf.mxu1  ;;  %v3579_v10 = vpop.f32.mrf.mxu0 }
 0x297   :  { %v14794_v42 = vld [vmem:[#allocation2 + $0x168] sm:$0xff]  }
 0x298   :  { %v13313_v56 = vpop.f32.mrf.mxu1  ;;  %13548 = vmatmul.mubr.bf16.gmra.mxu1 %v15776_v26  ;;  %v13445_v16 = vpop.f32.mrf.mxu0  ;;  %13680 = vmatmul.mubr.bf16.gmra.mxu0 %v14610_v31  ;;  %v14613_v26 = vld [vmem:[#allocation2 + $0x15c] sm:$0xff]   ;;  %v10006_v31 = vrot.slane %v14794_v42, 1  ;;  %v14614_v42 = vld [vmem:[#allocation2 + $0x164] sm:$0xff]  }
 0x299   :  { %v16149_v58 = vadd.f32 %v16056_v51, %v13313_v56  ;;  %13551 = vmatprep.mubr.bf16.mxu1 %v15779_v0  ;;  %13683 = vmatprep.mubr.bf16.mxu0 %v14611_v38  ;;  %v10010_v51 = vrot.slane %v14798_v29, 1 }
 0x29a   :  { %v3039_v62 = vpop.f32.mrf.mxu1  ;;  %v3591_v1 = vpop.f32.mrf.mxu0  ;;  %v16157_v38 = vsel %vm3680_vm2, %v10004_v9, %v10006_v31  ;;  %v14615_v9 = vld [vmem:[#allocation2 + $0x16c] sm:$0xff]  }
 0x29b   :  { %18358 = vst [vmem:[#allocation84_spill] sm:$0xff] %v16157_v38 }
 0x29c   :  { %v13314_v18 = vpop.f32.mrf.mxu1  ;;  %v13446_v6 = vpop.f32.mrf.mxu0 }
 0x29e   :  { %v3041_v19 = vpop.f32.mrf.mxu1  ;;  %v3594_v4 = vpop.f32.mrf.mxu0 }
 0x29f   :  { %v16152_v60 = vadd.f32 %v3564_v23, %v3041_v19  ;;  %v16160_v4 = vsel %vm3680_vm2, %v10006_v31, %v10008_v36  ;;  %v16163_v23 = vsel %vm3680_vm2, %v10008_v36, %v10010_v51 }
 0x2a0   :  { %v13317_v56 = vpop.f32.mrf.mxu1  ;;  %13552 = vmatmul.mubr.bf16.gmra.mxu1 %v15782_v47  ;;  %v13449_v0 = vpop.f32.mrf.mxu0  ;;  %13684 = vmatmul.mubr.bf16.gmra.mxu0 %v14612_v59  ;;  %18359 = vst [vmem:[#allocation85_spill] sm:$0xff] %v16160_v4  ;;  %18360 = vst [vmem:[#allocation86_spill] sm:$0xff] %v16163_v23 }
 0x2a1   :  { %13555 = vmatprep.mubr.bf16.mxu1 %v15785_v24  ;;  %13687 = vmatprep.mubr.bf16.mxu0 %v14613_v26  ;;  %v16171_v56 = vld [vmem:[#allocation2 + $0x190] sm:$0xff]  }
 0x2a2   :  { %v3053_v19 = vpop.f32.mrf.mxu1  ;;  %v3606_v13 = vpop.f32.mrf.mxu0  ;;  %18361 = vst [vmem:[#allocation87_spill] sm:$0xff] %v16171_v56  ;;  %v18285_v23 = vrot.slane %v16171_v56, 1 }
 0x2a3   :  { %v16165_v62 = vadd.f32 %v3576_v53, %v3053_v19  ;;  %v14800_v53 = vld [vmem:[#allocation2 + $0x180] sm:$0xff]  }
 0x2a4   :  { %v13318_v29 = vpop.f32.mrf.mxu1  ;;  %v13450_v47 = vpop.f32.mrf.mxu0 }
 0x2a5   :  { %v16167_v18 = vadd.f32 %v13442_v45, %v13318_v29  ;;  %v14803_v45 = vld [vmem:[#allocation2 + $0x188] sm:$0xff]  }
 0x2a6   :  { %v3056_v59 = vpop.f32.mrf.mxu1  ;;  %v3608_v24 = vpop.f32.mrf.mxu0 }
 0x2a7   :  { %v16169_v26 = vadd.f32 %v3579_v10, %v3056_v59  ;;  %v10012_v10 = vrot.slane %v14800_v53, 1  ;;  %v10014_v59 = vrot.slane %v14803_v45, 1 }
 0x2a8   :  { %v13321_v31 = vpop.f32.mrf.mxu1  ;;  %13556 = vmatmul.mubr.bf16.gmra.mxu1 %v15788_v27  ;;  %v13453_v36 = vpop.f32.mrf.mxu0  ;;  %13688 = vmatmul.mubr.bf16.gmra.mxu0 %v14614_v42 }
 0x2a9   :  { %v16174_v13 = vadd.f32 %v13445_v16, %v13321_v31  ;;  %13559 = vmatprep.mubr.bf16.mxu1 %v15791_v3  ;;  %13691 = vmatprep.mubr.bf16.mxu0 %v14615_v9  ;;  %v16183_v16 = vsel %vm3680_vm2, %v10010_v51, %v10012_v10  ;;  %v16186_v3 = vsel %vm3680_vm2, %v10012_v10, %v10014_v59  ;;  %v14617_v31 = vld [vmem:[#allocation2 + $0x174] sm:$0xff]   ;;  %v14618_v36 = vld [vmem:[#allocation2 + $0x17c] sm:$0xff]  }
 0x2aa   :  { %v3068_v19 = vpop.f32.mrf.mxu1  ;;  %v3620_v29 = vpop.f32.mrf.mxu0  ;;  %18362 = vst [vmem:[#allocation88_spill] sm:$0xff] %v16183_v16  ;;  %18363 = vst [vmem:[#allocation89_spill] sm:$0xff] %v16186_v3  ;;  %v16191_v42 = vsel %vm3680_vm2, %v10014_v59, %v18285_v23  ;;  %v16228_v16 = vld [vmem:[#allocation2 + $0x1c] sm:$0xff]  }
 0x2ab   :  { %v16177_v47 = vadd.f32 %v3591_v1, %v3068_v19  ;;  %18364 = vst [vmem:[#allocation90_spill] sm:$0xff] %v16191_v42  ;;  %v14621_v42 = vld [vmem:[#allocation2 + $0x18c] sm:$0xff]  }
 0x2ac   :  { %v13322_v4 = vpop.f32.mrf.mxu1  ;;  %v13454_v38 = vpop.f32.mrf.mxu0 }
 0x2ad   :  { %v16180_v27 = vadd.f32 %v13446_v6, %v13322_v4 }
 0x2ae   :  { %v3071_v1 = vpop.f32.mrf.mxu1  ;;  %v3623_v9 = vpop.f32.mrf.mxu0 }
 0x2af   :  { %v14619_v1 = vld [vmem:[#allocation2 + $0x184] sm:$0xff]  }
 0x2b0   :  { %v13325_v53 = vpop.f32.mrf.mxu1  ;;  %13560 = vmatmul.mubr.bf16.gmra.mxu1 %v15800_v34  ;;  %v13457_v6 = vpop.f32.mrf.mxu0  ;;  %13692 = vmatmul.mubr.bf16.gmra.mxu0 %v14617_v31 }
 0x2b1   :  { %v16194_v4 = vadd.f32 %v13449_v0, %v13325_v53  ;;  %13563 = vmatprep.mubr.bf16.mxu1 %v15803_v43  ;;  %13695 = vmatprep.mubr.bf16.mxu0 %v14618_v36 }
 0x2b2   :  { %v3083_v51 = vpop.f32.mrf.mxu1  ;;  %v3635_v45 = vpop.f32.mrf.mxu0 }
 0x2b3   :  { %v14623_v51 = vld [vmem:[#allocation2 + $0x194] sm:$0xff]  }
 0x2b4   :  { %v13326_v19 = vpop.f32.mrf.mxu1  ;;  %v13458_v10 = vpop.f32.mrf.mxu0 }
 0x2b6   :  { %v3085_v59 = vpop.f32.mrf.mxu1  ;;  %v3638_v23 = vpop.f32.mrf.mxu0 }
 0x2b7   :  { %v16197_v56 = vadd.f32 %v3608_v24, %v3085_v59 }
 0x2b8   :  { %v13329_v3 = vpop.f32.mrf.mxu1  ;;  %13564 = vmatmul.mubr.bf16.gmra.mxu1 %v15806_v46  ;;  %v13461_v34 = vpop.f32.mrf.mxu0  ;;  %13696 = vmatmul.mubr.bf16.gmra.mxu0 %v14619_v1  ;;  %v14628_v1 = vld [vmem:[#allocation2 + $0x1a4] sm:$0xff]  }
 0x2b9   :  { %13567 = vmatprep.mubr.bf16.mxu1 %v15820_v32  ;;  %13699 = vmatprep.mubr.bf16.mxu0 %v14621_v42  ;;  %v14625_v3 = vld [vmem:[#allocation2 + $0x19c] sm:$0xff]   ;;  %v5360_v34 = vld [vmem:[#allocation2 + $0x10] sm:$0xf] }
 0x2ba   :  { %v3097_v43 = vpop.f32.mrf.mxu1  ;;  %v3648_v0 = vpop.f32.mrf.mxu0 }
 0x2bb   :  { %v16201_v31 = vadd.f32 %v3620_v29, %v3097_v43 }
 0x2bc   :  { %v13330_v36 = vpop.f32.mrf.mxu1  ;;  %v13462_v53 = vpop.f32.mrf.mxu0 }
 0x2bd   :  { %v16203_v6 = vadd.f32 %v13454_v38, %v13330_v36  ;;  %v16220_v53 = vld [vmem:[#allocation2 + $0x14] sm:$0xff]  }
 0x2be   :  { %v3100_v23 = vpop.f32.mrf.mxu1  ;;  %v3650_v24 = vpop.f32.mrf.mxu0 }
 0x2bf   :  { %v16205_v19 = vadd.f32 %v3623_v9, %v3100_v23  ;;  %v14631_v9 = vld [vmem:[#allocation2 + $0x1ac] sm:$0xff]  }
 0x2c0   :  { %v13333_v46 = vpop.f32.mrf.mxu1  ;;  %13568 = vmatmul.mubr.bf16.gmra.mxu1 %v15823_v54  ;;  %v13605_v10 = vpop.f32.mrf.mxu0  ;;  %13700 = vmatmul.mubr.bf16.gmra.mxu0 %v14623_v51  ;;  %v6781_v54 = vld [vmem:[#allocation2 + $0xc] sm:$0xe] }
 0x2c1   :  { %13571 = vmatprep.mubr.bf16.mxu1 %v15826_v8  ;;  %13703 = vmatprep.mubr.bf16.mxu0 %v14625_v3  ;;  %v14900_v3 = vld [vmem:[#allocation2 + $0x198] sm:$0xff]  }
 0x2c2   :  { %v3112_v32 = vpop.f32.mrf.mxu1  ;;  %v16209_v29 = vpop.f32.mrf.mxu0  ;;  %v3782_v46 = vrot.slane %v14900_v3, 1  ;;  %v16237_v3 = vld [vmem:[#allocation2 + $0x24] sm:$0xff]  }
 0x2c3   :  { %v16211_v42 = vadd.f32 %v3635_v45, %v3112_v32  ;;  %v11970_v45 = vcombine.low %v6781_v54, %v5360_v34  ;;  %v14632_v32 = vld [vmem:[#allocation2 + $0x1b4] sm:$0xff]  }
 0x2c4   :  { %v13334_v38 = vpop.f32.mrf.mxu1  ;;  %v16213_v59 = vpop.f32.mrf.mxu0 }
 0x2c5   :  { %v6802_v38 = vrot.slane %v11970_v45, 1 }
 0x2c6   :  { %v3115_v43 = vpop.f32.mrf.mxu1  ;;  %v16215_v0 = vpop.f32.mrf.mxu0 }
 0x2c8   :  { %v13337_v36 = vpop.f32.mrf.mxu1  ;;  %13572 = vmatmul.mubr.bf16.gmra.mxu1 %v15836_v44  ;;  %v16218_v8 = vpop.f32.mrf.mxu0  ;;  %13704 = vmatmul.mubr.bf16.gmra.mxu0 %v14628_v1  ;;  %v6803_v44 = vrot.slane %v16220_v53, 1 }
 0x2c9   :  { %13575 = vmatprep.mubr.bf16.mxu1 %v15839_v48  ;;  %13707 = vmatprep.mubr.bf16.mxu0 %v14631_v9  ;;  %v5359_v36 = vld [vmem:[#allocation2 + $0xc] sm:$0xf]  ;;  %v18365_v48 = vrot.slane %v15817_v5, 1  ;;  %v6805_v5 = vrot.slane %v16228_v16, 1 }
 0x2ca   :  { %v3125_v23 = vpop.f32.mrf.mxu1  ;;  %v16223_v24 = vpop.f32.mrf.mxu0  ;;  %v6804_v45 = vsel %vm3680_vm2, %v6802_v38, %v6803_v44 }
 0x2cb   :  { %v3783_v9 = vsel %vm3680_vm2, %v18365_v48, %v3782_v46 }
 0x2cc   :  { %v13338_v51 = vpop.f32.mrf.mxu1  ;;  %v16225_v10 = vpop.f32.mrf.mxu0 }
 0x2cd   :  { %v11907_v51 = vcombine.low %v5359_v36, %v5360_v34  ;;  %v6807_v34 = vrot.slane %v16237_v3, 1 }
 0x2ce   :  { %v3127_v43 = vpop.f32.mrf.mxu1  ;;  %v4926_v1 = vpop.f32.mrf.mxu0 }
 0x2cf   :  { %v5761_v38 = vshll.u32 %v11907_v51, 16 }
 0x2d0   :  { %v13481_v54 = vpop.f32.mrf.mxu1  ;;  %13576 = vmatmul.mubr.bf16.gmra.mxu1 %v15844_v41  ;;  %v16234_v23 = vpop.f32.mrf.mxu0  ;;  %13708 = vmatmul.mubr.bf16.gmra.mxu0 %v14632_v32  ;;  %v14901_v41 = vld [vmem:[#allocation2 + $0x1a0] sm:$0xff]  }
 0x2d1   :  { %18366 = vst [vmem:[#allocation91_spill] sm:$0xff] %v16234_v23  ;;  %13579 = vmatprep.mubr.bf16.mxu1 %v3783_v9  ;;  %13851 = vmatprep.mubr.bf16.mxu0 %v6804_v45  ;;  %v3784_v50 = vrot.slane %v14901_v41, 1  ;;  %v16254_v41 = vld [vmem:[#allocation2 + $0x2c] sm:$0xff]  }
 0x2d2   :  { %v3926_v43 = vpop.f32.mrf.mxu1  ;;  %v4938_v1 = vpop.f32.mrf.mxu0 }
 0x2d3   :  { %v16240_v54 = vadd.f32 %v3926_v43, %v15848_v11  ;;  %v3785_v43 = vsel %vm3680_vm2, %v3782_v46, %v3784_v50  ;;  %v6806_v1 = vsel %vm3680_vm2, %v6803_v44, %v6805_v5  ;;  %v14903_v46 = vld [vmem:[#allocation2 + $0x1b0] ss:$0 sps:$4 sm:$0x11]  }
 0x2d4   :  { %v13482_v48 = vpop.f32.mrf.mxu1  ;;  %v13614_v32 = vpop.f32.mrf.mxu0 }
 0x2d5   :  { %v16245_v36 = vadd.f32 %v13482_v48, %v15850_v55  ;;  %v3787_v32 = vsel %vm3680_vm2, %v3784_v50, %v3786_v17  ;;  %v6808_v55 = vsel %vm3680_vm2, %v6805_v5, %v6807_v34  ;;  %v5763_v48 = vrot.slane %v5761_v38, 1 }
 0x2d6   :  { %v3929_v9 = vpop.f32.mrf.mxu1  ;;  %v16247_v45 = vpop.f32.mrf.mxu0  ;;  %v5766_v50 = vshll.u32 %v16220_v53, 16  ;;  %v6809_v5 = vrot.slane %v16254_v41, 1 }
 0x2d7   :  { %18367 = vst [vmem:[#allocation92_spill] sm:$0xff] %v16247_v45  ;;  %v16250_v11 = vadd.f32 %v3929_v9, %v15852_v22  ;;  %v3788_v9 = vrot.slane %v14903_v46, 1 }
 0x2d8   :  { %v13485_v20 = vpop.f32.mrf.mxu1  ;;  %13580 = vmatmul.mubr.bf16.gmra.mxu1 %v3785_v43  ;;  %v13617_v39 = vpop.f32.mrf.mxu0  ;;  %13852 = vmatmul.mubr.bf16.vlgmr.msra.gmra.mxu0 %v6806_v1  ;;  %v5759_v43 = vshrl.u32 %v11907_v51, 16  ;;  %v5768_v51 = vrot.slane %v5766_v50, 1  ;;  %v16291_v50 = vld [vmem:[#allocation2 + $0x44] sm:$0xff]  }
 0x2d9   :  { %v16261_v22 = vadd.f32 %v13485_v20, %v15856_v25  ;;  %13583 = vmatprep.mubr.bf16.mxu1 %v3787_v32  ;;  %13855 = vmatprep.mubr.bf16.mxu0 %v6808_v55  ;;  %v6811_v25 = vrot.slane %v16258_v12, 1  ;;  %v3789_v32 = vsel %vm3680_vm2, %v3786_v17, %v3788_v9  ;;  %v5782_v17 = vshll.u32 %v16237_v3, 16 }
 0x2da   :  { %v3941_v44 = vpop.f32.mrf.mxu1  ;;  %v16263_v21 = vpop.f32.mrf.mxu0  ;;  %v5764_v1 = vor.u32 %v5763_v48, %v5759_v43 }
 0x2db   :  { %18368 = vst [vmem:[#allocation93_spill] sm:$0xff] %v16263_v21  ;;  %v16267_v39 = vadd.f32 %v3941_v44, %v15858_v52  ;;  %v5774_v52 = vshll.u32 %v16228_v16, 16  ;;  %v6810_v44 = vsel %vm3680_vm2, %v6807_v34, %v6809_v5  ;;  %v16281_v21 = vld [vmem:[#allocation2 + $0x3c] sm:$0xff]  }
 0x2dc   :  { %v13486_v38 = vpop.f32.mrf.mxu1  ;;  %v16270_v45 = vpop.f32.mrf.mxu0  ;;  %v5769_v43 = vsel %vm2176_vm1, %v5764_v1, %v5768_v51  ;;  %v5770_v1 = vshrl.u32 %v16220_v53, 16 }
 0x2dd   :  { %18369 = vst [vmem:[#allocation94_spill] sm:$0xff] %v16270_v45  ;;  %v16274_v20 = vadd.f32 %v13486_v38, %v15860_v33  ;;  %v6812_v33 = vsel %vm3680_vm2, %v6809_v5, %v6811_v25  ;;  %v5776_v38 = vrot.slane %v5774_v52, 1  ;;  %v5778_v5 = vshrl.u32 %v16228_v16, 16  ;;  %v16307_v16 = vld [vmem:[#allocation2 + $0x4c] sm:$0xff]  }
 0x2de   :  { %v3944_v55 = vpop.f32.mrf.mxu1  ;;  %v16277_v46 = vpop.f32.mrf.mxu0  ;;  %v5790_v52 = vshll.u32 %v16254_v41, 16 }
 0x2df   :  { %18370 = vst [vmem:[#allocation95_spill] sm:$0xff] %v16277_v46 }
 0x2e0   :  { %v13489_v48 = vpop.f32.mrf.mxu1  ;;  %13584 = vmatmul.mubr.bf16.gmra.mxu1 %v3789_v32  ;;  %v16284_v45 = vpop.f32.mrf.mxu0  ;;  %13856 = vmatmul.mubr.bf16.gmra.mxu0 %v6810_v44  ;;  %v6813_v32 = vrot.slane %v16281_v21, 1 }
 0x2e1   :  { %18371 = vst [vmem:[#allocation96_spill] sm:$0xff] %v16284_v45  ;;  %v16289_v9 = vadd.f32 %v13489_v48, %v15864_v61  ;;  %13727 = vmatprep.mubr.bf16.mxu1 %v5769_v43  ;;  %13859 = vmatprep.mubr.bf16.mxu0 %v6812_v33  ;;  %v5784_v45 = vrot.slane %v5782_v17, 1  ;;  %v5772_v61 = vor.u32 %v5770_v1, %v5768_v51  ;;  %v6815_v48 = vrot.slane %v16291_v50, 1 }
 0x2e2   :  { %v3956_v34 = vpop.f32.mrf.mxu1  ;;  %v16293_v55 = vpop.f32.mrf.mxu0  ;;  %v5780_v33 = vor.u32 %v5778_v5, %v5776_v38  ;;  %v16313_v5 = vld [vmem:[#allocation2 + $0x54] sm:$0xff]  }
 0x2e3   :  { %18372 = vst [vmem:[#allocation97_spill] sm:$0xff] %v16293_v55  ;;  %v14649_v34 = vld [vmem:[#allocation8 + $0x1b0] sm:$0xff]   ;;  %v5777_v53 = vsel %vm2176_vm1, %v5772_v61, %v5776_v38  ;;  %v5792_v61 = vrot.slane %v5790_v52, 1 }
 0x2e4   :  { %v13490_v44 = vpop.f32.mrf.mxu1  ;;  %v16298_v46 = vpop.f32.mrf.mxu0  ;;  %v5785_v51 = vsel %vm2176_vm1, %v5780_v33, %v5784_v45  ;;  %v14656_v33 = vld [vmem:[#allocation8 + $0x1a8] sm:$0xff]  }
 0x2e5   :  { %18373 = vst [vmem:[#allocation98_spill] sm:$0xff] %v16298_v46  ;;  %v6814_v44 = vsel %vm3680_vm2, %v6811_v25, %v6813_v32  ;;  %v6816_v25 = vsel %vm3680_vm2, %v6813_v32, %v6815_v48  ;;  %v6819_v32 = vrot.slane %v16313_v5, 1 }
 0x2e6   :  { %v3958_v43 = vpop.f32.mrf.mxu1  ;;  %v4970_v23 = vpop.f32.mrf.mxu0 }
 0x2e7   :  { %v16303_v55 = vadd.f32 %v3958_v43, %v15866_v28  ;;  %v5798_v23 = vshll.u32 %v16258_v12, 16  ;;  %v5786_v28 = vshrl.u32 %v16237_v3, 16  ;;  %v5806_v3 = vshll.u32 %v16281_v21, 16 }
 0x2e8   :  { %v13493_v17 = vpop.f32.mrf.mxu1  ;;  %13728 = vmatmul.mubr.bf16.vlgmr.msra.gmra.mxu1 %v5777_v53  ;;  %v16310_v1 = vpop.f32.mrf.mxu0  ;;  %13860 = vmatmul.mubr.bf16.gmra.mxu0 %v6814_v44 }
 0x2e9   :  { %18374 = vst [vmem:[#allocation99_spill] sm:$0xff] %v16310_v1  ;;  %13960 = vmatpush3.bf16.msra.mxu1 %v15949_v35  ;;  %13731 = vmatprep.mubr.bf16.mxu1 %v5785_v51  ;;  %v5788_v44 = vor.u32 %v5786_v28, %v5784_v45  ;;  %v6817_v17 = vrot.slane %v16307_v16, 1  ;;  %v5794_v35 = vshrl.u32 %v16254_v41, 16  ;;  %v5800_v51 = vrot.slane %v5798_v23, 1  ;;  %v16335_v23 = vld [vmem:[#allocation2 + $0x5c] sm:$0xff]   ;;  %v14664_v28 = vld [vmem:[#allocation8 + $0x1a0] sm:$0xff]  }
 0x2ea   :  { %v3970_v38 = vpop.f32.mrf.mxu1  ;;  %13863 = vmatprep.mubr.bf16.mxu0 %v6816_v25  ;;  %v4982_v43 = vpop.f32.mrf.mxu0  ;;  %13961 = vmatprep.subr.bf16.mxu1 %v14649_v34 }
 0x2eb   :  { %v16319_v53 = vadd.f32 %v3970_v38, %v15870_v57  ;;  %v5796_v43 = vor.u32 %v5794_v35, %v5792_v61  ;;  %v5793_v41 = vsel %vm2176_vm1, %v5788_v44, %v5792_v61  ;;  %v6820_v35 = vsel %vm3680_vm2, %v6817_v17, %v6819_v32 }
 0x2ec   :  { %v13494_v1 = vpop.f32.mrf.mxu1  ;;  %v13626_v46 = vpop.f32.mrf.mxu0  ;;  %v5814_v44 = vshll.u32 %v16291_v50, 16 }
 0x2ed   :  { %v16326_v52 = vadd.f32 %v13494_v1, %v15872_v2  ;;  %13962 = vmatpush3.bf16.msra.mxu1 %v14649_v34  ;;  %v6818_v46 = vsel %vm3680_vm2, %v6815_v48, %v6817_v17  ;;  %v5801_v2 = vsel %vm2176_vm1, %v5796_v43, %v5800_v51  ;;  %v5808_v1 = vrot.slane %v5806_v3, 1  ;;  %v18381_v43 = vld [vmem:[#allocation17_spill] sm:$0xff] }
 0x2ee   :  { %v3973_v25 = vpop.f32.mrf.mxu1  ;;  %v16328_v57 = vpop.f32.mrf.mxu0  ;;  %13963 = vmatprep.subr.bf16.mxu1 %v14656_v33  ;;  %v5810_v48 = vshrl.u32 %v16281_v21, 16  ;;  %v5802_v17 = vshrl.u32 %v16258_v12, 16  ;;  %v6821_v3 = vrot.slane %v16335_v23, 1  ;;  %v5822_v12 = vshll.u32 %v16307_v16, 16 }
 0x2ef   :  { %18375 = vst [vmem:[#allocation100_spill] sm:$0xff] %v16326_v52  ;;  %18376 = vst [vmem:[#allocation101_spill] sm:$0xff] %v16328_v57  ;;  %v16331_v45 = vadd.f32 %v3973_v25, %v15874_v49  ;;  %v18378_v57 = vld [vmem:[#allocation16_spill] sm:$0xff]  ;;  %v16346_v25 = vld [vmem:[#allocation2 + $0x64] sm:$0xff]  }
 0x2f0   :  { %v13497_v38 = vpop.f32.mrf.mxu1  ;;  %13732 = vmatmul.mubr.bf16.gmra.mxu1 %v5793_v41  ;;  %v13629_v34 = vpop.f32.mrf.mxu0  ;;  %13864 = vmatmul.mubr.bf16.gmra.mxu0 %v6818_v46  ;;  %v6823_v21 = vrot.slane %v16346_v25, 1 }
 0x2f1   :  { %18377 = vst [vmem:[#allocation102_spill] sm:$0xff] %v16331_v45  ;;  %v16340_v52 = vadd.f32 %v13497_v38, %v18378_v57  ;;  %13735 = vmatprep.mubr.bf16.mxu1 %v5801_v2  ;;  %13867 = vmatprep.mubr.bf16.mxu0 %v6820_v35  ;;  %v14672_v57 = vld [vmem:[#allocation8 + $0x198] sm:$0xff]   ;;  %v5812_v38 = vor.u32 %v5810_v48, %v5808_v1  ;;  %v18384_v34 = vld [vmem:[#allocation18_spill] sm:$0xff] }
 0x2f2   :  { %v3985_v49 = vpop.f32.mrf.mxu1  ;;  %v16342_v61 = vpop.f32.mrf.mxu0  ;;  %13964 = vmatpush3.bf16.msra.mxu1 %v14656_v33  ;;  %v16364_v48 = vld [vmem:[#allocation2 + $0x6c] sm:$0xff]  }
 0x2f3   :  { %18379 = vst [vmem:[#allocation16_spill] sm:$0xff] %v16340_v52  ;;  %18380 = vst [vmem:[#allocation103_spill] sm:$0xff] %v16342_v61  ;;  %v16349_v41 = vadd.f32 %v3985_v49, %v18381_v43  ;;  %13965 = vmatprep.subr.bf16.mxu1 %v14664_v28  ;;  %v5804_v61 = vor.u32 %v5802_v17, %v5800_v51  ;;  %v5816_v52 = vrot.slane %v5814_v44, 1  ;;  %v5830_v17 = vshll.u32 %v16313_v5, 16 }
 0x2f4   :  { %v13498_v46 = vpop.f32.mrf.mxu1  ;;  %v16353_v2 = vpop.f32.mrf.mxu0  ;;  %v6824_v44 = vsel %vm3680_vm2, %v6821_v3, %v6823_v21 }
 0x2f5   :  { %18382 = vst [vmem:[#allocation17_spill] sm:$0xff] %v16349_v41  ;;  %18383 = vst [vmem:[#allocation104_spill] sm:$0xff] %v16353_v2  ;;  %v16357_v35 = vadd.f32 %v13498_v46, %v18384_v34  ;;  %v5809_v43 = vsel %vm2176_vm1, %v5804_v61, %v5808_v1  ;;  %v6822_v41 = vsel %vm3680_vm2, %v6819_v32, %v6821_v3  ;;  %v14679_v2 = vld [vmem:[#allocation8 + $0x190] sm:$0xff]   ;;  %v18387_v1 = vld [vmem:[#allocation19_spill] sm:$0xff]  ;;  %v5818_v32 = vshrl.u32 %v16291_v50, 16 }
 0x2f6   :  { %v3988_v33 = vpop.f32.mrf.mxu1  ;;  %v16359_v49 = vpop.f32.mrf.mxu0  ;;  %13966 = vmatpush3.bf16.msra.mxu1 %v14664_v28  ;;  %v5817_v46 = vsel %vm2176_vm1, %v5812_v38, %v5816_v52  ;;  %v16371_v28 = vld [vmem:[#allocation2 + $0x74] sm:$0xff]   ;;  %v6825_v3 = vrot.slane %v16364_v48, 1 }
 0x2f7   :  { %18385 = vst [vmem:[#allocation18_spill] sm:$0xff] %v16359_v49  ;;  %13967 = vmatprep.subr.bf16.mxu1 %v14672_v57  ;;  %v5824_v33 = vrot.slane %v5822_v12, 1  ;;  %v6827_v50 = vrot.slane %v16371_v28, 1  ;;  %v16390_v12 = vadd.f32 %v16213_v59, %v16245_v36 }
 0x2f8   :  { %v13501_v45 = vpop.f32.mrf.mxu1  ;;  %13736 = vmatmul.mubr.bf16.gmra.mxu1 %v5809_v43  ;;  %v16367_v51 = vpop.f32.mrf.mxu0  ;;  %13868 = vmatmul.mubr.bf16.gmra.mxu0 %v6822_v41  ;;  %v16381_v41 = vadd.f32 %v16209_v29, %v16240_v54  ;;  %v5838_v54 = vshll.u32 %v16335_v23, 16 }
 0x2f9   :  { %18386 = vst [vmem:[#allocation105_spill] sm:$0xff] %v16367_v51  ;;  %v16374_v61 = vadd.f32 %v13501_v45, %v18387_v1  ;;  %13739 = vmatprep.mubr.bf16.mxu1 %v5817_v46  ;;  %13871 = vmatprep.mubr.bf16.mxu0 %v6824_v44  ;;  %v5826_v45 = vshrl.u32 %v16307_v16, 16  ;;  %v5832_v1 = vrot.slane %v5830_v17, 1  ;;  %v18390_v16 = vld [vmem:[#allocation20_spill] sm:$0xff] }
 0x2fa   :  { %v4000_v34 = vpop.f32.mrf.mxu1  ;;  %v16377_v43 = vpop.f32.mrf.mxu0  ;;  %13968 = vmatpush3.bf16.msra.mxu1 %v14672_v57  ;;  %v5820_v57 = vor.u32 %v5818_v32, %v5816_v52  ;;  %v5842_v32 = vshrl.u32 %v16335_v23, 16 }
 0x2fb   :  { %18388 = vst [vmem:[#allocation19_spill] sm:$0xff] %v16377_v43  ;;  %13969 = vmatprep.subr.bf16.mxu1 %v14679_v2  ;;  %v5828_v34 = vor.u32 %v5826_v45, %v5824_v33  ;;  %v6826_v43 = vsel %vm3680_vm2, %v6823_v21, %v6825_v3  ;;  %v16412_v21 = vld [vmem:[#allocation2 + $0x7c] sm:$0xff]   ;;  %v5840_v45 = vrot.slane %v5838_v54, 1 }
 0x2fc   :  { %v13502_v38 = vpop.f32.mrf.mxu1  ;;  %v16385_v46 = vpop.f32.mrf.mxu0 }
 0x2fd   :  { %18389 = vst [vmem:[#allocation106_spill] sm:$0xff] %v16385_v46  ;;  %v16395_v38 = vadd.f32 %v16215_v0, %v16250_v11  ;;  %v5825_v46 = vsel %vm2176_vm1, %v5820_v57, %v5824_v33  ;;  %v5833_v36 = vsel %vm2176_vm1, %v5828_v34, %v5832_v1  ;;  %v16409_v0 = vadd.f32 %v16218_v8, %v16261_v22 }
 0x2fe   :  { %v4002_v44 = vpop.f32.mrf.mxu1  ;;  %v5014_v29 = vpop.f32.mrf.mxu0  ;;  %13970 = vmatpush3.bf16.msra.mxu1 %v14679_v2  ;;  %v6828_v2 = vsel %vm3680_vm2, %v6825_v3, %v6827_v50  ;;  %v5834_v11 = vshrl.u32 %v16313_v5, 16  ;;  %v5846_v57 = vshll.u32 %v16346_v25, 16  ;;  %v18392_v3 = vld [vmem:[#allocation21_spill] sm:$0xff]  ;;  %v6829_v8 = vrot.slane %v16412_v21, 1 }
 0x2ff   :  { %v16398_v17 = vadd.f32 %v4002_v44, %v18390_v16  ;;  %v5844_v34 = vor.u32 %v5842_v32, %v5840_v45  ;;  %v5854_v5 = vshll.u32 %v16364_v48, 16  ;;  %v16433_v32 = vld [vmem:[#allocation2 + $0x8c] sm:$0xff]  }
 0x300   :  { %v13505_v59 = vpop.f32.mrf.mxu1  ;;  %13740 = vmatmul.mubr.bf16.gmra.mxu1 %v5825_v46  ;;  %v16403_v52 = vpop.f32.mrf.mxu0  ;;  %13872 = vmatmul.mubr.bf16.gmra.mxu0 %v6826_v43  ;;  %v16415_v43 = vld [vmem:[#allocation2 + $0x84] sm:$0xff]   ;;  %v5836_v23 = vor.u32 %v5834_v11, %v5832_v1  ;;  %v6830_v11 = vsel %vm3680_vm2, %v6827_v50, %v6829_v8  ;;  %v14688_v50 = vld [vmem:[#allocation8 + $0x188] sm:$0xff]  }
 0x301   :  { %18391 = vst [vmem:[#allocation20_spill] sm:$0xff] %v16403_v52  ;;  %13743 = vmatprep.mubr.bf16.mxu1 %v5833_v36  ;;  %13875 = vmatprep.mubr.bf16.mxu0 %v6828_v2  ;;  %v6831_v16 = vrot.slane %v16415_v43, 1  ;;  %v18393_v59 = vld [vmem:[#allocation22_spill] sm:$0xff]  ;;  %v5848_v2 = vrot.slane %v5846_v57, 1  ;;  %v18396_v52 = vld [vmem:[#allocation23_spill] sm:$0xff] }
 0x302   :  { %v4014_v33 = vpop.f32.mrf.mxu1  ;;  %v5026_v46 = vpop.f32.mrf.mxu0  ;;  %v5841_v1 = vsel %vm2176_vm1, %v5836_v23, %v5840_v45  ;;  %v5850_v45 = vshrl.u32 %v16346_v25, 16  ;;  %13971 = vmatprep.subr.bf16.mxu1 %v14688_v50  ;;  %v5870_v25 = vshll.u32 %v16412_v21, 16 }
 0x303   :  { %v16418_v44 = vadd.f32 %v4014_v33, %v18392_v3  ;;  %v6832_v57 = vsel %vm3680_vm2, %v6829_v8, %v6831_v16  ;;  %v6833_v8 = vrot.slane %v16433_v32, 1  ;;  %13972 = vmatpush3.bf16.msra.mxu1 %v14688_v50 }
 0x304   :  { %v13506_v22 = vpop.f32.mrf.mxu1  ;;  %v13638_v29 = vpop.f32.mrf.mxu0  ;;  %v5872_v50 = vrot.slane %v5870_v25, 1 }
 0x305   :  { %v16424_v54 = vadd.f32 %v13506_v22, %v18393_v59  ;;  %v5849_v29 = vsel %vm2176_vm1, %v5844_v34, %v5848_v2  ;;  %v5856_v22 = vrot.slane %v5854_v5, 1  ;;  %v5862_v59 = vshll.u32 %v16371_v28, 16  ;;  %v18401_v5 = vld [vmem:[#allocation25_spill] sm:$0xff] }
 0x306   :  { %v4017_v36 = vpop.f32.mrf.mxu1  ;;  %v16426_v46 = vpop.f32.mrf.mxu0  ;;  %v5858_v34 = vshrl.u32 %v16364_v48, 16 }
 0x307   :  { %18394 = vst [vmem:[#allocation21_spill] sm:$0xff] %v16424_v54  ;;  %18395 = vst [vmem:[#allocation22_spill] sm:$0xff] %v16426_v46  ;;  %v16429_v33 = vadd.f32 %v4017_v36, %v18396_v52  ;;  %v18398_v46 = vld [vmem:[#allocation24_spill] sm:$0xff]  ;;  %v16517_v54 = vld [vmem:[#allocation2 + $0xbc] sm:$0xff]  }
 0x308   :  { %v13509_v3 = vpop.f32.mrf.mxu1  ;;  %13744 = vmatmul.mubr.bf16.gmra.mxu1 %v5841_v1  ;;  %v13641_v51 = vpop.f32.mrf.mxu0  ;;  %13876 = vmatmul.mubr.bf16.gmra.mxu0 %v6830_v11  ;;  %v5860_v11 = vor.u32 %v5858_v34, %v5856_v22 }
 0x309   :  { %18397 = vst [vmem:[#allocation23_spill] sm:$0xff] %v16429_v33  ;;  %v16439_v52 = vadd.f32 %v13509_v3, %v18398_v46  ;;  %13747 = vmatprep.mubr.bf16.mxu1 %v5849_v29  ;;  %13879 = vmatprep.mubr.bf16.mxu0 %v6832_v57  ;;  %v16445_v51 = vld [vmem:[#allocation2 + $0x94] sm:$0xff]   ;;  %v5864_v3 = vrot.slane %v5862_v59, 1  ;;  %v6834_v59 = vsel %vm3680_vm2, %v6831_v16, %v6833_v8  ;;  %v16473_v16 = vld [vmem:[#allocation2 + $0x9c] sm:$0xff]  }
 0x30a   :  { %v4029_v23 = vpop.f32.mrf.mxu1  ;;  %v16442_v36 = vpop.f32.mrf.mxu0  ;;  %v6835_v57 = vrot.slane %v16445_v51, 1 }
 0x30b   :  { %18399 = vst [vmem:[#allocation24_spill] sm:$0xff] %v16439_v52  ;;  %18400 = vst [vmem:[#allocation107_spill] sm:$0xff] %v16442_v36  ;;  %v16448_v1 = vadd.f32 %v4029_v23, %v18401_v5  ;;  %v18404_v36 = vld [vmem:[#allocation26_spill] sm:$0xff]  ;;  %v5852_v52 = vor.u32 %v5850_v45, %v5848_v2  ;;  %v5866_v5 = vshrl.u32 %v16371_v28, 16  ;;  %v18408_v45 = vld [vmem:[#allocation27_spill] sm:$0xff] }
 0x30c   :  { %v13510_v46 = vpop.f32.mrf.mxu1  ;;  %v16451_v29 = vpop.f32.mrf.mxu0  ;;  %v16468_v2 = vld [vmem:[#allocation2 + $0xa4] sm:$0xff]  }
 0x30d   :  { %18402 = vst [vmem:[#allocation25_spill] sm:$0xff] %v16448_v1  ;;  %18403 = vst [vmem:[#allocation108_spill] sm:$0xff] %v16451_v29  ;;  %v16456_v48 = vadd.f32 %v13510_v46, %v18404_v36  ;;  %v5857_v1 = vsel %vm2176_vm1, %v5852_v52, %v5856_v22  ;;  %v5865_v29 = vsel %vm2176_vm1, %v5860_v11, %v5864_v3  ;;  %v5878_v46 = vshll.u32 %v16415_v43, 16 }
 0x30e   :  { %v4032_v49 = vpop.f32.mrf.mxu1  ;;  %v16458_v23 = vpop.f32.mrf.mxu0  ;;  %v6836_v36 = vsel %vm3680_vm2, %v6833_v8, %v6835_v57  ;;  %v5868_v52 = vor.u32 %v5866_v5, %v5864_v3  ;;  %v6837_v11 = vrot.slane %v16473_v16, 1  ;;  %v18412_v3 = vld [vmem:[#allocation28_spill] sm:$0xff] }
 0x30f   :  { %18405 = vst [vmem:[#allocation26_spill] sm:$0xff] %v16456_v48  ;;  %18406 = vst [vmem:[#allocation109_spill] sm:$0xff] %v16458_v23  ;;  %v5874_v49 = vshrl.u32 %v16412_v21, 16 }
 0x310   :  { %v13513_v34 = vpop.f32.mrf.mxu1  ;;  %13748 = vmatmul.mubr.bf16.gmra.mxu1 %v5857_v1  ;;  %v16464_v33 = vpop.f32.mrf.mxu0  ;;  %13880 = vmatmul.mubr.bf16.gmra.mxu0 %v6834_v59  ;;  %v6839_v59 = vrot.slane %v16468_v2, 1 }
 0x311   :  { %18407 = vst [vmem:[#allocation110_spill] sm:$0xff] %v16464_v33  ;;  %v16471_v28 = vadd.f32 %v13513_v34, %v18408_v45  ;;  %13751 = vmatprep.mubr.bf16.mxu1 %v5865_v29  ;;  %13883 = vmatprep.mubr.bf16.mxu0 %v6836_v36  ;;  %v5876_v25 = vor.u32 %v5874_v49, %v5872_v50  ;;  %v5886_v34 = vshll.u32 %v16433_v32, 16  ;;  %v5880_v45 = vrot.slane %v5878_v46, 1 }
 0x312   :  { %v4044_v22 = vpop.f32.mrf.mxu1  ;;  %v16475_v1 = vpop.f32.mrf.mxu0  ;;  %v5873_v36 = vsel %vm2176_vm1, %v5868_v52, %v5872_v50  ;;  %v5882_v33 = vshrl.u32 %v16415_v43, 16  ;;  %v5890_v49 = vshrl.u32 %v16433_v32, 16  ;;  %v6840_v50 = vsel %vm3680_vm2, %v6837_v11, %v6839_v59  ;;  %v16497_v32 = vld [vmem:[#allocation2 + $0xb4] sm:$0xff]  }
 0x313   :  { %18409 = vst [vmem:[#allocation27_spill] sm:$0xff] %v16471_v28  ;;  %18410 = vst [vmem:[#allocation111_spill] sm:$0xff] %v16475_v1  ;;  %v6838_v1 = vsel %vm3680_vm2, %v6835_v57, %v6837_v11  ;;  %v5881_v23 = vsel %vm2176_vm1, %v5876_v25, %v5880_v45  ;;  %v5888_v52 = vrot.slane %v5886_v34, 1  ;;  %v5894_v46 = vshll.u32 %v16445_v51, 16  ;;  %v16495_v57 = vld [vmem:[#allocation2 + $0xac] sm:$0xff]  }
 0x314   :  { %v13514_v8 = vpop.f32.mrf.mxu1  ;;  %v16479_v21 = vpop.f32.mrf.mxu0  ;;  %v5884_v25 = vor.u32 %v5882_v33, %v5880_v45  ;;  %v5898_v33 = vshrl.u32 %v16445_v51, 16  ;;  %v14696_v45 = vld [vmem:[#allocation8 + $0x1e8] sm:$0xff]  }
 0x315   :  { %18411 = vst [vmem:[#allocation112_spill] sm:$0xff] %v16479_v21  ;;  %v14692_v8 = vld [vmem:[#allocation8 + $0x1f8] sm:$0xff]  }
 0x316   :  { %v4046_v29 = vpop.f32.mrf.mxu1  ;;  %v5058_v22 = vpop.f32.mrf.mxu0  ;;  %14083 = vmatprep.subr.bf16.mxu0 %v14692_v8 }
 0x317   :  { %v16485_v5 = vadd.f32 %v4046_v29, %v18412_v3  ;;  %v5892_v22 = vor.u32 %v5890_v49, %v5888_v52  ;;  %14084 = vmatpush3.bf16.msra.mxu0 %v14692_v8  ;;  %v5902_v3 = vshll.u32 %v16473_v16, 16  ;;  %v18420_v49 = vld [vmem:[#allocation31_spill] sm:$0xff] }
 0x318   :  { %v13517_v21 = vpop.f32.mrf.mxu1  ;;  %13752 = vmatmul.mubr.bf16.gmra.mxu1 %v5873_v36  ;;  %v16491_v28 = vpop.f32.mrf.mxu0  ;;  %13884 = vmatmul.mubr.bf16.gmra.mxu0 %v6838_v1  ;;  %v6841_v1 = vrot.slane %v16495_v57, 1 }
 0x319   :  { %18413 = vst [vmem:[#allocation28_spill] sm:$0xff] %v16485_v5  ;;  %18414 = vst [vmem:[#allocation113_spill] sm:$0xff] %v16491_v28  ;;  %13755 = vmatprep.mubr.bf16.mxu1 %v5881_v23  ;;  %13887 = vmatprep.mubr.bf16.mxu0 %v6840_v50  ;;  %v18415_v21 = vld [vmem:[#allocation29_spill] sm:$0xff]  ;;  %v14694_v23 = vld [vmem:[#allocation8 + $0x1f0] sm:$0xff]   ;;  %v6843_v50 = vrot.slane %v16497_v32, 1  ;;  %v5896_v5 = vrot.slane %v5894_v46, 1 }
 0x31a   :  { %v4058_v43 = vpop.f32.mrf.mxu1  ;;  %v5070_v29 = vpop.f32.mrf.mxu0  ;;  %v18417_v28 = vld [vmem:[#allocation30_spill] sm:$0xff]  ;;  %14085 = vmatprep.subr.bf16.mxu0 %v14694_v23 }
 0x31b   :  { %v16500_v36 = vadd.f32 %v4058_v43, %v18415_v21  ;;  %v5889_v21 = vsel %vm2176_vm1, %v5884_v25, %v5888_v52  ;;  %14086 = vmatpush3.bf16.msra.mxu0 %v14694_v23  ;;  %v6844_v51 = vsel %vm3680_vm2, %v6841_v1, %v6843_v50  ;;  %v14698_v23 = vld [vmem:[#allocation8 + $0x1e0] sm:$0xff]  }
 0x31c   :  { %v13518_v11 = vpop.f32.mrf.mxu1  ;;  %v13650_v34 = vpop.f32.mrf.mxu0  ;;  %14087 = vmatprep.subr.bf16.mxu0 %v14696_v45 }
 0x31d   :  { %18416 = vst [vmem:[#allocation29_spill] sm:$0xff] %v16500_v36  ;;  %v16506_v29 = vadd.f32 %v13518_v11, %v18417_v28  ;;  %v5897_v34 = vsel %vm2176_vm1, %v5892_v22, %v5896_v5  ;;  %v6842_v36 = vsel %vm3680_vm2, %v6839_v59, %v6841_v1  ;;  %v5904_v11 = vrot.slane %v5902_v3, 1  ;;  %v16525_v22 = vld [vmem:[#allocation2 + $0xc4] sm:$0xff]  }
 0x31e   :  { %v4061_v48 = vpop.f32.mrf.mxu1  ;;  %v16508_v43 = vpop.f32.mrf.mxu0  ;;  %v5900_v3 = vor.u32 %v5898_v33, %v5896_v5  ;;  %v6845_v1 = vrot.slane %v16517_v54, 1  ;;  %v14701_v5 = vld [vmem:[#allocation8 + $0x1d8] sm:$0xff]  }
 0x31f   :  { %18418 = vst [vmem:[#allocation30_spill] sm:$0xff] %v16506_v29  ;;  %18419 = vst [vmem:[#allocation114_spill] sm:$0xff] %v16508_v43  ;;  %v16512_v8 = vadd.f32 %v4061_v48, %v18420_v49  ;;  %v5906_v43 = vshrl.u32 %v16473_v16, 16  ;;  %v5910_v48 = vshll.u32 %v16468_v2, 16  ;;  %v18422_v49 = vld [vmem:[#allocation32_spill] sm:$0xff]  ;;  %14088 = vmatpush3.bf16.msra.mxu0 %v14696_v45  ;;  %v5914_v45 = vshrl.u32 %v16468_v2, 16 }
 0x320   :  { %v13521_v28 = vpop.f32.mrf.mxu1  ;;  %13756 = vmatmul.mubr.bf16.gmra.mxu1 %v5889_v21  ;;  %v13653_v46 = vpop.f32.mrf.mxu0  ;;  %13888 = vmatmul.mubr.bf16.gmra.mxu0 %v6842_v36  ;;  %v18424_v21 = vld [vmem:[#allocation33_spill] sm:$0xff]  ;;  %v5905_v33 = vsel %vm2176_vm1, %v5900_v3, %v5904_v11  ;;  %v18429_v3 = vld [vmem:[#allocation35_spill] sm:$0xff] }
 0x321   :  { %18421 = vst [vmem:[#allocation31_spill] sm:$0xff] %v16512_v8  ;;  %v16523_v52 = vadd.f32 %v13521_v28, %v18422_v49  ;;  %13759 = vmatprep.mubr.bf16.mxu1 %v5897_v34  ;;  %13891 = vmatprep.mubr.bf16.mxu0 %v6844_v51  ;;  %v5908_v46 = vor.u32 %v5906_v43, %v5904_v11  ;;  %v5912_v8 = vrot.slane %v5910_v48, 1  ;;  %v5918_v34 = vshll.u32 %v16495_v57, 16  ;;  %v14699_v49 = vld [vmem:[#allocation8 + $0x180] sm:$0xff]   ;;  %v16541_v48 = vld [vmem:[#allocation2 + $0xcc] sm:$0xff]  }
 0x322   :  { %v4073_v59 = vpop.f32.mrf.mxu1  ;;  %v5084_v25 = vpop.f32.mrf.mxu0  ;;  %v6847_v51 = vrot.slane %v16525_v22, 1  ;;  %14089 = vmatprep.subr.bf16.mxu0 %v14698_v23  ;;  %13973 = vmatprep.subr.bf16.mxu1 %v14699_v49  ;;  %v6846_v43 = vsel %vm3680_vm2, %v6843_v50, %v6845_v1  ;;  %v5922_v11 = vshrl.u32 %v16495_v57, 16 }
 0x323   :  { %18423 = vst [vmem:[#allocation32_spill] sm:$0xff] %v16523_v52  ;;  %v16528_v36 = vadd.f32 %v4073_v59, %v18424_v21  ;;  %v18426_v25 = vld [vmem:[#allocation34_spill] sm:$0xff]  ;;  %v16536_v21 = vld [vmem:[#allocation2 + $0xd4] sm:$0xff]   ;;  %14090 = vmatpush3.bf16.msra.mxu0 %v14698_v23  ;;  %13974 = vmatpush3.bf16.msra.mxu1 %v14699_v49  ;;  %v5926_v49 = vshll.u32 %v16497_v32, 16 }
 0x324   :  { %v13522_v16 = vpop.f32.mrf.mxu1  ;;  %v13654_v28 = vpop.f32.mrf.mxu0  ;;  %14091 = vmatprep.subr.bf16.mxu0 %v14701_v5 }
 0x325   :  { %18425 = vst [vmem:[#allocation33_spill] sm:$0xff] %v16528_v36  ;;  %v16534_v52 = vadd.f32 %v13522_v16, %v18426_v25  ;;  %v5913_v16 = vsel %vm2176_vm1, %v5908_v46, %v5912_v8  ;;  %v5920_v25 = vrot.slane %v5918_v34, 1  ;;  %v5916_v46 = vor.u32 %v5914_v45, %v5912_v8  ;;  %v14702_v34 = vld [vmem:[#allocation8 + $0x1d0] sm:$0xff]  }
 0x326   :  { %v4076_v29 = vpop.f32.mrf.mxu1  ;;  %v5086_v59 = vpop.f32.mrf.mxu0  ;;  %v5930_v45 = vshrl.u32 %v16497_v32, 16  ;;  %v5942_v32 = vshll.u32 %v16525_v22, 16 }
 0x327   :  { %18427 = vst [vmem:[#allocation34_spill] sm:$0xff] %v16534_v52  ;;  %v6848_v59 = vsel %vm3680_vm2, %v6845_v1, %v6847_v51  ;;  %14092 = vmatpush3.bf16.msra.mxu0 %v14701_v5  ;;  %v5921_v8 = vsel %vm2176_vm1, %v5916_v46, %v5920_v25 }
 0x328   :  { %v13525_v28 = vpop.f32.mrf.mxu1  ;;  %13760 = vmatmul.mubr.bf16.gmra.mxu1 %v5905_v33  ;;  %v16544_v29 = vpop.f32.mrf.mxu0  ;;  %13892 = vmatmul.mubr.bf16.gmra.mxu0 %v6846_v43  ;;  %v6851_v33 = vrot.slane %v16536_v21, 1  ;;  %v6849_v43 = vrot.slane %v16541_v48, 1 }
 0x329   :  { %18428 = vst [vmem:[#allocation115_spill] sm:$0xff] %v16544_v29  ;;  %v16549_v50 = vadd.f32 %v13525_v28, %v18429_v3  ;;  %13763 = vmatprep.mubr.bf16.mxu1 %v5913_v16  ;;  %13895 = vmatprep.mubr.bf16.mxu0 %v6848_v59  ;;  %v5924_v29 = vor.u32 %v5922_v11, %v5920_v25  ;;  %v5928_v16 = vrot.slane %v5926_v49, 1  ;;  %v5934_v3 = vshll.u32 %v16517_v54, 16  ;;  %v14705_v11 = vld [vmem:[#allocation8 + $0x1c8] sm:$0xff]  }
 0x32a   :  { %v4088_v2 = vpop.f32.mrf.mxu1  ;;  %v5096_v23 = vpop.f32.mrf.mxu0  ;;  %14093 = vmatprep.subr.bf16.mxu0 %v14702_v34  ;;  %v6850_v5 = vsel %vm3680_vm2, %v6847_v51, %v6849_v43 }
 0x32b   :  { %18430 = vst [vmem:[#allocation35_spill] sm:$0xff] %v16549_v50  ;;  %v6852_v2 = vsel %vm3680_vm2, %v6849_v43, %v6851_v33  ;;  %v18432_v23 = vld [vmem:[#allocation36_spill] sm:$0xff]  ;;  %14094 = vmatpush3.bf16.msra.mxu0 %v14702_v34  ;;  %v5929_v49 = vsel %vm2176_vm1, %v5924_v29, %v5928_v16  ;;  %v5936_v46 = vrot.slane %v5934_v3, 1  ;;  %v16571_v43 = vld [vmem:[#allocation2 + $0xe4] sm:$0xff]   ;;  %v5932_v34 = vor.u32 %v5930_v45, %v5928_v16 }
 0x32c   :  { %v13526_v1 = vpop.f32.mrf.mxu1  ;;  %v16554_v57 = vpop.f32.mrf.mxu0  ;;  %14095 = vmatprep.subr.bf16.mxu0 %v14705_v11  ;;  %v5954_v16 = vshrl.u32 %v16541_v48, 16  ;;  %v5958_v45 = vshll.u32 %v16536_v21, 16 }
 0x32d   :  { %18431 = vst [vmem:[#allocation116_spill] sm:$0xff] %v16554_v57  ;;  %v5938_v57 = vshrl.u32 %v16517_v54, 16 }
 0x32e   :  { %v4090_v28 = vpop.f32.mrf.mxu1  ;;  %v5098_v59 = vpop.f32.mrf.mxu0 }
 0x32f   :  { %v16559_v50 = vadd.f32 %v4090_v28, %v18432_v23  ;;  %v16568_v28 = vld [vmem:[#allocation2 + $0xdc] sm:$0xff]   ;;  %14096 = vmatpush3.bf16.msra.mxu0 %v14705_v11  ;;  %v14708_v23 = vld [vmem:[#allocation8 + $0x1c0] sm:$0xff]   ;;  %v5937_v11 = vsel %vm2176_vm1, %v5932_v34, %v5936_v46 }
 0x330   :  { %v13529_v1 = vpop.f32.mrf.mxu1  ;;  %13764 = vmatmul.mubr.bf16.gmra.mxu1 %v5921_v8  ;;  %v16565_v59 = vpop.f32.mrf.mxu0  ;;  %13896 = vmatmul.mubr.bf16.gmra.mxu0 %v6850_v5  ;;  %v6853_v29 = vrot.slane %v16568_v28, 1  ;;  %v5940_v5 = vor.u32 %v5938_v57, %v5936_v46  ;;  %v5946_v57 = vshrl.u32 %v16525_v22, 16 }
 0x331   :  { %18433 = vst [vmem:[#allocation36_spill] sm:$0xff] %v16559_v50  ;;  %18434 = vst [vmem:[#allocation117_spill] sm:$0xff] %v16565_v59  ;;  %13767 = vmatprep.mubr.bf16.mxu1 %v5929_v49  ;;  %13899 = vmatprep.mubr.bf16.mxu0 %v6852_v2  ;;  %v5950_v2 = vshll.u32 %v16541_v48, 16  ;;  %v6855_v1 = vrot.slane %v16571_v43, 1  ;;  %v16588_v48 = vld [vmem:[#allocation2 + $0xec] sm:$0xff]  }
 0x332   :  { %v4102_v25 = vpop.f32.mrf.mxu1  ;;  %v5110_v51 = vpop.f32.mrf.mxu0  ;;  %v6854_v3 = vsel %vm3680_vm2, %v6851_v33, %v6853_v29  ;;  %14097 = vmatprep.subr.bf16.mxu0 %v14708_v23 }
 0x333   :  { %v5944_v25 = vrot.slane %v5942_v32, 1  ;;  %14098 = vmatpush3.bf16.msra.mxu0 %v14708_v23  ;;  %v5952_v33 = vrot.slane %v5950_v2, 1  ;;  %v6856_v32 = vsel %vm3680_vm2, %v6853_v29, %v6855_v1  ;;  %v5960_v23 = vrot.slane %v5958_v45, 1 }
 0x334   :  { %v13530_v8 = vpop.f32.mrf.mxu1  ;;  %v13662_v54 = vpop.f32.mrf.mxu0  ;;  %v5966_v29 = vshll.u32 %v16568_v28, 16 }
 0x335   :  { %v5945_v54 = vsel %vm2176_vm1, %v5940_v5, %v5944_v25  ;;  %v5956_v22 = vor.u32 %v5954_v16, %v5952_v33  ;;  %v5948_v5 = vor.u32 %v5946_v57, %v5944_v25 }
 0x336   :  { %v4104_v49 = vpop.f32.mrf.mxu1  ;;  %v16577_v51 = vpop.f32.mrf.mxu0 }
 0x337   :  { %18435 = vst [vmem:[#allocation118_spill] sm:$0xff] %v16577_v51  ;;  %v18436_v49 = vld [vmem:[#allocation37_spill] sm:$0xff]  ;;  %v5961_v45 = vsel %vm2176_vm1, %v5956_v22, %v5960_v23  ;;  %v5953_v25 = vsel %vm2176_vm1, %v5948_v5, %v5952_v33 }
 0x338   :  { %v13533_v8 = vpop.f32.mrf.mxu1  ;;  %13768 = vmatmul.mubr.bf16.gmra.mxu1 %v5937_v11  ;;  %v13665_v59 = vpop.f32.mrf.mxu0  ;;  %13900 = vmatmul.mubr.bf16.gmra.mxu0 %v6854_v3  ;;  %v16592_v11 = vld [vmem:[#allocation2 + $0xf4] sm:$0xff]  }
 0x339   :  { %v16586_v51 = vadd.f32 %v13533_v8, %v18436_v49  ;;  %13771 = vmatprep.mubr.bf16.mxu1 %v5945_v54  ;;  %13903 = vmatprep.mubr.bf16.mxu0 %v6856_v32  ;;  %v6857_v59 = vrot.slane %v16588_v48, 1  ;;  %v6859_v8 = vrot.slane %v16592_v11, 1  ;;  %v18440_v54 = vld [vmem:[#allocation38_spill] sm:$0xff]  ;;  %v5962_v49 = vshrl.u32 %v16536_v21, 16 }
 0x33a   :  { %v4114_v46 = vpop.f32.mrf.mxu1  ;;  %v16590_v34 = vpop.f32.mrf.mxu0  ;;  %v5970_v21 = vshrl.u32 %v16568_v28, 16 }
 0x33b   :  { %18437 = vst [vmem:[#allocation37_spill] sm:$0xff] %v16586_v51  ;;  %18438 = vst [vmem:[#allocation119_spill] sm:$0xff] %v16590_v34  ;;  %v6858_v57 = vsel %vm3680_vm2, %v6855_v1, %v6857_v59  ;;  %v16608_v34 = vld [vmem:[#allocation8 + $0x238] sm:$0xff]   ;;  %v5964_v33 = vor.u32 %v5962_v49, %v5960_v23  ;;  %v16619_v1 = vld [vmem:[#allocation2 + $0xfc] sm:$0xff]  }
 0x33c   :  { %v13534_v2 = vpop.f32.mrf.mxu1  ;;  %v16595_v3 = vpop.f32.mrf.mxu0  ;;  %14207 = vmatprep.subr.bf16.mxu1 %v16608_v34 }
 0x33d   :  { %18439 = vst [vmem:[#allocation120_spill] sm:$0xff] %v16595_v3  ;;  %v16600_v32 = vadd.f32 %v13534_v2, %v18440_v54  ;;  %v5968_v2 = vrot.slane %v5966_v29, 1  ;;  %v6860_v54 = vsel %vm3680_vm2, %v6857_v59, %v6859_v8  ;;  %v6861_v59 = vrot.slane %v16619_v1, 1 }
 0x33e   :  { %v4116_v46 = vpop.f32.mrf.mxu1  ;;  %v16603_v16 = vpop.f32.mrf.mxu0 }
 0x33f   :  { %18441 = vst [vmem:[#allocation38_spill] sm:$0xff] %v16600_v32  ;;  %18442 = vst [vmem:[#allocation121_spill] sm:$0xff] %v16603_v16  ;;  %v16614_v46 = vld [vmem:[#allocation2 + $0x104] sm:$0xff]   ;;  %v18444_v16 = vld [vmem:[#allocation39_spill] sm:$0xff]  ;;  %v5972_v29 = vor.u32 %v5970_v21, %v5968_v2  ;;  %v5969_v49 = vsel %vm2176_vm1, %v5964_v33, %v5968_v2  ;;  %v5978_v32 = vshrl.u32 %v16571_v43, 16  ;;  %v5986_v33 = vshrl.u32 %v16588_v48, 16 }
 0x340   :  { %v13537_v3 = vpop.f32.mrf.mxu1  ;;  %13772 = vmatmul.mubr.bf16.gmra.mxu1 %v5953_v25  ;;  %v16610_v51 = vpop.f32.mrf.mxu0  ;;  %13904 = vmatmul.mubr.bf16.gmra.mxu0 %v6858_v57  ;;  %v5974_v57 = vshll.u32 %v16571_v43, 16  ;;  %v6863_v23 = vrot.slane %v16614_v46, 1  ;;  %v5990_v43 = vshll.u32 %v16592_v11, 16 }
 0x341   :  { %18443 = vst [vmem:[#allocation122_spill] sm:$0xff] %v16610_v51  ;;  %v16617_v22 = vadd.f32 %v13537_v3, %v18444_v16  ;;  %13775 = vmatprep.mubr.bf16.mxu1 %v5961_v45  ;;  %13907 = vmatprep.mubr.bf16.mxu0 %v6860_v54  ;;  %v5982_v3 = vshll.u32 %v16588_v48, 16 }
 0x342   :  { %v4128_v5 = vpop.f32.mrf.mxu1  ;;  %v16621_v25 = vpop.f32.mrf.mxu0  ;;  %v5976_v45 = vrot.slane %v5974_v57, 1  ;;  %v6864_v2 = vsel %vm3680_vm2, %v6861_v59, %v6863_v23  ;;  %v16641_v57 = vld [vmem:[#allocation2 + $0x10c] sm:$0xff]  }
 0x343   :  { %18445 = vst [vmem:[#allocation39_spill] sm:$0xff] %v16617_v22  ;;  %18446 = vst [vmem:[#allocation123_spill] sm:$0xff] %v16621_v25  ;;  %v18448_v5 = vld [vmem:[#allocation40_spill] sm:$0xff]  ;;  %v6862_v22 = vsel %vm3680_vm2, %v6859_v8, %v6861_v59  ;;  %v5984_v50 = vrot.slane %v5982_v3, 1  ;;  %v5998_v59 = vshll.u32 %v16619_v1, 16 }
 0x344   :  { %v13538_v28 = vpop.f32.mrf.mxu1  ;;  %v16626_v51 = vpop.f32.mrf.mxu0  ;;  %v5977_v21 = vsel %vm2176_vm1, %v5972_v29, %v5976_v45 }
 0x345   :  { %18447 = vst [vmem:[#allocation124_spill] sm:$0xff] %v16626_v51  ;;  %v5988_v48 = vor.u32 %v5986_v33, %v5984_v50  ;;  %v6000_v33 = vrot.slane %v5998_v59, 1  ;;  %v18460_v59 = vld [vmem:[#allocation45_spill] sm:$0xff] }
 0x346   :  { %v4130_v16 = vpop.f32.mrf.mxu1  ;;  %v5142_v54 = vpop.f32.mrf.mxu0 }
 0x347   :  { %v16632_v25 = vadd.f32 %v4130_v16, %v18448_v5  ;;  %v16644_v54 = vld [vmem:[#allocation2 + $0x114] sm:$0xff]   ;;  %v5980_v5 = vor.u32 %v5978_v32, %v5976_v45 }
 0x348   :  { %v13541_v28 = vpop.f32.mrf.mxu1  ;;  %13776 = vmatmul.mubr.bf16.gmra.mxu1 %v5969_v49  ;;  %v16637_v51 = vpop.f32.mrf.mxu0  ;;  %13908 = vmatmul.mubr.bf16.gmra.mxu0 %v6862_v22  ;;  %v18451_v49 = vld [vmem:[#allocation41_spill] sm:$0xff]  ;;  %v6865_v22 = vrot.slane %v16641_v57, 1 }
 0x349   :  { %18449 = vst [vmem:[#allocation40_spill] sm:$0xff] %v16632_v25  ;;  %18450 = vst [vmem:[#allocation125_spill] sm:$0xff] %v16637_v51  ;;  %13779 = vmatprep.mubr.bf16.mxu1 %v5977_v21  ;;  %13911 = vmatprep.mubr.bf16.mxu0 %v6864_v2  ;;  %v6867_v21 = vrot.slane %v16644_v54, 1  ;;  %v18453_v2 = vld [vmem:[#allocation42_spill] sm:$0xff]  ;;  %v5992_v25 = vrot.slane %v5990_v43, 1  ;;  %v5985_v45 = vsel %vm2176_vm1, %v5980_v5, %v5984_v50 }
 0x34a   :  { %v4142_v16 = vpop.f32.mrf.mxu1  ;;  %v5154_v8 = vpop.f32.mrf.mxu0  ;;  %v16674_v5 = vld [vmem:[#allocation2 + $0x124] sm:$0xff]  }
 0x34b   :  { %v16647_v29 = vadd.f32 %v4142_v16, %v18451_v49  ;;  %v5994_v16 = vshrl.u32 %v16592_v11, 16  ;;  %v18455_v49 = vld [vmem:[#allocation43_spill] sm:$0xff]  ;;  %v6868_v43 = vsel %vm3680_vm2, %v6865_v22, %v6867_v21  ;;  %v6002_v11 = vshrl.u32 %v16619_v1, 16 }
 0x34c   :  { %v13542_v3 = vpop.f32.mrf.mxu1  ;;  %v13674_v28 = vpop.f32.mrf.mxu0 }
 0x34d   :  { %18452 = vst [vmem:[#allocation41_spill] sm:$0xff] %v16647_v29  ;;  %v16653_v51 = vadd.f32 %v13542_v3, %v18453_v2  ;;  %v6866_v29 = vsel %vm3680_vm2, %v6863_v23, %v6865_v22  ;;  %v16663_v28 = vld [vmem:[#allocation2 + $0x11c] sm:$0xff]   ;;  %v5993_v3 = vsel %vm2176_vm1, %v5988_v48, %v5992_v25  ;;  %v6004_v1 = vor.u32 %v6002_v11, %v6000_v33 }
 0x34e   :  { %v4145_v8 = vpop.f32.mrf.mxu1  ;;  %v16655_v52 = vpop.f32.mrf.mxu0  ;;  %v6869_v22 = vrot.slane %v16663_v28, 1 }
 0x34f   :  { %18454 = vst [vmem:[#allocation42_spill] sm:$0xff] %v16655_v52  ;;  %v16659_v32 = vadd.f32 %v4145_v8, %v18455_v49  ;;  %v6006_v8 = vshll.u32 %v16614_v46, 16  ;;  %v18457_v49 = vld [vmem:[#allocation44_spill] sm:$0xff] }
 0x350   :  { %v13545_v36 = vpop.f32.mrf.mxu1  ;;  %13780 = vmatmul.mubr.bf16.gmra.mxu1 %v5985_v45  ;;  %v13677_v2 = vpop.f32.mrf.mxu0  ;;  %13912 = vmatmul.mubr.bf16.gmra.mxu0 %v6866_v29  ;;  %v5996_v29 = vor.u32 %v5994_v16, %v5992_v25  ;;  %v6870_v25 = vsel %vm3680_vm2, %v6867_v21, %v6869_v22  ;;  %v6010_v16 = vshrl.u32 %v16614_v46, 16  ;;  %v16702_v46 = vld [vmem:[#allocation2 + $0x12c] sm:$0xff]  }
 0x351   :  { %18456 = vst [vmem:[#allocation43_spill] sm:$0xff] %v16659_v32  ;;  %v16670_v52 = vadd.f32 %v13545_v36, %v18457_v49  ;;  %13783 = vmatprep.mubr.bf16.mxu1 %v5993_v3  ;;  %13915 = vmatprep.mubr.bf16.mxu0 %v6868_v43  ;;  %v6008_v2 = vrot.slane %v6006_v8, 1  ;;  %v6014_v36 = vshll.u32 %v16641_v57, 16  ;;  %v6871_v3 = vrot.slane %v16674_v5, 1  ;;  %v18462_v43 = vld [vmem:[#allocation46_spill] sm:$0xff] }
 0x352   :  { %v4157_v50 = vpop.f32.mrf.mxu1  ;;  %v16672_v23 = vpop.f32.mrf.mxu0 }
 0x353   :  { %18458 = vst [vmem:[#allocation44_spill] sm:$0xff] %v16670_v52  ;;  %18459 = vst [vmem:[#allocation126_spill] sm:$0xff] %v16672_v23  ;;  %v16677_v48 = vadd.f32 %v4157_v50, %v18460_v59  ;;  %v6001_v50 = vsel %vm2176_vm1, %v5996_v29, %v6000_v33  ;;  %v6009_v8 = vsel %vm2176_vm1, %v6004_v1, %v6008_v2  ;;  %v6022_v1 = vshll.u32 %v16644_v54, 16 }
 0x354   :  { %v13546_v45 = vpop.f32.mrf.mxu1  ;;  %v16680_v32 = vpop.f32.mrf.mxu0 }
 0x355   :  { %18461 = vst [vmem:[#allocation45_spill] sm:$0xff] %v16680_v32  ;;  %v16685_v49 = vadd.f32 %v13546_v45, %v18462_v43  ;;  %v6016_v32 = vrot.slane %v6014_v36, 1  ;;  %v6872_v45 = vsel %vm3680_vm2, %v6869_v22, %v6871_v3  ;;  %v16697_v43 = vld [vmem:[#allocation2 + $0x134] sm:$0xff]   ;;  %v6873_v36 = vrot.slane %v16702_v46, 1 }
 0x356   :  { %v4160_v23 = vpop.f32.mrf.mxu1  ;;  %v16687_v52 = vpop.f32.mrf.mxu0 }
 0x357   :  { %18463 = vst [vmem:[#allocation46_spill] sm:$0xff] %v16687_v52  ;;  %v6018_v23 = vshrl.u32 %v16641_v57, 16  ;;  %v18465_v52 = vld [vmem:[#allocation48_spill] sm:$0xff] }
 0x358   :  { %v13549_v11 = vpop.f32.mrf.mxu1  ;;  %13784 = vmatmul.mubr.bf16.gmra.mxu1 %v6001_v50  ;;  %v16693_v59 = vpop.f32.mrf.mxu0  ;;  %13916 = vmatmul.mubr.bf16.gmra.mxu0 %v6870_v25  ;;  %v6012_v50 = vor.u32 %v6010_v16, %v6008_v2  ;;  %v6874_v2 = vsel %vm3680_vm2, %v6871_v3, %v6873_v36  ;;  %v6026_v16 = vshrl.u32 %v16644_v54, 16  ;;  %v6038_v54 = vshll.u32 %v16674_v5, 16 }
 0x359   :  { %18464 = vst [vmem:[#allocation127_spill] sm:$0xff] %v16693_v59  ;;  %v16700_v33 = vadd.f32 %v13549_v11, %v18465_v52  ;;  %13787 = vmatprep.mubr.bf16.mxu1 %v6009_v8  ;;  %13919 = vmatprep.mubr.bf16.mxu0 %v6872_v45  ;;  %v6020_v25 = vor.u32 %v6018_v23, %v6016_v32  ;;  %v6875_v59 = vrot.slane %v16697_v43, 1  ;;  %v6024_v11 = vrot.slane %v6022_v1, 1 }
 0x35a   :  { %v4172_v21 = vpop.f32.mrf.mxu1  ;;  %v16704_v29 = vpop.f32.mrf.mxu0  ;;  %v6030_v45 = vshll.u32 %v16663_v28, 16 }
 0x35b   :  { %18466 = vst [vmem:[#allocation48_spill] sm:$0xff] %v16704_v29  ;;  %v6017_v29 = vsel %vm2176_vm1, %v6012_v50, %v6016_v32  ;;  %v6025_v23 = vsel %vm2176_vm1, %v6020_v25, %v6024_v11  ;;  %v6876_v1 = vsel %vm3680_vm2, %v6873_v36, %v6875_v59  ;;  %v6028_v25 = vor.u32 %v6026_v16, %v6024_v11 }
 0x35c   :  { %v13550_v22 = vpop.f32.mrf.mxu1  ;;  %v16708_v57 = vpop.f32.mrf.mxu0  ;;  %v6032_v50 = vrot.slane %v6030_v45, 1  ;;  %v6046_v36 = vshll.u32 %v16702_v46, 16 }
 0x35d   :  { %18467 = vst [vmem:[#allocation128_spill] sm:$0xff] %v16708_v57 }
 0x35e   :  { %v4174_v52 = vpop.f32.mrf.mxu1  ;;  %v5186_v8 = vpop.f32.mrf.mxu0  ;;  %v6033_v16 = vsel %vm2176_vm1, %v6028_v25, %v6032_v50  ;;  %v16756_v25 = vld [vmem:[#allocation2 + $0x154] sm:$0xff]  }
 0x35f   :  { %v16713_v21 = vadd.f32 %v4174_v52, %v16045_v7  ;;  %v6034_v8 = vshrl.u32 %v16663_v28, 16  ;;  %v16723_v7 = vld [vmem:[#allocation2 + $0x13c] sm:$0xff]   ;;  %v16726_v52 = vld [vmem:[#allocation2 + $0x144] sm:$0xff]  }
 0x360   :  { %v13553_v22 = vpop.f32.mrf.mxu1  ;;  %13788 = vmatmul.mubr.bf16.gmra.mxu1 %v6017_v29  ;;  %v16719_v57 = vpop.f32.mrf.mxu0  ;;  %13920 = vmatmul.mubr.bf16.gmra.mxu0 %v6874_v2  ;;  %v6877_v2 = vrot.slane %v16723_v7, 1 }
 0x361   :  { %18468 = vst [vmem:[#allocation129_spill] sm:$0xff] %v16713_v21  ;;  %18469 = vst [vmem:[#allocation130_spill] sm:$0xff] %v16719_v57  ;;  %13791 = vmatprep.mubr.bf16.mxu1 %v6025_v23  ;;  %13923 = vmatprep.mubr.bf16.mxu0 %v6876_v1  ;;  %v6036_v22 = vor.u32 %v6034_v8, %v6032_v50  ;;  %v6879_v1 = vrot.slane %v16726_v52, 1  ;;  %v6040_v57 = vrot.slane %v6038_v54, 1  ;;  %v6048_v8 = vrot.slane %v6046_v36, 1 }
 0x362   :  { %v4186_v32 = vpop.f32.mrf.mxu1  ;;  %v5198_v3 = vpop.f32.mrf.mxu0 }
 0x363   :  { %v16729_v29 = vadd.f32 %v4186_v32, %v16077_v63  ;;  %v6042_v63 = vshrl.u32 %v16674_v5, 16  ;;  %v6878_v32 = vsel %vm3680_vm2, %v6875_v59, %v6877_v2  ;;  %v6880_v54 = vsel %vm3680_vm2, %v6877_v2, %v6879_v1 }
 0x364   :  { %v13554_v28 = vpop.f32.mrf.mxu1  ;;  %v13686_v23 = vpop.f32.mrf.mxu0  ;;  %v6050_v5 = vshrl.u32 %v16702_v46, 16 }
 0x365   :  { %18470 = vst [vmem:[#allocation131_spill] sm:$0xff] %v16729_v29  ;;  %v16735_v45 = vadd.f32 %v13554_v28, %v16095_v37  ;;  %v16745_v23 = vld [vmem:[#allocation2 + $0x14c] sm:$0xff]   ;;  %v6041_v37 = vsel %vm2176_vm1, %v6036_v22, %v6040_v57  ;;  %v6044_v22 = vor.u32 %v6042_v63, %v6040_v57  ;;  %v6058_v63 = vshrl.u32 %v16697_v43, 16 }
 0x366   :  { %v4189_v3 = vpop.f32.mrf.mxu1  ;;  %v16737_v21 = vpop.f32.mrf.mxu0  ;;  %v6881_v2 = vrot.slane %v16745_v23, 1  ;;  %v6052_v46 = vor.u32 %v6050_v5, %v6048_v8 }
 0x367   :  { %v16741_v11 = vadd.f32 %v4189_v3, %v16104_v15  ;;  %v6054_v15 = vshll.u32 %v16697_v43, 16  ;;  %v16784_v43 = vld [vmem:[#allocation2 + $0x15c] sm:$0xff]  }
 0x368   :  { %v13557_v29 = vpop.f32.mrf.mxu1  ;;  %13792 = vmatmul.mubr.bf16.gmra.mxu1 %v6033_v16  ;;  %v13689_v28 = vpop.f32.mrf.mxu0  ;;  %13924 = vmatmul.mubr.bf16.gmra.mxu0 %v6878_v32  ;;  %v6882_v57 = vsel %vm3680_vm2, %v6879_v1, %v6881_v2 }
 0x369   :  { %v16752_v3 = vadd.f32 %v13557_v29, %v16125_v30  ;;  %13795 = vmatprep.mubr.bf16.mxu1 %v6041_v37  ;;  %13927 = vmatprep.mubr.bf16.mxu0 %v6880_v54  ;;  %v6056_v32 = vrot.slane %v6054_v15, 1  ;;  %v6062_v30 = vshll.u32 %v16723_v7, 16  ;;  %v6883_v29 = vrot.slane %v16756_v25, 1 }
 0x36a   :  { %v4201_v59 = vpop.f32.mrf.mxu1  ;;  %v16754_v50 = vpop.f32.mrf.mxu0 }
 0x36b   :  { %18471 = vst [vmem:[#allocation132_spill] sm:$0xff] %v16754_v50  ;;  %v16759_v36 = vadd.f32 %v4201_v59, %v16132_v40  ;;  %v6049_v40 = vsel %vm2176_vm1, %v6044_v22, %v6048_v8  ;;  %v6057_v15 = vsel %vm2176_vm1, %v6052_v46, %v6056_v32  ;;  %v6070_v46 = vshll.u32 %v16726_v52, 16 }
 0x36c   :  { %v13558_v16 = vpop.f32.mrf.mxu1  ;;  %v16762_v28 = vpop.f32.mrf.mxu0 }
 0x36d   :  { %18472 = vst [vmem:[#allocation133_spill] sm:$0xff] %v16762_v28  ;;  %v16767_v37 = vadd.f32 %v13558_v16, %v16136_v14  ;;  %v6064_v28 = vrot.slane %v6062_v30, 1  ;;  %v6884_v14 = vsel %vm3680_vm2, %v6881_v2, %v6883_v29  ;;  %v6066_v16 = vshrl.u32 %v16723_v7, 16 }
 0x36e   :  { %v4204_v54 = vpop.f32.mrf.mxu1  ;;  %v16769_v50 = vpop.f32.mrf.mxu0  ;;  %v6885_v30 = vrot.slane %v16784_v43, 1 }
 0x36f   :  { %18473 = vst [vmem:[#allocation134_spill] sm:$0xff] %v16769_v50  ;;  %v16779_v54 = vld [vmem:[#allocation2 + $0x164] sm:$0xff]  }
 0x370   :  { %v13561_v5 = vpop.f32.mrf.mxu1  ;;  %13796 = vmatmul.mubr.bf16.gmra.mxu1 %v6049_v40  ;;  %v16775_v59 = vpop.f32.mrf.mxu0  ;;  %13928 = vmatmul.mubr.bf16.gmra.mxu0 %v6882_v57  ;;  %v6060_v40 = vor.u32 %v6058_v63, %v6056_v32  ;;  %v6068_v57 = vor.u32 %v6066_v16, %v6064_v28  ;;  %v6886_v32 = vsel %vm3680_vm2, %v6883_v29, %v6885_v30  ;;  %v6074_v63 = vshrl.u32 %v16726_v52, 16 }
 0x371   :  { %18474 = vst [vmem:[#allocation135_spill] sm:$0xff] %v16775_v59  ;;  %v16782_v8 = vadd.f32 %v13561_v5, %v16149_v58  ;;  %13799 = vmatprep.mubr.bf16.mxu1 %v6057_v15  ;;  %13931 = vmatprep.mubr.bf16.mxu0 %v6884_v14  ;;  %v6887_v59 = vrot.slane %v16779_v54, 1  ;;  %v6072_v5 = vrot.slane %v6070_v46, 1  ;;  %v6078_v14 = vshll.u32 %v16745_v23, 16 }
 0x372   :  { %v4216_v1 = vpop.f32.mrf.mxu1  ;;  %v16786_v22 = vpop.f32.mrf.mxu0  ;;  %v6086_v52 = vshll.u32 %v16756_v25, 16 }
 0x373   :  { %18475 = vst [vmem:[#allocation136_spill] sm:$0xff] %v16786_v22  ;;  %v6065_v22 = vsel %vm2176_vm1, %v6060_v40, %v6064_v28  ;;  %v6073_v16 = vsel %vm2176_vm1, %v6068_v57, %v6072_v5  ;;  %v6888_v46 = vsel %vm3680_vm2, %v6885_v30, %v6887_v59  ;;  %v6080_v40 = vrot.slane %v6078_v14, 1 }
 0x374   :  { %v13562_v2 = vpop.f32.mrf.mxu1  ;;  %v16790_v7 = vpop.f32.mrf.mxu0  ;;  %v6076_v57 = vor.u32 %v6074_v63, %v6072_v5  ;;  %v6094_v30 = vshll.u32 %v16784_v43, 16 }
 0x375   :  { %18476 = vst [vmem:[#allocation137_spill] sm:$0xff] %v16790_v7 }
 0x376   :  { %v4218_v58 = vpop.f32.mrf.mxu1  ;;  %v5230_v15 = vpop.f32.mrf.mxu0  ;;  %v6081_v63 = vsel %vm2176_vm1, %v6076_v57, %v6080_v40  ;;  %v16838_v57 = vld [vmem:[#allocation2 + $0x184] sm:$0xff]  }
 0x377   :  { %v16795_v1 = vadd.f32 %v4218_v58, %v16152_v60  ;;  %v6082_v15 = vshrl.u32 %v16745_v23, 16  ;;  %v16805_v60 = vld [vmem:[#allocation2 + $0x16c] sm:$0xff]   ;;  %v16808_v58 = vld [vmem:[#allocation2 + $0x174] sm:$0xff]  }
 0x378   :  { %v13565_v2 = vpop.f32.mrf.mxu1  ;;  %13800 = vmatmul.mubr.bf16.gmra.mxu1 %v6065_v22  ;;  %v16801_v7 = vpop.f32.mrf.mxu0  ;;  %13932 = vmatmul.mubr.bf16.gmra.mxu0 %v6886_v32  ;;  %v6889_v32 = vrot.slane %v16805_v60, 1 }
 0x379   :  { %18477 = vst [vmem:[#allocation138_spill] sm:$0xff] %v16801_v7  ;;  %13803 = vmatprep.mubr.bf16.mxu1 %v6073_v16  ;;  %13935 = vmatprep.mubr.bf16.mxu0 %v6888_v46  ;;  %v6084_v2 = vor.u32 %v6082_v15, %v6080_v40  ;;  %v6891_v46 = vrot.slane %v16808_v58, 1  ;;  %v6088_v7 = vrot.slane %v6086_v52, 1  ;;  %v6096_v15 = vrot.slane %v6094_v30, 1 }
 0x37a   :  { %v4230_v28 = vpop.f32.mrf.mxu1  ;;  %v5242_v29 = vpop.f32.mrf.mxu0 }
 0x37b   :  { %v16811_v22 = vadd.f32 %v4230_v28, %v16165_v62  ;;  %v6090_v62 = vshrl.u32 %v16756_v25, 16  ;;  %v6890_v28 = vsel %vm3680_vm2, %v6887_v59, %v6889_v32  ;;  %v6892_v52 = vsel %vm3680_vm2, %v6889_v32, %v6891_v46 }
 0x37c   :  { %v13566_v23 = vpop.f32.mrf.mxu1  ;;  %v13698_v16 = vpop.f32.mrf.mxu0  ;;  %v6098_v25 = vshrl.u32 %v16784_v43, 16 }
 0x37d   :  { %18478 = vst [vmem:[#allocation139_spill] sm:$0xff] %v16811_v22  ;;  %v16817_v14 = vadd.f32 %v13566_v23, %v16167_v18  ;;  %v16827_v16 = vld [vmem:[#allocation2 + $0x17c] sm:$0xff]   ;;  %v6089_v18 = vsel %vm2176_vm1, %v6084_v2, %v6088_v7  ;;  %v6092_v2 = vor.u32 %v6090_v62, %v6088_v7  ;;  %v6106_v62 = vshrl.u32 %v16779_v54, 16 }
 0x37e   :  { %v4233_v29 = vpop.f32.mrf.mxu1  ;;  %v16819_v50 = vpop.f32.mrf.mxu0  ;;  %v6893_v32 = vrot.slane %v16827_v16, 1  ;;  %v6100_v43 = vor.u32 %v6098_v25, %v6096_v15 }
 0x37f   :  { %18479 = vst [vmem:[#allocation140_spill] sm:$0xff] %v16819_v50  ;;  %v16823_v5 = vadd.f32 %v4233_v29, %v16169_v26  ;;  %v6102_v26 = vshll.u32 %v16779_v54, 16 }
 0x380   :  { %v13569_v22 = vpop.f32.mrf.mxu1  ;;  %13804 = vmatmul.mubr.bf16.gmra.mxu1 %v6081_v63  ;;  %v13701_v23 = vpop.f32.mrf.mxu0  ;;  %13936 = vmatmul.mubr.bf16.gmra.mxu0 %v6890_v28  ;;  %v6894_v7 = vsel %vm3680_vm2, %v6891_v46, %v6893_v32  ;;  %v16864_v46 = vld [vmem:[#allocation2 + $0x18c] sm:$0xff]  }
 0x381   :  { %v16834_v29 = vadd.f32 %v13569_v22, %v16174_v13  ;;  %13807 = vmatprep.mubr.bf16.mxu1 %v6089_v18  ;;  %13939 = vmatprep.mubr.bf16.mxu0 %v6892_v52  ;;  %v6104_v28 = vrot.slane %v6102_v26, 1  ;;  %v6110_v13 = vshll.u32 %v16805_v60, 16  ;;  %v6895_v22 = vrot.slane %v16838_v57, 1 }
 0x382   :  { %v4245_v59 = vpop.f32.mrf.mxu1  ;;  %v16836_v40 = vpop.f32.mrf.mxu0 }
 0x383   :  { %18480 = vst [vmem:[#allocation141_spill] sm:$0xff] %v16836_v40  ;;  %v16841_v30 = vadd.f32 %v4245_v59, %v16177_v47  ;;  %v6097_v47 = vsel %vm2176_vm1, %v6092_v2, %v6096_v15  ;;  %v6105_v26 = vsel %vm2176_vm1, %v6100_v43, %v6104_v28  ;;  %v6896_v50 = vsel %vm3680_vm2, %v6893_v32, %v6895_v22 }
 0x384   :  { %v13570_v63 = vpop.f32.mrf.mxu1  ;;  %v16844_v23 = vpop.f32.mrf.mxu0  ;;  %v6118_v2 = vshll.u32 %v16808_v58, 16  ;;  %v6108_v43 = vor.u32 %v6106_v62, %v6104_v28  ;;  %v6122_v28 = vshrl.u32 %v16808_v58, 16  ;;  %v6134_v58 = vshll.u32 %v16838_v57, 16 }
 0x385   :  { %18481 = vst [vmem:[#allocation142_spill] sm:$0xff] %v16844_v23  ;;  %v16849_v18 = vadd.f32 %v13570_v63, %v16180_v27  ;;  %v6112_v23 = vrot.slane %v6110_v13, 1  ;;  %v6114_v27 = vshrl.u32 %v16805_v60, 16  ;;  %v16859_v63 = vld [vmem:[#allocation2 + $0x194] sm:$0xff]   ;;  %v6897_v13 = vrot.slane %v16864_v46, 1 }
 0x386   :  { %v4248_v52 = vpop.f32.mrf.mxu1  ;;  %v16851_v40 = vpop.f32.mrf.mxu0 }
 0x387   :  { %18482 = vst [vmem:[#allocation143_spill] sm:$0xff] %v16849_v18  ;;  %18483 = vst [vmem:[#allocation144_spill] sm:$0xff] %v16851_v40 }
 0x388   :  { %v13573_v25 = vpop.f32.mrf.mxu1  ;;  %13808 = vmatmul.mubr.bf16.gmra.mxu1 %v6097_v47  ;;  %v13705_v59 = vpop.f32.mrf.mxu0  ;;  %13940 = vmatmul.mubr.bf16.gmra.mxu0 %v6894_v7  ;;  %v6116_v47 = vor.u32 %v6114_v27, %v6112_v23  ;;  %v6899_v7 = vrot.slane %v16859_v63, 1 }
 0x389   :  { %v16862_v52 = vadd.f32 %v13573_v25, %v16194_v4  ;;  %13811 = vmatprep.mubr.bf16.mxu1 %v6105_v26  ;;  %13943 = vmatprep.mubr.bf16.mxu0 %v6896_v50  ;;  %v6120_v4 = vrot.slane %v6118_v2, 1  ;;  %v6126_v50 = vshll.u32 %v16827_v16, 16 }
 0x38a   :  { %v4260_v54 = vpop.f32.mrf.mxu1  ;;  %v16866_v15 = vpop.f32.mrf.mxu0  ;;  %v6900_v2 = vsel %vm3680_vm2, %v6897_v13, %v6899_v7 }
 0x38b   :  { %18484 = vst [vmem:[#allocation145_spill] sm:$0xff] %v16862_v52  ;;  %18485 = vst [vmem:[#allocation146_spill] sm:$0xff] %v16866_v15  ;;  %v6113_v54 = vsel %vm2176_vm1, %v6108_v43, %v6112_v23  ;;  %v6898_v15 = vsel %vm3680_vm2, %v6895_v22, %v6897_v13  ;;  %v6121_v27 = vsel %vm2176_vm1, %v6116_v47, %v6120_v4  ;;  %v6128_v22 = vrot.slane %v6126_v50, 1  ;;  %v16895_v50 = vld [vmem:[#allocation2 + $0x1ac] sm:$0xff]  }
 0x38c   :  { %v13574_v32 = vpop.f32.mrf.mxu1  ;;  %v13706_v60 = vpop.f32.mrf.mxu0  ;;  %v6124_v47 = vor.u32 %v6122_v28, %v6120_v4  ;;  %v6142_v13 = vshll.u32 %v16864_v46, 16  ;;  %v16898_v4 = vld [vmem:[#allocation2 + $0x1b4] sm:$0xff]  }
 0x38d   :  { %v6130_v60 = vshrl.u32 %v16827_v16, 16 }
 0x38e   :  { %v4262_v59 = vpop.f32.mrf.mxu1  ;;  %v5274_v25 = vpop.f32.mrf.mxu0 }
 0x38f   :  { %v16873_v26 = vadd.f32 %v4262_v59, %v16197_v56  ;;  %v16881_v25 = vld [vmem:[#allocation2 + $0x1a4] sm:$0xff]   ;;  %v16883_v56 = vld [vmem:[#allocation2 + $0x19c] sm:$0xff]  }
 0x390   :  { %v13577_v62 = vpop.f32.mrf.mxu1  ;;  %13812 = vmatmul.mubr.bf16.gmra.mxu1 %v6113_v54  ;;  %v13709_v32 = vpop.f32.mrf.mxu0  ;;  %13944 = vmatmul.mubr.bf16.gmra.mxu0 %v6898_v15  ;;  %v6901_v15 = vrot.slane %v16883_v56, 1  ;;  %v6132_v54 = vor.u32 %v6130_v60, %v6128_v22  ;;  %v6129_v60 = vsel %vm2176_vm1, %v6124_v47, %v6128_v22  ;;  %v6905_v22 = vrot.slane %v16895_v50, 1 }
 0x391   :  { %18486 = vst [vmem:[#allocation147_spill] sm:$0xff] %v16873_v26  ;;  %13815 = vmatprep.mubr.bf16.mxu1 %v6121_v27  ;;  %13947 = vmatprep.mubr.bf16.mxu0 %v6900_v2  ;;  %v6903_v27 = vrot.slane %v16881_v25, 1 }
 0x392   :  { %v4274_v23 = vpop.f32.mrf.mxu1  ;;  %v5284_v43 = vpop.f32.mrf.mxu0 }
 0x393   :  { %v16887_v59 = vadd.f32 %v4274_v23, %v16201_v31  ;;  %v6136_v43 = vrot.slane %v6134_v58, 1  ;;  %v6138_v31 = vshrl.u32 %v16838_v57, 16  ;;  %v6902_v23 = vsel %vm3680_vm2, %v6899_v7, %v6901_v15 }
 0x394   :  { %v13578_v16 = vpop.f32.mrf.mxu1  ;;  %v13710_v62 = vpop.f32.mrf.mxu0  ;;  %v6146_v57 = vshrl.u32 %v16864_v46, 16 }
 0x395   :  { %18487 = vst [vmem:[#allocation148_spill] sm:$0xff] %v16887_v59  ;;  %v16893_v32 = vadd.f32 %v13578_v16, %v16203_v6  ;;  %v6144_v62 = vrot.slane %v6142_v13, 1  ;;  %v8480_v59 = vld [vmem:[#allocation2 + $0x18] sm:$0xf]  ;;  %v8481_v6 = vld [vmem:[#allocation2 + $0x1c] sm:$0xf] }
 0x396   :  { %v4277_v2 = vpop.f32.mrf.mxu1  ;;  %v5286_v40 = vpop.f32.mrf.mxu0  ;;  %v6907_v13 = vrot.slane %v16898_v4, 1 }
 0x397   :  { %18488 = vst [vmem:[#allocation149_spill] sm:$0xff] %v16893_v32  ;;  %v16901_v28 = vadd.f32 %v4277_v2, %v16205_v19  ;;  %v6137_v32 = vsel %vm2176_vm1, %v6132_v54, %v6136_v43  ;;  %v6904_v40 = vsel %vm3680_vm2, %v6901_v15, %v6903_v27  ;;  %v6150_v19 = vshll.u32 %v16859_v63, 16 }
 0x398   :  { %v13581_v16 = vpop.f32.mrf.mxu1  ;;  %13816 = vmatmul.mubr.bf16.gmra.mxu1 %v6129_v60  ;;  %v13853_v58 = vpop.f32.mrf.mxu0  ;;  %13948 = vmatmul.mubr.bf16.gmra.mxu0 %v6902_v23  ;;  %v12041_v2 = vcombine.low %v8480_v59, %v8481_v6  ;;  %v6140_v60 = vor.u32 %v6138_v31, %v6136_v43  ;;  %v6148_v15 = vor.u32 %v6146_v57, %v6144_v62  ;;  %v6154_v31 = vshrl.u32 %v16859_v63, 16  ;;  %v14709_v57 = vld [vmem:[#allocation2 + $0x28] sm:$0xff]  }
 0x399   :  { %18489 = vst [vmem:[#allocation150_spill] sm:$0xff] %v16901_v28  ;;  %13819 = vmatprep.mubr.bf16.mxu1 %v6137_v32  ;;  %13951 = vmatprep.mubr.bf16.mxu0 %v6904_v40  ;;  %v6152_v16 = vrot.slane %v6150_v19, 1  ;;  %v6158_v32 = vshll.u32 %v16883_v56, 16  ;;  %v16919_v58 = vld [vmem:[#allocation2 + $0x20] sm:$0xff]   ;;  %v6906_v40 = vsel %vm3680_vm2, %v6903_v27, %v6905_v22  ;;  %v6166_v6 = vshll.u32 %v16881_v25, 16 }
 0x39a   :  { %v4289_v7 = vpop.f32.mrf.mxu1  ;;  %v16910_v47 = vpop.f32.mrf.mxu0  ;;  %v16922_v28 = vld [vmem:[#allocation2 + $0x1bc] ss:$0 sps:$4 sm:$0x11]   ;;  %v8882_v59 = vshll.u32 %v12041_v2, 16  ;;  %v6145_v43 = vsel %vm2176_vm1, %v6140_v60, %v6144_v62 }
 0x39b   :  { %18490 = vst [vmem:[#allocation151_spill] sm:$0xff] %v16910_v47  ;;  %v16914_v54 = vadd.f32 %v4289_v7, %v16211_v42  ;;  %v6908_v42 = vsel %vm3680_vm2, %v6905_v22, %v6907_v13  ;;  %v6153_v7 = vsel %vm2176_vm1, %v6148_v15, %v6152_v16  ;;  %v8887_v22 = vshll.u32 %v16919_v58, 16 }
 0x39c   :  { %v13582_v23 = vpop.f32.mrf.mxu1  ;;  %v16916_v46 = vpop.f32.mrf.mxu0  ;;  %v6909_v62 = vrot.slane %v16922_v28, 1 }
 0x39d   :  { %18491 = vst [vmem:[#allocation152_spill] sm:$0xff] %v16914_v54  ;;  %18492 = vst [vmem:[#allocation153_spill] sm:$0xff] %v16916_v46  ;;  %v6162_v23 = vshrl.u32 %v16883_v56, 16  ;;  %v8895_v46 = vshll.u32 %v14709_v57, 16  ;;  %v8880_v56 = vshrl.u32 %v12041_v2, 16 }
 0x39e   :  { %v4292_v47 = vpop.f32.mrf.mxu1  ;;  %v16924_v26 = vpop.f32.mrf.mxu0 }
 0x39f   :  { %18493 = vst [vmem:[#allocation154_spill] sm:$0xff] %v16924_v26  ;;  %v6160_v47 = vrot.slane %v6158_v32, 1  ;;  %v8884_v26 = vrot.slane %v8882_v59, 1  ;;  %v6174_v32 = vshll.u32 %v16895_v50, 16  ;;  %v6178_v59 = vshrl.u32 %v16895_v50, 16 }
 0x3a0   :  { %v13585_v19 = vpop.f32.mrf.mxu1  ;;  %13820 = vmatmul.mubr.bf16.gmra.mxu1 %v6145_v43  ;;  %v16931_v27 = vpop.f32.mrf.mxu0  ;;  %13952 = vmatmul.mubr.bf16.gmra.mxu0 %v6906_v40  ;;  %v6168_v43 = vrot.slane %v6166_v6, 1  ;;  %v8889_v40 = vrot.slane %v8887_v22, 1  ;;  %v8891_v50 = vshrl.u32 %v16919_v58, 16 }
 0x3a1   :  { %18494 = vst [vmem:[#allocation155_spill] sm:$0xff] %v16931_v27  ;;  %13823 = vmatprep.mubr.bf16.mxu1 %v6153_v7  ;;  %13955 = vmatprep.mubr.bf16.mxu0 %v6908_v42  ;;  %v6156_v19 = vor.u32 %v6154_v31, %v6152_v16  ;;  %v6164_v54 = vor.u32 %v6162_v23, %v6160_v47  ;;  %v6170_v42 = vshrl.u32 %v16881_v25, 16  ;;  %v6182_v16 = vshll.u32 %v16898_v4, 16  ;;  %v16945_v31 = vld [vmem:[#allocation2 + $0x30] sm:$0xff]  }
 0x3a2   :  { %v4302_v63 = vpop.f32.mrf.mxu1  ;;  %v16936_v60 = vpop.f32.mrf.mxu0  ;;  %v6910_v7 = vsel %vm3680_vm2, %v6907_v13, %v6909_v62  ;;  %v8885_v18 = vor.u32 %v8884_v26, %v8880_v56  ;;  %v6176_v13 = vrot.slane %v6174_v32, 1  ;;  %v8897_v25 = vrot.slane %v8895_v46, 1 }
 0x3a3   :  { %v6161_v6 = vsel %vm2176_vm1, %v6156_v19, %v6160_v47  ;;  %v6169_v2 = vsel %vm2176_vm1, %v6164_v54, %v6168_v43  ;;  %v6172_v26 = vor.u32 %v6170_v42, %v6168_v43  ;;  %v6184_v47 = vrot.slane %v6182_v16, 1  ;;  %v14712_v54 = vld [vmem:[#allocation2 + $0x38] sm:$0xff]  }
 0x3a4   :  { %v13586_v15 = vpop.f32.mrf.mxu1  ;;  %v16938_v27 = vpop.f32.mrf.mxu0  ;;  %v6180_v56 = vor.u32 %v6178_v59, %v6176_v13  ;;  %v8899_v19 = vshrl.u32 %v14709_v57, 16  ;;  %v6186_v42 = vshrl.u32 %v16898_v4, 16  ;;  %v6190_v57 = vshll.u32 %v16922_v28, 16 }
 0x3a5   :  { %v6177_v58 = vsel %vm2176_vm1, %v6172_v26, %v6176_v13  ;;  %v5298_v26 = vadd.f32 %v16223_v24, %v16267_v39 }
 0x3a6   :  { %v4304_v52 = vpop.f32.mrf.mxu1  ;;  %v7065_v63 = vpop.f32.mrf.mxu0  ;;  %v8901_v46 = vor.u32 %v8899_v19, %v8897_v25 }
 0x3a7   :  { %v8890_v52 = vsel %vm2176_vm1, %v8885_v18, %v8889_v40  ;;  %v8903_v63 = vshll.u32 %v16945_v31, 16 }
 0x3a8   :  { %v13729_v23 = vpop.f32.mrf.mxu1  ;;  %13824 = vmatmul.mubr.bf16.gmra.mxu1 %v6161_v6  ;;  %v16949_v22 = vpop.f32.mrf.mxu0  ;;  %13956 = vmatmul.mubr.bf16.gmra.mxu0 %v6910_v7  ;;  %v8893_v7 = vor.u32 %v8891_v50, %v8889_v40 }
 0x3a9   :  { %13827 = vmatprep.mubr.bf16.mxu1 %v6169_v2  ;;  %14099 = vmatprep.mubr.bf16.mxu0 %v8890_v52  ;;  %v14715_v23 = vld [vmem:[#allocation2 + $0x40] sm:$0xff]   ;;  %v8905_v2 = vrot.slane %v8903_v63, 1  ;;  %v8911_v52 = vshll.u32 %v14712_v54, 16 }
 0x3aa   :  { %v6330_v62 = vpop.f32.mrf.mxu1  ;;  %v7077_v15 = vpop.f32.mrf.mxu0  ;;  %v8898_v50 = vsel %vm2176_vm1, %v8893_v7, %v8897_v25  ;;  %v8919_v13 = vshll.u32 %v14715_v23, 16  ;;  %v8907_v7 = vshrl.u32 %v16945_v31, 16  ;;  %v8923_v31 = vshrl.u32 %v14715_v23, 16 }
 0x3ab   :  { %v16955_v6 = vadd.f32 %v6330_v62, %v16381_v41  ;;  %v6185_v41 = vsel %vm2176_vm1, %v6180_v56, %v6184_v47  ;;  %v8906_v4 = vsel %vm2176_vm1, %v8901_v46, %v8905_v2  ;;  %v6188_v15 = vor.u32 %v6186_v42, %v6184_v47 }
 0x3ac   :  { %v13730_v32 = vpop.f32.mrf.mxu1  ;;  %v13862_v18 = vpop.f32.mrf.mxu0  ;;  %v6192_v56 = vrot.slane %v6190_v57, 1  ;;  %v8913_v25 = vrot.slane %v8911_v52, 1  ;;  %v8915_v46 = vshrl.u32 %v14712_v54, 16  ;;  %v8921_v24 = vrot.slane %v8919_v13, 1  ;;  %v14905_v13 = vld [vmem:[#allocation2 + $0x50] sm:$0xff]  }
 0x3ad   :  { %v16958_v43 = vadd.f32 %v13730_v32, %v16390_v12  ;;  %v5300_v32 = vadd.f32 %v16225_v10, %v16274_v20  ;;  %v14711_v10 = vld [vmem:[#allocation2 + $0x18] sm:$0xff]  }
 0x3ae   :  { %v6333_v59 = vpop.f32.mrf.mxu1  ;;  %v16963_v16 = vpop.f32.mrf.mxu0  ;;  %v6193_v47 = vsel %vm2176_vm1, %v6188_v15, %v6192_v56  ;;  %v8925_v56 = vor.u32 %v8923_v31, %v8921_v24 }
 0x3af   :  { %v16967_v40 = vadd.f32 %v6333_v59, %v16395_v38  ;;  %v8917_v59 = vor.u32 %v8915_v46, %v8913_v25 }
 0x3b0   :  { %v13733_v12 = vpop.f32.mrf.mxu1  ;;  %13828 = vmatmul.mubr.bf16.gmra.mxu1 %v6177_v58  ;;  %v13865_v62 = vpop.f32.mrf.mxu0  ;;  %14100 = vmatmul.mubr.bf16.vlgmr.msra.gmra.mxu0 %v8898_v50  ;;  %v8909_v58 = vor.u32 %v8907_v7, %v8905_v2  ;;  %v14904_v50 = vld [vmem:[#allocation2 + $0x48] sm:$0xff]   ;;  %v18498_v7 = vld [vmem:[#allocation92_spill] sm:$0xff] }
 0x3b1   :  { %v16972_v28 = vadd.f32 %v13733_v12, %v16409_v0  ;;  %13831 = vmatprep.mubr.bf16.mxu1 %v6185_v41  ;;  %14103 = vmatprep.mubr.bf16.mxu0 %v8906_v4  ;;  %v18495_v41 = vld [vmem:[#allocation91_spill] sm:$0xff]  ;;  %v8927_v12 = vshll.u32 %v14904_v50, 16  ;;  %v8922_v2 = vsel %vm2176_vm1, %v8917_v59, %v8921_v24  ;;  %v14906_v59 = vld [vmem:[#allocation2 + $0x58] sm:$0xff]  }
 0x3b2   :  { %v6345_v38 = vpop.f32.mrf.mxu1  ;;  %v16976_v19 = vpop.f32.mrf.mxu0  ;;  %v5302_v52 = vadd.f32 %v18495_v41, %v16289_v9  ;;  %v8914_v20 = vsel %vm2176_vm1, %v8909_v58, %v8913_v25  ;;  %v14714_v58 = vld [vmem:[#allocation2 + $0x20] sm:$0xff]   ;;  %v8943_v41 = vshll.u32 %v14906_v59, 16 }
 0x3b3   :  { %v16978_v63 = vadd.f32 %v6345_v38, %v5298_v26  ;;  %v8935_v26 = vshll.u32 %v14905_v13, 16  ;;  %v8929_v23 = vrot.slane %v8927_v12, 1  ;;  %v8931_v38 = vshrl.u32 %v14904_v50, 16 }
 0x3b4   :  { %v13734_v0 = vpop.f32.mrf.mxu1  ;;  %v16983_v18 = vpop.f32.mrf.mxu0 }
 0x3b5   :  { %v16985_v39 = vadd.f32 %v13734_v0, %v5300_v32  ;;  %v5301_v0 = vadd.f32 %v18498_v7, %v16303_v55  ;;  %v8937_v46 = vrot.slane %v8935_v26, 1  ;;  %v8930_v24 = vsel %vm2176_vm1, %v8925_v56, %v8929_v23  ;;  %v18500_v55 = vld [vmem:[#allocation93_spill] sm:$0xff] }
 0x3b6   :  { %v6348_v42 = vpop.f32.mrf.mxu1  ;;  %v16988_v57 = vpop.f32.mrf.mxu0  ;;  %v8933_v31 = vor.u32 %v8931_v38, %v8929_v23  ;;  %v8945_v7 = vrot.slane %v8943_v41, 1  ;;  %v14907_v56 = vld [vmem:[#allocation2 + $0x60] sm:$0xff]  }
 0x3b7   :  { %v8951_v23 = vshll.u32 %v14907_v56, 16  ;;  %v14742_v38 = vld [vmem:[#allocation8 + $0x228] sm:$0xff]  }
 0x3b8   :  { %v13737_v54 = vpop.f32.mrf.mxu1  ;;  %13832 = vmatmul.mubr.bf16.gmra.mxu1 %v6193_v47  ;;  %v16993_v62 = vpop.f32.mrf.mxu0  ;;  %14104 = vmatmul.mubr.bf16.gmra.mxu0 %v8914_v20  ;;  %v14716_v20 = vld [vmem:[#allocation2 + $0x28] sm:$0xff]   ;;  %v8938_v26 = vsel %vm2176_vm1, %v8933_v31, %v8937_v46 }
 0x3b9   :  { %v16996_v4 = vadd.f32 %v13737_v54, %v5302_v52  ;;  %13975 = vmatprep.mubr.bf16.mxu1 %v14711_v10  ;;  %14107 = vmatprep.mubr.bf16.mxu0 %v8922_v2  ;;  %v14729_v52 = vld [vmem:[#allocation8 + $0x230] sm:$0xff]   ;;  %v8947_v54 = vshrl.u32 %v14906_v59, 16  ;;  %v5303_v2 = vadd.f32 %v18500_v55, %v16319_v53 }
 0x3ba   :  { %v6360_v9 = vpop.f32.mrf.mxu1  ;;  %v16998_v15 = vpop.f32.mrf.mxu0  ;;  %v18503_v31 = vld [vmem:[#allocation102_spill] sm:$0xff] }
 0x3bb   :  { %18496 = vst [vmem:[#allocation91_spill] sm:$0xff] %v16998_v15 }
 0x3bc   :  { %v13738_v25 = vpop.f32.mrf.mxu1  ;;  %v17000_v32 = vpop.f32.mrf.mxu0 }
 0x3bd   :  { %18497 = vst [vmem:[#allocation156_spill] sm:$0xff] %v17000_v32 }
 0x3be   :  { %v6362_v47 = vpop.f32.mrf.mxu1  ;;  %v7109_v42 = vpop.f32.mrf.mxu0 }
 0x3bf   :  { %v17004_v10 = vadd.f32 %v6362_v47, %v5301_v0  ;;  %v18501_v47 = vld [vmem:[#allocation100_spill] sm:$0xff] }
 0x3c0   :  { %v13741_v50 = vpop.f32.mrf.mxu1  ;;  %13976 = vmatmul.mubr.bf16.vlgmr.msra.gmra.mxu1 %v14714_v58  ;;  %v17007_v12 = vpop.f32.mrf.mxu0  ;;  %14108 = vmatmul.mubr.bf16.gmra.mxu0 %v8930_v24  ;;  %v18502_v58 = vld [vmem:[#allocation94_spill] sm:$0xff]  ;;  %v8949_v24 = vor.u32 %v8947_v54, %v8945_v7 }
 0x3c1   :  { %18499 = vst [vmem:[#allocation92_spill] sm:$0xff] %v17007_v12  ;;  %14208 = vmatpush3.bf16.msra.mxu1 %v16608_v34  ;;  %13979 = vmatprep.mubr.bf16.mxu1 %v14716_v20  ;;  %v5305_v42 = vadd.f32 %v18502_v58, %v18501_v47  ;;  %v8939_v34 = vshrl.u32 %v14905_v13, 16  ;;  %v18504_v50 = vld [vmem:[#allocation95_spill] sm:$0xff]  ;;  %v18506_v13 = vld [vmem:[#allocation16_spill] sm:$0xff] }
 0x3c2   :  { %v6374_v9 = vpop.f32.mrf.mxu1  ;;  %14111 = vmatprep.mubr.bf16.mxu0 %v8938_v26  ;;  %v7121_v25 = vpop.f32.mrf.mxu0  ;;  %14209 = vmatprep.subr.bf16.mxu1 %v14729_v52  ;;  %v5304_v55 = vadd.f32 %v18504_v50, %v18503_v31  ;;  %v18507_v58 = vld [vmem:[#allocation96_spill] sm:$0xff] }
 0x3c3   :  { %v17013_v0 = vadd.f32 %v6374_v9, %v5303_v2  ;;  %v8941_v26 = vor.u32 %v8939_v34, %v8937_v46  ;;  %v14718_v25 = vld [vmem:[#allocation2 + $0x30] sm:$0xff]   ;;  %v8953_v2 = vrot.slane %v8951_v23, 1  ;;  %v14908_v9 = vld [vmem:[#allocation2 + $0x68] sm:$0xff]   ;;  %v5307_v54 = vadd.f32 %v18507_v58, %v18506_v13 }
 0x3c4   :  { %v13742_v59 = vpop.f32.mrf.mxu1  ;;  %v13874_v20 = vpop.f32.mrf.mxu0  ;;  %v8959_v32 = vshll.u32 %v14908_v9, 16  ;;  %v14758_v31 = vld [vmem:[#allocation8 + $0x220] sm:$0xff]  }
 0x3c5   :  { %v17017_v53 = vadd.f32 %v13742_v59, %v5305_v42  ;;  %14210 = vmatpush3.bf16.msra.mxu1 %v14729_v52  ;;  %v14720_v42 = vld [vmem:[#allocation2 + $0x38] sm:$0xff]   ;;  %v8946_v59 = vsel %vm2176_vm1, %v8941_v26, %v8945_v7  ;;  %v8955_v20 = vshrl.u32 %v14907_v56, 16  ;;  %v8954_v34 = vsel %vm2176_vm1, %v8949_v24, %v8953_v2  ;;  %v14909_v23 = vld [vmem:[#allocation2 + $0x70] sm:$0xff]  }
 0x3c6   :  { %v6377_v41 = vpop.f32.mrf.mxu1  ;;  %v17021_v12 = vpop.f32.mrf.mxu0  ;;  %14211 = vmatprep.subr.bf16.mxu1 %v14742_v38  ;;  %v8967_v50 = vshll.u32 %v14909_v23, 16  ;;  %v8961_v7 = vrot.slane %v8959_v32, 1  ;;  %v8963_v56 = vshrl.u32 %v14908_v9, 16  ;;  %v14722_v32 = vld [vmem:[#allocation2 + $0x40] sm:$0xff]  }
 0x3c7   :  { %18505 = vst [vmem:[#allocation93_spill] sm:$0xff] %v17021_v12  ;;  %v17023_v47 = vadd.f32 %v6377_v41, %v5304_v55  ;;  %v18508_v55 = vld [vmem:[#allocation17_spill] sm:$0xff] }
 0x3c8   :  { %v13745_v46 = vpop.f32.mrf.mxu1  ;;  %13980 = vmatmul.mubr.bf16.gmra.mxu1 %v14718_v25  ;;  %v13877_v52 = vpop.f32.mrf.mxu0  ;;  %14112 = vmatmul.mubr.bf16.gmra.mxu0 %v8946_v59  ;;  %v18509_v41 = vld [vmem:[#allocation97_spill] sm:$0xff]  ;;  %v18511_v25 = vld [vmem:[#allocation98_spill] sm:$0xff]  ;;  %v8957_v59 = vor.u32 %v8955_v20, %v8953_v2 }
 0x3c9   :  { %v17029_v12 = vadd.f32 %v13745_v46, %v5307_v54  ;;  %13983 = vmatprep.mubr.bf16.mxu1 %v14720_v42  ;;  %v5306_v15 = vadd.f32 %v18509_v41, %v18508_v55  ;;  %14115 = vmatprep.mubr.bf16.mxu0 %v8954_v34  ;;  %v5308_v24 = vadd.f32 %v18511_v25, %v16357_v35  ;;  %v14772_v54 = vld [vmem:[#allocation8 + $0x218] sm:$0xff]   ;;  %v8969_v52 = vrot.slane %v8967_v50, 1  ;;  %v14910_v55 = vld [vmem:[#allocation2 + $0x78] sm:$0xff]   ;;  %v14785_v25 = vld [vmem:[#allocation8 + $0x210] sm:$0xff]  }
 0x3ca   :  { %v6389_v13 = vpop.f32.mrf.mxu1  ;;  %v17033_v58 = vpop.f32.mrf.mxu0  ;;  %14212 = vmatpush3.bf16.msra.mxu1 %v14742_v38  ;;  %v8975_v34 = vshll.u32 %v14910_v55, 16  ;;  %v18514_v38 = vld [vmem:[#allocation99_spill] sm:$0xff]  ;;  %v8962_v20 = vsel %vm2176_vm1, %v8957_v59, %v8961_v7 }
 0x3cb   :  { %18510 = vst [vmem:[#allocation100_spill] sm:$0xff] %v17033_v58  ;;  %v17035_v26 = vadd.f32 %v6389_v13, %v5306_v15  ;;  %14213 = vmatprep.subr.bf16.mxu1 %v14758_v31  ;;  %v8965_v15 = vor.u32 %v8963_v56, %v8961_v7  ;;  %v5310_v35 = vadd.f32 %v18514_v38, %v16374_v61  ;;  %v14724_v2 = vld [vmem:[#allocation2 + $0x48] sm:$0xff]   ;;  %v8971_v13 = vshrl.u32 %v14909_v23, 16  ;;  %v14911_v7 = vld [vmem:[#allocation2 + $0x80] sm:$0xff]  }
 0x3cc   :  { %v13746_v46 = vpop.f32.mrf.mxu1  ;;  %v17039_v42 = vpop.f32.mrf.mxu0  ;;  %v8983_v23 = vshll.u32 %v14911_v7, 16 }
 0x3cd   :  { %18512 = vst [vmem:[#allocation94_spill] sm:$0xff] %v17039_v42  ;;  %v17041_v41 = vadd.f32 %v13746_v46, %v5308_v24  ;;  %v8977_v24 = vrot.slane %v8975_v34, 1  ;;  %v8979_v46 = vshrl.u32 %v14910_v55, 16  ;;  %v8973_v59 = vor.u32 %v8971_v13, %v8969_v52 }
 0x3ce   :  { %v6392_v58 = vpop.f32.mrf.mxu1  ;;  %v17043_v9 = vpop.f32.mrf.mxu0  ;;  %14214 = vmatpush3.bf16.msra.mxu1 %v14758_v31 }
 0x3cf   :  { %18513 = vst [vmem:[#allocation102_spill] sm:$0xff] %v17043_v9  ;;  %14215 = vmatprep.subr.bf16.mxu1 %v14772_v54  ;;  %v8970_v58 = vsel %vm2176_vm1, %v8965_v15, %v8969_v52  ;;  %v18519_v15 = vld [vmem:[#allocation101_spill] sm:$0xff]  ;;  %v8987_v52 = vshrl.u32 %v14911_v7, 16 }
 0x3d0   :  { %v13749_v50 = vpop.f32.mrf.mxu1  ;;  %13984 = vmatmul.mubr.bf16.gmra.mxu1 %v14722_v32  ;;  %v17048_v42 = vpop.f32.mrf.mxu0  ;;  %14116 = vmatmul.mubr.bf16.gmra.mxu0 %v8962_v20  ;;  %v8981_v20 = vor.u32 %v8979_v46, %v8977_v24  ;;  %v5309_v34 = vadd.f32 %v18519_v15, %v16398_v17  ;;  %v18524_v7 = vld [vmem:[#allocation21_spill] sm:$0xff] }
 0x3d1   :  { %18515 = vst [vmem:[#allocation95_spill] sm:$0xff] %v17048_v42  ;;  %v17051_v56 = vadd.f32 %v13749_v50, %v5310_v35  ;;  %13987 = vmatprep.mubr.bf16.mxu1 %v14724_v2  ;;  %14119 = vmatprep.mubr.bf16.mxu0 %v8970_v58  ;;  %v14726_v35 = vld [vmem:[#allocation2 + $0x50] sm:$0xff]   ;;  %v8985_v2 = vrot.slane %v8983_v23, 1  ;;  %v14912_v58 = vld [vmem:[#allocation2 + $0x88] sm:$0xff]   ;;  %v14728_v42 = vld [vmem:[#allocation2 + $0x58] sm:$0xff]  }
 0x3d2   :  { %v6404_v61 = vpop.f32.mrf.mxu1  ;;  %v17053_v31 = vpop.f32.mrf.mxu0  ;;  %14216 = vmatpush3.bf16.msra.mxu1 %v14772_v54  ;;  %v8978_v54 = vsel %vm2176_vm1, %v8973_v59, %v8977_v24  ;;  %v8995_v46 = vshrl.u32 %v14912_v58, 16  ;;  %v18522_v23 = vld [vmem:[#allocation103_spill] sm:$0xff]  ;;  %v18525_v59 = vld [vmem:[#allocation104_spill] sm:$0xff] }
 0x3d3   :  { %18516 = vst [vmem:[#allocation16_spill] sm:$0xff] %v17051_v56  ;;  %18517 = vst [vmem:[#allocation96_spill] sm:$0xff] %v17053_v31  ;;  %14217 = vmatprep.subr.bf16.mxu1 %v14785_v25  ;;  %v8991_v61 = vshll.u32 %v14912_v58, 16  ;;  %v8986_v17 = vsel %vm2176_vm1, %v8981_v20, %v8985_v2  ;;  %v5311_v15 = vadd.f32 %v18522_v23, %v16418_v44  ;;  %v14914_v58 = vld [vmem:[#allocation2 + $0x98] sm:$0xff]   ;;  %v18527_v44 = vld [vmem:[#allocation23_spill] sm:$0xff] }
 0x3d4   :  { %v13750_v32 = vpop.f32.mrf.mxu1  ;;  %v17055_v38 = vpop.f32.mrf.mxu0 }
 0x3d5   :  { %18518 = vst [vmem:[#allocation17_spill] sm:$0xff] %v17055_v38 }
 0x3d6   :  { %v6406_v55 = vpop.f32.mrf.mxu1  ;;  %v7153_v50 = vpop.f32.mrf.mxu0  ;;  %14218 = vmatpush3.bf16.msra.mxu1 %v14785_v25 }
 0x3d7   :  { %v17059_v31 = vadd.f32 %v6406_v55, %v5309_v34  ;;  %v8993_v55 = vrot.slane %v8991_v61, 1  ;;  %v14913_v50 = vld [vmem:[#allocation2 + $0x90] sm:$0xff]   ;;  %v14731_v61 = vld [vmem:[#allocation2 + $0x60] sm:$0xff]  }
 0x3d8   :  { %v13753_v13 = vpop.f32.mrf.mxu1  ;;  %13988 = vmatmul.mubr.bf16.gmra.mxu1 %v14726_v35  ;;  %v17062_v32 = vpop.f32.mrf.mxu0  ;;  %14120 = vmatmul.mubr.bf16.gmra.mxu0 %v8978_v54  ;;  %v8999_v38 = vshll.u32 %v14913_v50, 16  ;;  %v5313_v35 = vadd.f32 %v18525_v59, %v18524_v7  ;;  %v18532_v7 = vld [vmem:[#allocation105_spill] sm:$0xff] }
 0x3d9   :  { %18520 = vst [vmem:[#allocation97_spill] sm:$0xff] %v17059_v31  ;;  %18521 = vst [vmem:[#allocation98_spill] sm:$0xff] %v17062_v32  ;;  %13991 = vmatprep.mubr.bf16.mxu1 %v14728_v42  ;;  %14123 = vmatprep.mubr.bf16.mxu0 %v8986_v17  ;;  %v8989_v13 = vor.u32 %v8987_v52, %v8985_v2  ;;  %v8997_v20 = vor.u32 %v8995_v46, %v8993_v55  ;;  %v9007_v42 = vshll.u32 %v14914_v58, 16  ;;  %v18528_v17 = vld [vmem:[#allocation18_spill] sm:$0xff] }
 0x3da   :  { %v6418_v25 = vpop.f32.mrf.mxu1  ;;  %v7165_v34 = vpop.f32.mrf.mxu0  ;;  %v5312_v23 = vadd.f32 %v18528_v17, %v18527_v44  ;;  %v14733_v52 = vld [vmem:[#allocation2 + $0x68] sm:$0xff]   ;;  %v9003_v46 = vshrl.u32 %v14913_v50, 16  ;;  %v9011_v17 = vshrl.u32 %v14914_v58, 16 }
 0x3db   :  { %v17067_v24 = vadd.f32 %v6418_v25, %v5311_v15  ;;  %v9001_v15 = vrot.slane %v8999_v38, 1  ;;  %v9009_v44 = vrot.slane %v9007_v42, 1 }
 0x3dc   :  { %v13754_v54 = vpop.f32.mrf.mxu1  ;;  %v13886_v32 = vpop.f32.mrf.mxu0 }
 0x3dd   :  { %18523 = vst [vmem:[#allocation99_spill] sm:$0xff] %v17067_v24  ;;  %v17071_v9 = vadd.f32 %v13754_v54, %v5313_v35  ;;  %v18531_v24 = vld [vmem:[#allocation24_spill] sm:$0xff]  ;;  %v8994_v32 = vsel %vm2176_vm1, %v8989_v13, %v8993_v55  ;;  %v9002_v54 = vsel %vm2176_vm1, %v8997_v20, %v9001_v15  ;;  %v9005_v42 = vor.u32 %v9003_v46, %v9001_v15 }
 0x3de   :  { %v6421_v34 = vpop.f32.mrf.mxu1  ;;  %v17075_v31 = vpop.f32.mrf.mxu0  ;;  %v5315_v2 = vadd.f32 %v18532_v7, %v18531_v24  ;;  %v14802_v7 = vld [vmem:[#allocation8 + $0x208] sm:$0xff]  }
 0x3df   :  { %18526 = vst [vmem:[#allocation101_spill] sm:$0xff] %v17071_v9  ;;  %18529 = vst [vmem:[#allocation103_spill] sm:$0xff] %v17075_v31  ;;  %v17077_v25 = vadd.f32 %v6421_v34, %v5312_v23  ;;  %v14915_v9 = vld [vmem:[#allocation2 + $0xa0] sm:$0xff]   ;;  %v18535_v34 = vld [vmem:[#allocation19_spill] sm:$0xff]  ;;  %14219 = vmatprep.subr.bf16.mxu1 %v14802_v7  ;;  %v9010_v15 = vsel %vm2176_vm1, %v9005_v42, %v9009_v44 }
 0x3e0   :  { %v13757_v59 = vpop.f32.mrf.mxu1  ;;  %13992 = vmatmul.mubr.bf16.gmra.mxu1 %v14731_v61  ;;  %v13889_v35 = vpop.f32.mrf.mxu0  ;;  %14124 = vmatmul.mubr.bf16.gmra.mxu0 %v8994_v32  ;;  %v9015_v31 = vshll.u32 %v14915_v9, 16  ;;  %v18534_v23 = vld [vmem:[#allocation25_spill] sm:$0xff]  ;;  %v18538_v61 = vld [vmem:[#allocation26_spill] sm:$0xff]  ;;  %v9019_v46 = vshrl.u32 %v14915_v9, 16 }
 0x3e1   :  { %18530 = vst [vmem:[#allocation21_spill] sm:$0xff] %v17077_v25  ;;  %v17083_v38 = vadd.f32 %v13757_v59, %v5315_v2  ;;  %13995 = vmatprep.mubr.bf16.mxu1 %v14733_v52  ;;  %v5314_v24 = vadd.f32 %v18535_v34, %v18534_v23  ;;  %14127 = vmatprep.mubr.bf16.mxu0 %v9002_v54  ;;  %v18539_v32 = vld [vmem:[#allocation106_spill] sm:$0xff]  ;;  %v14735_v34 = vld [vmem:[#allocation2 + $0x70] sm:$0xff]  }
 0x3e2   :  { %v6433_v55 = vpop.f32.mrf.mxu1  ;;  %v17087_v50 = vpop.f32.mrf.mxu0  ;;  %v5316_v20 = vadd.f32 %v18539_v32, %v18538_v61  ;;  %v9013_v2 = vor.u32 %v9011_v17, %v9009_v44  ;;  %v9017_v52 = vrot.slane %v9015_v31, 1  ;;  %v14916_v59 = vld [vmem:[#allocation2 + $0xa8] sm:$0xff]   ;;  %14220 = vmatpush3.bf16.msra.mxu1 %v14802_v7  ;;  %v14737_v61 = vld [vmem:[#allocation2 + $0x78] sm:$0xff]  }
 0x3e3   :  { %18533 = vst [vmem:[#allocation104_spill] sm:$0xff] %v17083_v38  ;;  %18536 = vst [vmem:[#allocation23_spill] sm:$0xff] %v17087_v50  ;;  %v17089_v13 = vadd.f32 %v6433_v55, %v5314_v24  ;;  %v9023_v38 = vshll.u32 %v14916_v59, 16  ;;  %v18543_v24 = vld [vmem:[#allocation27_spill] sm:$0xff]  ;;  %v18544_v55 = vld [vmem:[#allocation20_spill] sm:$0xff] }
 0x3e4   :  { %v13758_v58 = vpop.f32.mrf.mxu1  ;;  %v17093_v35 = vpop.f32.mrf.mxu0  ;;  %v9018_v31 = vsel %vm2176_vm1, %v9013_v2, %v9017_v52  ;;  %v9021_v44 = vor.u32 %v9019_v46, %v9017_v52 }
 0x3e5   :  { %18537 = vst [vmem:[#allocation18_spill] sm:$0xff] %v17089_v13  ;;  %18540 = vst [vmem:[#allocation24_spill] sm:$0xff] %v17093_v35  ;;  %v17095_v54 = vadd.f32 %v13758_v58, %v5316_v20  ;;  %v5318_v13 = vadd.f32 %v18544_v55, %v18543_v24  ;;  %v9025_v7 = vrot.slane %v9023_v38, 1  ;;  %v9027_v20 = vshrl.u32 %v14916_v59, 16  ;;  %v14917_v24 = vld [vmem:[#allocation2 + $0xb0] sm:$0xff]   ;;  %v14739_v38 = vld [vmem:[#allocation2 + $0x80] sm:$0xff]  }
 0x3e6   :  { %v6436_v23 = vpop.f32.mrf.mxu1  ;;  %v17097_v50 = vpop.f32.mrf.mxu0  ;;  %v9031_v55 = vshll.u32 %v14917_v24, 16 }
 0x3e7   :  { %18541 = vst [vmem:[#allocation105_spill] sm:$0xff] %v17095_v54  ;;  %18542 = vst [vmem:[#allocation25_spill] sm:$0xff] %v17097_v50  ;;  %v14753_v54 = vld [vmem:[#allocation2 + $0xd0] sm:$0xff]  }
 0x3e8   :  { %v13761_v32 = vpop.f32.mrf.mxu1  ;;  %13996 = vmatmul.mubr.bf16.gmra.mxu1 %v14735_v34  ;;  %v17102_v17 = vpop.f32.mrf.mxu0  ;;  %14128 = vmatmul.mubr.bf16.gmra.mxu0 %v9010_v15  ;;  %v9029_v34 = vor.u32 %v9027_v20, %v9025_v7  ;;  %v18550_v15 = vld [vmem:[#allocation22_spill] sm:$0xff] }
 0x3e9   :  { %18545 = vst [vmem:[#allocation19_spill] sm:$0xff] %v17102_v17  ;;  %v17105_v58 = vadd.f32 %v13761_v32, %v5318_v13  ;;  %13999 = vmatprep.mubr.bf16.mxu1 %v14737_v61  ;;  %14131 = vmatprep.mubr.bf16.mxu0 %v9018_v31  ;;  %v18549_v17 = vld [vmem:[#allocation28_spill] sm:$0xff]  ;;  %v9033_v13 = vrot.slane %v9031_v55, 1 }
 0x3ea   :  { %v6448_v23 = vpop.f32.mrf.mxu1  ;;  %v17107_v50 = vpop.f32.mrf.mxu0  ;;  %v5317_v35 = vadd.f32 %v18550_v15, %v18549_v17  ;;  %v14918_v32 = vld [vmem:[#allocation2 + $0xb8] sm:$0xff]   ;;  %v18554_v15 = vld [vmem:[#allocation107_spill] sm:$0xff] }
 0x3eb   :  { %18546 = vst [vmem:[#allocation26_spill] sm:$0xff] %v17105_v58  ;;  %18547 = vst [vmem:[#allocation106_spill] sm:$0xff] %v17107_v50  ;;  %v9039_v61 = vshll.u32 %v14918_v32, 16  ;;  %v14741_v23 = vld [vmem:[#allocation2 + $0x88] sm:$0xff]   ;;  %v9026_v50 = vsel %vm2176_vm1, %v9021_v44, %v9025_v7  ;;  %v9035_v58 = vshrl.u32 %v14917_v24, 16  ;;  %v9034_v20 = vsel %vm2176_vm1, %v9029_v34, %v9033_v13  ;;  %v18557_v44 = vld [vmem:[#allocation108_spill] sm:$0xff] }
 0x3ec   :  { %v13762_v9 = vpop.f32.mrf.mxu1  ;;  %v17109_v42 = vpop.f32.mrf.mxu0  ;;  %v9043_v17 = vshrl.u32 %v14918_v32, 16  ;;  %v18556_v24 = vld [vmem:[#allocation30_spill] sm:$0xff] }
 0x3ed   :  { %18548 = vst [vmem:[#allocation27_spill] sm:$0xff] %v17109_v42  ;;  %v18553_v9 = vld [vmem:[#allocation29_spill] sm:$0xff]  ;;  %v14920_v32 = vld [vmem:[#allocation2 + $0xc8] sm:$0xff]  }
 0x3ee   :  { %v6450_v2 = vpop.f32.mrf.mxu1  ;;  %v7197_v59 = vpop.f32.mrf.mxu0  ;;  %v5319_v55 = vadd.f32 %v18554_v15, %v18553_v9  ;;  %v14919_v42 = vld [vmem:[#allocation2 + $0xc0] sm:$0xff]  }
 0x3ef   :  { %v17113_v31 = vadd.f32 %v6450_v2, %v5317_v35  ;;  %v9041_v2 = vrot.slane %v9039_v61, 1  ;;  %v18560_v9 = vld [vmem:[#allocation109_spill] sm:$0xff] }
 0x3f0   :  { %v13765_v52 = vpop.f32.mrf.mxu1  ;;  %14000 = vmatmul.mubr.bf16.gmra.mxu1 %v14739_v38  ;;  %v17116_v46 = vpop.f32.mrf.mxu0  ;;  %14132 = vmatmul.mubr.bf16.gmra.mxu0 %v9026_v50  ;;  %v5321_v38 = vadd.f32 %v18557_v44, %v18556_v24  ;;  %v18563_v24 = vld [vmem:[#allocation32_spill] sm:$0xff]  ;;  %v9051_v44 = vshrl.u32 %v14919_v42, 16 }
 0x3f1   :  { %18551 = vst [vmem:[#allocation20_spill] sm:$0xff] %v17113_v31  ;;  %18552 = vst [vmem:[#allocation28_spill] sm:$0xff] %v17116_v46  ;;  %14003 = vmatprep.mubr.bf16.mxu1 %v14741_v23  ;;  %14135 = vmatprep.mubr.bf16.mxu0 %v9034_v20  ;;  %v9047_v31 = vshll.u32 %v14919_v42, 16  ;;  %v9037_v52 = vor.u32 %v9035_v58, %v9033_v13  ;;  %v9045_v34 = vor.u32 %v9043_v17, %v9041_v2  ;;  %v18559_v20 = vld [vmem:[#allocation31_spill] sm:$0xff]  ;;  %v18564_v58 = vld [vmem:[#allocation110_spill] sm:$0xff] }
 0x3f2   :  { %v6462_v59 = vpop.f32.mrf.mxu1  ;;  %v7209_v35 = vpop.f32.mrf.mxu0  ;;  %v9055_v23 = vshll.u32 %v14920_v32, 16  ;;  %v5320_v15 = vadd.f32 %v18560_v9, %v18559_v20  ;;  %v5323_v13 = vadd.f32 %v18564_v58, %v18563_v24  ;;  %v9059_v9 = vshrl.u32 %v14920_v32, 16  ;;  %v18569_v42 = vld [vmem:[#allocation34_spill] sm:$0xff] }
 0x3f3   :  { %v17121_v7 = vadd.f32 %v6462_v59, %v5319_v55  ;;  %v14744_v35 = vld [vmem:[#allocation2 + $0x90] sm:$0xff]   ;;  %v9049_v55 = vrot.slane %v9047_v31, 1  ;;  %v9042_v17 = vsel %vm2176_vm1, %v9037_v52, %v9041_v2  ;;  %v18566_v31 = vld [vmem:[#allocation33_spill] sm:$0xff] }
 0x3f4   :  { %v13766_v50 = vpop.f32.mrf.mxu1  ;;  %v13898_v46 = vpop.f32.mrf.mxu0  ;;  %v9057_v20 = vrot.slane %v9055_v23, 1  ;;  %v18570_v52 = vld [vmem:[#allocation112_spill] sm:$0xff] }
 0x3f5   :  { %18555 = vst [vmem:[#allocation22_spill] sm:$0xff] %v17121_v7  ;;  %v17125_v25 = vadd.f32 %v13766_v50, %v5321_v38  ;;  %v14746_v46 = vld [vmem:[#allocation2 + $0x98] sm:$0xff]   ;;  %v9050_v50 = vsel %vm2176_vm1, %v9045_v34, %v9049_v55 }
 0x3f6   :  { %v6465_v61 = vpop.f32.mrf.mxu1  ;;  %v17129_v56 = vpop.f32.mrf.mxu0  ;;  %v9061_v23 = vor.u32 %v9059_v9, %v9057_v20 }
 0x3f7   :  { %18558 = vst [vmem:[#allocation29_spill] sm:$0xff] %v17125_v25  ;;  %18561 = vst [vmem:[#allocation107_spill] sm:$0xff] %v17129_v56  ;;  %v17131_v59 = vadd.f32 %v6465_v61, %v5320_v15  ;;  %v9063_v25 = vshll.u32 %v14753_v54, 16  ;;  %v18567_v15 = vld [vmem:[#allocation111_spill] sm:$0xff] }
 0x3f8   :  { %v13769_v7 = vpop.f32.mrf.mxu1  ;;  %14004 = vmatmul.mubr.bf16.gmra.mxu1 %v14744_v35  ;;  %v13901_v38 = vpop.f32.mrf.mxu0  ;;  %14136 = vmatmul.mubr.bf16.gmra.mxu0 %v9042_v17  ;;  %v5322_v61 = vadd.f32 %v18567_v15, %v18566_v31  ;;  %v5324_v35 = vadd.f32 %v18570_v52, %v18569_v42  ;;  %v9053_v17 = vor.u32 %v9051_v44, %v9049_v55 }
 0x3f9   :  { %18562 = vst [vmem:[#allocation30_spill] sm:$0xff] %v17131_v59  ;;  %v17137_v56 = vadd.f32 %v13769_v7, %v5323_v13  ;;  %14007 = vmatprep.mubr.bf16.mxu1 %v14746_v46  ;;  %14139 = vmatprep.mubr.bf16.mxu0 %v9050_v50  ;;  %v9065_v32 = vrot.slane %v9063_v25, 1  ;;  %v14921_v59 = vld [vmem:[#allocation2 + $0xd8] sm:$0xff]   ;;  %v14748_v50 = vld [vmem:[#allocation2 + $0xa0] sm:$0xff]  }
 0x3fa   :  { %v6477_v24 = vpop.f32.mrf.mxu1  ;;  %v7223_v58 = vpop.f32.mrf.mxu0  ;;  %v9071_v7 = vshll.u32 %v14921_v59, 16  ;;  %v14814_v13 = vld [vmem:[#allocation8 + $0x200] sm:$0xff]   ;;  %v9058_v55 = vsel %vm2176_vm1, %v9053_v17, %v9057_v20 }
 0x3fb   :  { %18565 = vst [vmem:[#allocation108_spill] sm:$0xff] %v17137_v56  ;;  %v17141_v2 = vadd.f32 %v6477_v24, %v5322_v61  ;;  %v9067_v56 = vshrl.u32 %v14753_v54, 16  ;;  %14221 = vmatprep.subr.bf16.mxu1 %v14814_v13  ;;  %v18571_v61 = vld [vmem:[#allocation35_spill] sm:$0xff]  ;;  %v18572_v24 = vld [vmem:[#allocation113_spill] sm:$0xff]  ;;  %v9066_v9 = vsel %vm2176_vm1, %v9061_v23, %v9065_v32  ;;  %v9075_v54 = vshrl.u32 %v14921_v59, 16 }
 0x3fc   :  { %v13770_v38 = vpop.f32.mrf.mxu1  ;;  %v13902_v34 = vpop.f32.mrf.mxu0  ;;  %v5326_v58 = vadd.f32 %v18572_v24, %v18571_v61  ;;  %14222 = vmatpush3.bf16.msra.mxu1 %v14814_v13  ;;  %v9073_v42 = vrot.slane %v9071_v7, 1  ;;  %v18576_v24 = vld [vmem:[#allocation36_spill] sm:$0xff] }
 0x3fd   :  { %18568 = vst [vmem:[#allocation31_spill] sm:$0xff] %v17141_v2  ;;  %v17145_v46 = vadd.f32 %v13770_v38, %v5324_v35  ;;  %v14750_v2 = vld [vmem:[#allocation2 + $0xa8] sm:$0xff]   ;;  %v9069_v35 = vor.u32 %v9067_v56, %v9065_v32  ;;  %v14754_v32 = vld [vmem:[#allocation2 + $0xb8] sm:$0xff]  }
 0x3fe   :  { %v6480_v31 = vpop.f32.mrf.mxu1  ;;  %v7225_v15 = vpop.f32.mrf.mxu0  ;;  %v9077_v13 = vor.u32 %v9075_v54, %v9073_v42 }
 0x3ff   :  { %v14922_v31 = vld [vmem:[#allocation2 + $0xe0] sm:$0xff]   ;;  %v9074_v59 = vsel %vm2176_vm1, %v9069_v35, %v9073_v42 }
 0x400   :  { %v13773_v44 = vpop.f32.mrf.mxu1  ;;  %14008 = vmatmul.mubr.bf16.gmra.mxu1 %v14748_v50  ;;  %v17150_v25 = vpop.f32.mrf.mxu0  ;;  %14140 = vmatmul.mubr.bf16.gmra.mxu0 %v9058_v55  ;;  %v9079_v15 = vshll.u32 %v14922_v31, 16  ;;  %v14923_v50 = vld [vmem:[#allocation2 + $0xe8] sm:$0xff]  }
 0x401   :  { %18573 = vst [vmem:[#allocation109_spill] sm:$0xff] %v17150_v25  ;;  %v17153_v52 = vadd.f32 %v13773_v44, %v5326_v58  ;;  %14011 = vmatprep.mubr.bf16.mxu1 %v14750_v2  ;;  %14143 = vmatprep.mubr.bf16.mxu0 %v9066_v9  ;;  %v9087_v61 = vshll.u32 %v14923_v50, 16  ;;  %v18577_v55 = vld [vmem:[#allocation114_spill] sm:$0xff]  ;;  %v14752_v58 = vld [vmem:[#allocation2 + $0xb0] sm:$0xff]   ;;  %v9083_v9 = vshrl.u32 %v14922_v31, 16  ;;  %v14925_v31 = vld [vmem:[#allocation2 + $0xf8] sm:$0xff]  }
 0x402   :  { %v6492_v38 = vpop.f32.mrf.mxu1  ;;  %v7235_v34 = vpop.f32.mrf.mxu0  ;;  %v5325_v23 = vadd.f32 %v18577_v55, %v18576_v24  ;;  %v9081_v44 = vrot.slane %v9079_v15, 1  ;;  %v14924_v24 = vld [vmem:[#allocation2 + $0xf0] sm:$0xff]   ;;  %v14756_v25 = vld [vmem:[#allocation2 + $0xc0] sm:$0xff]  }
 0x403   :  { %18574 = vst [vmem:[#allocation32_spill] sm:$0xff] %v17153_v52  ;;  %v9095_v55 = vshll.u32 %v14924_v24, 16 }
 0x404   :  { %v13774_v20 = vpop.f32.mrf.mxu1  ;;  %v17155_v17 = vpop.f32.mrf.mxu0  ;;  %v9082_v54 = vsel %vm2176_vm1, %v9077_v13, %v9081_v44  ;;  %v9085_v15 = vor.u32 %v9083_v9, %v9081_v44  ;;  %v18581_v13 = vld [vmem:[#allocation37_spill] sm:$0xff] }
 0x405   :  { %18575 = vst [vmem:[#allocation110_spill] sm:$0xff] %v17155_v17  ;;  %v9089_v20 = vrot.slane %v9087_v61, 1  ;;  %v9091_v17 = vshrl.u32 %v14923_v50, 16  ;;  %v18582_v61 = vld [vmem:[#allocation115_spill] sm:$0xff] }
 0x406   :  { %v6494_v7 = vpop.f32.mrf.mxu1  ;;  %v7237_v2 = vpop.f32.mrf.mxu0  ;;  %v5327_v50 = vadd.f32 %v18582_v61, %v18581_v13  ;;  %v18584_v61 = vld [vmem:[#allocation38_spill] sm:$0xff] }
 0x407   :  { %v17160_v56 = vadd.f32 %v6494_v7, %v5325_v23  ;;  %v9093_v2 = vor.u32 %v9091_v17, %v9089_v20 }
 0x408   :  { %v13777_v38 = vpop.f32.mrf.mxu1  ;;  %14012 = vmatmul.mubr.bf16.gmra.mxu1 %v14752_v58  ;;  %v17162_v34 = vpop.f32.mrf.mxu0  ;;  %14144 = vmatmul.mubr.bf16.gmra.mxu0 %v9074_v59  ;;  %v9097_v59 = vrot.slane %v9095_v55, 1 }
 0x409   :  { %18578 = vst [vmem:[#allocation33_spill] sm:$0xff] %v17160_v56  ;;  %18579 = vst [vmem:[#allocation111_spill] sm:$0xff] %v17162_v34  ;;  %14015 = vmatprep.mubr.bf16.mxu1 %v14754_v32  ;;  %14147 = vmatprep.mubr.bf16.mxu0 %v9082_v54  ;;  %v9103_v38 = vshll.u32 %v14925_v31, 16  ;;  %v14759_v32 = vld [vmem:[#allocation2 + $0xc8] sm:$0xff]   ;;  %v9090_v54 = vsel %vm2176_vm1, %v9085_v15, %v9089_v20  ;;  %v18585_v20 = vld [vmem:[#allocation116_spill] sm:$0xff] }
 0x40a   :  { %v6506_v42 = vpop.f32.mrf.mxu1  ;;  %v7249_v35 = vpop.f32.mrf.mxu0  ;;  %v9098_v17 = vsel %vm2176_vm1, %v9093_v2, %v9097_v59 }
 0x40b   :  { %v9099_v42 = vshrl.u32 %v14924_v24, 16  ;;  %v9105_v9 = vrot.slane %v9103_v38, 1  ;;  %v5328_v24 = vadd.f32 %v18585_v20, %v18584_v61 }
 0x40c   :  { %v13778_v23 = vpop.f32.mrf.mxu1  ;;  %v13910_v7 = vpop.f32.mrf.mxu0 }
 0x40d   :  { %v9107_v23 = vshrl.u32 %v14925_v31, 16  ;;  %v14926_v7 = vld [vmem:[#allocation2 + $0x100] sm:$0xff]   ;;  %v9101_v15 = vor.u32 %v9099_v42, %v9097_v59  ;;  %v14927_v31 = vld [vmem:[#allocation2 + $0x108] sm:$0xff]  }
 0x40e   :  { %v6508_v58 = vpop.f32.mrf.mxu1  ;;  %v17165_v34 = vpop.f32.mrf.mxu0  ;;  %v9115_v59 = vshrl.u32 %v14926_v7, 16 }
 0x40f   :  { %18580 = vst [vmem:[#allocation34_spill] sm:$0xff] %v17165_v34  ;;  %v9111_v58 = vshll.u32 %v14926_v7, 16  ;;  %v9109_v2 = vor.u32 %v9107_v23, %v9105_v9  ;;  %v9119_v34 = vshll.u32 %v14927_v31, 16  ;;  %v9106_v61 = vsel %vm2176_vm1, %v9101_v15, %v9105_v9 }
 0x410   :  { %v13781_v35 = vpop.f32.mrf.mxu1  ;;  %14016 = vmatmul.mubr.bf16.gmra.mxu1 %v14756_v25  ;;  %v13913_v44 = vpop.f32.mrf.mxu0  ;;  %14148 = vmatmul.mubr.bf16.gmra.mxu0 %v9090_v54 }
 0x411   :  { %v17171_v56 = vadd.f32 %v13781_v35, %v5327_v50  ;;  %14019 = vmatprep.mubr.bf16.mxu1 %v14759_v32  ;;  %14151 = vmatprep.mubr.bf16.mxu0 %v9098_v17  ;;  %v14761_v44 = vld [vmem:[#allocation2 + $0xd0] sm:$0xff]   ;;  %v9113_v38 = vrot.slane %v9111_v58, 1  ;;  %v14763_v50 = vld [vmem:[#allocation2 + $0xd8] sm:$0xff]   ;;  %v9121_v58 = vrot.slane %v9119_v34, 1  ;;  %v14765_v34 = vld [vmem:[#allocation2 + $0xe0] sm:$0xff]  }
 0x412   :  { %v6518_v55 = vpop.f32.mrf.mxu1  ;;  %v17173_v13 = vpop.f32.mrf.mxu0  ;;  %v18589_v17 = vld [vmem:[#allocation39_spill] sm:$0xff] }
 0x413   :  { %18583 = vst [vmem:[#allocation112_spill] sm:$0xff] %v17173_v13  ;;  %v18590_v55 = vld [vmem:[#allocation117_spill] sm:$0xff]  ;;  %v9114_v23 = vsel %vm2176_vm1, %v9109_v2, %v9113_v38  ;;  %v9117_v9 = vor.u32 %v9115_v59, %v9113_v38 }
 0x414   :  { %v13782_v25 = vpop.f32.mrf.mxu1  ;;  %v17177_v54 = vpop.f32.mrf.mxu0  ;;  %v5330_v13 = vadd.f32 %v18590_v55, %v18589_v17  ;;  %v14928_v17 = vld [vmem:[#allocation2 + $0x110] sm:$0xff]  }
 0x415   :  { %18586 = vst [vmem:[#allocation35_spill] sm:$0xff] %v17177_v54  ;;  %v17179_v52 = vadd.f32 %v13782_v25, %v5328_v24  ;;  %v9123_v24 = vshrl.u32 %v14927_v31, 16  ;;  %v9127_v55 = vshll.u32 %v14928_v17, 16 }
 0x416   :  { %v6520_v32 = vpop.f32.mrf.mxu1  ;;  %v17181_v35 = vpop.f32.mrf.mxu0 }
 0x417   :  { %18587 = vst [vmem:[#allocation113_spill] sm:$0xff] %v17179_v52  ;;  %18588 = vst [vmem:[#allocation36_spill] sm:$0xff] %v17181_v35 }
 0x418   :  { %v13785_v42 = vpop.f32.mrf.mxu1  ;;  %14020 = vmatmul.mubr.bf16.gmra.mxu1 %v14761_v44  ;;  %v17186_v20 = vpop.f32.mrf.mxu0  ;;  %14152 = vmatmul.mubr.bf16.gmra.mxu0 %v9106_v61  ;;  %v9125_v44 = vor.u32 %v9123_v24, %v9121_v58  ;;  %v18596_v61 = vld [vmem:[#allocation118_spill] sm:$0xff] }
 0x419   :  { %18591 = vst [vmem:[#allocation114_spill] sm:$0xff] %v17186_v20  ;;  %v17189_v25 = vadd.f32 %v13785_v42, %v5330_v13  ;;  %14023 = vmatprep.mubr.bf16.mxu1 %v14763_v50  ;;  %14155 = vmatprep.mubr.bf16.mxu0 %v9114_v23  ;;  %v18595_v20 = vld [vmem:[#allocation40_spill] sm:$0xff]  ;;  %v9129_v13 = vrot.slane %v9127_v55, 1 }
 0x41a   :  { %v6532_v32 = vpop.f32.mrf.mxu1  ;;  %v17191_v35 = vpop.f32.mrf.mxu0  ;;  %v5329_v54 = vadd.f32 %v18596_v61, %v18595_v20  ;;  %v14929_v42 = vld [vmem:[#allocation2 + $0x118] sm:$0xff]   ;;  %v18600_v61 = vld [vmem:[#allocation119_spill] sm:$0xff] }
 0x41b   :  { %18592 = vst [vmem:[#allocation37_spill] sm:$0xff] %v17189_v25  ;;  %18593 = vst [vmem:[#allocation115_spill] sm:$0xff] %v17191_v35  ;;  %v9135_v50 = vshll.u32 %v14929_v42, 16  ;;  %v14767_v32 = vld [vmem:[#allocation2 + $0xe8] sm:$0xff]   ;;  %v9122_v35 = vsel %vm2176_vm1, %v9117_v9, %v9121_v58  ;;  %v9131_v25 = vshrl.u32 %v14928_v17, 16  ;;  %v9130_v24 = vsel %vm2176_vm1, %v9125_v44, %v9129_v13  ;;  %v18602_v17 = vld [vmem:[#allocation120_spill] sm:$0xff] }
 0x41c   :  { %v13786_v7 = vpop.f32.mrf.mxu1  ;;  %v17193_v15 = vpop.f32.mrf.mxu0  ;;  %v9139_v20 = vshrl.u32 %v14929_v42, 16  ;;  %v5333_v9 = vadd.f32 %v18602_v17, %v16653_v51  ;;  %v14931_v42 = vld [vmem:[#allocation2 + $0x128] sm:$0xff]  }
 0x41d   :  { %18594 = vst [vmem:[#allocation38_spill] sm:$0xff] %v17193_v15  ;;  %v18599_v7 = vld [vmem:[#allocation41_spill] sm:$0xff]  ;;  %v18608_v51 = vld [vmem:[#allocation122_spill] sm:$0xff] }
 0x41e   :  { %v6534_v2 = vpop.f32.mrf.mxu1  ;;  %v7281_v31 = vpop.f32.mrf.mxu0  ;;  %v5331_v55 = vadd.f32 %v18600_v61, %v18599_v7  ;;  %v14930_v15 = vld [vmem:[#allocation2 + $0x120] sm:$0xff]   ;;  %v18604_v7 = vld [vmem:[#allocation43_spill] sm:$0xff] }
 0x41f   :  { %v17197_v23 = vadd.f32 %v6534_v2, %v5329_v54  ;;  %v9137_v2 = vrot.slane %v9135_v50, 1  ;;  %v14769_v50 = vld [vmem:[#allocation2 + $0xf0] sm:$0xff]   ;;  %v9147_v17 = vshrl.u32 %v14930_v15, 16 }
 0x420   :  { %v13789_v38 = vpop.f32.mrf.mxu1  ;;  %14024 = vmatmul.mubr.bf16.gmra.mxu1 %v14765_v34  ;;  %v17200_v59 = vpop.f32.mrf.mxu0  ;;  %14156 = vmatmul.mubr.bf16.gmra.mxu0 %v9122_v35  ;;  %v9133_v34 = vor.u32 %v9131_v25, %v9129_v13  ;;  %v14771_v13 = vld [vmem:[#allocation2 + $0xf8] sm:$0xff]  }
 0x421   :  { %18597 = vst [vmem:[#allocation116_spill] sm:$0xff] %v17197_v23  ;;  %18598 = vst [vmem:[#allocation39_spill] sm:$0xff] %v17200_v59  ;;  %14027 = vmatprep.mubr.bf16.mxu1 %v14767_v32  ;;  %14159 = vmatprep.mubr.bf16.mxu0 %v9130_v24  ;;  %v9143_v23 = vshll.u32 %v14930_v15, 16  ;;  %v9141_v44 = vor.u32 %v9139_v20, %v9137_v2  ;;  %v9151_v32 = vshll.u32 %v14931_v42, 16  ;;  %v18605_v24 = vld [vmem:[#allocation121_spill] sm:$0xff] }
 0x422   :  { %v6546_v31 = vpop.f32.mrf.mxu1  ;;  %v7293_v54 = vpop.f32.mrf.mxu0  ;;  %v5332_v61 = vadd.f32 %v18605_v24, %v18604_v7  ;;  %v9138_v20 = vsel %vm2176_vm1, %v9133_v34, %v9137_v2  ;;  %v9155_v24 = vshrl.u32 %v14931_v42, 16  ;;  %v18611_v34 = vld [vmem:[#allocation124_spill] sm:$0xff] }
 0x423   :  { %v17205_v58 = vadd.f32 %v6546_v31, %v5331_v55  ;;  %v9145_v55 = vrot.slane %v9143_v23, 1  ;;  %v9153_v7 = vrot.slane %v9151_v32, 1 }
 0x424   :  { %v13790_v35 = vpop.f32.mrf.mxu1  ;;  %v13922_v38 = vpop.f32.mrf.mxu0 }
 0x425   :  { %18601 = vst [vmem:[#allocation117_spill] sm:$0xff] %v17205_v58  ;;  %v17209_v59 = vadd.f32 %v13790_v35, %v5333_v9  ;;  %v18607_v58 = vld [vmem:[#allocation44_spill] sm:$0xff]  ;;  %v9146_v35 = vsel %vm2176_vm1, %v9141_v44, %v9145_v55  ;;  %v9149_v44 = vor.u32 %v9147_v17, %v9145_v55 }
 0x426   :  { %v6549_v54 = vpop.f32.mrf.mxu1  ;;  %v17213_v52 = vpop.f32.mrf.mxu0  ;;  %v5335_v25 = vadd.f32 %v18608_v51, %v18607_v58  ;;  %v9157_v51 = vor.u32 %v9155_v24, %v9153_v7 }
 0x427   :  { %18603 = vst [vmem:[#allocation40_spill] sm:$0xff] %v17209_v59  ;;  %18606 = vst [vmem:[#allocation118_spill] sm:$0xff] %v17213_v52  ;;  %v17215_v31 = vadd.f32 %v6549_v54, %v5332_v61  ;;  %v14932_v59 = vld [vmem:[#allocation2 + $0x130] sm:$0xff]  }
 0x428   :  { %v13793_v38 = vpop.f32.mrf.mxu1  ;;  %14028 = vmatmul.mubr.bf16.gmra.mxu1 %v14769_v50  ;;  %v13925_v9 = vpop.f32.mrf.mxu0  ;;  %14160 = vmatmul.mubr.bf16.gmra.mxu0 %v9138_v20  ;;  %v9159_v52 = vshll.u32 %v14932_v59, 16  ;;  %v18609_v61 = vld [vmem:[#allocation123_spill] sm:$0xff]  ;;  %v5336_v50 = vadd.f32 %v18611_v34, %v16685_v49  ;;  %v14933_v20 = vld [vmem:[#allocation2 + $0x138] sm:$0xff]   ;;  %v9154_v49 = vsel %vm2176_vm1, %v9149_v44, %v9153_v7  ;;  %v9163_v55 = vshrl.u32 %v14932_v59, 16 }
 0x429   :  { %v17221_v23 = vadd.f32 %v13793_v38, %v5335_v25  ;;  %14031 = vmatprep.mubr.bf16.mxu1 %v14771_v13  ;;  %v5334_v58 = vadd.f32 %v18609_v61, %v16677_v48  ;;  %14163 = vmatprep.mubr.bf16.mxu0 %v9146_v35  ;;  %v9167_v13 = vshll.u32 %v14933_v20, 16  ;;  %v14774_v9 = vld [vmem:[#allocation2 + $0x100] sm:$0xff]  }
 0x42a   :  { %v6561_v54 = vpop.f32.mrf.mxu1  ;;  %v17225_v2 = vpop.f32.mrf.mxu0  ;;  %v9161_v25 = vrot.slane %v9159_v52, 1  ;;  %v18614_v61 = vld [vmem:[#allocation125_spill] sm:$0xff] }
 0x42b   :  { %18610 = vst [vmem:[#allocation41_spill] sm:$0xff] %v17225_v2  ;;  %v17227_v15 = vadd.f32 %v6561_v54, %v5334_v58  ;;  %v5338_v58 = vadd.f32 %v18614_v61, %v16700_v33  ;;  %v14776_v54 = vld [vmem:[#allocation2 + $0x108] sm:$0xff]   ;;  %v9169_v24 = vrot.slane %v9167_v13, 1  ;;  %v14934_v33 = vld [vmem:[#allocation2 + $0x140] sm:$0xff]   ;;  %v14778_v13 = vld [vmem:[#allocation2 + $0x110] sm:$0xff]  }
 0x42c   :  { %v13794_v32 = vpop.f32.mrf.mxu1  ;;  %v17231_v42 = vpop.f32.mrf.mxu0  ;;  %v9162_v52 = vsel %vm2176_vm1, %v9157_v51, %v9161_v25  ;;  %v9175_v61 = vshll.u32 %v14934_v33, 16  ;;  %v9165_v7 = vor.u32 %v9163_v55, %v9161_v25  ;;  %v9179_v2 = vshrl.u32 %v14934_v33, 16  ;;  %v18624_v33 = vld [vmem:[#allocation45_spill] sm:$0xff] }
 0x42d   :  { %18612 = vst [vmem:[#allocation119_spill] sm:$0xff] %v17231_v42  ;;  %v17233_v38 = vadd.f32 %v13794_v32, %v5336_v50  ;;  %v9171_v50 = vshrl.u32 %v14933_v20, 16 }
 0x42e   :  { %v6564_v48 = vpop.f32.mrf.mxu1  ;;  %v17235_v35 = vpop.f32.mrf.mxu0 }
 0x42f   :  { %18613 = vst [vmem:[#allocation120_spill] sm:$0xff] %v17235_v35 }
 0x430   :  { %v13797_v17 = vpop.f32.mrf.mxu1  ;;  %14032 = vmatmul.mubr.bf16.gmra.mxu1 %v14774_v9  ;;  %v17240_v34 = vpop.f32.mrf.mxu0  ;;  %14164 = vmatmul.mubr.bf16.gmra.mxu0 %v9154_v49  ;;  %v9173_v9 = vor.u32 %v9171_v50, %v9169_v24  ;;  %v18619_v49 = vld [vmem:[#allocation42_spill] sm:$0xff] }
 0x431   :  { %18615 = vst [vmem:[#allocation43_spill] sm:$0xff] %v17240_v34  ;;  %v17243_v32 = vadd.f32 %v13797_v17, %v5338_v58  ;;  %14035 = vmatprep.mubr.bf16.mxu1 %v14776_v54  ;;  %14167 = vmatprep.mubr.bf16.mxu0 %v9162_v52  ;;  %v18618_v34 = vld [vmem:[#allocation129_spill] sm:$0xff]  ;;  %v9177_v58 = vrot.slane %v9175_v61, 1  ;;  %v14935_v17 = vld [vmem:[#allocation2 + $0x148] sm:$0xff]  }
 0x432   :  { %v6576_v48 = vpop.f32.mrf.mxu1  ;;  %v17245_v35 = vpop.f32.mrf.mxu0  ;;  %v5337_v42 = vadd.f32 %v18619_v49, %v18618_v34  ;;  %v9183_v54 = vshll.u32 %v14935_v17, 16  ;;  %v9187_v34 = vshrl.u32 %v14935_v17, 16  ;;  %v18623_v49 = vld [vmem:[#allocation126_spill] sm:$0xff]  ;;  %v14937_v17 = vld [vmem:[#allocation2 + $0x158] sm:$0xff]  }
 0x433   :  { %18616 = vst [vmem:[#allocation121_spill] sm:$0xff] %v17245_v35  ;;  %v14780_v48 = vld [vmem:[#allocation2 + $0x118] sm:$0xff]   ;;  %v9170_v35 = vsel %vm2176_vm1, %v9165_v7, %v9169_v24  ;;  %v9178_v50 = vsel %vm2176_vm1, %v9173_v9, %v9177_v58  ;;  %v5341_v7 = vadd.f32 %v18624_v33, %v16735_v45  ;;  %v18628_v45 = vld [vmem:[#allocation127_spill] sm:$0xff] }
 0x434   :  { %v13798_v59 = vpop.f32.mrf.mxu1  ;;  %v17247_v44 = vpop.f32.mrf.mxu0 }
 0x435   :  { %18617 = vst [vmem:[#allocation44_spill] sm:$0xff] %v17247_v44  ;;  %v18622_v59 = vld [vmem:[#allocation131_spill] sm:$0xff] }
 0x436   :  { %v6578_v51 = vpop.f32.mrf.mxu1  ;;  %v7325_v20 = vpop.f32.mrf.mxu0  ;;  %v5339_v61 = vadd.f32 %v18623_v49, %v18622_v59  ;;  %v14936_v44 = vld [vmem:[#allocation2 + $0x150] sm:$0xff]  }
 0x437   :  { %v17251_v52 = vadd.f32 %v6578_v51, %v5337_v42  ;;  %v9185_v51 = vrot.slane %v9183_v54, 1  ;;  %v14782_v54 = vld [vmem:[#allocation2 + $0x120] sm:$0xff]   ;;  %v9195_v33 = vshrl.u32 %v14936_v44, 16 }
 0x438   :  { %v13801_v25 = vpop.f32.mrf.mxu1  ;;  %14036 = vmatmul.mubr.bf16.gmra.mxu1 %v14778_v13  ;;  %v17254_v55 = vpop.f32.mrf.mxu0  ;;  %14168 = vmatmul.mubr.bf16.gmra.mxu0 %v9170_v35  ;;  %v9181_v13 = vor.u32 %v9179_v2, %v9177_v58  ;;  %v5343_v2 = vadd.f32 %v18628_v45, %v16752_v3  ;;  %v14784_v58 = vld [vmem:[#allocation2 + $0x128] sm:$0xff]  }
 0x439   :  { %18620 = vst [vmem:[#allocation122_spill] sm:$0xff] %v17251_v52  ;;  %18621 = vst [vmem:[#allocation123_spill] sm:$0xff] %v17254_v55  ;;  %14039 = vmatprep.mubr.bf16.mxu1 %v14780_v48  ;;  %14171 = vmatprep.mubr.bf16.mxu0 %v9178_v50  ;;  %v9191_v52 = vshll.u32 %v14936_v44, 16  ;;  %v9189_v9 = vor.u32 %v9187_v34, %v9185_v51  ;;  %v9199_v48 = vshll.u32 %v14937_v17, 16  ;;  %v18626_v50 = vld [vmem:[#allocation46_spill] sm:$0xff] }
 0x43a   :  { %v6590_v20 = vpop.f32.mrf.mxu1  ;;  %v7337_v42 = vpop.f32.mrf.mxu0  ;;  %v5340_v59 = vadd.f32 %v18626_v50, %v16741_v11  ;;  %v9186_v34 = vsel %vm2176_vm1, %v9181_v13, %v9185_v51  ;;  %v9203_v50 = vshrl.u32 %v14937_v17, 16  ;;  %v18630_v13 = vld [vmem:[#allocation128_spill] sm:$0xff] }
 0x43b   :  { %v17259_v24 = vadd.f32 %v6590_v20, %v5339_v61  ;;  %v9193_v61 = vrot.slane %v9191_v52, 1 }
 0x43c   :  { %v13802_v35 = vpop.f32.mrf.mxu1  ;;  %v13934_v25 = vpop.f32.mrf.mxu0 }
 0x43d   :  { %v17263_v55 = vadd.f32 %v13802_v35, %v5341_v7  ;;  %v9194_v11 = vsel %vm2176_vm1, %v9189_v9, %v9193_v61  ;;  %v9201_v35 = vrot.slane %v9199_v48, 1  ;;  %v9197_v9 = vor.u32 %v9195_v33, %v9193_v61 }
 0x43e   :  { %v6593_v49 = vpop.f32.mrf.mxu1  ;;  %v17267_v42 = vpop.f32.mrf.mxu0 }
 0x43f   :  { %18625 = vst [vmem:[#allocation124_spill] sm:$0xff] %v17263_v55  ;;  %18627 = vst [vmem:[#allocation125_spill] sm:$0xff] %v17267_v42  ;;  %v17269_v20 = vadd.f32 %v6593_v49, %v5340_v59  ;;  %v14938_v55 = vld [vmem:[#allocation2 + $0x160] sm:$0xff]   ;;  %v18629_v59 = vld [vmem:[#allocation48_spill] sm:$0xff]  ;;  %v9205_v45 = vor.u32 %v9203_v50, %v9201_v35 }
 0x440   :  { %v13805_v25 = vpop.f32.mrf.mxu1  ;;  %14040 = vmatmul.mubr.bf16.gmra.mxu1 %v14782_v54  ;;  %v13937_v7 = vpop.f32.mrf.mxu0  ;;  %14172 = vmatmul.mubr.bf16.gmra.mxu0 %v9186_v34  ;;  %v9207_v42 = vshll.u32 %v14938_v55, 16  ;;  %v5342_v3 = vadd.f32 %v18629_v59, %v16759_v36  ;;  %v5344_v54 = vadd.f32 %v18630_v13, %v16767_v37  ;;  %v14939_v34 = vld [vmem:[#allocation2 + $0x168] sm:$0xff]   ;;  %v9202_v37 = vsel %vm2176_vm1, %v9197_v9, %v9201_v35 }
 0x441   :  { %v17275_v52 = vadd.f32 %v13805_v25, %v5343_v2  ;;  %14043 = vmatprep.mubr.bf16.mxu1 %v14784_v58  ;;  %14175 = vmatprep.mubr.bf16.mxu0 %v9194_v11  ;;  %v9215_v58 = vshll.u32 %v14939_v34, 16  ;;  %v14787_v7 = vld [vmem:[#allocation2 + $0x130] sm:$0xff]   ;;  %v18633_v59 = vld [vmem:[#allocation130_spill] sm:$0xff]  ;;  %v9211_v61 = vshrl.u32 %v14938_v55, 16 }
 0x442   :  { %v6605_v49 = vpop.f32.mrf.mxu1  ;;  %v17279_v51 = vpop.f32.mrf.mxu0  ;;  %v9209_v2 = vrot.slane %v9207_v42, 1 }
 0x443   :  { %v17281_v44 = vadd.f32 %v6605_v49, %v5342_v3  ;;  %v5346_v3 = vadd.f32 %v18633_v59, %v16782_v8  ;;  %v14789_v49 = vld [vmem:[#allocation2 + $0x138] sm:$0xff]   ;;  %v9217_v50 = vrot.slane %v9215_v58, 1  ;;  %v14940_v8 = vld [vmem:[#allocation2 + $0x170] sm:$0xff]   ;;  %v14791_v58 = vld [vmem:[#allocation2 + $0x140] sm:$0xff]  }
 0x444   :  { %v13806_v48 = vpop.f32.mrf.mxu1  ;;  %v17285_v17 = vpop.f32.mrf.mxu0  ;;  %v9210_v42 = vsel %vm2176_vm1, %v9205_v45, %v9209_v2  ;;  %v9223_v59 = vshll.u32 %v14940_v8, 16  ;;  %v9213_v35 = vor.u32 %v9211_v61, %v9209_v2 }
 0x445   :  { %18631 = vst [vmem:[#allocation129_spill] sm:$0xff] %v17285_v17  ;;  %v17287_v25 = vadd.f32 %v13806_v48, %v5344_v54  ;;  %v9219_v54 = vshrl.u32 %v14939_v34, 16 }
 0x446   :  { %v6608_v36 = vpop.f32.mrf.mxu1  ;;  %v17289_v11 = vpop.f32.mrf.mxu0 }
 0x447   :  { %18632 = vst [vmem:[#allocation42_spill] sm:$0xff] %v17289_v11 }
 0x448   :  { %v13809_v33 = vpop.f32.mrf.mxu1  ;;  %14044 = vmatmul.mubr.bf16.gmra.mxu1 %v14787_v7  ;;  %v17294_v13 = vpop.f32.mrf.mxu0  ;;  %14176 = vmatmul.mubr.bf16.gmra.mxu0 %v9202_v37  ;;  %v9221_v7 = vor.u32 %v9219_v54, %v9217_v50  ;;  %v5345_v37 = vadd.f32 %v16737_v21, %v16795_v1  ;;  %v18638_v1 = vld [vmem:[#allocation139_spill] sm:$0xff] }
 0x449   :  { %18634 = vst [vmem:[#allocation131_spill] sm:$0xff] %v17294_v13  ;;  %v17297_v48 = vadd.f32 %v13809_v33, %v5346_v3  ;;  %14047 = vmatprep.mubr.bf16.mxu1 %v14789_v49  ;;  %14179 = vmatprep.mubr.bf16.mxu0 %v9210_v42  ;;  %v9225_v3 = vrot.slane %v9223_v59, 1  ;;  %v14941_v33 = vld [vmem:[#allocation2 + $0x178] sm:$0xff]   ;;  %v9227_v13 = vshrl.u32 %v14940_v8, 16 }
 0x44a   :  { %v6620_v36 = vpop.f32.mrf.mxu1  ;;  %v17299_v11 = vpop.f32.mrf.mxu0  ;;  %v9231_v49 = vshll.u32 %v14941_v33, 16  ;;  %v9235_v21 = vshrl.u32 %v14941_v33, 16  ;;  %v18640_v8 = vld [vmem:[#allocation133_spill] sm:$0xff]  ;;  %v14943_v33 = vld [vmem:[#allocation2 + $0x188] sm:$0xff]  }
 0x44b   :  { %18635 = vst [vmem:[#allocation126_spill] sm:$0xff] %v17299_v11  ;;  %v14793_v36 = vld [vmem:[#allocation2 + $0x148] sm:$0xff]   ;;  %v9218_v11 = vsel %vm2176_vm1, %v9213_v35, %v9217_v50  ;;  %v9226_v54 = vsel %vm2176_vm1, %v9221_v7, %v9225_v3  ;;  %v5349_v35 = vadd.f32 %v18640_v8, %v16817_v14 }
 0x44c   :  { %v13810_v55 = vpop.f32.mrf.mxu1  ;;  %v17301_v9 = vpop.f32.mrf.mxu0  ;;  %v18645_v14 = vld [vmem:[#allocation135_spill] sm:$0xff] }
 0x44d   :  { %18636 = vst [vmem:[#allocation45_spill] sm:$0xff] %v17301_v9  ;;  %v18639_v55 = vld [vmem:[#allocation132_spill] sm:$0xff]  ;;  %v14942_v9 = vld [vmem:[#allocation2 + $0x180] sm:$0xff]  }
 0x44e   :  { %v6622_v45 = vpop.f32.mrf.mxu1  ;;  %v7369_v34 = vpop.f32.mrf.mxu0  ;;  %v5347_v59 = vadd.f32 %v18639_v55, %v18638_v1  ;;  %v9239_v17 = vshll.u32 %v14942_v9, 16  ;;  %v9243_v8 = vshrl.u32 %v14942_v9, 16 }
 0x44f   :  { %v17305_v42 = vadd.f32 %v6622_v45, %v5345_v37  ;;  %v9233_v45 = vrot.slane %v9231_v49, 1  ;;  %v14795_v49 = vld [vmem:[#allocation2 + $0x150] sm:$0xff]  }
 0x450   :  { %v13813_v2 = vpop.f32.mrf.mxu1  ;;  %14048 = vmatmul.mubr.bf16.gmra.mxu1 %v14791_v58  ;;  %v17308_v61 = vpop.f32.mrf.mxu0  ;;  %14180 = vmatmul.mubr.bf16.gmra.mxu0 %v9218_v11  ;;  %v9229_v58 = vor.u32 %v9227_v13, %v9225_v3  ;;  %v5351_v13 = vadd.f32 %v18645_v14, %v16834_v29  ;;  %v14797_v3 = vld [vmem:[#allocation2 + $0x158] sm:$0xff]  }
 0x451   :  { %18637 = vst [vmem:[#allocation46_spill] sm:$0xff] %v17308_v61  ;;  %14051 = vmatprep.mubr.bf16.mxu1 %v14793_v36  ;;  %14183 = vmatprep.mubr.bf16.mxu0 %v9226_v54  ;;  %v9237_v7 = vor.u32 %v9235_v21, %v9233_v45  ;;  %v9247_v36 = vshll.u32 %v14943_v33, 16  ;;  %v18642_v54 = vld [vmem:[#allocation134_spill] sm:$0xff]  ;;  %v18647_v29 = vld [vmem:[#allocation136_spill] sm:$0xff]  ;;  %v18651_v14 = vld [vmem:[#allocation137_spill] sm:$0xff] }
 0x452   :  { %v6634_v34 = vpop.f32.mrf.mxu1  ;;  %v7381_v37 = vpop.f32.mrf.mxu0  ;;  %v5348_v1 = vadd.f32 %v18642_v54, %v16823_v5  ;;  %v9234_v21 = vsel %vm2176_vm1, %v9229_v58, %v9233_v45  ;;  %v9251_v54 = vshrl.u32 %v14943_v33, 16 }
 0x453   :  { %v17313_v50 = vadd.f32 %v6634_v34, %v5347_v59  ;;  %v9241_v59 = vrot.slane %v9239_v17, 1  ;;  %v14807_v17 = vld [vmem:[#allocation2 + $0x198] sm:$0xff]  }
 0x454   :  { %v13814_v11 = vpop.f32.mrf.mxu1  ;;  %v13946_v2 = vpop.f32.mrf.mxu0 }
 0x455   :  { %v17317_v61 = vadd.f32 %v13814_v11, %v5349_v35  ;;  %v9242_v5 = vsel %vm2176_vm1, %v9237_v7, %v9241_v59  ;;  %v9249_v11 = vrot.slane %v9247_v36, 1  ;;  %v9245_v36 = vor.u32 %v9243_v8, %v9241_v59 }
 0x456   :  { %v6637_v55 = vpop.f32.mrf.mxu1  ;;  %v17321_v37 = vpop.f32.mrf.mxu0 }
 0x457   :  { %18641 = vst [vmem:[#allocation127_spill] sm:$0xff] %v17317_v61  ;;  %18643 = vst [vmem:[#allocation48_spill] sm:$0xff] %v17321_v37  ;;  %v17323_v34 = vadd.f32 %v6637_v55, %v5348_v1  ;;  %v14944_v61 = vld [vmem:[#allocation2 + $0x190] sm:$0xff]   ;;  %v5350_v55 = vadd.f32 %v18647_v29, %v16841_v30  ;;  %v14799_v30 = vld [vmem:[#allocation2 + $0x160] sm:$0xff]  }
 0x458   :  { %v13817_v2 = vpop.f32.mrf.mxu1  ;;  %14052 = vmatmul.mubr.bf16.gmra.mxu1 %v14795_v49  ;;  %v13949_v35 = vpop.f32.mrf.mxu0  ;;  %14184 = vmatmul.mubr.bf16.gmra.mxu0 %v9234_v21  ;;  %v9255_v37 = vshll.u32 %v14944_v61, 16  ;;  %v18650_v49 = vld [vmem:[#allocation143_spill] sm:$0xff]  ;;  %v14809_v29 = vld [vmem:[#allocation2 + $0x1a0] sm:$0xff]   ;;  %v9259_v59 = vshrl.u32 %v14944_v61, 16 }
 0x459   :  { %18644 = vst [vmem:[#allocation128_spill] sm:$0xff] %v17323_v34  ;;  %v17329_v1 = vadd.f32 %v13817_v2, %v5351_v13  ;;  %14055 = vmatprep.mubr.bf16.mxu1 %v14797_v3  ;;  %14187 = vmatprep.mubr.bf16.mxu0 %v9242_v5  ;;  %v5352_v7 = vadd.f32 %v18651_v14, %v18650_v49  ;;  %v9263_v2 = vshll.u32 %v14807_v17, 16 }
 0x45a   :  { %v6649_v45 = vpop.f32.mrf.mxu1  ;;  %v17333_v9 = vpop.f32.mrf.mxu0  ;;  %v9253_v35 = vor.u32 %v9251_v54, %v9249_v11  ;;  %v9257_v13 = vrot.slane %v9255_v37, 1  ;;  %v9250_v49 = vsel %vm2176_vm1, %v9245_v36, %v9249_v11 }
 0x45b   :  { %18646 = vst [vmem:[#allocation130_spill] sm:$0xff] %v17329_v1  ;;  %18648 = vst [vmem:[#allocation139_spill] sm:$0xff] %v17333_v9  ;;  %v17335_v58 = vadd.f32 %v6649_v45, %v5350_v55  ;;  %v18655_v9 = vld [vmem:[#allocation145_spill] sm:$0xff]  ;;  %v18656_v55 = vld [vmem:[#allocation138_spill] sm:$0xff]  ;;  %v9265_v54 = vrot.slane %v9263_v2, 1 }
 0x45c   :  { %v13818_v33 = vpop.f32.mrf.mxu1  ;;  %v17339_v21 = vpop.f32.mrf.mxu0  ;;  %v5354_v45 = vadd.f32 %v18656_v55, %v18655_v9  ;;  %v9258_v37 = vsel %vm2176_vm1, %v9253_v35, %v9257_v13  ;;  %v9271_v9 = vshll.u32 %v14809_v29, 16  ;;  %v14818_v55 = vld [vmem:[#allocation2 + $0x1b0] sm:$0xff]   ;;  %v9261_v11 = vor.u32 %v9259_v59, %v9257_v13 }
 0x45d   :  { %18649 = vst [vmem:[#allocation132_spill] sm:$0xff] %v17335_v58  ;;  %18652 = vst [vmem:[#allocation133_spill] sm:$0xff] %v17339_v21  ;;  %v17341_v3 = vadd.f32 %v13818_v33, %v5352_v7  ;;  %v14801_v58 = vld [vmem:[#allocation2 + $0x168] sm:$0xff]   ;;  %v9267_v7 = vshrl.u32 %v14807_v17, 16  ;;  %v14804_v17 = vld [vmem:[#allocation2 + $0x170] sm:$0xff]  }
 0x45e   :  { %v6652_v1 = vpop.f32.mrf.mxu1  ;;  %v17343_v5 = vpop.f32.mrf.mxu0 }
 0x45f   :  { %18653 = vst [vmem:[#allocation134_spill] sm:$0xff] %v17341_v3  ;;  %18654 = vst [vmem:[#allocation135_spill] sm:$0xff] %v17343_v5  ;;  %v14811_v1 = vld [vmem:[#allocation2 + $0x1a8] sm:$0xff]   ;;  %v18660_v3 = vld [vmem:[#allocation140_spill] sm:$0xff] }
 0x460   :  { %v13821_v8 = vpop.f32.mrf.mxu1  ;;  %14056 = vmatmul.mubr.bf16.gmra.mxu1 %v14799_v30  ;;  %v13953_v14 = vpop.f32.mrf.mxu0  ;;  %14188 = vmatmul.mubr.bf16.gmra.mxu0 %v9250_v49  ;;  %v9269_v30 = vor.u32 %v9267_v7, %v9265_v54  ;;  %v18659_v49 = vld [vmem:[#allocation147_spill] sm:$0xff] }
 0x461   :  { %v17349_v33 = vadd.f32 %v13821_v8, %v5354_v45  ;;  %14059 = vmatprep.mubr.bf16.mxu1 %v14801_v58  ;;  %14191 = vmatprep.mubr.bf16.mxu0 %v9258_v37  ;;  %v9279_v14 = vshll.u32 %v14811_v1, 16  ;;  %v5353_v35 = vadd.f32 %v18660_v3, %v18659_v49  ;;  %v9273_v45 = vrot.slane %v9271_v9, 1  ;;  %v18662_v3 = vld [vmem:[#allocation148_spill] sm:$0xff] }
 0x462   :  { %v6664_v5 = vpop.f32.mrf.mxu1  ;;  %v17351_v21 = vpop.f32.mrf.mxu0  ;;  %v9283_v8 = vshrl.u32 %v14811_v1, 16  ;;  %v9287_v58 = vshll.u32 %v14818_v55, 16  ;;  %v17361_v1 = vld [vmem:[#allocation2 + $0x1b8] sm:$0xff]  }
 0x463   :  { %18657 = vst [vmem:[#allocation136_spill] sm:$0xff] %v17349_v33  ;;  %18658 = vst [vmem:[#allocation143_spill] sm:$0xff] %v17351_v21  ;;  %v14806_v5 = vld [vmem:[#allocation2 + $0x178] sm:$0xff]   ;;  %v9266_v21 = vsel %vm2176_vm1, %v9261_v11, %v9265_v54  ;;  %v9275_v33 = vshrl.u32 %v14809_v29, 16  ;;  %v9274_v7 = vsel %vm2176_vm1, %v9269_v30, %v9273_v45  ;;  %v18665_v11 = vld [vmem:[#allocation142_spill] sm:$0xff] }
 0x464   :  { %v13822_v61 = vpop.f32.mrf.mxu1  ;;  %v13954_v36 = vpop.f32.mrf.mxu0  ;;  %v18664_v29 = vld [vmem:[#allocation149_spill] sm:$0xff] }
 0x465   :  { %v9281_v61 = vrot.slane %v9279_v14, 1  ;;  %v18663_v36 = vld [vmem:[#allocation141_spill] sm:$0xff] }
 0x466   :  { %v6666_v2 = vpop.f32.mrf.mxu1  ;;  %v7413_v34 = vpop.f32.mrf.mxu0 }
 0x467   :  { %v17355_v37 = vadd.f32 %v6666_v2, %v5353_v35  ;;  %v5355_v34 = vadd.f32 %v18663_v36, %v18662_v3  ;;  %v9285_v35 = vor.u32 %v9283_v8, %v9281_v61  ;;  %v9289_v2 = vrot.slane %v9287_v58, 1  ;;  %v14808_v58 = vld [vmem:[#allocation2 + $0x180] sm:$0xff]  }
 0x468   :  { %v13825_v13 = vpop.f32.mrf.mxu1  ;;  %14060 = vmatmul.mubr.bf16.gmra.mxu1 %v14804_v17  ;;  %v13957_v59 = vpop.f32.mrf.mxu0  ;;  %14192 = vmatmul.mubr.bf16.gmra.mxu0 %v9266_v21  ;;  %v5357_v17 = vadd.f32 %v18665_v11, %v18664_v29  ;;  %v9277_v21 = vor.u32 %v9275_v33, %v9273_v45  ;;  %v9295_v36 = vshll.u32 %v17361_v1, 16  ;;  %v14810_v33 = vld [vmem:[#allocation2 + $0x188] sm:$0xff]   ;;  %v18668_v11 = vld [vmem:[#allocation152_spill] sm:$0xff] }
 0x469   :  { %18661 = vst [vmem:[#allocation137_spill] sm:$0xff] %v17355_v37  ;;  %14063 = vmatprep.mubr.bf16.mxu1 %v14806_v5  ;;  %14195 = vmatprep.mubr.bf16.mxu0 %v9274_v7  ;;  %v18666_v5 = vld [vmem:[#allocation150_spill] sm:$0xff]  ;;  %v18667_v59 = vld [vmem:[#allocation144_spill] sm:$0xff]  ;;  %v9291_v7 = vshrl.u32 %v14818_v55, 16  ;;  %v17372_v37 = vld [vmem:[#allocation9 + $0x38] sm:$0xff]  }
 0x46a   :  { %v6678_v9 = vpop.f32.mrf.mxu1  ;;  %v7423_v49 = vpop.f32.mrf.mxu0  ;;  %v5356_v3 = vadd.f32 %v18667_v59, %v18666_v5  ;;  %v9282_v45 = vsel %vm2176_vm1, %v9277_v21, %v9281_v61  ;;  %14331 = vmatprep.subr.bf16.mxu0 %v17372_v37  ;;  %14411 = vmatprep.subr.bf16.mxu1 %v17372_v37 }
 0x46b   :  { %v17363_v54 = vadd.f32 %v6678_v9, %v5355_v34  ;;  %v9290_v9 = vsel %vm2176_vm1, %v9285_v35, %v9289_v2  ;;  %v17382_v35 = vrot.slane %v9295_v36, 1  ;;  %14332 = vmatpush3.bf16.msra.mxu0 %v17372_v37 }
 0x46c   :  { %v13826_v13 = vpop.f32.mrf.mxu1  ;;  %v13958_v30 = vpop.f32.mrf.mxu0 }
 0x46d   :  { %v17367_v14 = vadd.f32 %v13826_v13, %v5357_v17  ;;  %v18669_v17 = vld [vmem:[#allocation146_spill] sm:$0xff]  ;;  %v9293_v30 = vor.u32 %v9291_v7, %v9289_v2  ;;  %v14813_v2 = vld [vmem:[#allocation2 + $0x198] sm:$0xff]  }
 0x46e   :  { %v6681_v8 = vpop.f32.mrf.mxu1  ;;  %v7425_v34 = vpop.f32.mrf.mxu0  ;;  %v5358_v13 = vadd.f32 %v18669_v17, %v18668_v11  ;;  %v14816_v11 = vld [vmem:[#allocation2 + $0x1a8] sm:$0xff]  }
 0x46f   :  { %v17375_v49 = vadd.f32 %v6681_v8, %v5356_v3  ;;  %v9298_v8 = vsel %vm2176_vm1, %v9293_v30, %v17382_v35  ;;  %v14812_v34 = vld [vmem:[#allocation2 + $0x190] sm:$0xff]  }
 0x470   :  { %v13829_v29 = vpop.f32.mrf.mxu1  ;;  %14064 = vmatmul.mubr.bf16.gmra.mxu1 %v14808_v58  ;;  %v14101_v55 = vpop.f32.mrf.mxu0  ;;  %14196 = vmatmul.mubr.bf16.gmra.mxu0 %v9282_v45 }
 0x471   :  { %14067 = vmatprep.mubr.bf16.mxu1 %v14810_v33  ;;  %14199 = vmatprep.mubr.bf16.mxu0 %v9290_v9 }
 0x472   :  { %v6693_v5 = vpop.f32.mrf.mxu1  ;;  %v17384_v59 = vpop.f32.mrf.mxu0 }
 0x473   :  { %v17387_v61 = vadd.f32 %v6693_v5, %v5358_v13  ;;  %v14815_v13 = vld [vmem:[#allocation2 + $0x1a0] sm:$0xff]  }
 0x474   :  { %v13830_v21 = vpop.f32.mrf.mxu1  ;;  %v17389_v3 = vpop.f32.mrf.mxu0 }
 0x476   :  { %v6696_v58 = vpop.f32.mrf.mxu1  ;;  %v17393_v33 = vpop.f32.mrf.mxu0 }
 0x477   :  { %18670 = vst [vmem:[#allocation145_spill] sm:$0xff] %v17393_v33  ;;  %v18675_v58 = vld [vmem:[#allocation151_spill] sm:$0xff] }
 0x478   :  { %v13833_v7 = vpop.f32.mrf.mxu1  ;;  %14068 = vmatmul.mubr.bf16.gmra.mxu1 %v14812_v34  ;;  %v17395_v36 = vpop.f32.mrf.mxu0  ;;  %14200 = vmatmul.mubr.bf16.gmra.mxu0 %v9298_v8  ;;  %v7434_v34 = vadd.f32 %v18675_v58, %v16955_v6  ;;  %v17415_v6 = vld [vmem:[#allocation9 + $0x30] sm:$0xff]   ;;  %v18678_v58 = vld [vmem:[#allocation155_spill] sm:$0xff] }
 0x479   :  { %18671 = vst [vmem:[#allocation138_spill] sm:$0xff] %v17395_v36  ;;  %14071 = vmatprep.mubr.bf16.mxu1 %v14813_v2  ;;  %14333 = vmatprep.subr.bf16.mxu0 %v17415_v6 }
 0x47a   :  { %v6706_v9 = vpop.f32.mrf.mxu1  ;;  %v17397_v45 = vpop.f32.mrf.mxu0  ;;  %14334 = vmatpush3.bf16.msra.mxu0 %v17415_v6 }
 0x47b   :  { %18672 = vst [vmem:[#allocation147_spill] sm:$0xff] %v17397_v45  ;;  %v18676_v9 = vld [vmem:[#allocation153_spill] sm:$0xff]  ;;  %v14817_v45 = vld [vmem:[#allocation2 + $0x1b0] sm:$0xff]  }
 0x47c   :  { %v13834_v29 = vpop.f32.mrf.mxu1  ;;  %v17399_v55 = vpop.f32.mrf.mxu0 }
 0x47d   :  { %18673 = vst [vmem:[#allocation140_spill] sm:$0xff] %v17399_v55  ;;  %v7436_v29 = vadd.f32 %v18676_v9, %v16958_v43  ;;  %v9902_v43 = vld [vmem:[#allocation2 + $0x18] sm:$0xe] }
 0x47e   :  { %v6708_v17 = vpop.f32.mrf.mxu1  ;;  %v9469_v30 = vpop.f32.mrf.mxu0 }
 0x480   :  { %v13977_v5 = vpop.f32.mrf.mxu1  ;;  %14072 = vmatmul.mubr.bf16.gmra.mxu1 %v14815_v13  ;;  %v17401_v21 = vpop.f32.mrf.mxu0  ;;  %v18677_v13 = vld [vmem:[#allocation154_spill] sm:$0xff] }
 0x481   :  { %18674 = vst [vmem:[#allocation148_spill] sm:$0xff] %v17401_v21  ;;  %14075 = vmatprep.mubr.bf16.mxu1 %v14816_v11  ;;  %v7435_v30 = vadd.f32 %v18677_v13, %v16967_v40  ;;  %v14820_v5 = vld [vmem:[#allocation2 + $0x1b8] sm:$0xff]   ;;  %v7437_v40 = vadd.f32 %v16936_v60, %v16978_v63 }
 0x482   :  { %v8029_v8 = vpop.f32.mrf.mxu1  ;;  %v9481_v2 = vpop.f32.mrf.mxu0 }
 0x483   :  { %v17405_v7 = vadd.f32 %v8029_v8, %v7434_v34  ;;  %v7438_v34 = vadd.f32 %v18678_v58, %v16972_v28  ;;  %v14946_v58 = vld [vmem:[#allocation2 + $0x20] sm:$0xff]  }
 0x484   :  { %v13978_v55 = vpop.f32.mrf.mxu1  ;;  %v14110_v17 = vpop.f32.mrf.mxu0 }
 0x485   :  { %v17409_v36 = vadd.f32 %v13978_v55, %v7436_v29  ;;  %v14945_v29 = vld [vmem:[#allocation2 + $0x1c] sm:$0xf] }
 0x486   :  { %v8032_v21 = vpop.f32.mrf.mxu1  ;;  %v17413_v33 = vpop.f32.mrf.mxu0  ;;  %v12104_v17 = vcombine.low %v9902_v43, %v14945_v29  ;;  %v7441_v43 = vadd.f32 %v16949_v22, %v16996_v4  ;;  %v7440_v22 = vadd.f32 %v16963_v16, %v17004_v10 }
 0x487   :  { %v17417_v11 = vadd.f32 %v8032_v21, %v7435_v30  ;;  %v14821_v30 = vld [vmem:[#allocation2 + $0x1c0] sm:$0xff]  }
 0x488   :  { %v13981_v8 = vpop.f32.mrf.mxu1  ;;  %14076 = vmatmul.mubr.bf16.gmra.mxu1 %v14817_v45  ;;  %v14113_v2 = vpop.f32.mrf.mxu0  ;;  %v7439_v45 = vadd.f32 %v16938_v27, %v16985_v39 }
 0x489   :  { %v17422_v55 = vadd.f32 %v13981_v8, %v7438_v34  ;;  %14079 = vmatprep.mubr.bf16.mxu1 %v14820_v5  ;;  %v9924_v34 = vrot.slane %v14946_v58, 1  ;;  %v9923_v5 = vrot.slane %v12104_v17, 1 }
 0x48a   :  { %v8044_v9 = vpop.f32.mrf.mxu1  ;;  %v17427_v21 = vpop.f32.mrf.mxu0 }
 0x48b   :  { %v17429_v28 = vadd.f32 %v8044_v9, %v7437_v40  ;;  %v9925_v9 = vsel %vm3680_vm2, %v9923_v5, %v9924_v34 }
 0x48c   :  { %v13982_v13 = vpop.f32.mrf.mxu1  ;;  %v17433_v8 = vpop.f32.mrf.mxu0 }
 0x48d   :  { %18679 = vst [vmem:[#allocation141_spill] sm:$0xff] %v17433_v8  ;;  %v17435_v60 = vadd.f32 %v13982_v13, %v7439_v45  ;;  %v14947_v45 = vld [vmem:[#allocation2 + $0x28] sm:$0xff]  }
 0x48e   :  { %v8047_v63 = vpop.f32.mrf.mxu1  ;;  %v17437_v2 = vpop.f32.mrf.mxu0  ;;  %v9926_v13 = vrot.slane %v14947_v45, 1  ;;  %v7442_v45 = vadd.f32 %v16976_v19, %v17013_v0  ;;  %v7443_v19 = vadd.f32 %v16988_v57, %v17023_v47  ;;  %v18682_v57 = vld [vmem:[#allocation91_spill] sm:$0xff] }
 0x48f   :  { %18680 = vst [vmem:[#allocation149_spill] sm:$0xff] %v17437_v2  ;;  %v7445_v47 = vadd.f32 %v18682_v57, %v17035_v26 }
 0x490   :  { %v13985_v40 = vpop.f32.mrf.mxu1  ;;  %14080 = vmatmul.mubr.bf16.gmra.mxu1 %v14821_v30  ;;  %v17442_v27 = vpop.f32.mrf.mxu0  ;;  %v14948_v30 = vld [vmem:[#allocation2 + $0x30] sm:$0xff]  }
 0x491   :  { %v17444_v39 = vadd.f32 %v13985_v40, %v7441_v43  ;;  %14223 = vmatprep.mubr.bf16.mxu1 %v9925_v9  ;;  %v9928_v2 = vrot.slane %v14948_v30, 1  ;;  %v9927_v43 = vsel %vm3680_vm2, %v9924_v34, %v9926_v13  ;;  %v7444_v34 = vadd.f32 %v16983_v18, %v17017_v53  ;;  %v14950_v30 = vld [vmem:[#allocation2 + $0x40] sm:$0xff]  }
 0x492   :  { %v8059_v29 = vpop.f32.mrf.mxu1  ;;  %v17446_v58 = vpop.f32.mrf.mxu0  ;;  %v7446_v18 = vadd.f32 %v16993_v62, %v17029_v12  ;;  %v18684_v62 = vld [vmem:[#allocation156_spill] sm:$0xff] }
 0x493   :  { %v9929_v9 = vsel %vm3680_vm2, %v9926_v13, %v9928_v2  ;;  %v7447_v12 = vadd.f32 %v18684_v62, %v17041_v41 }
 0x494   :  { %v13986_v17 = vpop.f32.mrf.mxu1  ;;  %v17448_v63 = vpop.f32.mrf.mxu0 }
 0x496   :  { %v8061_v4 = vpop.f32.mrf.mxu1  ;;  %v9513_v5 = vpop.f32.mrf.mxu0 }
 0x497   :  { %v17452_v8 = vadd.f32 %v8061_v4, %v7440_v22  ;;  %v14949_v22 = vld [vmem:[#allocation2 + $0x38] sm:$0xff]   ;;  %v9932_v5 = vrot.slane %v14950_v30, 1 }
 0x498   :  { %v13989_v40 = vpop.f32.mrf.mxu1  ;;  %14224 = vmatmul.mubr.bf16.vlgmr.msra.gmra.mxu1 %v9927_v43  ;;  %v17456_v29 = vpop.f32.mrf.mxu0  ;;  %v9930_v4 = vrot.slane %v14949_v22, 1 }
 0x499   :  { %14227 = vmatprep.mubr.bf16.mxu1 %v9929_v9  ;;  %14419 = vmatpush3.bf16.msra.mxu1 %v17372_v37 }
 0x49a   :  { %v8073_v16 = vpop.f32.mrf.mxu1  ;;  %v9525_v10 = vpop.f32.mrf.mxu0  ;;  %14412 = vmatprep.subr.bf16.mxu1 %v17415_v6  ;;  %v9931_v53 = vsel %vm3680_vm2, %v9928_v2, %v9930_v4 }
 0x49b   :  { %v17462_v17 = vadd.f32 %v8073_v16, %v7442_v45  ;;  %v9933_v16 = vsel %vm3680_vm2, %v9930_v4, %v9932_v5 }
 0x49c   :  { %v13990_v13 = vpop.f32.mrf.mxu1  ;;  %v14122_v43 = vpop.f32.mrf.mxu0 }
 0x49d   :  { %v17466_v40 = vadd.f32 %v13990_v13, %v7444_v34  ;;  %14420 = vmatpush3.bf16.msra.mxu1 %v17415_v6  ;;  %v14825_v13 = vld [vmem:[#allocation9 + $0x28] sm:$0xff]  }
 0x49e   :  { %v8076_v0 = vpop.f32.mrf.mxu1  ;;  %v17471_v37 = vpop.f32.mrf.mxu0  ;;  %14335 = vmatprep.subr.bf16.mxu0 %v14825_v13  ;;  %14413 = vmatprep.subr.bf16.mxu1 %v14825_v13 }
 0x49f   :  { %18681 = vst [vmem:[#allocation142_spill] sm:$0xff] %v17471_v37  ;;  %v17473_v9 = vadd.f32 %v8076_v0, %v7443_v19  ;;  %14336 = vmatpush3.bf16.msra.mxu0 %v14825_v13  ;;  %v18687_v0 = vld [vmem:[#allocation16_spill] sm:$0xff] }
 0x4a0   :  { %v13993_v45 = vpop.f32.mrf.mxu1  ;;  %14228 = vmatmul.mubr.bf16.gmra.mxu1 %v9931_v53  ;;  %v14125_v10 = vpop.f32.mrf.mxu0 }
 0x4a1   :  { %v17479_v34 = vadd.f32 %v13993_v45, %v7446_v18  ;;  %14231 = vmatprep.mubr.bf16.mxu1 %v9933_v16  ;;  %14421 = vmatpush3.bf16.msra.mxu1 %v14825_v13  ;;  %v18688_v18 = vld [vmem:[#allocation92_spill] sm:$0xff]  ;;  %v18689_v45 = vld [vmem:[#allocation47_spill] sm:$0xff] }
 0x4a2   :  { %v8088_v6 = vpop.f32.mrf.mxu1  ;;  %v17483_v22 = vpop.f32.mrf.mxu0  ;;  %v7449_v53 = vadd.f32 %v18688_v18, %v18687_v0  ;;  %v18690_v16 = vrot.slane %v18689_v45, 1  ;;  %v18696_v0 = vld [vmem:[#allocation93_spill] sm:$0xff] }
 0x4a3   :  { %18683 = vst [vmem:[#allocation150_spill] sm:$0xff] %v17483_v22  ;;  %v17485_v30 = vadd.f32 %v8088_v6, %v7445_v47  ;;  %v18692_v6 = vld [vmem:[#allocation49_spill] sm:$0xff] }
 0x4a4   :  { %v13994_v2 = vpop.f32.mrf.mxu1  ;;  %v17489_v43 = vpop.f32.mrf.mxu0  ;;  %v9935_v10 = vsel %vm3680_vm2, %v9932_v5, %v18690_v16 }
 0x4a5   :  { %18685 = vst [vmem:[#allocation144_spill] sm:$0xff] %v17489_v43  ;;  %v17491_v4 = vadd.f32 %v13994_v2, %v7447_v12  ;;  %v18703_v43 = vld [vmem:[#allocation101_spill] sm:$0xff] }
 0x4a6   :  { %v8091_v19 = vpop.f32.mrf.mxu1  ;;  %v17493_v26 = vpop.f32.mrf.mxu0 }
 0x4a7   :  { %18686 = vst [vmem:[#allocation152_spill] sm:$0xff] %v17493_v26  ;;  %v18695_v19 = vld [vmem:[#allocation97_spill] sm:$0xff] }
 0x4a8   :  { %v13997_v41 = vpop.f32.mrf.mxu1  ;;  %14232 = vmatmul.mubr.bf16.gmra.mxu1 %v9935_v10  ;;  %v17500_v57 = vpop.f32.mrf.mxu0  ;;  %v7448_v18 = vadd.f32 %v18696_v0, %v18695_v19  ;;  %v18697_v10 = vld [vmem:[#allocation50_spill] sm:$0xff] }
 0x4a9   :  { %18691 = vst [vmem:[#allocation146_spill] sm:$0xff] %v17500_v57  ;;  %v17502_v47 = vadd.f32 %v13997_v41, %v7449_v53  ;;  %14235 = vmatprep.mubr.bf16.mxu1 %v18692_v6  ;;  %v18699_v41 = vld [vmem:[#allocation51_spill] sm:$0xff]  ;;  %v18704_v19 = vld [vmem:[#allocation94_spill] sm:$0xff] }
 0x4aa   :  { %v8103_v62 = vpop.f32.mrf.mxu1  ;;  %v17505_v13 = vpop.f32.mrf.mxu0  ;;  %v18700_v6 = vld [vmem:[#allocation99_spill] sm:$0xff]  ;;  %v7452_v0 = vadd.f32 %v18704_v19, %v18703_v43  ;;  %v18714_v19 = vld [vmem:[#allocation53_spill] sm:$0xff] }
 0x4ab   :  { %18693 = vst [vmem:[#allocation151_spill] sm:$0xff] %v17505_v13  ;;  %v18701_v62 = vld [vmem:[#allocation100_spill] sm:$0xff] }
 0x4ac   :  { %v13998_v12 = vpop.f32.mrf.mxu1  ;;  %v17507_v2 = vpop.f32.mrf.mxu0  ;;  %v7450_v13 = vadd.f32 %v18701_v62, %v18700_v6  ;;  %v18710_v6 = vld [vmem:[#allocation104_spill] sm:$0xff]  ;;  %v18711_v62 = vld [vmem:[#allocation95_spill] sm:$0xff] }
 0x4ad   :  { %18694 = vst [vmem:[#allocation153_spill] sm:$0xff] %v17507_v2 }
 0x4ae   :  { %v8105_v45 = vpop.f32.mrf.mxu1  ;;  %v9557_v26 = vpop.f32.mrf.mxu0 }
 0x4af   :  { %v17511_v5 = vadd.f32 %v8105_v45, %v7448_v18 }
 0x4b0   :  { %v14001_v16 = vpop.f32.mrf.mxu1  ;;  %14236 = vmatmul.mubr.bf16.gmra.mxu1 %v18697_v10  ;;  %v17514_v53 = vpop.f32.mrf.mxu0  ;;  %v18707_v10 = vld [vmem:[#allocation102_spill] sm:$0xff] }
 0x4b1   :  { %18698 = vst [vmem:[#allocation154_spill] sm:$0xff] %v17514_v53  ;;  %14239 = vmatprep.mubr.bf16.mxu1 %v18699_v41  ;;  %v18706_v16 = vld [vmem:[#allocation21_spill] sm:$0xff] }
 0x4b2   :  { %v8117_v12 = vpop.f32.mrf.mxu1  ;;  %v9569_v57 = vpop.f32.mrf.mxu0  ;;  %v7451_v22 = vadd.f32 %v18707_v10, %v18706_v16 }
 0x4b3   :  { %v17519_v2 = vadd.f32 %v8117_v12, %v7450_v13  ;;  %v7454_v57 = vadd.f32 %v18711_v62, %v18710_v6  ;;  %v18712_v12 = vld [vmem:[#allocation52_spill] sm:$0xff] }
 0x4b4   :  { %v14002_v26 = vpop.f32.mrf.mxu1  ;;  %v14134_v18 = vpop.f32.mrf.mxu0 }
 0x4b5   :  { %18702 = vst [vmem:[#allocation155_spill] sm:$0xff] %v17519_v2  ;;  %v17523_v45 = vadd.f32 %v14002_v26, %v7452_v0  ;;  %v18715_v0 = vld [vmem:[#allocation18_spill] sm:$0xff]  ;;  %v18716_v26 = vld [vmem:[#allocation96_spill] sm:$0xff] }
 0x4b6   :  { %v8120_v53 = vpop.f32.mrf.mxu1  ;;  %v17527_v37 = vpop.f32.mrf.mxu0  ;;  %v7453_v18 = vadd.f32 %v18716_v26, %v18715_v0  ;;  %v18725_v0 = vld [vmem:[#allocation98_spill] sm:$0xff] }
 0x4b7   :  { %18705 = vst [vmem:[#allocation91_spill] sm:$0xff] %v17523_v45  ;;  %18708 = vst [vmem:[#allocation156_spill] sm:$0xff] %v17527_v37  ;;  %v17529_v41 = vadd.f32 %v8120_v53, %v7451_v22  ;;  %v18719_v22 = vld [vmem:[#allocation105_spill] sm:$0xff] }
 0x4b8   :  { %v14005_v13 = vpop.f32.mrf.mxu1  ;;  %14240 = vmatmul.mubr.bf16.gmra.mxu1 %v18712_v12  ;;  %v14137_v2 = vpop.f32.mrf.mxu0  ;;  %v18720_v53 = vld [vmem:[#allocation17_spill] sm:$0xff]  ;;  %v14826_v12 = vld [vmem:[#allocation9 + $0x20] sm:$0xff]  }
 0x4b9   :  { %18709 = vst [vmem:[#allocation16_spill] sm:$0xff] %v17529_v41  ;;  %v17534_v43 = vadd.f32 %v14005_v13, %v7454_v57  ;;  %14243 = vmatprep.mubr.bf16.mxu1 %v18714_v19  ;;  %v7455_v41 = vadd.f32 %v18720_v53, %v18719_v22  ;;  %14337 = vmatprep.subr.bf16.mxu0 %v14826_v12  ;;  %v18724_v19 = vld [vmem:[#allocation26_spill] sm:$0xff] }
 0x4ba   :  { %v8132_v16 = vpop.f32.mrf.mxu1  ;;  %v17539_v10 = vpop.f32.mrf.mxu0  ;;  %14414 = vmatprep.subr.bf16.mxu1 %v14826_v12  ;;  %v7457_v26 = vadd.f32 %v18725_v0, %v18724_v19  ;;  %14338 = vmatpush3.bf16.msra.mxu0 %v14826_v12 }
 0x4bb   :  { %18713 = vst [vmem:[#allocation92_spill] sm:$0xff] %v17534_v43  ;;  %18717 = vst [vmem:[#allocation47_spill] sm:$0xff] %v17539_v10  ;;  %v17541_v37 = vadd.f32 %v8132_v16, %v7453_v18  ;;  %14422 = vmatpush3.bf16.msra.mxu1 %v14826_v12  ;;  %v18726_v16 = vld [vmem:[#allocation54_spill] sm:$0xff]  ;;  %v18732_v10 = vld [vmem:[#allocation20_spill] sm:$0xff] }
 0x4bc   :  { %v14006_v6 = vpop.f32.mrf.mxu1  ;;  %v17545_v62 = vpop.f32.mrf.mxu0  ;;  %v18735_v43 = vld [vmem:[#allocation57_spill] sm:$0xff] }
 0x4bd   :  { %18718 = vst [vmem:[#allocation49_spill] sm:$0xff] %v17541_v37  ;;  %18721 = vst [vmem:[#allocation97_spill] sm:$0xff] %v17545_v62  ;;  %v17547_v2 = vadd.f32 %v14006_v6, %v7455_v41  ;;  %v18729_v62 = vld [vmem:[#allocation55_spill] sm:$0xff] }
 0x4be   :  { %v8135_v57 = vpop.f32.mrf.mxu1  ;;  %v17549_v13 = vpop.f32.mrf.mxu0 }
 0x4bf   :  { %18722 = vst [vmem:[#allocation93_spill] sm:$0xff] %v17547_v2  ;;  %18723 = vst [vmem:[#allocation50_spill] sm:$0xff] %v17549_v13  ;;  %v18733_v2 = vld [vmem:[#allocation103_spill] sm:$0xff] }
 0x4c0   :  { %v14009_v18 = vpop.f32.mrf.mxu1  ;;  %14244 = vmatmul.mubr.bf16.gmra.mxu1 %v18726_v16  ;;  %v17554_v22 = vpop.f32.mrf.mxu0  ;;  %v7456_v19 = vadd.f32 %v18733_v2, %v18732_v10  ;;  %v18742_v10 = vld [vmem:[#allocation24_spill] sm:$0xff] }
 0x4c1   :  { %18727 = vst [vmem:[#allocation51_spill] sm:$0xff] %v17554_v22  ;;  %v17556_v53 = vadd.f32 %v14009_v18, %v7457_v26  ;;  %14247 = vmatprep.mubr.bf16.mxu1 %v18729_v62  ;;  %v18737_v18 = vld [vmem:[#allocation58_spill] sm:$0xff] }
 0x4c2   :  { %v8147_v41 = vpop.f32.mrf.mxu1  ;;  %v17559_v6 = vpop.f32.mrf.mxu0  ;;  %v18738_v62 = vld [vmem:[#allocation22_spill] sm:$0xff] }
 0x4c3   :  { %18728 = vst [vmem:[#allocation99_spill] sm:$0xff] %v17556_v53  ;;  %18730 = vst [vmem:[#allocation100_spill] sm:$0xff] %v17559_v6  ;;  %v18739_v41 = vld [vmem:[#allocation23_spill] sm:$0xff]  ;;  %v18741_v53 = vld [vmem:[#allocation29_spill] sm:$0xff] }
 0x4c4   :  { %v14010_v57 = vpop.f32.mrf.mxu1  ;;  %v17561_v13 = vpop.f32.mrf.mxu0  ;;  %v7458_v6 = vadd.f32 %v18739_v41, %v18738_v62  ;;  %v7460_v2 = vadd.f32 %v18742_v10, %v18741_v53  ;;  %v18748_v62 = vld [vmem:[#allocation108_spill] sm:$0xff]  ;;  %v18749_v41 = vld [vmem:[#allocation19_spill] sm:$0xff]  ;;  %v18752_v10 = vld [vmem:[#allocation61_spill] sm:$0xff] }
 0x4c5   :  { %18731 = vst [vmem:[#allocation101_spill] sm:$0xff] %v17561_v13 }
 0x4c6   :  { %v8149_v0 = vpop.f32.mrf.mxu1  ;;  %v9601_v12 = vpop.f32.mrf.mxu0 }
 0x4c7   :  { %v17565_v37 = vadd.f32 %v8149_v0, %v7456_v19 }
 0x4c8   :  { %v14013_v16 = vpop.f32.mrf.mxu1  ;;  %14248 = vmatmul.mubr.bf16.gmra.mxu1 %v18735_v43  ;;  %v17568_v26 = vpop.f32.mrf.mxu0  ;;  %v18745_v43 = vld [vmem:[#allocation25_spill] sm:$0xff] }
 0x4c9   :  { %18734 = vst [vmem:[#allocation94_spill] sm:$0xff] %v17565_v37  ;;  %18736 = vst [vmem:[#allocation21_spill] sm:$0xff] %v17568_v26  ;;  %14251 = vmatprep.mubr.bf16.mxu1 %v18737_v18  ;;  %v18744_v16 = vld [vmem:[#allocation30_spill] sm:$0xff] }
 0x4ca   :  { %v8161_v57 = vpop.f32.mrf.mxu1  ;;  %v9613_v22 = vpop.f32.mrf.mxu0  ;;  %v7459_v37 = vadd.f32 %v18745_v43, %v18744_v16 }
 0x4cb   :  { %v17573_v13 = vadd.f32 %v8161_v57, %v7458_v6  ;;  %v7462_v22 = vadd.f32 %v18749_v41, %v18748_v62  ;;  %v18750_v57 = vld [vmem:[#allocation59_spill] sm:$0xff] }
 0x4cc   :  { %v14014_v12 = vpop.f32.mrf.mxu1  ;;  %v14146_v19 = vpop.f32.mrf.mxu0 }
 0x4cd   :  { %18740 = vst [vmem:[#allocation102_spill] sm:$0xff] %v17573_v13  ;;  %v17577_v0 = vadd.f32 %v14014_v12, %v7460_v2  ;;  %v18753_v2 = vld [vmem:[#allocation31_spill] sm:$0xff]  ;;  %v18754_v12 = vld [vmem:[#allocation106_spill] sm:$0xff] }
 0x4ce   :  { %v8164_v26 = vpop.f32.mrf.mxu1  ;;  %v17581_v45 = vpop.f32.mrf.mxu0  ;;  %v7461_v19 = vadd.f32 %v18754_v12, %v18753_v2  ;;  %v14827_v12 = vld [vmem:[#allocation9 + $0x18] sm:$0xff]  }
 0x4cf   :  { %18743 = vst [vmem:[#allocation104_spill] sm:$0xff] %v17577_v0  ;;  %18746 = vst [vmem:[#allocation95_spill] sm:$0xff] %v17581_v45  ;;  %v17583_v18 = vadd.f32 %v8164_v26, %v7459_v37  ;;  %v18756_v37 = vld [vmem:[#allocation27_spill] sm:$0xff]  ;;  %14339 = vmatprep.subr.bf16.mxu0 %v14827_v12  ;;  %14415 = vmatprep.subr.bf16.mxu1 %v14827_v12 }
 0x4d0   :  { %v14017_v6 = vpop.f32.mrf.mxu1  ;;  %14252 = vmatmul.mubr.bf16.gmra.mxu1 %v18750_v57  ;;  %v14149_v13 = vpop.f32.mrf.mxu0  ;;  %v7463_v26 = vadd.f32 %v18756_v37, %v17145_v46  ;;  %14340 = vmatpush3.bf16.msra.mxu0 %v14827_v12 }
 0x4d1   :  { %18747 = vst [vmem:[#allocation52_spill] sm:$0xff] %v17583_v18  ;;  %v17588_v53 = vadd.f32 %v14017_v6, %v7462_v22  ;;  %14255 = vmatprep.mubr.bf16.mxu1 %v18752_v10  ;;  %v18758_v22 = vld [vmem:[#allocation32_spill] sm:$0xff]  ;;  %v18760_v18 = vld [vmem:[#allocation62_spill] sm:$0xff]  ;;  %14423 = vmatpush3.bf16.msra.mxu1 %v14827_v12 }
 0x4d2   :  { %v8176_v16 = vpop.f32.mrf.mxu1  ;;  %v9627_v43 = vpop.f32.mrf.mxu0  ;;  %v18759_v6 = vld [vmem:[#allocation28_spill] sm:$0xff] }
 0x4d3   :  { %18751 = vst [vmem:[#allocation53_spill] sm:$0xff] %v17588_v53  ;;  %v17593_v0 = vadd.f32 %v8176_v16, %v7461_v19  ;;  %v7465_v53 = vadd.f32 %v18759_v6, %v18758_v22  ;;  %v18763_v16 = vld [vmem:[#allocation63_spill] sm:$0xff]  ;;  %v18768_v6 = vld [vmem:[#allocation64_spill] sm:$0xff] }
 0x4d4   :  { %v14018_v45 = vpop.f32.mrf.mxu1  ;;  %v14150_v62 = vpop.f32.mrf.mxu0 }
 0x4d5   :  { %18755 = vst [vmem:[#allocation18_spill] sm:$0xff] %v17593_v0  ;;  %v17597_v41 = vadd.f32 %v14018_v45, %v7463_v26  ;;  %v18765_v26 = vld [vmem:[#allocation33_spill] sm:$0xff]  ;;  %v18766_v62 = vld [vmem:[#allocation107_spill] sm:$0xff] }
 0x4d6   :  { %v8179_v57 = vpop.f32.mrf.mxu1  ;;  %v9629_v13 = vpop.f32.mrf.mxu0 }
 0x4d7   :  { %18757 = vst [vmem:[#allocation96_spill] sm:$0xff] %v17597_v41  ;;  %v7464_v57 = vadd.f32 %v18766_v62, %v18765_v26  ;;  %v18772_v26 = vld [vmem:[#allocation109_spill] sm:$0xff] }
 0x4d8   :  { %v14021_v10 = vpop.f32.mrf.mxu1  ;;  %14256 = vmatmul.mubr.bf16.gmra.mxu1 %v18760_v18  ;;  %v17602_v2 = vpop.f32.mrf.mxu0  ;;  %v7466_v62 = vadd.f32 %v18772_v26, %v17171_v56  ;;  %v18779_v56 = vld [vmem:[#allocation110_spill] sm:$0xff] }
 0x4d9   :  { %18761 = vst [vmem:[#allocation105_spill] sm:$0xff] %v17602_v2  ;;  %v17604_v19 = vadd.f32 %v14021_v10, %v7465_v53  ;;  %14259 = vmatprep.mubr.bf16.mxu1 %v18763_v16  ;;  %v18770_v16 = vld [vmem:[#allocation65_spill] sm:$0xff] }
 0x4da   :  { %v8191_v46 = vpop.f32.mrf.mxu1  ;;  %v9639_v43 = vpop.f32.mrf.mxu0  ;;  %v17631_v26 = vld [vmem:[#allocation2 + $0x1c0] sm:$0xff]  }
 0x4db   :  { %18762 = vst [vmem:[#allocation17_spill] sm:$0xff] %v17604_v19 }
 0x4dc   :  { %v14022_v45 = vpop.f32.mrf.mxu1  ;;  %v17607_v37 = vpop.f32.mrf.mxu0 }
 0x4dd   :  { %18764 = vst [vmem:[#allocation26_spill] sm:$0xff] %v17607_v37  ;;  %v14951_v45 = vld [vmem:[#allocation2 + $0xd0] sm:$0xff]  }
 0x4de   :  { %v8193_v18 = vpop.f32.mrf.mxu1  ;;  %v9641_v13 = vpop.f32.mrf.mxu0  ;;  %v9968_v2 = vrot.slane %v14951_v45, 1 }
 0x4df   :  { %v17611_v22 = vadd.f32 %v8193_v18, %v7464_v57  ;;  %v14828_v57 = vld [vmem:[#allocation9 + $0x10] sm:$0xff]  }
 0x4e0   :  { %v14025_v53 = vpop.f32.mrf.mxu1  ;;  %14260 = vmatmul.mubr.bf16.gmra.mxu1 %v18768_v6  ;;  %v17614_v10 = vpop.f32.mrf.mxu0  ;;  %v18773_v13 = vld [vmem:[#allocation66_spill] sm:$0xff]  ;;  %14341 = vmatprep.subr.bf16.mxu0 %v14828_v57 }
 0x4e1   :  { %18767 = vst [vmem:[#allocation98_spill] sm:$0xff] %v17611_v22  ;;  %18769 = vst [vmem:[#allocation54_spill] sm:$0xff] %v17614_v10  ;;  %14263 = vmatprep.mubr.bf16.mxu1 %v18770_v16  ;;  %v18774_v53 = vld [vmem:[#allocation56_spill] sm:$0xff]  ;;  %14342 = vmatpush3.bf16.msra.mxu0 %v14828_v57 }
 0x4e2   :  { %v8205_v46 = vpop.f32.mrf.mxu1  ;;  %v9653_v43 = vpop.f32.mrf.mxu0  ;;  %v18775_v6 = vrot.slane %v18774_v53, 1  ;;  %14416 = vmatprep.subr.bf16.mxu1 %v14828_v57  ;;  %v17634_v53 = vld [vmem:[#allocation2 + $0x1c8] ss:$0 sps:$4 sm:$0x11]  }
 0x4e3   :  { %14424 = vmatpush3.bf16.msra.mxu1 %v14828_v57  ;;  %v9311_v57 = vshll.u32 %v17634_v53, 16 }
 0x4e4   :  { %v14026_v12 = vpop.f32.mrf.mxu1  ;;  %v14158_v37 = vpop.f32.mrf.mxu0  ;;  %v9969_v16 = vsel %vm3680_vm2, %v18775_v6, %v9968_v2  ;;  %v14831_v6 = vld [vmem:[#allocation9 + $0x8] sm:$0xff]  }
 0x4e5   :  { %v18778_v12 = vld [vmem:[#allocation113_spill] sm:$0xff]  ;;  %14343 = vmatprep.subr.bf16.mxu0 %v14831_v6  ;;  %14417 = vmatprep.subr.bf16.mxu1 %v14831_v6 }
 0x4e6   :  { %v8207_v19 = vpop.f32.mrf.mxu1  ;;  %v17617_v41 = vpop.f32.mrf.mxu0  ;;  %v7467_v45 = vadd.f32 %v18779_v56, %v18778_v12  ;;  %v9303_v12 = vshll.u32 %v17631_v26, 16  ;;  %v9307_v56 = vshrl.u32 %v17631_v26, 16  ;;  %14344 = vmatpush3.bf16.msra.mxu0 %v14831_v6 }
 0x4e7   :  { %18771 = vst [vmem:[#allocation55_spill] sm:$0xff] %v17617_v41  ;;  %14425 = vmatpush3.bf16.msra.mxu1 %v14831_v6 }
 0x4e8   :  { %v14029_v18 = vpop.f32.mrf.mxu1  ;;  %14264 = vmatmul.mubr.bf16.gmra.mxu1 %v18773_v13  ;;  %v14161_v46 = vpop.f32.mrf.mxu0  ;;  %v9299_v13 = vshrl.u32 %v17361_v1, 16 }
 0x4e9   :  { %v17625_v43 = vadd.f32 %v14029_v18, %v7466_v62  ;;  %14267 = vmatprep.mubr.bf16.mxu1 %v9969_v16  ;;  %v18780_v18 = vld [vmem:[#allocation60_spill] sm:$0xff] }
 0x4ea   :  { %v8217_v37 = vpop.f32.mrf.mxu1  ;;  %v17627_v19 = vpop.f32.mrf.mxu0  ;;  %v18781_v16 = vrot.slane %v18780_v18, 1  ;;  %v9301_v41 = vor.u32 %v9299_v13, %v17382_v35  ;;  %v18785_v18 = vld [vmem:[#allocation37_spill] sm:$0xff]  ;;  %v9313_v13 = vrot.slane %v9311_v57, 1  ;;  %v18790_v57 = vld [vmem:[#allocation116_spill] sm:$0xff] }
 0x4eb   :  { %18776 = vst [vmem:[#allocation20_spill] sm:$0xff] %v17625_v43  ;;  %18777 = vst [vmem:[#allocation103_spill] sm:$0xff] %v17627_v19  ;;  %v18787_v43 = vld [vmem:[#allocation67_spill] sm:$0xff] }
 0x4ec   :  { %v14030_v62 = vpop.f32.mrf.mxu1  ;;  %v9971_v46 = vsel %vm3680_vm2, %v9968_v2, %v18781_v16  ;;  %v17639_v37 = vpop.f32.mrf.mxu0  ;;  %v18786_v2 = vld [vmem:[#allocation111_spill] sm:$0xff] }
 0x4ed   :  { %18782 = vst [vmem:[#allocation57_spill] sm:$0xff] %v17639_v37  ;;  %v17641_v19 = vadd.f32 %v14030_v62, %v7467_v45  ;;  %v7469_v16 = vadd.f32 %v18786_v2, %v18785_v18  ;;  %v9305_v37 = vrot.slane %v9303_v12, 1  ;;  %v14832_v45 = vld [vmem:[#allocation9] sm:$0xff]   ;;  %v18791_v18 = vld [vmem:[#allocation34_spill] sm:$0xff] }
 0x4ee   :  { %v8219_v1 = vpop.f32.mrf.mxu1  ;;  %v17646_v10 = vpop.f32.mrf.mxu0  ;;  %14345 = vmatprep.subr.bf16.mxu0 %v14832_v45  ;;  %14418 = vmatprep.subr.bf16.mxu1 %v14832_v45 }
 0x4ef   :  { %18783 = vst [vmem:[#allocation58_spill] sm:$0xff] %v17641_v19  ;;  %18784 = vst [vmem:[#allocation22_spill] sm:$0xff] %v17646_v10  ;;  %v9306_v1 = vsel %vm2176_vm1, %v9301_v41, %v9305_v37  ;;  %v9309_v10 = vor.u32 %v9307_v56, %v9305_v37  ;;  %14346 = vmatpush3.bf16.msra.mxu0 %v14832_v45  ;;  %14426 = vmatpush3.bf16.msra.mxu1 %v14832_v45  ;;  %v18792_v56 = vld [vmem:[#allocation68_spill] sm:$0xff] }
 0x4f0   :  { %v14033_v62 = vpop.f32.mrf.mxu1  ;;  %14268 = vmatmul.mubr.bf16.gmra.mxu1 %v9971_v46  ;;  %v17651_v35 = vpop.f32.mrf.mxu0  ;;  %14203 = vmatprep.mubr.bf16.mxu0 %v9306_v1 }
 0x4f1   :  { %v17653_v19 = vadd.f32 %v14033_v62, %v7469_v16  ;;  %14271 = vmatprep.mubr.bf16.mxu1 %v18787_v43  ;;  %v9314_v6 = vsel %vm2176_vm1, %v9309_v10, %v9313_v13  ;;  %v7468_v43 = vadd.f32 %v18791_v18, %v18790_v57  ;;  %v18794_v62 = vld [vmem:[#allocation69_spill] sm:$0xff]  ;;  %v18796_v13 = vld [vmem:[#allocation112_spill] sm:$0xff]  ;;  %v18798_v57 = vld [vmem:[#allocation35_spill] sm:$0xff] }
 0x4f2   :  { %v8231_v22 = vpop.f32.mrf.mxu1  ;;  %v17657_v0 = vpop.f32.mrf.mxu0  ;;  %14204 = vmatmul.mubr.bf16.gmra.mxu0 %v9314_v6  ;;  %v18795_v10 = vld [vmem:[#allocation117_spill] sm:$0xff] }
 0x4f3   :  { %18788 = vst [vmem:[#allocation23_spill] sm:$0xff] %v17657_v0  ;;  %v7470_v1 = vadd.f32 %v18796_v13, %v18795_v10  ;;  %v18801_v10 = vld [vmem:[#allocation114_spill] sm:$0xff] }
 0x4f4   :  { %v14034_v46 = vpop.f32.mrf.mxu1  ;;  %v17660_v12 = vpop.f32.mrf.mxu0  ;;  %v7474_v13 = vadd.f32 %v18801_v10, %v17221_v23 }
 0x4f5   :  { %18789 = vst [vmem:[#allocation29_spill] sm:$0xff] %v17660_v12  ;;  %v18797_v12 = vld [vmem:[#allocation40_spill] sm:$0xff] }
 0x4f6   :  { %v8233_v2 = vpop.f32.mrf.mxu1  ;;  %v9685_v41 = vpop.f32.mrf.mxu0  ;;  %v7472_v18 = vadd.f32 %v18798_v57, %v18797_v12  ;;  %v18803_v57 = vld [vmem:[#allocation71_spill] sm:$0xff] }
 0x4f7   :  { %v17664_v37 = vadd.f32 %v8233_v2, %v7468_v43 }
 0x4f8   :  { %v14037_v22 = vpop.f32.mrf.mxu1  ;;  %14272 = vmatmul.mubr.bf16.gmra.mxu1 %v18792_v56  ;;  %v17667_v16 = vpop.f32.mrf.mxu0 }
 0x4f9   :  { %18793 = vst [vmem:[#allocation24_spill] sm:$0xff] %v17667_v16  ;;  %14275 = vmatprep.mubr.bf16.mxu1 %v18794_v62  ;;  %v18799_v22 = vld [vmem:[#allocation36_spill] sm:$0xff] }
 0x4fa   :  { %v8245_v46 = vpop.f32.mrf.mxu1  ;;  %v9697_v6 = vpop.f32.mrf.mxu0  ;;  %v7471_v56 = vadd.f32 %v18799_v22, %v17215_v31 }
 0x4fb   :  { %v17672_v45 = vadd.f32 %v8245_v46, %v7470_v1  ;;  %v18802_v46 = vld [vmem:[#allocation70_spill] sm:$0xff] }
 0x4fc   :  { %v14038_v41 = vpop.f32.mrf.mxu1  ;;  %v14170_v43 = vpop.f32.mrf.mxu0 }
 0x4fd   :  { %v17676_v2 = vadd.f32 %v14038_v41, %v7472_v18  ;;  %v18804_v18 = vld [vmem:[#allocation115_spill] sm:$0xff] }
 0x4fe   :  { %v8248_v16 = vpop.f32.mrf.mxu1  ;;  %v17680_v0 = vpop.f32.mrf.mxu0  ;;  %v7473_v41 = vadd.f32 %v18804_v18, %v17227_v15  ;;  %v18811_v18 = vld [vmem:[#allocation72_spill] sm:$0xff] }
 0x4ff   :  { %18800 = vst [vmem:[#allocation30_spill] sm:$0xff] %v17680_v0  ;;  %v17682_v62 = vadd.f32 %v8248_v16, %v7471_v56  ;;  %v18806_v16 = vld [vmem:[#allocation38_spill] sm:$0xff] }
 0x500   :  { %v14041_v1 = vpop.f32.mrf.mxu1  ;;  %14276 = vmatmul.mubr.bf16.gmra.mxu1 %v18802_v46  ;;  %v14173_v6 = vpop.f32.mrf.mxu0  ;;  %v7475_v56 = vadd.f32 %v18806_v16, %v17233_v38 }
 0x501   :  { %v17687_v12 = vadd.f32 %v14041_v1, %v7474_v13  ;;  %14279 = vmatprep.mubr.bf16.mxu1 %v18803_v57  ;;  %v18810_v6 = vld [vmem:[#allocation39_spill] sm:$0xff] }
 0x502   :  { %v8260_v31 = vpop.f32.mrf.mxu1  ;;  %v17692_v43 = vpop.f32.mrf.mxu0  ;;  %v7477_v57 = vadd.f32 %v18810_v6, %v17243_v32 }
 0x503   :  { %18805 = vst [vmem:[#allocation25_spill] sm:$0xff] %v17692_v43  ;;  %v17694_v22 = vadd.f32 %v8260_v31, %v7473_v41  ;;  %v18813_v31 = vld [vmem:[#allocation73_spill] sm:$0xff] }
 0x504   :  { %v14042_v23 = vpop.f32.mrf.mxu1  ;;  %v17698_v10 = vpop.f32.mrf.mxu0 }
 0x505   :  { %18807 = vst [vmem:[#allocation108_spill] sm:$0xff] %v17698_v10  ;;  %v17700_v46 = vadd.f32 %v14042_v23, %v7475_v56 }
 0x506   :  { %v8263_v13 = vpop.f32.mrf.mxu1  ;;  %v17702_v1 = vpop.f32.mrf.mxu0 }
 0x507   :  { %18808 = vst [vmem:[#allocation19_spill] sm:$0xff] %v17700_v46  ;;  %18809 = vst [vmem:[#allocation59_spill] sm:$0xff] %v17702_v1  ;;  %v18816_v13 = vld [vmem:[#allocation122_spill] sm:$0xff] }
 0x508   :  { %v14045_v15 = vpop.f32.mrf.mxu1  ;;  %14280 = vmatmul.mubr.bf16.gmra.mxu1 %v18811_v18  ;;  %v17707_v43 = vpop.f32.mrf.mxu0  ;;  %v18817_v1 = vld [vmem:[#allocation118_spill] sm:$0xff] }
 0x509   :  { %18812 = vst [vmem:[#allocation61_spill] sm:$0xff] %v17707_v43  ;;  %v17709_v41 = vadd.f32 %v14045_v15, %v7477_v57  ;;  %14283 = vmatprep.mubr.bf16.mxu1 %v18813_v31  ;;  %v7476_v10 = vadd.f32 %v18817_v1, %v18816_v13  ;;  %v18819_v46 = vld [vmem:[#allocation74_spill] sm:$0xff]  ;;  %v18821_v15 = vld [vmem:[#allocation75_spill] sm:$0xff]  ;;  %v18822_v31 = vld [vmem:[#allocation41_spill] sm:$0xff] }
 0x50a   :  { %v8275_v38 = vpop.f32.mrf.mxu1  ;;  %v17712_v16 = vpop.f32.mrf.mxu0  ;;  %v18823_v43 = vld [vmem:[#allocation124_spill] sm:$0xff]  ;;  %v18824_v1 = vld [vmem:[#allocation119_spill] sm:$0xff] }
 0x50b   :  { %18814 = vst [vmem:[#allocation31_spill] sm:$0xff] %v17712_v16  ;;  %v7478_v38 = vadd.f32 %v18822_v31, %v17259_v24  ;;  %v7480_v13 = vadd.f32 %v18824_v1, %v18823_v43  ;;  %v18827_v24 = vld [vmem:[#allocation43_spill] sm:$0xff]  ;;  %v18829_v1 = vld [vmem:[#allocation77_spill] sm:$0xff] }
 0x50c   :  { %v14046_v56 = vpop.f32.mrf.mxu1  ;;  %v17714_v23 = vpop.f32.mrf.mxu0 }
 0x50d   :  { %18815 = vst [vmem:[#allocation106_spill] sm:$0xff] %v17714_v23 }
 0x50e   :  { %v8277_v0 = vpop.f32.mrf.mxu1  ;;  %v9729_v32 = vpop.f32.mrf.mxu0 }
 0x50f   :  { %v17718_v6 = vadd.f32 %v8277_v0, %v7476_v10 }
 0x510   :  { %v14049_v18 = vpop.f32.mrf.mxu1  ;;  %14284 = vmatmul.mubr.bf16.gmra.mxu1 %v18819_v46  ;;  %v17721_v57 = vpop.f32.mrf.mxu0  ;;  %v18825_v46 = vld [vmem:[#allocation120_spill] sm:$0xff] }
 0x511   :  { %18818 = vst [vmem:[#allocation27_spill] sm:$0xff] %v17718_v6  ;;  %18820 = vst [vmem:[#allocation32_spill] sm:$0xff] %v17721_v57  ;;  %14287 = vmatprep.mubr.bf16.mxu1 %v18821_v15  ;;  %v7479_v18 = vadd.f32 %v18825_v46, %v17269_v20 }
 0x512   :  { %v8289_v56 = vpop.f32.mrf.mxu1  ;;  %v9741_v16 = vpop.f32.mrf.mxu0 }
 0x513   :  { %v17726_v23 = vadd.f32 %v8289_v56, %v7478_v38  ;;  %v7482_v16 = vadd.f32 %v18827_v24, %v17275_v52  ;;  %v18828_v38 = vld [vmem:[#allocation76_spill] sm:$0xff] }
 0x514   :  { %v14050_v32 = vpop.f32.mrf.mxu1  ;;  %v14182_v0 = vpop.f32.mrf.mxu0 }
 0x515   :  { %v17730_v10 = vadd.f32 %v14050_v32, %v7480_v13  ;;  %v18830_v13 = vld [vmem:[#allocation121_spill] sm:$0xff] }
 0x516   :  { %v8292_v57 = vpop.f32.mrf.mxu1  ;;  %v17734_v6 = vpop.f32.mrf.mxu0  ;;  %v7481_v32 = vadd.f32 %v18830_v13, %v17281_v44  ;;  %v18836_v13 = vld [vmem:[#allocation78_spill] sm:$0xff] }
 0x517   :  { %18826 = vst [vmem:[#allocation28_spill] sm:$0xff] %v17734_v6  ;;  %v17736_v15 = vadd.f32 %v8292_v57, %v7479_v18  ;;  %v18832_v57 = vld [vmem:[#allocation44_spill] sm:$0xff] }
 0x518   :  { %v14053_v31 = vpop.f32.mrf.mxu1  ;;  %14288 = vmatmul.mubr.bf16.gmra.mxu1 %v18828_v38  ;;  %v14185_v56 = vpop.f32.mrf.mxu0  ;;  %v7483_v18 = vadd.f32 %v18832_v57, %v17287_v25  ;;  %v18843_v6 = vld [vmem:[#allocation80_spill] sm:$0xff] }
 0x519   :  { %v17741_v43 = vadd.f32 %v14053_v31, %v7482_v16  ;;  %14291 = vmatprep.mubr.bf16.mxu1 %v18829_v1  ;;  %v18835_v56 = vld [vmem:[#allocation123_spill] sm:$0xff] }
 0x51a   :  { %v8304_v20 = vpop.f32.mrf.mxu1  ;;  %v17746_v0 = vpop.f32.mrf.mxu0  ;;  %v7485_v1 = vadd.f32 %v18835_v56, %v17297_v48 }
 0x51b   :  { %18831 = vst [vmem:[#allocation62_spill] sm:$0xff] %v17746_v0  ;;  %v17748_v46 = vadd.f32 %v8304_v20, %v7481_v32  ;;  %v18838_v20 = vld [vmem:[#allocation79_spill] sm:$0xff] }
 0x51c   :  { %v14054_v52 = vpop.f32.mrf.mxu1  ;;  %v17752_v24 = vpop.f32.mrf.mxu0 }
 0x51d   :  { %18833 = vst [vmem:[#allocation63_spill] sm:$0xff] %v17752_v24  ;;  %v17754_v38 = vadd.f32 %v14054_v52, %v7483_v18 }
 0x51e   :  { %v8307_v16 = vpop.f32.mrf.mxu1  ;;  %v17756_v31 = vpop.f32.mrf.mxu0 }
 0x51f   :  { %18834 = vst [vmem:[#allocation33_spill] sm:$0xff] %v17756_v31  ;;  %v18841_v16 = vld [vmem:[#allocation125_spill] sm:$0xff] }
 0x520   :  { %v14057_v44 = vpop.f32.mrf.mxu1  ;;  %14292 = vmatmul.mubr.bf16.gmra.mxu1 %v18836_v13  ;;  %v17761_v0 = vpop.f32.mrf.mxu0  ;;  %v7484_v31 = vadd.f32 %v18841_v16, %v17305_v42  ;;  %v18848_v42 = vld [vmem:[#allocation129_spill] sm:$0xff] }
 0x521   :  { %18837 = vst [vmem:[#allocation107_spill] sm:$0xff] %v17761_v0  ;;  %v17763_v32 = vadd.f32 %v14057_v44, %v7485_v1  ;;  %14295 = vmatprep.mubr.bf16.mxu1 %v18838_v20  ;;  %v18845_v44 = vld [vmem:[#allocation81_spill] sm:$0xff]  ;;  %v7486_v20 = vadd.f32 %v17279_v51, %v17313_v50  ;;  %v18854_v51 = vld [vmem:[#allocation130_spill] sm:$0xff]  ;;  %v18855_v50 = vld [vmem:[#allocation131_spill] sm:$0xff] }
 0x522   :  { %v8319_v25 = vpop.f32.mrf.mxu1  ;;  %v17766_v57 = vpop.f32.mrf.mxu0 }
 0x523   :  { %18839 = vst [vmem:[#allocation64_spill] sm:$0xff] %v17766_v57  ;;  %v18847_v57 = vld [vmem:[#allocation127_spill] sm:$0xff] }
 0x524   :  { %v14058_v18 = vpop.f32.mrf.mxu1  ;;  %v17768_v52 = vpop.f32.mrf.mxu0  ;;  %v7488_v16 = vadd.f32 %v18848_v42, %v18847_v57  ;;  %v18858_v42 = vld [vmem:[#allocation83_spill] sm:$0xff] }
 0x525   :  { %18840 = vst [vmem:[#allocation65_spill] sm:$0xff] %v17768_v52 }
 0x526   :  { %v8321_v24 = vpop.f32.mrf.mxu1  ;;  %v9773_v48 = vpop.f32.mrf.mxu0 }
 0x527   :  { %v17772_v56 = vadd.f32 %v8321_v24, %v7484_v31 }
 0x528   :  { %v14061_v13 = vpop.f32.mrf.mxu1  ;;  %14296 = vmatmul.mubr.bf16.gmra.mxu1 %v18843_v6  ;;  %v17775_v1 = vpop.f32.mrf.mxu0  ;;  %v18851_v6 = vld [vmem:[#allocation42_spill] sm:$0xff] }
 0x529   :  { %18842 = vst [vmem:[#allocation109_spill] sm:$0xff] %v17772_v56  ;;  %18844 = vst [vmem:[#allocation66_spill] sm:$0xff] %v17775_v1  ;;  %14299 = vmatprep.mubr.bf16.mxu1 %v18845_v44  ;;  %v18850_v13 = vld [vmem:[#allocation128_spill] sm:$0xff] }
 0x52a   :  { %v8333_v25 = vpop.f32.mrf.mxu1  ;;  %v9785_v18 = vpop.f32.mrf.mxu0  ;;  %v7487_v0 = vadd.f32 %v18851_v6, %v18850_v13 }
 0x52b   :  { %v17780_v52 = vadd.f32 %v8333_v25, %v7486_v20  ;;  %v7490_v18 = vadd.f32 %v18855_v50, %v18854_v51  ;;  %v18856_v25 = vld [vmem:[#allocation82_spill] sm:$0xff] }
 0x52c   :  { %v14062_v48 = vpop.f32.mrf.mxu1  ;;  %v14194_v24 = vpop.f32.mrf.mxu0 }
 0x52d   :  { %18846 = vst [vmem:[#allocation56_spill] sm:$0xff] %v17780_v52  ;;  %v17784_v31 = vadd.f32 %v14062_v48, %v7488_v16  ;;  %v18859_v16 = vld [vmem:[#allocation132_spill] sm:$0xff]  ;;  %v18860_v48 = vld [vmem:[#allocation126_spill] sm:$0xff] }
 0x52e   :  { %v8336_v1 = vpop.f32.mrf.mxu1  ;;  %v17788_v56 = vpop.f32.mrf.mxu0  ;;  %v7489_v24 = vadd.f32 %v18860_v48, %v18859_v16  ;;  %v18870_v48 = vld [vmem:[#allocation84_spill] sm:$0xff] }
 0x52f   :  { %18849 = vst [vmem:[#allocation113_spill] sm:$0xff] %v17784_v31  ;;  %18852 = vst [vmem:[#allocation110_spill] sm:$0xff] %v17788_v56  ;;  %v17790_v44 = vadd.f32 %v8336_v1, %v7487_v0  ;;  %v18863_v0 = vld [vmem:[#allocation134_spill] sm:$0xff]  ;;  %v18864_v1 = vld [vmem:[#allocation45_spill] sm:$0xff] }
 0x530   :  { %v14065_v20 = vpop.f32.mrf.mxu1  ;;  %14300 = vmatmul.mubr.bf16.gmra.mxu1 %v18856_v25  ;;  %v14197_v52 = vpop.f32.mrf.mxu0 }
 0x531   :  { %18853 = vst [vmem:[#allocation60_spill] sm:$0xff] %v17790_v44  ;;  %v17795_v57 = vadd.f32 %v14065_v20, %v7490_v18  ;;  %14303 = vmatprep.mubr.bf16.mxu1 %v18858_v42  ;;  %v7491_v44 = vadd.f32 %v18864_v1, %v18863_v0  ;;  %v18868_v20 = vld [vmem:[#allocation136_spill] sm:$0xff]  ;;  %v18869_v42 = vld [vmem:[#allocation46_spill] sm:$0xff] }
 0x532   :  { %v8348_v13 = vpop.f32.mrf.mxu1  ;;  %v17800_v6 = vpop.f32.mrf.mxu0 }
 0x533   :  { %18857 = vst [vmem:[#allocation37_spill] sm:$0xff] %v17795_v57  ;;  %18861 = vst [vmem:[#allocation111_spill] sm:$0xff] %v17800_v6  ;;  %v17802_v56 = vadd.f32 %v8348_v13, %v7489_v24  ;;  %v7493_v57 = vadd.f32 %v18869_v42, %v18868_v20  ;;  %v18871_v13 = vld [vmem:[#allocation85_spill] sm:$0xff]  ;;  %v18874_v42 = vld [vmem:[#allocation86_spill] sm:$0xff] }
 0x534   :  { %v14066_v51 = vpop.f32.mrf.mxu1  ;;  %v17806_v50 = vpop.f32.mrf.mxu0 }
 0x535   :  { %18862 = vst [vmem:[#allocation67_spill] sm:$0xff] %v17802_v56  ;;  %18865 = vst [vmem:[#allocation116_spill] sm:$0xff] %v17806_v50  ;;  %v17808_v25 = vadd.f32 %v14066_v51, %v7491_v44  ;;  %v18872_v44 = vld [vmem:[#allocation137_spill] sm:$0xff]  ;;  %v18873_v51 = vld [vmem:[#allocation48_spill] sm:$0xff] }
 0x536   :  { %v8351_v52 = vpop.f32.mrf.mxu1  ;;  %v17810_v18 = vpop.f32.mrf.mxu0 }
 0x537   :  { %18866 = vst [vmem:[#allocation34_spill] sm:$0xff] %v17808_v25  ;;  %18867 = vst [vmem:[#allocation68_spill] sm:$0xff] %v17810_v18  ;;  %v7492_v52 = vadd.f32 %v18873_v51, %v18872_v44 }
 0x538   :  { %v14069_v16 = vpop.f32.mrf.mxu1  ;;  %14304 = vmatmul.mubr.bf16.gmra.mxu1 %v18870_v48  ;;  %v14201_v6 = vpop.f32.mrf.mxu0  ;;  %v18875_v48 = vld [vmem:[#allocation88_spill] sm:$0xff] }
 0x539   :  { %v17815_v24 = vadd.f32 %v14069_v16, %v7493_v57  ;;  %14307 = vmatprep.mubr.bf16.mxu1 %v18871_v13  ;;  %v18876_v57 = vld [vmem:[#allocation139_spill] sm:$0xff] }
 0x53a   :  { %v8363_v0 = vpop.f32.mrf.mxu1  ;;  %v9814_v1 = vpop.f32.mrf.mxu0  ;;  %v7494_v6 = vadd.f32 %v18876_v57, %v17363_v54  ;;  %v18883_v54 = vld [vmem:[#allocation143_spill] sm:$0xff] }
 0x53b   :  { %v7497_v57 = vadd.f32 %v18883_v54, %v17387_v61 }
 0x53c   :  { %v14070_v56 = vpop.f32.mrf.mxu1  ;;  %v14202_v50 = vpop.f32.mrf.mxu0 }
 0x53d   :  { %v18878_v56 = vld [vmem:[#allocation133_spill] sm:$0xff] }
 0x53e   :  { %v8365_v25 = vpop.f32.mrf.mxu1  ;;  %v9817_v18 = vpop.f32.mrf.mxu0  ;;  %v7496_v50 = vadd.f32 %v18878_v56, %v17367_v14  ;;  %v14952_v14 = vld [vmem:[#allocation2 + $0x198] sm:$0xff]  }
 0x53f   :  { %v17820_v31 = vadd.f32 %v8365_v25, %v7492_v52  ;;  %v18880_v25 = vld [vmem:[#allocation135_spill] sm:$0xff]  ;;  %v10018_v56 = vrot.slane %v14952_v14, 1 }
 0x540   :  { %v14073_v20 = vpop.f32.mrf.mxu1  ;;  %14308 = vmatmul.mubr.bf16.gmra.mxu1 %v18874_v42  ;;  %v7495_v18 = vadd.f32 %v18880_v25, %v17375_v49  ;;  %v18881_v42 = vld [vmem:[#allocation89_spill] sm:$0xff]  ;;  %v18884_v25 = vld [vmem:[#allocation87_spill] sm:$0xff] }
 0x541   :  { %14311 = vmatprep.mubr.bf16.mxu1 %v18875_v48  ;;  %v18882_v48 = vld [vmem:[#allocation90_spill] sm:$0xff] }
 0x542   :  { %v8377_v16 = vpop.f32.mrf.mxu1 }
 0x543   :  { %v17826_v13 = vadd.f32 %v8377_v16, %v7494_v6 }
 0x544   :  { %v14074_v0 = vpop.f32.mrf.mxu1 }
 0x545   :  { %18877 = vst [vmem:[#allocation69_spill] sm:$0xff] %v17826_v13  ;;  %v17830_v44 = vadd.f32 %v14074_v0, %v7496_v50  ;;  %v14953_v0 = vld [vmem:[#allocation2 + $0x1a0] sm:$0xff]  }
 0x546   :  { %v8380_v51 = vpop.f32.mrf.mxu1 }
 0x547   :  { %18879 = vst [vmem:[#allocation117_spill] sm:$0xff] %v17830_v44  ;;  %v17834_v52 = vadd.f32 %v8380_v51, %v7495_v18  ;;  %v10020_v44 = vrot.slane %v14953_v0, 1  ;;  %v18885_v18 = vrot.slane %v18884_v25, 1  ;;  %v17850_v25 = vld [vmem:[#allocation2 + $0x1b8] sm:$0xff]  }
 0x548   :  { %v14077_v20 = vpop.f32.mrf.mxu1  ;;  %14312 = vmatmul.mubr.bf16.gmra.mxu1 %v18881_v42 }
 0x549   :  { %14315 = vmatprep.mubr.bf16.mxu1 %v18882_v48  ;;  %v10019_v51 = vsel %vm3680_vm2, %v18885_v18, %v10018_v56  ;;  %v10021_v42 = vsel %vm3680_vm2, %v10018_v56, %v10020_v44  ;;  %v14954_v48 = vld [vmem:[#allocation2 + $0x1b0] sm:$0xff]   ;;  %v10026_v56 = vrot.slane %v17850_v25, 1 }
 0x54a   :  { %v8392_v6 = vpop.f32.mrf.mxu1  ;;  %v10024_v54 = vrot.slane %v14954_v48, 1  ;;  %v18886_v48 = vld [vmem:[#allocation145_spill] sm:$0xff] }
 0x54b   :  { %v8479_v16 = vadd.f32 %v8392_v6, %v7497_v57  ;;  %v14955_v57 = vld [vmem:[#allocation2 + $0x1a8] sm:$0xff]  }
 0x54c   :  { %v14078_v50 = vpop.f32.mrf.mxu1  ;;  %v10022_v6 = vrot.slane %v14955_v57, 1  ;;  %v9839_v57 = vadd.f32 %v18886_v48, %v17417_v11  ;;  %v18888_v11 = vld [vmem:[#allocation147_spill] sm:$0xff] }
 0x54d   :  { %v17840_v13 = vadd.f32 %v9814_v1, %v8479_v16 }
 0x54e   :  { %v8395_v49 = vpop.f32.mrf.mxu1  ;;  %v10025_v1 = vsel %vm3680_vm2, %v10022_v6, %v10024_v54  ;;  %v10023_v16 = vsel %vm3680_vm2, %v10020_v44, %v10022_v6  ;;  %v9840_v44 = vadd.f32 %v17389_v3, %v17409_v36  ;;  %v10027_v6 = vsel %vm3680_vm2, %v10024_v54, %v10026_v56  ;;  %v18887_v3 = vld [vmem:[#allocation138_spill] sm:$0xff] }
 0x54f   :  { %v9838_v49 = vadd.f32 %v17384_v59, %v17405_v7  ;;  %v17864_v59 = vld [vmem:[%s18273_s7] ss:$0 sm:$0xff]  ;;  %v9842_v36 = vadd.f32 %v18887_v3, %v17422_v55  ;;  %v18889_v55 = vld [vmem:[#allocation140_spill] sm:$0xff] }
 0x550   :  { %v14081_v20 = vpop.f32.mrf.mxu1  ;;  %14316 = vmatmul.mubr.bf16.gmra.mxu1 %v10019_v51  ;;  %v17856_v51 = vld [vmem:[%s18272_s6] ss:$0 sm:$0xff] }
 0x551   :  { %14319 = vmatprep.mubr.bf16.mxu1 %v10021_v42 }
 0x552   :  { %v8405_v61 = vpop.f32.mrf.mxu1 }
 0x554   :  { %v14082_v14 = vpop.f32.mrf.mxu1 }
 0x556   :  { %v8407_v50 = vpop.f32.mrf.mxu1 }
 0x558   :  { %v14225_v0 = vpop.f32.mrf.mxu1  ;;  %14320 = vmatmul.mubr.bf16.gmra.mxu1 %v10023_v16 }
 0x559   :  { %14323 = vmatprep.mubr.bf16.mxu1 %v10025_v1 }
 0x55a   :  { %v10168_v18 = vpop.f32.mrf.mxu1 }
 0x55b   :  { %v10555_v20 = vadd.f32 %v10168_v18, %v9838_v49 }
 0x55c   :  { %v14226_v42 = vpop.f32.mrf.mxu1 }
 0x55d   :  { %v10626_v61 = vmul.f32 %v17856_v51, %v10555_v20  ;;  %v10557_v7 = vadd.f32 %v14226_v42, %v9840_v44  ;;  %v9841_v20 = vadd.f32 %v18888_v11, %v17429_v28  ;;  %v18890_v28 = vld [vmem:[#allocation148_spill] sm:$0xff] }
 0x55e   :  { %v10171_v14 = vpop.f32.mrf.mxu1 }
 0x55f   :  { %v10556_v50 = vadd.f32 %v10171_v14, %v9839_v57  ;;  %v10697_v1 = vadd.f32 %v17864_v59, %v10626_v61  ;;  %v10628_v0 = vmul.f32 %v17856_v51, %v10557_v7  ;;  %v9843_v57 = vadd.f32 %v18889_v55, %v17435_v60 }
 0x560   :  { %v14229_v16 = vpop.f32.mrf.mxu1  ;;  %14324 = vmatmul.mubr.bf16.gmra.mxu1 %v10027_v6 }
 0x561   :  { %v10627_v49 = vmul.f32 %v17856_v51, %v10556_v50  ;;  %v10559_v18 = vadd.f32 %v14229_v16, %v9842_v36  ;;  %v10761_v61 = vmax.f32 %v10697_v1, 0.0  ;;  %v10699_v6 = vadd.f32 %v17864_v59, %v10628_v0 }
 0x562   :  { %v10183_v44 = vpop.f32.mrf.mxu1  ;;  %v9845_v16 = vadd.f32 %v18890_v28, %v17444_v39 }
 0x563   :  { %v10698_v54 = vadd.f32 %v17864_v59, %v10627_v49  ;;  %v10630_v42 = vmul.f32 %v17856_v51, %v10559_v18  ;;  %v10558_v48 = vadd.f32 %v10183_v44, %v9841_v20  ;;  %v10763_v1 = vmax.f32 %v10699_v6, 0.0 }
 0x564   :  { %v14230_v14 = vpop.f32.mrf.mxu1 }
 0x565   :  { %v10629_v7 = vmul.f32 %v17856_v51, %v10558_v48  ;;  %v10560_v50 = vadd.f32 %v14230_v14, %v9843_v57  ;;  %v10762_v3 = vmax.f32 %v10698_v54, 0.0  ;;  %v10701_v49 = vadd.f32 %v17864_v59, %v10630_v42 }
 0x566   :  { %v10186_v36 = vpop.f32.mrf.mxu1  ;;  %v9844_v42 = vadd.f32 %v17413_v33, %v17452_v8  ;;  %v18892_v8 = vld [vmem:[#allocation149_spill] sm:$0xff] }
 0x567   :  { %v10700_v18 = vadd.f32 %v17864_v59, %v10629_v7  ;;  %v10631_v11 = vmul.f32 %v17856_v51, %v10560_v50  ;;  %v10825_v20 = vpack.c.bf16 %v10762_v3, %v10761_v61  ;;  %v10765_v54 = vmax.f32 %v10701_v49, 0.0 }
 0x568   :  { %v14233_v60 = vpop.f32.mrf.mxu1 }
 0x569   :  { %v10764_v44 = vmax.f32 %v10700_v18, 0.0  ;;  %v10702_v0 = vadd.f32 %v17864_v59, %v10631_v11  ;;  %v10562_v55 = vadd.f32 %v14233_v60, %v9845_v16  ;;  %14347 = vmatprep.mubr.bf16.mxu0 %v10825_v20  ;;  %v9846_v16 = vadd.f32 %v17427_v21, %v17462_v17  ;;  %v18891_v20 = vld [vmem:[#allocation141_spill] sm:$0xff] }
 0x56a   :  { %v10198_v48 = vpop.f32.mrf.mxu1  ;;  %v9848_v60 = vadd.f32 %v18891_v20, %v17466_v40  ;;  %v9850_v21 = vadd.f32 %v17442_v27, %v17479_v34  ;;  %v9851_v27 = vadd.f32 %v17448_v63, %v17491_v4 }
 0x56b   :  { %v10826_v57 = vpack.c.bf16 %v10764_v44, %v10763_v1  ;;  %v10766_v14 = vmax.f32 %v10702_v0, 0.0  ;;  %v10633_v39 = vmul.f32 %v17856_v51, %v10562_v55  ;;  %v9847_v1 = vadd.f32 %v18892_v8, %v17473_v9 }
 0x56c   :  { %v14234_v36 = vpop.f32.mrf.mxu1  ;;  %v9849_v9 = vadd.f32 %v17446_v58, %v17485_v30  ;;  %v9853_v58 = vadd.f32 %v17456_v29, %v17502_v47  ;;  %v18893_v47 = vld [vmem:[#allocation142_spill] sm:$0xff] }
 0x56d   :  { %14348 = vmatmul.mubr.bf16.vlgmr.msra.gmra.mxu0 %v10826_v57  ;;  %v10827_v7 = vpack.c.bf16 %v10766_v14, %v10765_v54  ;;  %v10704_v3 = vadd.f32 %v17864_v59, %v10633_v39 }
 0x56e   :  { %v10200_v61 = vpop.f32.mrf.mxu1 }
 0x56f   :  { %v10561_v50 = vadd.f32 %v10200_v61, %v9844_v42  ;;  %14351 = vmatprep.mubr.bf16.mxu0 %v10827_v7  ;;  %v10768_v44 = vmax.f32 %v10704_v3, 0.0 }
 0x570   :  { %v14237_v6 = vpop.f32.mrf.mxu1 }
 0x571   :  { %v10632_v28 = vmul.f32 %v17856_v51, %v10561_v50 }
 0x572   :  { %v10212_v49 = vpop.f32.mrf.mxu1 }
 0x573   :  { %v10703_v18 = vadd.f32 %v17864_v59, %v10632_v28  ;;  %v10563_v11 = vadd.f32 %v10212_v49, %v9846_v16 }
 0x574   :  { %v14238_v33 = vpop.f32.mrf.mxu1 }
 0x575   :  { %v10767_v0 = vmax.f32 %v10703_v18, 0.0  ;;  %v10634_v55 = vmul.f32 %v17856_v51, %v10563_v11  ;;  %v10565_v48 = vadd.f32 %v14238_v33, %v9848_v60 }
 0x576   :  { %v10215_v54 = vpop.f32.mrf.mxu1 }
 0x577   :  { %v10828_v57 = vpack.c.bf16 %v10768_v44, %v10767_v0  ;;  %v10564_v14 = vadd.f32 %v10215_v54, %v9847_v1  ;;  %v10705_v17 = vadd.f32 %v17864_v59, %v10634_v55  ;;  %v10636_v40 = vmul.f32 %v17856_v51, %v10565_v48 }
 0x578   :  { %v14241_v36 = vpop.f32.mrf.mxu1 }
 0x579   :  { %v10635_v39 = vmul.f32 %v17856_v51, %v10564_v14  ;;  %v10567_v42 = vadd.f32 %v14241_v36, %v9850_v21  ;;  %14352 = vmatmul.mubr.bf16.gmra.mxu0 %v10828_v57  ;;  %v10769_v34 = vmax.f32 %v10705_v17, 0.0  ;;  %v10707_v28 = vadd.f32 %v17864_v59, %v10636_v40 }
 0x57a   :  { %v10227_v7 = vpop.f32.mrf.mxu1  ;;  %v9852_v14 = vadd.f32 %v18893_v47, %v17511_v5 }
 0x57b   :  { %v10706_v61 = vadd.f32 %v17864_v59, %v10635_v39  ;;  %v10638_v50 = vmul.f32 %v17856_v51, %v10567_v42  ;;  %v10566_v6 = vadd.f32 %v10227_v7, %v9849_v9  ;;  %v10771_v4 = vmax.f32 %v10707_v28, 0.0  ;;  %v18894_v9 = vld [vmem:[#allocation155_spill] sm:$0xff]  ;;  %v18895_v7 = vld [vmem:[#allocation150_spill] sm:$0xff] }
 0x57c   :  { %v14242_v3 = vpop.f32.mrf.mxu1 }
 0x57d   :  { %v10770_v16 = vmax.f32 %v10706_v61, 0.0  ;;  %v10637_v49 = vmul.f32 %v17856_v51, %v10566_v6  ;;  %v10568_v18 = vadd.f32 %v14242_v3, %v9851_v27  ;;  %v10709_v30 = vadd.f32 %v17864_v59, %v10638_v50  ;;  %v18897_v3 = vld [vmem:[#allocation144_spill] sm:$0xff] }
 0x57e   :  { %v10230_v11 = vpop.f32.mrf.mxu1  ;;  %v9854_v61 = vadd.f32 %v18895_v7, %v18894_v9 }
 0x57f   :  { %v10708_v20 = vadd.f32 %v17864_v59, %v10637_v49  ;;  %v10639_v60 = vmul.f32 %v17856_v51, %v10568_v18  ;;  %v10829_v33 = vpack.c.bf16 %v10770_v16, %v10769_v34  ;;  %v10773_v55 = vmax.f32 %v10709_v30, 0.0  ;;  %v18896_v34 = vld [vmem:[#allocation91_spill] sm:$0xff]  ;;  %v18898_v16 = vld [vmem:[#allocation16_spill] sm:$0xff] }
 0x580   :  { %v14245_v63 = vpop.f32.mrf.mxu1  ;;  %v9856_v28 = vadd.f32 %v18897_v3, %v18896_v34  ;;  %v18899_v49 = vld [vmem:[#allocation152_spill] sm:$0xff]  ;;  %v18906_v3 = vld [vmem:[#allocation99_spill] sm:$0xff] }
 0x581   :  { %v10772_v8 = vmax.f32 %v10708_v20, 0.0  ;;  %v10710_v1 = vadd.f32 %v17864_v59, %v10639_v60  ;;  %v10570_v44 = vadd.f32 %v14245_v63, %v9853_v58  ;;  %14355 = vmatprep.mubr.bf16.mxu0 %v10829_v33  ;;  %v9855_v18 = vadd.f32 %v18899_v49, %v18898_v16 }
 0x582   :  { %v10242_v0 = vpop.f32.mrf.mxu1 }
 0x583   :  { %v10830_v48 = vpack.c.bf16 %v10772_v8, %v10771_v4  ;;  %v10774_v54 = vmax.f32 %v10710_v1, 0.0  ;;  %v10641_v29 = vmul.f32 %v17856_v51, %v10570_v44  ;;  %v18900_v4 = vld [vmem:[#allocation92_spill] sm:$0xff]  ;;  %v18901_v8 = vld [vmem:[#allocation146_spill] sm:$0xff] }
 0x584   :  { %v14246_v57 = vpop.f32.mrf.mxu1  ;;  %v9858_v1 = vadd.f32 %v18901_v8, %v18900_v4 }
 0x585   :  { %14356 = vmatmul.mubr.bf16.gmra.mxu0 %v10830_v48  ;;  %v10831_v21 = vpack.c.bf16 %v10774_v54, %v10773_v55  ;;  %v10712_v39 = vadd.f32 %v17864_v59, %v10641_v29  ;;  %v18902_v57 = vld [vmem:[#allocation49_spill] sm:$0xff]  ;;  %v18903_v29 = vld [vmem:[#allocation151_spill] sm:$0xff] }
 0x586   :  { %v10244_v17 = vpop.f32.mrf.mxu1  ;;  %v9857_v47 = vadd.f32 %v18903_v29, %v18902_v57 }
 0x587   :  { %v10569_v36 = vadd.f32 %v10244_v17, %v9852_v14  ;;  %14359 = vmatprep.mubr.bf16.mxu0 %v10831_v21  ;;  %v10776_v11 = vmax.f32 %v10712_v39, 0.0  ;;  %v18905_v39 = vld [vmem:[#allocation153_spill] sm:$0xff] }
 0x588   :  { %v14249_v40 = vpop.f32.mrf.mxu1 }
 0x589   :  { %v10640_v42 = vmul.f32 %v17856_v51, %v10569_v36  ;;  %v18904_v40 = vld [vmem:[#allocation93_spill] sm:$0xff] }
 0x58a   :  { %v10256_v50 = vpop.f32.mrf.mxu1 }
 0x58b   :  { %v10711_v6 = vadd.f32 %v17864_v59, %v10640_v42  ;;  %v10571_v27 = vadd.f32 %v10256_v50, %v9854_v61  ;;  %v9859_v42 = vadd.f32 %v18905_v39, %v18904_v40  ;;  %v18911_v40 = vld [vmem:[#allocation47_spill] sm:$0xff] }
 0x58c   :  { %v14250_v5 = vpop.f32.mrf.mxu1 }
 0x58d   :  { %v10775_v58 = vmax.f32 %v10711_v6, 0.0  ;;  %v10642_v30 = vmul.f32 %v17856_v51, %v10571_v27  ;;  %v10573_v20 = vadd.f32 %v14250_v5, %v9856_v28  ;;  %v18907_v28 = vld [vmem:[#allocation154_spill] sm:$0xff] }
 0x58e   :  { %v10259_v60 = vpop.f32.mrf.mxu1  ;;  %v9861_v5 = vadd.f32 %v18907_v28, %v18906_v3  ;;  %v18915_v3 = vld [vmem:[#allocation50_spill] sm:$0xff] }
 0x58f   :  { %v10832_v33 = vpack.c.bf16 %v10776_v11, %v10775_v58  ;;  %v10572_v63 = vadd.f32 %v10259_v60, %v9855_v18  ;;  %v10713_v44 = vadd.f32 %v17864_v59, %v10642_v30  ;;  %v10644_v55 = vmul.f32 %v17856_v51, %v10573_v20 }
 0x590   :  { %v14253_v0 = vpop.f32.mrf.mxu1  ;;  %v10028_v30 = vrot.slane %v17631_v26, 1  ;;  %v18908_v26 = vld [vmem:[#allocation94_spill] sm:$0xff] }
 0x591   :  { %v10643_v48 = vmul.f32 %v17856_v51, %v10572_v63  ;;  %v10575_v54 = vadd.f32 %v14253_v0, %v9858_v1  ;;  %14360 = vmatmul.mubr.bf16.gmra.mxu0 %v10832_v33  ;;  %v10777_v9 = vmax.f32 %v10713_v44, 0.0  ;;  %v10715_v61 = vadd.f32 %v17864_v59, %v10644_v55 }
 0x592   :  { %v10271_v14 = vpop.f32.mrf.mxu1  ;;  %v10029_v8 = vsel %vm3680_vm2, %v10026_v56, %v10028_v30 }
 0x593   :  { %v10714_v21 = vadd.f32 %v17864_v59, %v10643_v48  ;;  %v10646_v17 = vmul.f32 %v17856_v51, %v10575_v54  ;;  %v10574_v36 = vadd.f32 %v10271_v14, %v9857_v47  ;;  %v10779_v20 = vmax.f32 %v10715_v61, 0.0  ;;  %14327 = vmatprep.mubr.bf16.mxu1 %v10029_v8  ;;  %v18909_v54 = vld [vmem:[#allocation156_spill] sm:$0xff] }
 0x594   :  { %v14254_v7 = vpop.f32.mrf.mxu1  ;;  %v9860_v57 = vadd.f32 %v18909_v54, %v18908_v26 }
 0x595   :  { %v10778_v50 = vmax.f32 %v10714_v21, 0.0  ;;  %v10645_v6 = vmul.f32 %v17856_v51, %v10574_v36  ;;  %v10576_v27 = vadd.f32 %v14254_v7, %v9859_v42  ;;  %v10717_v16 = vadd.f32 %v17864_v59, %v10646_v17  ;;  %v18910_v36 = vld [vmem:[#allocation102_spill] sm:$0xff] }
 0x596   :  { %v10274_v34 = vpop.f32.mrf.mxu1  ;;  %v10030_v21 = vrot.slane %v17634_v53, 1  ;;  %v9862_v39 = vadd.f32 %v18911_v40, %v18910_v36  ;;  %v18914_v53 = vld [vmem:[#allocation52_spill] sm:$0xff] }
 0x597   :  { %v10716_v49 = vadd.f32 %v17864_v59, %v10645_v6  ;;  %v10647_v18 = vmul.f32 %v17856_v51, %v10576_v27  ;;  %v10833_v11 = vpack.c.bf16 %v10778_v50, %v10777_v9  ;;  %v10781_v1 = vmax.f32 %v10717_v16, 0.0  ;;  %v18912_v50 = vld [vmem:[#allocation104_spill] sm:$0xff]  ;;  %v18913_v6 = vld [vmem:[#allocation97_spill] sm:$0xff] }
 0x598   :  { %v14257_v58 = vpop.f32.mrf.mxu1  ;;  %v10031_v42 = vsel %vm3680_vm2, %v10028_v30, %v10030_v21  ;;  %v9864_v27 = vadd.f32 %v18913_v6, %v18912_v50  ;;  %v9863_v28 = vadd.f32 %v18915_v3, %v18914_v53 }
 0x599   :  { %v10780_v60 = vmax.f32 %v10716_v49, 0.0  ;;  %v10718_v33 = vadd.f32 %v17864_v59, %v10647_v18  ;;  %v10578_v63 = vadd.f32 %v14257_v58, %v9861_v5  ;;  %14363 = vmatprep.mubr.bf16.mxu0 %v10833_v11  ;;  %14328 = vmatmul.mubr.bf16.gmra.mxu1 %v10031_v42 }
 0x59a   :  { %v10286_v4 = vpop.f32.mrf.mxu1 }
 0x59b   :  { %v10834_v44 = vpack.c.bf16 %v10780_v60, %v10779_v20  ;;  %v10782_v0 = vmax.f32 %v10718_v33, 0.0  ;;  %v10649_v48 = vmul.f32 %v17856_v51, %v10578_v63  ;;  %v18916_v20 = vld [vmem:[#allocation53_spill] sm:$0xff]  ;;  %v18917_v60 = vld [vmem:[#allocation51_spill] sm:$0xff] }
 0x59c   :  { %v14258_v55 = vpop.f32.mrf.mxu1  ;;  %v9866_v33 = vadd.f32 %v18917_v60, %v18916_v20 }
 0x59d   :  { %14364 = vmatmul.mubr.bf16.gmra.mxu0 %v10834_v44  ;;  %v10835_v29 = vpack.c.bf16 %v10782_v0, %v10781_v1  ;;  %v10720_v56 = vadd.f32 %v17864_v59, %v10649_v48  ;;  %v18918_v0 = vld [vmem:[#allocation18_spill] sm:$0xff]  ;;  %v18919_v55 = vld [vmem:[#allocation100_spill] sm:$0xff] }
 0x59e   :  { %v10288_v47 = vpop.f32.mrf.mxu1  ;;  %v9865_v48 = vadd.f32 %v18919_v55, %v18918_v0 }
 0x59f   :  { %v10577_v14 = vadd.f32 %v10288_v47, %v9860_v57  ;;  %14367 = vmatprep.mubr.bf16.mxu0 %v10835_v29  ;;  %v10784_v5 = vmax.f32 %v10720_v56, 0.0  ;;  %v18920_v47 = vld [vmem:[#allocation96_spill] sm:$0xff] }
 0x5a0   :  { %v14261_v25 = vpop.f32.mrf.mxu1 }
 0x5a1   :  { %v10648_v17 = vmul.f32 %v17856_v51, %v10577_v14  ;;  %v18921_v14 = vld [vmem:[#allocation101_spill] sm:$0xff] }
 0x5a2   :  { %v10300_v9 = vpop.f32.mrf.mxu1  ;;  %v9867_v21 = vadd.f32 %v18921_v14, %v18920_v47 }
 0x5a3   :  { %v10719_v7 = vadd.f32 %v17864_v59, %v10648_v17  ;;  %v10579_v61 = vadd.f32 %v10300_v9, %v9862_v39  ;;  %v18922_v9 = vld [vmem:[#allocation17_spill] sm:$0xff] }
 0x5a4   :  { %v14262_v34 = vpop.f32.mrf.mxu1 }
 0x5a5   :  { %v10783_v16 = vmax.f32 %v10719_v7, 0.0  ;;  %v10650_v49 = vmul.f32 %v17856_v51, %v10579_v61  ;;  %v10581_v18 = vadd.f32 %v14262_v34, %v9864_v27  ;;  %v18923_v7 = vld [vmem:[#allocation21_spill] sm:$0xff] }
 0x5a6   :  { %v10303_v11 = vpop.f32.mrf.mxu1  ;;  %v9869_v61 = vadd.f32 %v18923_v7, %v18922_v9 }
 0x5a7   :  { %v10836_v58 = vpack.c.bf16 %v10784_v5, %v10783_v16  ;;  %v10580_v30 = vadd.f32 %v10303_v11, %v9863_v28  ;;  %v10721_v63 = vadd.f32 %v17864_v59, %v10650_v49  ;;  %v10652_v8 = vmul.f32 %v17856_v51, %v10581_v18 }
 0x5a8   :  { %v14265_v4 = vpop.f32.mrf.mxu1 }
 0x5a9   :  { %v10651_v1 = vmul.f32 %v17856_v51, %v10580_v30  ;;  %v10583_v44 = vadd.f32 %v14265_v4, %v9866_v33  ;;  %14368 = vmatmul.mubr.bf16.gmra.mxu0 %v10836_v58  ;;  %v10785_v25 = vmax.f32 %v10721_v63, 0.0  ;;  %v10723_v17 = vadd.f32 %v17864_v59, %v10652_v8  ;;  %v18924_v33 = vld [vmem:[#allocation98_spill] sm:$0xff]  ;;  %v18925_v63 = vld [vmem:[#allocation95_spill] sm:$0xff] }
 0x5aa   :  { %v10315_v26 = vpop.f32.mrf.mxu1  ;;  %v9868_v4 = vadd.f32 %v18925_v63, %v18924_v33 }
 0x5ab   :  { %v10722_v54 = vadd.f32 %v17864_v59, %v10651_v1  ;;  %v10654_v57 = vmul.f32 %v17856_v51, %v10583_v44  ;;  %v10582_v29 = vadd.f32 %v10315_v26, %v9865_v48  ;;  %v10787_v3 = vmax.f32 %v10723_v17, 0.0 }
 0x5ac   :  { %v14266_v56 = vpop.f32.mrf.mxu1 }
 0x5ad   :  { %v10786_v36 = vmax.f32 %v10722_v54, 0.0  ;;  %v10653_v40 = vmul.f32 %v17856_v51, %v10582_v29  ;;  %v10584_v39 = vadd.f32 %v14266_v56, %v9867_v21  ;;  %v10725_v50 = vadd.f32 %v17864_v59, %v10654_v57 }
 0x5ae   :  { %v10318_v42 = vpop.f32.mrf.mxu1 }
 0x5af   :  { %v10724_v6 = vadd.f32 %v17864_v59, %v10653_v40  ;;  %v10655_v27 = vmul.f32 %v17856_v51, %v10584_v39  ;;  %v10837_v34 = vpack.c.bf16 %v10786_v36, %v10785_v25  ;;  %v10789_v18 = vmax.f32 %v10725_v50, 0.0  ;;  %v18926_v36 = vld [vmem:[#allocation20_spill] sm:$0xff]  ;;  %v18927_v40 = vld [vmem:[#allocation105_spill] sm:$0xff]  ;;  %v18928_v50 = vld [vmem:[#allocation58_spill] sm:$0xff] }
 0x5b0   :  { %v14269_v53 = vpop.f32.mrf.mxu1  ;;  %v9870_v39 = vadd.f32 %v18927_v40, %v18926_v36 }
 0x5b1   :  { %v10788_v28 = vmax.f32 %v10724_v6, 0.0  ;;  %v10726_v5 = vadd.f32 %v17864_v59, %v10655_v27  ;;  %v10586_v16 = vadd.f32 %v14269_v53, %v9869_v61  ;;  %14371 = vmatprep.mubr.bf16.mxu0 %v10837_v34  ;;  %v18929_v6 = vld [vmem:[#allocation26_spill] sm:$0xff] }
 0x5b2   :  { %v10330_v49 = vpop.f32.mrf.mxu1  ;;  %v14205_v20 = vpop.f32.mrf.mxu0  ;;  %v9871_v27 = vadd.f32 %v18929_v6, %v18928_v50 }
 0x5b3   :  { %v10838_v11 = vpack.c.bf16 %v10788_v28, %v10787_v3  ;;  %v10790_v58 = vmax.f32 %v10726_v5, 0.0  ;;  %v10657_v60 = vmul.f32 %v17856_v51, %v10586_v16  ;;  %v18930_v16 = vld [vmem:[#allocation54_spill] sm:$0xff] }
 0x5b4   :  { %v14270_v30 = vpop.f32.mrf.mxu1  ;;  %v9827_v44 = vpop.f32.mrf.mxu0  ;;  %v9873_v49 = vadd.f32 %v18930_v16, %v17653_v19  ;;  %v18936_v16 = vld [vmem:[#allocation19_spill] sm:$0xff] }
 0x5b5   :  { %14372 = vmatmul.mubr.bf16.gmra.mxu0 %v10838_v11  ;;  %v10839_v8 = vpack.c.bf16 %v10790_v58, %v10789_v18  ;;  %v10728_v26 = vadd.f32 %v17864_v59, %v10657_v60 }
 0x5b6   :  { %v10332_v1 = vpop.f32.mrf.mxu1  ;;  %v14206_v48 = vpop.f32.mrf.mxu0 }
 0x5b7   :  { %v10585_v0 = vadd.f32 %v10332_v1, %v9868_v4  ;;  %14375 = vmatprep.mubr.bf16.mxu0 %v10839_v8  ;;  %v10792_v21 = vmax.f32 %v10728_v26, 0.0  ;;  %v18931_v4 = vld [vmem:[#allocation55_spill] sm:$0xff] }
 0x5b8   :  { %v14273_v55 = vpop.f32.mrf.mxu1  ;;  %v9829_v29 = vpop.f32.mrf.mxu0  ;;  %v9872_v8 = vadd.f32 %v18931_v4, %v17664_v37  ;;  %v18932_v26 = vld [vmem:[#allocation103_spill] sm:$0xff] }
 0x5b9   :  { %v10656_v54 = vmul.f32 %v17856_v51, %v10585_v0 }
 0x5ba   :  { %v10344_v57 = vpop.f32.mrf.mxu1 }
 0x5bb   :  { %v10727_v47 = vadd.f32 %v17864_v59, %v10656_v54  ;;  %v9874_v54 = vadd.f32 %v18932_v26, %v17672_v45  ;;  %v9878_v45 = vadd.f32 %v17651_v35, %v17687_v12  ;;  %v18937_v35 = vld [vmem:[#allocation29_spill] sm:$0xff] }
 0x5bc   :  { %v14274_v14 = vpop.f32.mrf.mxu1  ;;  %v9879_v12 = vadd.f32 %v18937_v35, %v18936_v16 }
 0x5bd   :  { %v10791_v25 = vmax.f32 %v10727_v47, 0.0  ;;  %v18933_v14 = vld [vmem:[#allocation57_spill] sm:$0xff] }
 0x5be   :  { %v10346_v56 = vpop.f32.mrf.mxu1 }
 0x5bf   :  { %v10840_v17 = vpack.c.bf16 %v10792_v21, %v10791_v25  ;;  %v9876_v21 = vadd.f32 %v18933_v14, %v17676_v2  ;;  %v18934_v25 = vld [vmem:[#allocation22_spill] sm:$0xff]  ;;  %v18939_v14 = vld [vmem:[#allocation27_spill] sm:$0xff] }
 0x5c0   :  { %v14277_v42 = vpop.f32.mrf.mxu1  ;;  %v9875_v56 = vadd.f32 %v18934_v25, %v17682_v62  ;;  %v18935_v62 = vld [vmem:[#allocation23_spill] sm:$0xff] }
 0x5c1   :  { %v10587_v9 = vadd.f32 %v14277_v42, %v9870_v39  ;;  %14376 = vmatmul.mubr.bf16.gmra.mxu0 %v10840_v17 }
 0x5c2   :  { %v10356_v7 = vpop.f32.mrf.mxu1 }
 0x5c3   :  { %v10658_v61 = vmul.f32 %v17856_v51, %v10587_v9 }
 0x5c4   :  { %v14278_v34 = vpop.f32.mrf.mxu1 }
 0x5c5   :  { %v10588_v53 = vadd.f32 %v14278_v34, %v9871_v27  ;;  %v10729_v28 = vadd.f32 %v17864_v59, %v10658_v61  ;;  %v9877_v34 = vadd.f32 %v18935_v62, %v17694_v22  ;;  %v18938_v22 = vld [vmem:[#allocation24_spill] sm:$0xff] }
 0x5c6   :  { %v10358_v3 = vpop.f32.mrf.mxu1 }
 0x5c7   :  { %v10659_v5 = vmul.f32 %v17856_v51, %v10588_v53  ;;  %v10793_v20 = vmax.f32 %v10729_v28, 0.0 }
 0x5c8   :  { %v14281_v18 = vpop.f32.mrf.mxu1 }
 0x5c9   :  { %v10730_v11 = vadd.f32 %v17864_v59, %v10659_v5  ;;  %v10590_v58 = vadd.f32 %v14281_v18, %v9873_v49 }
 0x5ca   :  { %v10370_v30 = vpop.f32.mrf.mxu1 }
 0x5cb   :  { %v10794_v60 = vmax.f32 %v10730_v11, 0.0  ;;  %v10661_v63 = vmul.f32 %v17856_v51, %v10590_v58 }
 0x5cc   :  { %v14282_v33 = vpop.f32.mrf.mxu1 }
 0x5cd   :  { %v10841_v1 = vpack.c.bf16 %v10794_v60, %v10793_v20  ;;  %v10732_v19 = vadd.f32 %v17864_v59, %v10661_v63  ;;  %v9881_v33 = vadd.f32 %v18938_v22, %v17709_v41 }
 0x5ce   :  { %v10372_v44 = vpop.f32.mrf.mxu1 }
 0x5cf   :  { %v10589_v0 = vadd.f32 %v10372_v44, %v9872_v8  ;;  %14379 = vmatprep.mubr.bf16.mxu0 %v10841_v1  ;;  %v10796_v17 = vmax.f32 %v10732_v19, 0.0 }
 0x5d0   :  { %v14285_v55 = vpop.f32.mrf.mxu1 }
 0x5d1   :  { %v10660_v48 = vmul.f32 %v17856_v51, %v10589_v0 }
 0x5d2   :  { %v10384_v57 = vpop.f32.mrf.mxu1 }
 0x5d3   :  { %v10731_v29 = vadd.f32 %v17864_v59, %v10660_v48  ;;  %v10591_v47 = vadd.f32 %v10384_v57, %v9874_v54 }
 0x5d4   :  { %v14286_v37 = vpop.f32.mrf.mxu1 }
 0x5d5   :  { %v10795_v36 = vmax.f32 %v10731_v29, 0.0  ;;  %v10662_v40 = vmul.f32 %v17856_v51, %v10591_v47  ;;  %v10593_v39 = vadd.f32 %v14286_v37, %v9876_v21  ;;  %v18940_v21 = vld [vmem:[#allocation30_spill] sm:$0xff] }
 0x5d6   :  { %v10387_v42 = vpop.f32.mrf.mxu1  ;;  %v9880_v37 = vadd.f32 %v18940_v21, %v18939_v14 }
 0x5d7   :  { %v10842_v9 = vpack.c.bf16 %v10796_v17, %v10795_v36  ;;  %v10592_v7 = vadd.f32 %v10387_v42, %v9875_v56  ;;  %v10733_v61 = vadd.f32 %v17864_v59, %v10662_v40  ;;  %v10664_v2 = vmul.f32 %v17856_v51, %v10593_v39  ;;  %v18941_v42 = vld [vmem:[#allocation25_spill] sm:$0xff] }
 0x5d8   :  { %v14289_v50 = vpop.f32.mrf.mxu1 }
 0x5d9   :  { %v10663_v6 = vmul.f32 %v17856_v51, %v10592_v7  ;;  %v10595_v27 = vadd.f32 %v14289_v50, %v9878_v45  ;;  %14380 = vmatmul.mubr.bf16.gmra.mxu0 %v10842_v9  ;;  %v10797_v49 = vmax.f32 %v10733_v61, 0.0  ;;  %v10735_v11 = vadd.f32 %v17864_v59, %v10664_v2  ;;  %v18942_v50 = vld [vmem:[#allocation108_spill] sm:$0xff] }
 0x5da   :  { %v10399_v53 = vpop.f32.mrf.mxu1  ;;  %v9882_v9 = vadd.f32 %v18941_v42, %v17726_v23  ;;  %v9884_v2 = vadd.f32 %v18942_v50, %v17730_v10  ;;  %v18944_v23 = vld [vmem:[#allocation61_spill] sm:$0xff] }
 0x5db   :  { %v10734_v3 = vadd.f32 %v17864_v59, %v10663_v6  ;;  %v10666_v28 = vmul.f32 %v17856_v51, %v10595_v27  ;;  %v10594_v5 = vadd.f32 %v10399_v53, %v9877_v34  ;;  %v10799_v0 = vmax.f32 %v10735_v11, 0.0  ;;  %v18943_v27 = vld [vmem:[#allocation59_spill] sm:$0xff] }
 0x5dc   :  { %v14290_v18 = vpop.f32.mrf.mxu1  ;;  %v9883_v62 = vadd.f32 %v18943_v27, %v17736_v15  ;;  %v18945_v15 = vld [vmem:[#allocation31_spill] sm:$0xff]  ;;  %v18951_v27 = vld [vmem:[#allocation62_spill] sm:$0xff] }
 0x5dd   :  { %v10798_v58 = vmax.f32 %v10734_v3, 0.0  ;;  %v10665_v30 = vmul.f32 %v17856_v51, %v10594_v5  ;;  %v10596_v20 = vadd.f32 %v14290_v18, %v9879_v12  ;;  %v10737_v63 = vadd.f32 %v17864_v59, %v10666_v28 }
 0x5de   :  { %v10402_v60 = vpop.f32.mrf.mxu1  ;;  %v9886_v12 = vadd.f32 %v18944_v23, %v17741_v43  ;;  %v18946_v43 = vld [vmem:[#allocation106_spill] sm:$0xff]  ;;  %v18954_v23 = vld [vmem:[#allocation60_spill] sm:$0xff] }
 0x5df   :  { %v10736_v4 = vadd.f32 %v17864_v59, %v10665_v30  ;;  %v10667_v8 = vmul.f32 %v17856_v51, %v10596_v20  ;;  %v10843_v1 = vpack.c.bf16 %v10798_v58, %v10797_v49  ;;  %v10801_v54 = vmax.f32 %v10737_v63, 0.0 }
 0x5e0   :  { %v14293_v44 = vpop.f32.mrf.mxu1  ;;  %v9885_v30 = vadd.f32 %v18945_v15, %v17748_v46  ;;  %v9887_v63 = vadd.f32 %v18946_v43, %v17754_v38  ;;  %v18947_v46 = vld [vmem:[#allocation32_spill] sm:$0xff] }
 0x5e1   :  { %v10800_v55 = vmax.f32 %v10736_v4, 0.0  ;;  %v10738_v19 = vadd.f32 %v17864_v59, %v10667_v8  ;;  %v10598_v48 = vadd.f32 %v14293_v44, %v9881_v33  ;;  %14383 = vmatprep.mubr.bf16.mxu0 %v10843_v1 }
 0x5e2   :  { %v10414_v26 = vpop.f32.mrf.mxu1 }
 0x5e3   :  { %v10844_v57 = vpack.c.bf16 %v10800_v55, %v10799_v0  ;;  %v10802_v29 = vmax.f32 %v10738_v19, 0.0  ;;  %v10669_v41 = vmul.f32 %v17856_v51, %v10598_v48  ;;  %v9889_v48 = vadd.f32 %v18947_v46, %v17763_v32 }
 0x5e4   :  { %v14294_v47 = vpop.f32.mrf.mxu1 }
 0x5e5   :  { %14384 = vmatmul.mubr.bf16.gmra.mxu0 %v10844_v57  ;;  %v10845_v25 = vpack.c.bf16 %v10802_v29, %v10801_v54  ;;  %v10740_v40 = vadd.f32 %v17864_v59, %v10669_v41 }
 0x5e6   :  { %v10416_v56 = vpop.f32.mrf.mxu1 }
 0x5e7   :  { %v10597_v17 = vadd.f32 %v10416_v56, %v9880_v37  ;;  %14387 = vmatprep.mubr.bf16.mxu0 %v10845_v25  ;;  %v10804_v34 = vmax.f32 %v10740_v40, 0.0  ;;  %v18948_v40 = vld [vmem:[#allocation109_spill] sm:$0xff] }
 0x5e8   :  { %v14297_v36 = vpop.f32.mrf.mxu1 }
 0x5e9   :  { %v10668_v39 = vmul.f32 %v17856_v51, %v10597_v17 }
 0x5ea   :  { %v10428_v7 = vpop.f32.mrf.mxu1 }
 0x5eb   :  { %v10739_v45 = vadd.f32 %v17864_v59, %v10668_v39  ;;  %v10599_v61 = vadd.f32 %v10428_v7, %v9882_v9  ;;  %v18949_v39 = vld [vmem:[#allocation28_spill] sm:$0xff] }
 0x5ec   :  { %v14298_v6 = vpop.f32.mrf.mxu1  ;;  %v9888_v42 = vadd.f32 %v18949_v39, %v18948_v40 }
 0x5ed   :  { %v10803_v53 = vmax.f32 %v10739_v45, 0.0  ;;  %v10670_v3 = vmul.f32 %v17856_v51, %v10599_v61  ;;  %v10601_v28 = vadd.f32 %v14298_v6, %v9884_v2  ;;  %v18950_v6 = vld [vmem:[#allocation56_spill] sm:$0xff] }
 0x5ee   :  { %v10431_v5 = vpop.f32.mrf.mxu1 }
 0x5ef   :  { %v10846_v16 = vpack.c.bf16 %v10804_v34, %v10803_v53  ;;  %v10600_v35 = vadd.f32 %v10431_v5, %v9883_v62  ;;  %v10741_v49 = vadd.f32 %v17864_v59, %v10670_v3  ;;  %v10672_v10 = vmul.f32 %v17856_v51, %v10601_v28  ;;  %v18952_v28 = vld [vmem:[#allocation113_spill] sm:$0xff]  ;;  %v18953_v5 = vld [vmem:[#allocation63_spill] sm:$0xff] }
 0x5f0   :  { %v14301_v18 = vpop.f32.mrf.mxu1  ;;  %v9890_v62 = vadd.f32 %v18951_v27, %v18950_v6 }
 0x5f1   :  { %v10671_v11 = vmul.f32 %v17856_v51, %v10600_v35  ;;  %v10603_v58 = vadd.f32 %v14301_v18, %v9886_v12  ;;  %14388 = vmatmul.mubr.bf16.gmra.mxu0 %v10846_v16  ;;  %v10805_v4 = vmax.f32 %v10741_v49, 0.0  ;;  %v10743_v1 = vadd.f32 %v17864_v59, %v10672_v10  ;;  %v18955_v12 = vld [vmem:[#allocation33_spill] sm:$0xff] }
 0x5f2   :  { %v10443_v20 = vpop.f32.mrf.mxu1  ;;  %v9892_v16 = vadd.f32 %v18953_v5, %v18952_v28  ;;  %v9891_v49 = vadd.f32 %v18955_v12, %v18954_v23  ;;  %v18964_v12 = vld [vmem:[#allocation69_spill] sm:$0xff] }
 0x5f3   :  { %v10742_v60 = vadd.f32 %v17864_v59, %v10671_v11  ;;  %v10674_v22 = vmul.f32 %v17856_v51, %v10603_v58  ;;  %v10602_v33 = vadd.f32 %v10443_v20, %v9885_v30  ;;  %v10807_v47 = vmax.f32 %v10743_v1, 0.0 }
 0x5f4   :  { %v14302_v8 = vpop.f32.mrf.mxu1 }
 0x5f5   :  { %v10806_v44 = vmax.f32 %v10742_v60, 0.0  ;;  %v10673_v0 = vmul.f32 %v17856_v51, %v10602_v33  ;;  %v10604_v55 = vadd.f32 %v14302_v8, %v9887_v63  ;;  %v10745_v26 = vadd.f32 %v17864_v59, %v10674_v22  ;;  %v18956_v60 = vld [vmem:[#allocation37_spill] sm:$0xff]  ;;  %v18957_v22 = vld [vmem:[#allocation107_spill] sm:$0xff] }
 0x5f6   :  { %v10446_v19 = vpop.f32.mrf.mxu1  ;;  %v9894_v33 = vadd.f32 %v18957_v22, %v18956_v60  ;;  %v18968_v60 = vld [vmem:[#allocation68_spill] sm:$0xff] }
 0x5f7   :  { %v10744_v54 = vadd.f32 %v17864_v59, %v10673_v0  ;;  %v10675_v57 = vmul.f32 %v17856_v51, %v10604_v55  ;;  %v10847_v29 = vpack.c.bf16 %v10806_v44, %v10805_v4  ;;  %v10809_v25 = vmax.f32 %v10745_v26, 0.0  ;;  %v18958_v44 = vld [vmem:[#allocation67_spill] sm:$0xff]  ;;  %v18959_v0 = vld [vmem:[#allocation64_spill] sm:$0xff] }
 0x5f8   :  { %v14305_v38 = vpop.f32.mrf.mxu1  ;;  %v9893_v55 = vadd.f32 %v18959_v0, %v18958_v44  ;;  %v9899_v22 = vadd.f32 %v18968_v60, %v17834_v52 }
 0x5f9   :  { %v10808_v41 = vmax.f32 %v10744_v54, 0.0  ;;  %v10746_v14 = vadd.f32 %v17864_v59, %v10675_v57  ;;  %v10606_v21 = vadd.f32 %v14305_v38, %v9889_v48  ;;  %14391 = vmatprep.mubr.bf16.mxu0 %v10847_v29  ;;  %v18960_v54 = vld [vmem:[#allocation34_spill] sm:$0xff]  ;;  %v18961_v57 = vld [vmem:[#allocation65_spill] sm:$0xff] }
 0x5fa   :  { %v10458_v37 = vpop.f32.mrf.mxu1  ;;  %v9895_v29 = vadd.f32 %v18961_v57, %v18960_v54 }
 0x5fb   :  { %v10848_v56 = vpack.c.bf16 %v10808_v41, %v10807_v47  ;;  %v10810_v17 = vmax.f32 %v10746_v14, 0.0  ;;  %v10677_v32 = vmul.f32 %v17856_v51, %v10606_v21 }
 0x5fc   :  { %v14306_v36 = vpop.f32.mrf.mxu1 }
 0x5fd   :  { %14392 = vmatmul.mubr.bf16.gmra.mxu0 %v10848_v56  ;;  %v10849_v9 = vpack.c.bf16 %v10810_v17, %v10809_v25  ;;  %v10748_v50 = vadd.f32 %v17864_v59, %v10677_v32  ;;  %v18962_v56 = vld [vmem:[#allocation66_spill] sm:$0xff] }
 0x5fe   :  { %v10460_v7 = vpop.f32.mrf.mxu1  ;;  %v9897_v17 = vadd.f32 %v18962_v56, %v17815_v24 }
 0x5ff   :  { %v10605_v45 = vadd.f32 %v10460_v7, %v9888_v42  ;;  %14395 = vmatprep.mubr.bf16.mxu0 %v10849_v9  ;;  %v10812_v18 = vmax.f32 %v10748_v50, 0.0 }
 0x600   :  { %v14309_v61 = vpop.f32.mrf.mxu1 }
 0x601   :  { %v10676_v2 = vmul.f32 %v17856_v51, %v10605_v45 }
 0x602   :  { %v10472_v34 = vpop.f32.mrf.mxu1 }
 0x603   :  { %v10747_v53 = vadd.f32 %v17864_v59, %v10676_v2  ;;  %v10607_v3 = vadd.f32 %v10472_v34, %v9890_v62  ;;  %v18963_v34 = vld [vmem:[#allocation110_spill] sm:$0xff] }
 0x604   :  { %v14310_v35 = vpop.f32.mrf.mxu1 }
 0x605   :  { %v10811_v10 = vmax.f32 %v10747_v53, 0.0  ;;  %v10678_v11 = vmul.f32 %v17856_v51, %v10607_v3  ;;  %v10609_v58 = vadd.f32 %v14310_v35, %v9892_v16  ;;  %v9896_v53 = vadd.f32 %v18963_v34, %v17820_v31 }
 0x606   :  { %v10475_v15 = vpop.f32.mrf.mxu1 }
 0x607   :  { %v10850_v30 = vpack.c.bf16 %v10812_v18, %v10811_v10  ;;  %v10608_v20 = vadd.f32 %v10475_v15, %v9891_v49  ;;  %v10749_v43 = vadd.f32 %v17864_v59, %v10678_v11  ;;  %v10680_v4 = vmul.f32 %v17856_v51, %v10609_v58  ;;  %v18965_v49 = vld [vmem:[#allocation111_spill] sm:$0xff]  ;;  %v18966_v15 = vld [vmem:[#allocation117_spill] sm:$0xff] }
 0x608   :  { %v14313_v63 = vpop.f32.mrf.mxu1  ;;  %v9898_v18 = vadd.f32 %v18965_v49, %v18964_v12  ;;  %v14959_v49 = vld [vmem:[#allocation3 + $0x18] sm:$0xff]  }
 0x609   :  { %v10679_v8 = vmul.f32 %v17856_v51, %v10608_v20  ;;  %v10611_v1 = vadd.f32 %v14313_v63, %v9894_v33  ;;  %14396 = vmatmul.mubr.bf16.gmra.mxu0 %v10850_v30  ;;  %v10813_v38 = vmax.f32 %v10749_v43, 0.0  ;;  %v10751_v41 = vadd.f32 %v17864_v59, %v10680_v4  ;;  %v18967_v30 = vld [vmem:[#allocation116_spill] sm:$0xff] }
 0x60a   :  { %v10487_v19 = vpop.f32.mrf.mxu1  ;;  %v9900_v20 = vadd.f32 %v18967_v30, %v18966_v15  ;;  %v14960_v15 = vld [vmem:[#allocation3 + $0x10] sm:$0xff]  }
 0x60b   :  { %v10750_v46 = vadd.f32 %v17864_v59, %v10679_v8  ;;  %v10682_v48 = vmul.f32 %v17856_v51, %v10611_v1  ;;  %v10610_v26 = vadd.f32 %v10487_v19, %v9893_v55  ;;  %v10815_v9 = vmax.f32 %v10751_v41, 0.0 }
 0x60c   :  { %v14314_v47 = vpop.f32.mrf.mxu1  ;;  %v11356_v30 = vunpack.c.l.bf16 %v14960_v15 }
 0x60d   :  { %v10814_v14 = vmax.f32 %v10750_v46, 0.0  ;;  %v10681_v21 = vmul.f32 %v17856_v51, %v10610_v26  ;;  %v10612_v37 = vadd.f32 %v14314_v47, %v9895_v29  ;;  %v10753_v36 = vadd.f32 %v17864_v59, %v10682_v48 }
 0x60e   :  { %v10490_v25 = vpop.f32.mrf.mxu1 }
 0x60f   :  { %v10752_v32 = vadd.f32 %v17864_v59, %v10681_v21  ;;  %v10683_v40 = vmul.f32 %v17856_v51, %v10612_v37  ;;  %v10851_v39 = vpack.c.bf16 %v10814_v14, %v10813_v38  ;;  %v10817_v2 = vmax.f32 %v10753_v36, 0.0  ;;  %v18133_v36 = vld [vmem:[%s18275_s9] ss:$0 sm:$0xff] }
 0x610   :  { %v14317_v42 = vpop.f32.mrf.mxu1 }
 0x611   :  { %v10816_v7 = vmax.f32 %v10752_v32, 0.0  ;;  %v10754_v45 = vadd.f32 %v17864_v59, %v10683_v40  ;;  %v10614_v61 = vadd.f32 %v14317_v42, %v9897_v17  ;;  %14399 = vmatprep.mubr.bf16.mxu0 %v10851_v39  ;;  %v18128_v17 = vld [vmem:[%s18274_s8] ss:$0 sm:$0xff]  ;;  %v14958_v39 = vld [vmem:[#allocation3] sm:$0xff]   ;;  %s15104_s8 = smov [#allocation11]  }
 0x612   :  { %v10502_v50 = vpop.f32.mrf.mxu1  ;;  %v11352_v42 = vunpack.c.l.bf16 %v14958_v39  ;;  %s11613_s9 = sshll.u32 %s15104_s8, 4  ;;  %s11614_s9 = int_to_ptr.vmem [resolvable:$true] %s11613_s9 }
 0x613   :  { %v10852_v6 = vpack.c.bf16 %v10816_v7, %v10815_v9  ;;  %v10818_v27 = vmax.f32 %v10754_v45, 0.0  ;;  %v10685_v24 = vmul.f32 %v17856_v51, %v10614_v61  ;;  %s15069_s23 = scalar_lea.vmem %s11614_s9, 8192  ;;  %p15074_p7 = scmp.lt.s32.totalorder %s11614_s9, %s11614_s9 }
 0x614   :  { %v14318_v62 = vpop.f32.mrf.mxu1  ;;  %p15070_p6 = scmp.ne.s32.totalorder %s11614_s9, %s15069_s23  ;;  %p15075_p8 = scmp.lt.s32.totalorder %s15069_s23, %s15069_s23 }
 0x615   :  { %14400 = vmatmul.mubr.bf16.gmra.mxu0 %v10852_v6  ;;  %v10853_v3 = vpack.c.bf16 %v10818_v27, %v10817_v2  ;;  %v10756_v35 = vadd.f32 %v17864_v59, %v10685_v24  ;;  %v11353_v27 = vunpack.c.h.bf16 %v14958_v39 }
 0x616   :  { %v10504_v28 = vpop.f32.mrf.mxu1  ;;  %p15076_p9 = por %p15075_p8, %p15074_p7 }
 0x617   :  { %v10613_v5 = vadd.f32 %v10504_v28, %v9896_v53  ;;  %14403 = vmatprep.mubr.bf16.mxu1 %v10853_v3  ;;  %v10820_v33 = vmax.f32 %v10756_v35, 0.0 }
 0x618   :  { %v14321_v16 = vpop.f32.mrf.mxu1  ;;  %p15077_p10 = pnand %p15076_p9, %p15070_p6 }
 0x619   :  { %v10684_v23 = vmul.f32 %v17856_v51, %v10613_v5 }
 0x61a   :  { %v10516_v10 = vpop.f32.mrf.mxu1 }
 0x61b   :  { %v10755_v11 = vadd.f32 %v17864_v59, %v10684_v23  ;;  %v10615_v58 = vadd.f32 %v10516_v10, %v9898_v18  ;;  %v11358_v18 = vunpack.c.l.bf16 %v14959_v49 }
 0x61c   :  { %v14322_v31 = vpop.f32.mrf.mxu1 }
 0x61d   :  { %v10819_v43 = vmax.f32 %v10755_v11, 0.0  ;;  %v10686_v63 = vmul.f32 %v17856_v51, %v10615_v58  ;;  %v10617_v4 = vadd.f32 %v14322_v31, %v9900_v20 }
 0x61e   :  { %v10519_v8 = vpop.f32.mrf.mxu1 }
 0x61f   :  { %v10854_v1 = vpack.c.bf16 %v10820_v33, %v10819_v43  ;;  %v10616_v44 = vadd.f32 %v10519_v8, %v9899_v22  ;;  %v10757_v55 = vadd.f32 %v17864_v59, %v10686_v63  ;;  %v10688_v19 = vmul.f32 %v17856_v51, %v10617_v4 }
 0x620   :  { %v14325_v0 = vpop.f32.mrf.mxu1  ;;  %v11359_v22 = vunpack.c.h.bf16 %v14959_v49  ;;  %v11357_v4 = vunpack.c.h.bf16 %v14960_v15 }
 0x621   :  { %v10687_v46 = vmul.f32 %v17856_v51, %v10616_v44  ;;  %14404 = vmatmul.mubr.bf16.vlgmr.msra.gmra.mxu1 %v10854_v1  ;;  %v10821_v57 = vmax.f32 %v10757_v55, 0.0  ;;  %v10759_v29 = vadd.f32 %v17864_v59, %v10688_v19 }
 0x622   :  { %v10531_v48 = vpop.f32.mrf.mxu1 }
 0x623   :  { %v10758_v26 = vadd.f32 %v17864_v59, %v10687_v46  ;;  %v10618_v52 = vadd.f32 %v10531_v48, %v17840_v13  ;;  %v10823_v37 = vmax.f32 %v10759_v29, 0.0 }
 0x624   :  { %v14326_v54 = vpop.f32.mrf.mxu1 }
 0x625   :  { %v10822_v38 = vmax.f32 %v10758_v26, 0.0  ;;  %v10689_v47 = vmul.f32 %v17856_v51, %v10618_v52  ;;  %v14957_v51 = vld [vmem:[#allocation3 + $0x8] sm:$0xff]  }
 0x626   :  { %v10534_v41 = vpop.f32.mrf.mxu1  ;;  %v11354_v32 = vunpack.c.l.bf16 %v14957_v51  ;;  %v11355_v61 = vunpack.c.h.bf16 %v14957_v51 }
 0x627   :  { %v10760_v14 = vadd.f32 %v17864_v59, %v10689_v47  ;;  %v10855_v21 = vpack.c.bf16 %v10822_v38, %v10821_v57  ;;  %v14961_v57 = vld [vmem:[#allocation3 + $0x28] sm:$0xff]  }
 0x628   :  { %v11362_v29 = vunpack.c.l.bf16 %v14961_v57 }
 0x629   :  { %v10824_v25 = vmax.f32 %v10760_v14, 0.0  ;;  %14407 = vmatprep.mubr.bf16.mxu1 %v10855_v21  ;;  %v14962_v14 = vld [vmem:[#allocation3 + $0x20] sm:$0xff]  }
 0x62a   :  { %v11360_v21 = vunpack.c.l.bf16 %v14962_v14 }
 0x62b   :  { %v10856_v56 = vpack.c.bf16 %v10824_v25, %v10823_v37 }
 0x62d   :  { %v14349_v13 = vpop.f32.mrf.mxu0  ;;  %14408 = vmatmul.mubr.bf16.gmra.mxu1 %v10856_v56 }
 0x62e   :  { %v11219_v59 = vmul.f32 %v14349_v13, %v18128_v17  ;;  %v11363_v13 = vunpack.c.h.bf16 %v14961_v57 }
 0x62f   :  { %v10955_v40 = vpop.f32.mrf.mxu0 }
 0x630   :  { %v11290_v9 = vadd.f32 %v18133_v36, %v11219_v59  ;;  %v11217_v7 = vmul.f32 %v18128_v17, %v10955_v40  ;;  %v11361_v40 = vunpack.c.h.bf16 %v14962_v14 }
 0x631   :  { %v14350_v45 = vpop.f32.mrf.mxu0 }
 0x632   :  { %v11418_v50 = vadd.f32 %v11354_v32, %v11290_v9  ;;  %v11288_v2 = vadd.f32 %v18133_v36, %v11217_v7  ;;  %v11220_v6 = vmul.f32 %v14350_v45, %v18128_v17 }
 0x633   :  { %v10958_v62 = vpop.f32.mrf.mxu0 }
 0x634   :  { %v11482_v24 = vmax.f32 %v11418_v50, 0.0  ;;  %v11416_v34 = vadd.f32 %v11352_v42, %v11288_v2  ;;  %v11291_v53 = vadd.f32 %v18133_v36, %v11220_v6  ;;  %v11218_v3 = vmul.f32 %v18128_v17, %v10958_v62 }
 0x636   :  { %11546 = vst [vmem:[#allocation11 + $0x10] sm:$0xff] %v11482_v24  ;;  %v11480_v28 = vmax.f32 %v11416_v34, 0.0  ;;  %v11419_v5 = vadd.f32 %v11355_v61, %v11291_v53  ;;  %v11289_v16 = vadd.f32 %v18133_v36, %v11218_v3  ;;  %v14963_v24 = vld [vmem:[#allocation3 + $0x38] sm:$0xff]  }
 0x637   :  { %v11366_v34 = vunpack.c.l.bf16 %v14963_v24  ;;  %v11367_v49 = vunpack.c.h.bf16 %v14963_v24 }
 0x638   :  { %11544 = vst [vmem:[#allocation11] sm:$0xff] %v11480_v28  ;;  %v11483_v35 = vmax.f32 %v11419_v5, 0.0  ;;  %v11417_v23 = vadd.f32 %v11353_v27, %v11289_v16  ;;  %v14964_v5 = vld [vmem:[#allocation3 + $0x30] sm:$0xff]  }
 0x639   :  { %v14353_v12 = vpop.f32.mrf.mxu0  ;;  %v11364_v16 = vunpack.c.l.bf16 %v14964_v5 }
 0x63a   :  { %11547 = vst [vmem:[#allocation11 + $0x18] sm:$0xff] %v11483_v35  ;;  %v11481_v10 = vmax.f32 %v11417_v23, 0.0  ;;  %v11223_v11 = vmul.f32 %v14353_v12, %v18128_v17 }
 0x63b   :  { %v10971_v58 = vpop.f32.mrf.mxu0 }
 0x63c   :  { %11545 = vst [vmem:[#allocation11 + $0x8] sm:$0xff] %v11481_v10  ;;  %v11294_v20 = vadd.f32 %v18133_v36, %v11223_v11  ;;  %v11221_v31 = vmul.f32 %v18128_v17, %v10971_v58  ;;  %v11365_v58 = vunpack.c.h.bf16 %v14964_v5 }
 0x63d   :  { %v14354_v60 = vpop.f32.mrf.mxu0 }
 0x63e   :  { %v11422_v33 = vadd.f32 %v11358_v18, %v11294_v20  ;;  %v11292_v43 = vadd.f32 %v18133_v36, %v11221_v31  ;;  %v11224_v63 = vmul.f32 %v14354_v60, %v18128_v17 }
 0x63f   :  { %v10974_v8 = vpop.f32.mrf.mxu0 }
 0x640   :  { %v11486_v1 = vmax.f32 %v11422_v33, 0.0  ;;  %v11420_v44 = vadd.f32 %v11356_v30, %v11292_v43  ;;  %v11295_v0 = vadd.f32 %v18133_v36, %v11224_v63  ;;  %v11222_v55 = vmul.f32 %v18128_v17, %v10974_v8 }
 0x642   :  { %11550 = vst [vmem:[#allocation11 + $0x30] sm:$0xff] %v11486_v1  ;;  %v11484_v19 = vmax.f32 %v11420_v44, 0.0  ;;  %v11423_v46 = vadd.f32 %v11359_v22, %v11295_v0  ;;  %v11293_v48 = vadd.f32 %v18133_v36, %v11222_v55  ;;  %v14965_v1 = vld [vmem:[#allocation3 + $0x48] sm:$0xff]  }
 0x643   :  { %v11370_v44 = vunpack.c.l.bf16 %v14965_v1  ;;  %v11371_v57 = vunpack.c.h.bf16 %v14965_v1 }
 0x644   :  { %11548 = vst [vmem:[#allocation11 + $0x20] sm:$0xff] %v11484_v19  ;;  %v11487_v26 = vmax.f32 %v11423_v46, 0.0  ;;  %v11421_v52 = vadd.f32 %v11357_v4, %v11293_v48  ;;  %v14966_v46 = vld [vmem:[#allocation3 + $0x40] sm:$0xff]  }
 0x645   :  { %v14357_v54 = vpop.f32.mrf.mxu0  ;;  %v11368_v48 = vunpack.c.l.bf16 %v14966_v46  ;;  %v11369_v14 = vunpack.c.h.bf16 %v14966_v46 }
 0x646   :  { %11551 = vst [vmem:[#allocation11 + $0x38] sm:$0xff] %v11487_v26  ;;  %v11485_v38 = vmax.f32 %v11421_v52, 0.0  ;;  %v11227_v47 = vmul.f32 %v14357_v54, %v18128_v17 }
 0x647   :  { %v10987_v41 = vpop.f32.mrf.mxu0 }
 0x648   :  { %11549 = vst [vmem:[#allocation11 + $0x28] sm:$0xff] %v11485_v38  ;;  %v11298_v37 = vadd.f32 %v18133_v36, %v11227_v47  ;;  %v11225_v25 = vmul.f32 %v18128_v17, %v10987_v41 }
 0x649   :  { %v14358_v56 = vpop.f32.mrf.mxu0 }
 0x64a   :  { %v11426_v51 = vadd.f32 %v11362_v29, %v11298_v37  ;;  %v11296_v32 = vadd.f32 %v18133_v36, %v11225_v25  ;;  %v11228_v59 = vmul.f32 %v14358_v56, %v18128_v17 }
 0x64b   :  { %v10990_v39 = vpop.f32.mrf.mxu0 }
 0x64c   :  { %v11490_v42 = vmax.f32 %v11426_v51, 0.0  ;;  %v11424_v9 = vadd.f32 %v11360_v21, %v11296_v32  ;;  %v11299_v7 = vadd.f32 %v18133_v36, %v11228_v59  ;;  %v11226_v45 = vmul.f32 %v18128_v17, %v10990_v39 }
 0x64e   :  { %11554 = vst [vmem:[#allocation11 + $0x50] sm:$0xff] %v11490_v42  ;;  %v11488_v61 = vmax.f32 %v11424_v9, 0.0  ;;  %v11427_v50 = vadd.f32 %v11363_v13, %v11299_v7  ;;  %v11297_v2 = vadd.f32 %v18133_v36, %v11226_v45 }
 0x650   :  { %11552 = vst [vmem:[#allocation11 + $0x40] sm:$0xff] %v11488_v61  ;;  %v11491_v6 = vmax.f32 %v11427_v50, 0.0  ;;  %v11425_v27 = vadd.f32 %v11361_v40, %v11297_v2  ;;  %v14967_v61 = vld [vmem:[#allocation3 + $0x58] sm:$0xff]  }
 0x651   :  { %v14361_v62 = vpop.f32.mrf.mxu0  ;;  %v11374_v50 = vunpack.c.l.bf16 %v14967_v61 }
 0x652   :  { %11555 = vst [vmem:[#allocation11 + $0x58] sm:$0xff] %v11491_v6  ;;  %v11489_v53 = vmax.f32 %v11425_v27, 0.0  ;;  %v11231_v3 = vmul.f32 %v14361_v62, %v18128_v17  ;;  %v14968_v62 = vld [vmem:[#allocation3 + $0x50] sm:$0xff]  }
 0x653   :  { %v11003_v28 = vpop.f32.mrf.mxu0  ;;  %v11372_v24 = vunpack.c.l.bf16 %v14968_v62 }
 0x654   :  { %11553 = vst [vmem:[#allocation11 + $0x48] sm:$0xff] %v11489_v53  ;;  %v11302_v35 = vadd.f32 %v18133_v36, %v11231_v3  ;;  %v11229_v23 = vmul.f32 %v18128_v17, %v11003_v28  ;;  %v11375_v28 = vunpack.c.h.bf16 %v14967_v61 }
 0x655   :  { %v14362_v12 = vpop.f32.mrf.mxu0 }
 0x656   :  { %v11430_v18 = vadd.f32 %v11366_v34, %v11302_v35  ;;  %v11300_v10 = vadd.f32 %v18133_v36, %v11229_v23  ;;  %v11232_v11 = vmul.f32 %v14362_v12, %v18128_v17  ;;  %v11373_v23 = vunpack.c.h.bf16 %v14968_v62 }
 0x657   :  { %v11006_v15 = vpop.f32.mrf.mxu0 }
 0x658   :  { %v11494_v30 = vmax.f32 %v11430_v18, 0.0  ;;  %v11428_v20 = vadd.f32 %v11364_v16, %v11300_v10  ;;  %v11303_v31 = vadd.f32 %v18133_v36, %v11232_v11  ;;  %v11230_v60 = vmul.f32 %v18128_v17, %v11006_v15 }
 0x659   :  { %v14329_v41 = vpop.f32.mrf.mxu1 }
 0x65a   :  { %11558 = vst [vmem:[#allocation11 + $0x70] sm:$0xff] %v11494_v30  ;;  %v11492_v22 = vmax.f32 %v11428_v20, 0.0  ;;  %v11431_v33 = vadd.f32 %v11367_v49, %v11303_v31  ;;  %v11301_v43 = vadd.f32 %v18133_v36, %v11230_v60 }
 0x65b   :  { %v10544_v51 = vpop.f32.mrf.mxu1 }
 0x65c   :  { %11556 = vst [vmem:[#allocation11 + $0x60] sm:$0xff] %v11492_v22  ;;  %v11495_v63 = vmax.f32 %v11431_v33, 0.0  ;;  %v11429_v4 = vadd.f32 %v11365_v58, %v11301_v43  ;;  %v14969_v22 = vld [vmem:[#allocation3 + $0x68] sm:$0xff]  }
 0x65d   :  { %v14365_v8 = vpop.f32.mrf.mxu0  ;;  %v14330_v39 = vpop.f32.mrf.mxu1  ;;  %v11378_v33 = vunpack.c.l.bf16 %v14969_v22 }
 0x65e   :  { %11559 = vst [vmem:[#allocation11 + $0x78] sm:$0xff] %v11495_v63  ;;  %v11493_v0 = vmax.f32 %v11429_v4, 0.0  ;;  %v11235_v55 = vmul.f32 %v14365_v8, %v18128_v17  ;;  %v14970_v8 = vld [vmem:[#allocation3 + $0x60] sm:$0xff]   ;;  %v14972_v39 = vld [vmem:[#allocation3 + $0x70] sm:$0xff]  }
 0x65f   :  { %v11019_v19 = vpop.f32.mrf.mxu0  ;;  %v10546_v7 = vpop.f32.mrf.mxu1  ;;  %v11376_v1 = vunpack.c.l.bf16 %v14970_v8 }
 0x660   :  { %11557 = vst [vmem:[#allocation11 + $0x68] sm:$0xff] %v11493_v0  ;;  %v11306_v26 = vadd.f32 %v18133_v36, %v11235_v55  ;;  %v11233_v52 = vmul.f32 %v18128_v17, %v11019_v19  ;;  %v11379_v19 = vunpack.c.h.bf16 %v14969_v22 }
 0x661   :  { %v14366_v54 = vpop.f32.mrf.mxu0 }
 0x662   :  { %v11434_v29 = vadd.f32 %v11370_v44, %v11306_v26  ;;  %v11304_v38 = vadd.f32 %v18133_v36, %v11233_v52  ;;  %v11236_v47 = vmul.f32 %v14366_v54, %v18128_v17  ;;  %v11377_v52 = vunpack.c.h.bf16 %v14970_v8 }
 0x663   :  { %v11022_v21 = vpop.f32.mrf.mxu0 }
 0x664   :  { %v11498_v37 = vmax.f32 %v11434_v29, 0.0  ;;  %v11432_v25 = vadd.f32 %v11368_v48, %v11304_v38  ;;  %v11307_v56 = vadd.f32 %v18133_v36, %v11236_v47  ;;  %v11234_v13 = vmul.f32 %v18128_v17, %v11022_v21 }
 0x666   :  { %11562 = vst [vmem:[#allocation11 + $0x90] sm:$0xff] %v11498_v37  ;;  %v11496_v32 = vmax.f32 %v11432_v25, 0.0  ;;  %v11435_v59 = vadd.f32 %v11371_v57, %v11307_v56  ;;  %v11305_v40 = vadd.f32 %v18133_v36, %v11234_v13  ;;  %v14971_v13 = vld [vmem:[#allocation3 + $0x78] sm:$0xff]  }
 0x667   :  { %v11382_v51 = vunpack.c.l.bf16 %v14971_v13  ;;  %v11383_v61 = vunpack.c.h.bf16 %v14971_v13 }
 0x668   :  { %11560 = vst [vmem:[#allocation11 + $0x80] sm:$0xff] %v11496_v32  ;;  %v11499_v42 = vmax.f32 %v11435_v59, 0.0  ;;  %v11433_v9 = vadd.f32 %v11369_v14, %v11305_v40 }
 0x669   :  { %v14369_v45 = vpop.f32.mrf.mxu0 }
 0x66a   :  { %11563 = vst [vmem:[#allocation11 + $0x98] sm:$0xff] %v11499_v42  ;;  %v11497_v2 = vmax.f32 %v11433_v9, 0.0  ;;  %v11239_v6 = vmul.f32 %v14369_v45, %v18128_v17  ;;  %v11380_v42 = vunpack.c.l.bf16 %v14972_v39 }
 0x66b   :  { %v11035_v27 = vpop.f32.mrf.mxu0 }
 0x66c   :  { %11561 = vst [vmem:[#allocation11 + $0x88] sm:$0xff] %v11497_v2  ;;  %v11310_v34 = vadd.f32 %v18133_v36, %v11239_v6  ;;  %v11237_v53 = vmul.f32 %v18128_v17, %v11035_v27  ;;  %v11381_v27 = vunpack.c.h.bf16 %v14972_v39 }
 0x66d   :  { %v14370_v3 = vpop.f32.mrf.mxu0 }
 0x66e   :  { %v11438_v5 = vadd.f32 %v11374_v50, %v11310_v34  ;;  %v11308_v16 = vadd.f32 %v18133_v36, %v11237_v53  ;;  %v11240_v35 = vmul.f32 %v14370_v3, %v18128_v17 }
 0x66f   :  { %v11038_v12 = vpop.f32.mrf.mxu0 }
 0x670   :  { %v11502_v49 = vmax.f32 %v11438_v5, 0.0  ;;  %v11436_v18 = vadd.f32 %v11372_v24, %v11308_v16  ;;  %v11311_v10 = vadd.f32 %v18133_v36, %v11240_v35  ;;  %v11238_v11 = vmul.f32 %v18128_v17, %v11038_v12 }
 0x672   :  { %11566 = vst [vmem:[#allocation11 + $0xb0] sm:$0xff] %v11502_v49  ;;  %v11500_v58 = vmax.f32 %v11436_v18, 0.0  ;;  %v11439_v15 = vadd.f32 %v11375_v28, %v11311_v10  ;;  %v11309_v30 = vadd.f32 %v18133_v36, %v11238_v11  ;;  %v14973_v18 = vld [vmem:[#allocation3 + $0x88] sm:$0xff]  }
 0x673   :  { %v11386_v10 = vunpack.c.l.bf16 %v14973_v18  ;;  %v11387_v22 = vunpack.c.h.bf16 %v14973_v18 }
 0x674   :  { %11564 = vst [vmem:[#allocation11 + $0xa0] sm:$0xff] %v11500_v58  ;;  %v11503_v20 = vmax.f32 %v11439_v15, 0.0  ;;  %v11437_v31 = vadd.f32 %v11373_v23, %v11309_v30  ;;  %v14974_v15 = vld [vmem:[#allocation3 + $0x80] sm:$0xff]  }
 0x675   :  { %v14373_v60 = vpop.f32.mrf.mxu0  ;;  %v11384_v30 = vunpack.c.l.bf16 %v14974_v15 }
 0x676   :  { %11567 = vst [vmem:[#allocation11 + $0xb8] sm:$0xff] %v11503_v20  ;;  %v11501_v43 = vmax.f32 %v11437_v31, 0.0  ;;  %v11243_v63 = vmul.f32 %v14373_v60, %v18128_v17 }
 0x677   :  { %v11051_v4 = vpop.f32.mrf.mxu0 }
 0x678   :  { %11565 = vst [vmem:[#allocation11 + $0xa8] sm:$0xff] %v11501_v43  ;;  %v11314_v44 = vadd.f32 %v18133_v36, %v11243_v63  ;;  %v11241_v0 = vmul.f32 %v18128_v17, %v11051_v4  ;;  %v11385_v4 = vunpack.c.h.bf16 %v14974_v15 }
 0x679   :  { %v14374_v55 = vpop.f32.mrf.mxu0 }
 0x67a   :  { %v11442_v46 = vadd.f32 %v11378_v33, %v11314_v44  ;;  %v11312_v48 = vadd.f32 %v18133_v36, %v11241_v0  ;;  %v11244_v26 = vmul.f32 %v14374_v55, %v18128_v17 }
 0x67b   :  { %v11054_v54 = vpop.f32.mrf.mxu0 }
 0x67c   :  { %v11506_v57 = vmax.f32 %v11442_v46, 0.0  ;;  %v11440_v29 = vadd.f32 %v11376_v1, %v11312_v48  ;;  %v11315_v38 = vadd.f32 %v18133_v36, %v11244_v26  ;;  %v11242_v47 = vmul.f32 %v18128_v17, %v11054_v54 }
 0x67e   :  { %11570 = vst [vmem:[#allocation11 + $0xd0] sm:$0xff] %v11506_v57  ;;  %v11504_v41 = vmax.f32 %v11440_v29, 0.0  ;;  %v11443_v14 = vadd.f32 %v11379_v19, %v11315_v38  ;;  %v11313_v21 = vadd.f32 %v18133_v36, %v11242_v47  ;;  %v14975_v57 = vld [vmem:[#allocation3 + $0x98] sm:$0xff]  }
 0x67f   :  { %v11390_v29 = vunpack.c.l.bf16 %v14975_v57  ;;  %v11391_v13 = vunpack.c.h.bf16 %v14975_v57 }
 0x680   :  { %11568 = vst [vmem:[#allocation11 + $0xc0] sm:$0xff] %v11504_v41  ;;  %v11507_v37 = vmax.f32 %v11443_v14, 0.0  ;;  %v11441_v25 = vadd.f32 %v11377_v52, %v11313_v21  ;;  %v14976_v14 = vld [vmem:[#allocation3 + $0x90] sm:$0xff]  }
 0x681   :  { %v14377_v56 = vpop.f32.mrf.mxu0  ;;  %v11388_v21 = vunpack.c.l.bf16 %v14976_v14 }
 0x682   :  { %11571 = vst [vmem:[#allocation11 + $0xd8] sm:$0xff] %v11507_v37  ;;  %v11505_v32 = vmax.f32 %v11441_v25, 0.0  ;;  %v11247_v59 = vmul.f32 %v14377_v56, %v18128_v17 }
 0x683   :  { %v11067_v40 = vpop.f32.mrf.mxu0 }
 0x684   :  { %11569 = vst [vmem:[#allocation11 + $0xc8] sm:$0xff] %v11505_v32  ;;  %v11318_v9 = vadd.f32 %v18133_v36, %v11247_v59  ;;  %v11245_v7 = vmul.f32 %v18128_v17, %v11067_v40  ;;  %v11389_v40 = vunpack.c.h.bf16 %v14976_v14 }
 0x685   :  { %v14378_v45 = vpop.f32.mrf.mxu0 }
 0x686   :  { %v11446_v50 = vadd.f32 %v11382_v51, %v11318_v9  ;;  %v11316_v2 = vadd.f32 %v18133_v36, %v11245_v7  ;;  %v11248_v6 = vmul.f32 %v14378_v45, %v18128_v17 }
 0x687   :  { %v11070_v62 = vpop.f32.mrf.mxu0 }
 0x688   :  { %v11510_v24 = vmax.f32 %v11446_v50, 0.0  ;;  %v11444_v34 = vadd.f32 %v11380_v42, %v11316_v2  ;;  %v11319_v53 = vadd.f32 %v18133_v36, %v11248_v6  ;;  %v11246_v3 = vmul.f32 %v18128_v17, %v11070_v62 }
 0x68a   :  { %11574 = vst [vmem:[#allocation11 + $0xf0] sm:$0xff] %v11510_v24  ;;  %v11508_v28 = vmax.f32 %v11444_v34, 0.0  ;;  %v11447_v5 = vadd.f32 %v11383_v61, %v11319_v53  ;;  %v11317_v16 = vadd.f32 %v18133_v36, %v11246_v3  ;;  %v14977_v24 = vld [vmem:[#allocation3 + $0xa8] sm:$0xff]  }
 0x68b   :  { %v11394_v34 = vunpack.c.l.bf16 %v14977_v24 }
 0x68c   :  { %11572 = vst [vmem:[#allocation11 + $0xe0] sm:$0xff] %v11508_v28  ;;  %v11511_v35 = vmax.f32 %v11447_v5, 0.0  ;;  %v11445_v23 = vadd.f32 %v11381_v27, %v11317_v16  ;;  %v14978_v5 = vld [vmem:[#allocation3 + $0xa0] sm:$0xff]  }
 0x68d   :  { %v11392_v16 = vunpack.c.l.bf16 %v14978_v5 }
 0x68e   :  { %11575 = vst [vmem:[#allocation11 + $0xf8] sm:$0xff] %v11511_v35  ;;  %v11509_v12 = vmax.f32 %v11445_v23, 0.0 }
 0x690   :  { %11573 = vst [vmem:[#allocation11 + $0xe8] sm:$0xff] %v11509_v12 }
 0x699   :  { %v14381_v49 = vpop.f32.mrf.mxu0 }
 0x69a   :  { %v11251_v11 = vmul.f32 %v14381_v49, %v18128_v17  ;;  %v11395_v49 = vunpack.c.h.bf16 %v14977_v24 }
 0x69b   :  { %v11083_v58 = vpop.f32.mrf.mxu0 }
 0x69c   :  { %v11322_v20 = vadd.f32 %v18133_v36, %v11251_v11  ;;  %v11249_v31 = vmul.f32 %v18128_v17, %v11083_v58  ;;  %v11393_v58 = vunpack.c.h.bf16 %v14978_v5 }
 0x69d   :  { %v14382_v60 = vpop.f32.mrf.mxu0 }
 0x69e   :  { %v11450_v33 = vadd.f32 %v11386_v10, %v11322_v20  ;;  %v11320_v43 = vadd.f32 %v18133_v36, %v11249_v31  ;;  %v11252_v63 = vmul.f32 %v14382_v60, %v18128_v17 }
 0x69f   :  { %v11086_v8 = vpop.f32.mrf.mxu0 }
 0x6a0   :  { %v11514_v1 = vmax.f32 %v11450_v33, 0.0  ;;  %v11448_v44 = vadd.f32 %v11384_v30, %v11320_v43  ;;  %v11323_v0 = vadd.f32 %v18133_v36, %v11252_v63  ;;  %v11250_v55 = vmul.f32 %v18128_v17, %v11086_v8 }
 0x6a2   :  { %11578 = vst [vmem:[#allocation11 + $0x110] sm:$0xff] %v11514_v1  ;;  %v11512_v19 = vmax.f32 %v11448_v44, 0.0  ;;  %v11451_v46 = vadd.f32 %v11387_v22, %v11323_v0  ;;  %v11321_v48 = vadd.f32 %v18133_v36, %v11250_v55  ;;  %v14979_v1 = vld [vmem:[#allocation3 + $0xb8] sm:$0xff]  }
 0x6a3   :  { %v11398_v44 = vunpack.c.l.bf16 %v14979_v1  ;;  %v11399_v57 = vunpack.c.h.bf16 %v14979_v1 }
 0x6a4   :  { %11576 = vst [vmem:[#allocation11 + $0x100] sm:$0xff] %v11512_v19  ;;  %v11515_v26 = vmax.f32 %v11451_v46, 0.0  ;;  %v11449_v52 = vadd.f32 %v11385_v4, %v11321_v48  ;;  %v14980_v46 = vld [vmem:[#allocation3 + $0xb0] sm:$0xff]  }
 0x6a5   :  { %v14385_v54 = vpop.f32.mrf.mxu0  ;;  %v11396_v48 = vunpack.c.l.bf16 %v14980_v46 }
 0x6a6   :  { %11579 = vst [vmem:[#allocation11 + $0x118] sm:$0xff] %v11515_v26  ;;  %v11513_v38 = vmax.f32 %v11449_v52, 0.0  ;;  %v11255_v47 = vmul.f32 %v14385_v54, %v18128_v17 }
 0x6a7   :  { %v11099_v41 = vpop.f32.mrf.mxu0 }
 0x6a8   :  { %11577 = vst [vmem:[#allocation11 + $0x108] sm:$0xff] %v11513_v38  ;;  %v11326_v37 = vadd.f32 %v18133_v36, %v11255_v47  ;;  %v11253_v25 = vmul.f32 %v18128_v17, %v11099_v41  ;;  %v11397_v41 = vunpack.c.h.bf16 %v14980_v46 }
 0x6a9   :  { %v14386_v56 = vpop.f32.mrf.mxu0 }
 0x6aa   :  { %v11454_v51 = vadd.f32 %v11390_v29, %v11326_v37  ;;  %v11324_v32 = vadd.f32 %v18133_v36, %v11253_v25  ;;  %v11256_v59 = vmul.f32 %v14386_v56, %v18128_v17 }
 0x6ab   :  { %v11102_v39 = vpop.f32.mrf.mxu0 }
 0x6ac   :  { %v11518_v42 = vmax.f32 %v11454_v51, 0.0  ;;  %v11452_v9 = vadd.f32 %v11388_v21, %v11324_v32  ;;  %v11327_v7 = vadd.f32 %v18133_v36, %v11256_v59  ;;  %v11254_v45 = vmul.f32 %v18128_v17, %v11102_v39 }
 0x6ae   :  { %11582 = vst [vmem:[#allocation11 + $0x130] sm:$0xff] %v11518_v42  ;;  %v11516_v61 = vmax.f32 %v11452_v9, 0.0  ;;  %v11455_v50 = vadd.f32 %v11391_v13, %v11327_v7  ;;  %v11325_v2 = vadd.f32 %v18133_v36, %v11254_v45  ;;  %v14981_v42 = vld [vmem:[#allocation3 + $0xc8] sm:$0xff]  }
 0x6af   :  { %v11402_v9 = vunpack.c.l.bf16 %v14981_v42  ;;  %v11403_v24 = vunpack.c.h.bf16 %v14981_v42 }
 0x6b0   :  { %11580 = vst [vmem:[#allocation11 + $0x120] sm:$0xff] %v11516_v61  ;;  %v11519_v6 = vmax.f32 %v11455_v50, 0.0  ;;  %v11453_v27 = vadd.f32 %v11389_v40, %v11325_v2  ;;  %v14982_v50 = vld [vmem:[#allocation3 + $0xc0] sm:$0xff]  }
 0x6b1   :  { %v14389_v62 = vpop.f32.mrf.mxu0  ;;  %v11400_v2 = vunpack.c.l.bf16 %v14982_v50 }
 0x6b2   :  { %11583 = vst [vmem:[#allocation11 + $0x138] sm:$0xff] %v11519_v6  ;;  %v11517_v53 = vmax.f32 %v11453_v27, 0.0  ;;  %v11259_v3 = vmul.f32 %v14389_v62, %v18128_v17 }
 0x6b3   :  { %v11115_v28 = vpop.f32.mrf.mxu0 }
 0x6b4   :  { %11581 = vst [vmem:[#allocation11 + $0x128] sm:$0xff] %v11517_v53  ;;  %v11330_v35 = vadd.f32 %v18133_v36, %v11259_v3  ;;  %v11257_v23 = vmul.f32 %v18128_v17, %v11115_v28  ;;  %v11401_v28 = vunpack.c.h.bf16 %v14982_v50 }
 0x6b5   :  { %v14390_v12 = vpop.f32.mrf.mxu0 }
 0x6b6   :  { %v11458_v18 = vadd.f32 %v11394_v34, %v11330_v35  ;;  %v11328_v10 = vadd.f32 %v18133_v36, %v11257_v23  ;;  %v11260_v11 = vmul.f32 %v14390_v12, %v18128_v17 }
 0x6b7   :  { %v11118_v15 = vpop.f32.mrf.mxu0 }
 0x6b8   :  { %v11522_v30 = vmax.f32 %v11458_v18, 0.0  ;;  %v11456_v20 = vadd.f32 %v11392_v16, %v11328_v10  ;;  %v11331_v31 = vadd.f32 %v18133_v36, %v11260_v11  ;;  %v11258_v60 = vmul.f32 %v18128_v17, %v11118_v15 }
 0x6ba   :  { %11586 = vst [vmem:[#allocation11 + $0x150] sm:$0xff] %v11522_v30  ;;  %v11520_v22 = vmax.f32 %v11456_v20, 0.0  ;;  %v11459_v33 = vadd.f32 %v11395_v49, %v11331_v31  ;;  %v11329_v43 = vadd.f32 %v18133_v36, %v11258_v60  ;;  %v14983_v30 = vld [vmem:[#allocation3 + $0xd8] sm:$0xff]  }
 0x6bb   :  { %v11406_v20 = vunpack.c.l.bf16 %v14983_v30  ;;  %v11407_v1 = vunpack.c.h.bf16 %v14983_v30 }
 0x6bc   :  { %11584 = vst [vmem:[#allocation11 + $0x140] sm:$0xff] %v11520_v22  ;;  %v11523_v63 = vmax.f32 %v11459_v33, 0.0  ;;  %v11457_v4 = vadd.f32 %v11393_v58, %v11329_v43  ;;  %v14984_v33 = vld [vmem:[#allocation3 + $0xd0] sm:$0xff]  }
 0x6bd   :  { %v14393_v8 = vpop.f32.mrf.mxu0  ;;  %v11404_v43 = vunpack.c.l.bf16 %v14984_v33 }
 0x6be   :  { %11587 = vst [vmem:[#allocation11 + $0x158] sm:$0xff] %v11523_v63  ;;  %v11521_v0 = vmax.f32 %v11457_v4, 0.0  ;;  %v11263_v55 = vmul.f32 %v14393_v8, %v18128_v17 }
 0x6bf   :  { %v11131_v19 = vpop.f32.mrf.mxu0 }
 0x6c0   :  { %11585 = vst [vmem:[#allocation11 + $0x148] sm:$0xff] %v11521_v0  ;;  %v11334_v26 = vadd.f32 %v18133_v36, %v11263_v55  ;;  %v11261_v52 = vmul.f32 %v18128_v17, %v11131_v19  ;;  %v11405_v19 = vunpack.c.h.bf16 %v14984_v33 }
 0x6c1   :  { %v14394_v54 = vpop.f32.mrf.mxu0 }
 0x6c2   :  { %v11462_v29 = vadd.f32 %v11398_v44, %v11334_v26  ;;  %v11332_v38 = vadd.f32 %v18133_v36, %v11261_v52  ;;  %v11264_v47 = vmul.f32 %v14394_v54, %v18128_v17 }
 0x6c3   :  { %v11134_v14 = vpop.f32.mrf.mxu0 }
 0x6c4   :  { %v11526_v21 = vmax.f32 %v11462_v29, 0.0  ;;  %v11460_v37 = vadd.f32 %v11396_v48, %v11332_v38  ;;  %v11335_v25 = vadd.f32 %v18133_v36, %v11264_v47  ;;  %v11262_v56 = vmul.f32 %v18128_v17, %v11134_v14 }
 0x6c6   :  { %11590 = vst [vmem:[#allocation11 + $0x170] sm:$0xff] %v11526_v21  ;;  %v11524_v13 = vmax.f32 %v11460_v37, 0.0  ;;  %v11463_v51 = vadd.f32 %v11399_v57, %v11335_v25  ;;  %v11333_v32 = vadd.f32 %v18133_v36, %v11262_v56  ;;  %v14985_v21 = vld [vmem:[#allocation3 + $0xe8] sm:$0xff]  }
 0x6c7   :  { %v11410_v37 = vunpack.c.l.bf16 %v14985_v21  ;;  %v11411_v42 = vunpack.c.h.bf16 %v14985_v21 }
 0x6c8   :  { %11588 = vst [vmem:[#allocation11 + $0x160] sm:$0xff] %v11524_v13  ;;  %v11527_v59 = vmax.f32 %v11463_v51, 0.0  ;;  %v11461_v40 = vadd.f32 %v11397_v41, %v11333_v32  ;;  %v14986_v51 = vld [vmem:[#allocation3 + $0xe0] sm:$0xff]  }
 0x6c9   :  { %v14397_v39 = vpop.f32.mrf.mxu0  ;;  %v11408_v32 = vunpack.c.l.bf16 %v14986_v51 }
 0x6ca   :  { %11591 = vst [vmem:[#allocation11 + $0x178] sm:$0xff] %v11527_v59  ;;  %v11525_v7 = vmax.f32 %v11461_v40, 0.0  ;;  %v11267_v45 = vmul.f32 %v14397_v39, %v18128_v17 }
 0x6cb   :  { %v11147_v61 = vpop.f32.mrf.mxu0 }
 0x6cc   :  { %11589 = vst [vmem:[#allocation11 + $0x168] sm:$0xff] %v11525_v7  ;;  %v11338_v6 = vadd.f32 %v18133_v36, %v11267_v45  ;;  %v11265_v27 = vmul.f32 %v18128_v17, %v11147_v61  ;;  %v11409_v61 = vunpack.c.h.bf16 %v14986_v51 }
 0x6cd   :  { %v14398_v62 = vpop.f32.mrf.mxu0 }
 0x6ce   :  { %v11466_v34 = vadd.f32 %v11402_v9, %v11338_v6  ;;  %v11336_v53 = vadd.f32 %v18133_v36, %v11265_v27  ;;  %v11268_v3 = vmul.f32 %v14398_v62, %v18128_v17 }
 0x6cf   :  { %v11150_v5 = vpop.f32.mrf.mxu0 }
 0x6d0   :  { %v11530_v16 = vmax.f32 %v11466_v34, 0.0  ;;  %v11464_v35 = vadd.f32 %v11400_v2, %v11336_v53  ;;  %v11339_v23 = vadd.f32 %v18133_v36, %v11268_v3  ;;  %v11266_v12 = vmul.f32 %v18128_v17, %v11150_v5 }
 0x6d2   :  { %11594 = vst [vmem:[#allocation11 + $0x190] sm:$0xff] %v11530_v16  ;;  %v11528_v49 = vmax.f32 %v11464_v35, 0.0  ;;  %v11467_v18 = vadd.f32 %v11403_v24, %v11339_v23  ;;  %v11337_v10 = vadd.f32 %v18133_v36, %v11266_v12  ;;  %v14987_v16 = vld [vmem:[#allocation3 + $0xf8] sm:$0xff]  }
 0x6d3   :  { %v11414_v35 = vunpack.c.l.bf16 %v14987_v16  ;;  %v11415_v30 = vunpack.c.h.bf16 %v14987_v16 }
 0x6d4   :  { %11592 = vst [vmem:[#allocation11 + $0x180] sm:$0xff] %v11528_v49  ;;  %v11531_v11 = vmax.f32 %v11467_v18, 0.0  ;;  %v11465_v58 = vadd.f32 %v11401_v28, %v11337_v10  ;;  %v14988_v18 = vld [vmem:[#allocation3 + $0xf0] sm:$0xff]  }
 0x6d5   :  { %v14401_v15 = vpop.f32.mrf.mxu0  ;;  %v11412_v10 = vunpack.c.l.bf16 %v14988_v18 }
 0x6d6   :  { %11595 = vst [vmem:[#allocation11 + $0x198] sm:$0xff] %v11531_v11  ;;  %v11529_v31 = vmax.f32 %v11465_v58, 0.0  ;;  %v11271_v60 = vmul.f32 %v14401_v15, %v18128_v17 }
 0x6d7   :  { %v11163_v22 = vpop.f32.mrf.mxu0 }
 0x6d8   :  { %11593 = vst [vmem:[#allocation11 + $0x188] sm:$0xff] %v11529_v31  ;;  %v11342_v63 = vadd.f32 %v18133_v36, %v11271_v60  ;;  %v11269_v4 = vmul.f32 %v18128_v17, %v11163_v22  ;;  %v11413_v22 = vunpack.c.h.bf16 %v14988_v18 }
 0x6d9   :  { %v14402_v8 = vpop.f32.mrf.mxu0 }
 0x6da   :  { %v11470_v44 = vadd.f32 %v11406_v20, %v11342_v63  ;;  %v11340_v0 = vadd.f32 %v18133_v36, %v11269_v4  ;;  %v11272_v55 = vmul.f32 %v14402_v8, %v18128_v17 }
 0x6db   :  { %v11166_v46 = vpop.f32.mrf.mxu0 }
 0x6dc   :  { %v11534_v48 = vmax.f32 %v11470_v44, 0.0  ;;  %v11468_v26 = vadd.f32 %v11404_v43, %v11340_v0  ;;  %v11343_v52 = vadd.f32 %v18133_v36, %v11272_v55  ;;  %v11270_v54 = vmul.f32 %v18128_v17, %v11166_v46 }
 0x6de   :  { %11598 = vst [vmem:[#allocation11 + $0x1b0] sm:$0xff] %v11534_v48  ;;  %v11532_v57 = vmax.f32 %v11468_v26, 0.0  ;;  %v11471_v29 = vadd.f32 %v11407_v1, %v11343_v52  ;;  %v11341_v38 = vadd.f32 %v18133_v36, %v11270_v54 }
 0x6e0   :  { %11596 = vst [vmem:[#allocation11 + $0x1a0] sm:$0xff] %v11532_v57  ;;  %v11535_v47 = vmax.f32 %v11471_v29, 0.0  ;;  %v11469_v41 = vadd.f32 %v11405_v19, %v11341_v38 }
 0x6e1   :  { %v14405_v14 = vpop.f32.mrf.mxu1 }
 0x6e2   :  { %11599 = vst [vmem:[#allocation11 + $0x1b8] sm:$0xff] %v11535_v47  ;;  %v11533_v25 = vmax.f32 %v11469_v41, 0.0  ;;  %v11275_v56 = vmul.f32 %v14405_v14, %v18128_v17 }
 0x6e3   :  { %v11179_v13 = vpop.f32.mrf.mxu1 }
 0x6e4   :  { %11597 = vst [vmem:[#allocation11 + $0x1a8] sm:$0xff] %v11533_v25  ;;  %v11346_v59 = vadd.f32 %v18133_v36, %v11275_v56  ;;  %v11273_v40 = vmul.f32 %v18128_v17, %v11179_v13 }
 0x6e5   :  { %v14406_v39 = vpop.f32.mrf.mxu1 }
 0x6e6   :  { %v11474_v9 = vadd.f32 %v11410_v37, %v11346_v59  ;;  %v11344_v7 = vadd.f32 %v18133_v36, %v11273_v40  ;;  %v11276_v45 = vmul.f32 %v14406_v39, %v18128_v17 }
 0x6e7   :  { %v11182_v50 = vpop.f32.mrf.mxu1 }
 0x6e8   :  { %v11538_v2 = vmax.f32 %v11474_v9, 0.0  ;;  %v11472_v6 = vadd.f32 %v11408_v32, %v11344_v7  ;;  %v11347_v27 = vadd.f32 %v18133_v36, %v11276_v45  ;;  %v11274_v62 = vmul.f32 %v18128_v17, %v11182_v50 }
 0x6ea   :  { %11602 = vst [vmem:[#allocation11 + $0x1d0] sm:$0xff] %v11538_v2  ;;  %v11536_v24 = vmax.f32 %v11472_v6, 0.0  ;;  %v11475_v34 = vadd.f32 %v11411_v42, %v11347_v27  ;;  %v11345_v53 = vadd.f32 %v18133_v36, %v11274_v62 }
 0x6ec   :  { %11600 = vst [vmem:[#allocation11 + $0x1c0] sm:$0xff] %v11536_v24  ;;  %v11539_v3 = vmax.f32 %v11475_v34, 0.0  ;;  %v11473_v28 = vadd.f32 %v11409_v61, %v11345_v53 }
 0x6ed   :  { %v14409_v5 = vpop.f32.mrf.mxu1 }
 0x6ee   :  { %11603 = vst [vmem:[#allocation11 + $0x1d8] sm:$0xff] %v11539_v3  ;;  %v11537_v23 = vmax.f32 %v11473_v28, 0.0  ;;  %v11279_v12 = vmul.f32 %v14409_v5, %v18128_v17 }
 0x6ef   :  { %v11195_v49 = vpop.f32.mrf.mxu1 }
 0x6f0   :  { %11601 = vst [vmem:[#allocation11 + $0x1c8] sm:$0xff] %v11537_v23  ;;  %v11350_v11 = vadd.f32 %v18133_v36, %v11279_v12  ;;  %v11277_v58 = vmul.f32 %v18128_v17, %v11195_v49 }
 0x6f1   :  { %v14410_v15 = vpop.f32.mrf.mxu1 }
 0x6f2   :  { %v11478_v20 = vadd.f32 %v11414_v35, %v11350_v11  ;;  %v11348_v31 = vadd.f32 %v18133_v36, %v11277_v58  ;;  %v11280_v60 = vmul.f32 %v14410_v15, %v18128_v17 }
 0x6f3   :  { %v11198_v33 = vpop.f32.mrf.mxu1 }
 0x6f4   :  { %v11542_v43 = vmax.f32 %v11478_v20, 0.0  ;;  %v11476_v63 = vadd.f32 %v11412_v10, %v11348_v31  ;;  %v11351_v4 = vadd.f32 %v18133_v36, %v11280_v60  ;;  %v11278_v8 = vmul.f32 %v18128_v17, %v11198_v33 }
 0x6f6   :  { %11606 = vst [vmem:[#allocation11 + $0x1f0] sm:$0xff] %v11542_v43  ;;  %v11540_v1 = vmax.f32 %v11476_v63, 0.0  ;;  %v11479_v44 = vadd.f32 %v11415_v30, %v11351_v4  ;;  %v11349_v0 = vadd.f32 %v18133_v36, %v11278_v8 }
 0x6f8   :  { %11604 = vst [vmem:[#allocation11 + $0x1e0] sm:$0xff] %v11540_v1  ;;  %v11543_v55 = vmax.f32 %v11479_v44, 0.0  ;;  %v11477_v19 = vadd.f32 %v11413_v22, %v11349_v0 }
 0x6fa   :  { %11607 = vst [vmem:[#allocation11 + $0x1f8] sm:$0xff] %v11543_v55  ;;  %v11541_v46 = vmax.f32 %v11477_v19, 0.0 }
 0x6fc   :  { %11605 = vst [vmem:[#allocation11 + $0x1e8] sm:$0xff] %v11541_v46 }
 0x6fd   :  { %15080 = shalt.err (!%p15077_p10)
}
 0x6fe   :  { %s15105_s24 = smov 128   ;;  %s15106_s25 = smov 8  }
 0x6ff   :  { %11619 = dma.vmem_to_hbm [thread:$0]  %s11614_s9, 8192, %s18276_s10, [#allocation5], %s15105_s24, %s15105_s24, %s15106_s25  }
 0x700   :  { %15095 = dma.done.wait [#allocation5], 8192  }
 0x701   :  { %15096 = vsyncadd [#allocation5], 4294959104 }
 0x702   :  { %11623 = vsyncpa [#allocation4], 1 }
 0x703   :  { %11624 = vsyncpa [#allocation7], 1 }
 0x704   :  { %11625 = vsyncpa [#allocation10], 1 }
 0x705   :  { %11626 = vsyncpa [#allocation5], 1 }

</bundles_post_ra>
